<compile_context>
chip_gen: v7x
topology: tpu7x:2x2x1
jax: 0.10.0
libtpu: 0.0.40
codegen_flags: <defaults>
</compile_context>

<pallas_src>
import functools
import numpy as np
import jax
import jax.numpy as jnp
from jax.experimental import pallas as pl
from jax.experimental.pallas import tpu as pltpu

GROUP_SIZE = {'rot90': 4, 'hflip': 2, 'vflip': 2, 'id': 1}
_VMEM_LIMIT = 32 * 1024 * 1024


# ----------------------------- Pallas kernels ------------------------------

def _conv_stage_kernel(x_ref, w_ref, se_ref, so_ref, re_ref, ro_ref,
                       b_ref, s_ref, t_ref, o_ref, *, kh, kw, cin, ho, wo, cout):
    """Fused conv(valid) + bias + ReLU + 2x2 maxpool + BN affine for one image.

    x_ref : (1, H, W*Cin)            bf16  (NHWC flattened on the last two dims)
    w_ref : (kh*kw, Wo*Cin, Wo*Cout) bf16  block-diagonal im2col weight
    se/so : (Hp, Ho)   f32  row-pool selection (even / odd output rows)
    re/ro : (Wo*Cout, Wp*Cout) f32  col-pool selection (even / odd output cols)
    b_ref : (1, Wo*Cout) f32 ; s_ref/t_ref : (1, Wp*Cout) f32
    o_ref : (1, Hp, Wp*Cout) bf16
    """
    # Working copy in f32 (bf16 -> f32 -> bf16 is exact); keeps the 25 shifted
    # slices on an unpacked layout, operands handed to the MXU as bf16.
    img = x_ref[0].astype(jnp.float32)                       # (H, W*Cin)

    acc = jnp.zeros((ho, wo * cout), jnp.float32)
    for di in range(kh):
        for dj in range(kw):
            patch = img[di:di + ho, dj * cin:dj * cin + wo * cin]
            acc = acc + jnp.dot(patch.astype(jnp.bfloat16),
                                w_ref[di * kw + dj],
                                preferred_element_type=jnp.float32)

    y = jnp.maximum(acc + b_ref[...], 0.0)                   # bias + ReLU, (Ho, Wo*Cout)

    # 2x2 max pool via exact 0/1 selection matmuls (all MXU, no reshapes).
    rows = jnp.maximum(
        jnp.dot(se_ref[...], y, preferred_element_type=jnp.float32),
        jnp.dot(so_ref[...], y, preferred_element_type=jnp.float32))     # (Hp, Wo*Cout)
    pooled = jnp.maximum(
        jnp.dot(rows, re_ref[...], preferred_element_type=jnp.float32),
        jnp.dot(rows, ro_ref[...], preferred_element_type=jnp.float32))  # (Hp, Wp*Cout)

    o_ref[0] = (pooled * s_ref[...] + t_ref[...]).astype(o_ref.dtype)    # BN affine


def conv_pool_bn_stage(x_imgs, sp, *, cin, cout, kh=5, kw=5):
    """x_imgs: (N, H, W*Cin) bf16 -> (N, Hp, Wp*Cout) bf16, grid over images."""
    n, h, wc = x_imgs.shape
    w = wc // cin
    ho, wo = h - kh + 1, w - kw + 1
    hp, wp = ho // 2, wo // 2
    kernel = functools.partial(_conv_stage_kernel, kh=kh, kw=kw, cin=cin,
                               ho=ho, wo=wo, cout=cout)
    return pl.pallas_call(
        kernel,
        out_shape=jax.ShapeDtypeStruct((n, hp, wp * cout), jnp.bfloat16),
        grid=(n,),
        in_specs=[
            pl.BlockSpec((1, h, wc), lambda i: (i, 0, 0)),
            pl.BlockSpec((kh * kw, wo * cin, wo * cout), lambda i: (0, 0, 0)),
            pl.BlockSpec((hp, ho), lambda i: (0, 0)),
            pl.BlockSpec((hp, ho), lambda i: (0, 0)),
            pl.BlockSpec((wo * cout, wp * cout), lambda i: (0, 0)),
            pl.BlockSpec((wo * cout, wp * cout), lambda i: (0, 0)),
            pl.BlockSpec((1, wo * cout), lambda i: (0, 0)),
            pl.BlockSpec((1, wp * cout), lambda i: (0, 0)),
            pl.BlockSpec((1, wp * cout), lambda i: (0, 0)),
        ],
        out_specs=pl.BlockSpec((1, hp, wp * cout), lambda i: (i, 0, 0)),
        compiler_params=pltpu.CompilerParams(
            dimension_semantics=("parallel",),
            vmem_limit_bytes=_VMEM_LIMIT),
    )(x_imgs, sp['w_bd'], sp['se'], sp['so'], sp['re'], sp['ro'],
      sp['bias'], sp['scale'], sp['shift'])


def _fc1_group_mean_kernel(z_ref, w_ref, b_ref, s_ref, t_ref, g_ref, o_ref):
    """fc1 (both branches) + bias + ReLU + bn3 affine + per-group mean."""
    y = jnp.dot(z_ref[...], w_ref[...], preferred_element_type=jnp.float32)
    y = jnp.maximum(y + b_ref[...], 0.0) * s_ref[...] + t_ref[...]
    o_ref[...] = jnp.dot(g_ref[...], y, preferred_element_type=jnp.float32)


def fc1_bn_group_mean(z, w, b, s, t, gme):
    """z:(N_imgs,K) bf16, w:(K,2*lin) bf16, gme:(k*B,N_imgs) f32 -> (k*B, 2*lin) f32.

    Whole problem is a few tens of KB; intentionally single-block (nothing to
    pipeline), exists only to fuse fc1/ReLU/bn3/group-mean into one HBM pass.
    """
    m, kdim = z.shape
    n = w.shape[1]
    r = gme.shape[0]
    return pl.pallas_call(
        _fc1_group_mean_kernel,
        out_shape=jax.ShapeDtypeStruct((r, n), jnp.float32),
        grid=(1,),
        in_specs=[
            pl.BlockSpec((m, kdim), lambda i: (0, 0)),
            pl.BlockSpec((kdim, n), lambda i: (0, 0)),
            pl.BlockSpec((1, n), lambda i: (0, 0)),
            pl.BlockSpec((1, n), lambda i: (0, 0)),
            pl.BlockSpec((1, n), lambda i: (0, 0)),
            pl.BlockSpec((r, m), lambda i: (0, 0)),
        ],
        out_specs=pl.BlockSpec((r, n), lambda i: (0, 0)),
        compiler_params=pltpu.CompilerParams(
            dimension_semantics=("arbitrary",),
            vmem_limit_bytes=_VMEM_LIMIT),
    )(z, w, b, s, t, gme)


# ------------------------------ group transforms ----------------------------

def group_transformed_input(x, symmetry_group):
    """x: (B, C, H, W) -> (group_size, B, C, H, W). Matches torch.rot90 / hflip / vflip."""
    if symmetry_group == 'id':
        return jnp.stack([x])
    if symmetry_group == 'rot90':
        return jnp.stack([jnp.rot90(x, k=i, axes=(-2, -1)) for i in range(4)])
    if symmetry_group == 'hflip':
        return jnp.stack([x, jnp.flip(x, axis=-1)])
    if symmetry_group == 'vflip':
        return jnp.stack([x, jnp.flip(x, axis=-2)])
    raise NotImplementedError(symmetry_group)


# --------------------------- parameter packing -------------------------------

def _bn_affine_np(bn):
    gamma, beta, mean, var = (np.asarray(v, np.float32) for v in bn)
    scale = gamma / np.sqrt(var + 1e-5)
    return scale, beta - mean * scale


def _conv_bd_weight(w_oihw, wo):
    """(Cout, Cin, kh, kw) -> (kh*kw, Wo*Cin, Wo*Cout) block-diagonal im2col weight."""
    cout, cin, kh, kw = w_oihw.shape
    blk = np.transpose(w_oihw, (2, 3, 1, 0)).reshape(kh * kw, cin, cout)
    bd = np.zeros((kh * kw, wo * cin, wo * cout), np.float32)
    for w in range(wo):
        bd[:, w * cin:(w + 1) * cin, w * cout:(w + 1) * cout] = blk
    return bd


def _pool_selectors(ho, wo, cout):
    hp, wp = ho // 2, wo // 2
    se = np.zeros((hp, ho), np.float32)
    so = np.zeros((hp, ho), np.float32)
    se[np.arange(hp), 2 * np.arange(hp)] = 1.0
    so[np.arange(hp), 2 * np.arange(hp) + 1] = 1.0
    re = np.zeros((wo * cout, wp * cout), np.float32)
    ro = np.zeros_like(re)
    for wpi in range(wp):
        cols = wpi * cout + np.arange(cout)
        re[(2 * wpi) * cout + np.arange(cout), cols] = 1.0
        ro[(2 * wpi + 1) * cout + np.arange(cout), cols] = 1.0
    return se, so, re, ro


def _pack_conv_stage(w_oihw, bias, bn_scale, bn_shift, h_in, w_in):
    cout, cin, kh, kw = w_oihw.shape
    ho, wo = h_in - kh + 1, w_in - kw + 1
    hp, wp = ho // 2, wo // 2
    assert ho % 2 == 0 and wo % 2 == 0, "MaxPool2d(2,2) path assumes even conv output"
    se, so, re, ro = _pool_selectors(ho, wo, cout)
    return dict(
        w_bd=jnp.asarray(_conv_bd_weight(w_oihw, wo), jnp.bfloat16),
        se=jnp.asarray(se), so=jnp.asarray(so),
        re=jnp.asarray(re), ro=jnp.asarray(ro),
        bias=jnp.asarray(np.tile(bias.astype(np.float32), wo).reshape(1, wo * cout)),
        scale=jnp.asarray(np.tile(bn_scale, wp).reshape(1, wp * cout)),
        shift=jnp.asarray(np.tile(bn_shift, wp).reshape(1, wp * cout)),
    )


def prepare_packed_params(prm, *, in_channels, conv_channels, input_size):
    cc = conv_channels
    # stage 1: both branches concatenated along Cout.
    w1 = np.concatenate([np.asarray(prm['conv1'][0]), np.asarray(prm['conv1_fusion'][0])], 0)
    b1 = np.concatenate([np.asarray(prm['conv1'][1]), np.asarray(prm['conv1_fusion'][1])], 0)
    s1a, t1a = _bn_affine_np(prm['bn1']); s1b, t1b = _bn_affine_np(prm['bn1_fusion'])
    stage1 = _pack_conv_stage(w1, b1, np.concatenate([s1a, s1b]),
                              np.concatenate([t1a, t1b]), input_size, input_size)

    # stage 2: block-diagonal over branches.
    w2 = np.zeros((2 * cc, 2 * cc, 5, 5), np.float32)
    w2[:cc, :cc] = np.asarray(prm['conv2'][0])
    w2[cc:, cc:] = np.asarray(prm['conv2_fusion'][0])
    b2 = np.concatenate([np.asarray(prm['conv2'][1]), np.asarray(prm['conv2_fusion'][1])], 0)
    s2a, t2a = _bn_affine_np(prm['bn2']); s2b, t2b = _bn_affine_np(prm['bn2_fusion'])
    h1 = (input_size - 4) // 2
    stage2 = _pack_conv_stage(w2, b2, np.concatenate([s2a, s2b]),
                              np.concatenate([t2a, t2b]), h1, h1)

    # fc1 + bn3, both branches, rows re-ordered to the NHWC-flattened (h, w, c) layout.
    hp2 = (h1 - 4) // 2
    fw1 = np.asarray(prm['fc1'][0]); fw1f = np.asarray(prm['fc1_fusion'][0])
    lin = fw1.shape[0]
    a = np.transpose(fw1.reshape(lin, cc, hp2, hp2), (2, 3, 1, 0))     # (h, w, c, lin)
    af = np.transpose(fw1f.reshape(lin, cc, hp2, hp2), (2, 3, 1, 0))
    w1c = np.zeros((hp2, hp2, 2 * cc, 2 * lin), np.float32)
    w1c[:, :, :cc, :lin] = a
    w1c[:, :, cc:, lin:] = af
    w1c = w1c.reshape(hp2 * hp2 * 2 * cc, 2 * lin)
    b1c = np.concatenate([np.asarray(prm['fc1'][1]), np.asarray(prm['fc1_fusion'][1])], 0)
    s3a, t3a = _bn_affine_np(prm['bn3']); s3b, t3b = _bn_affine_np(prm['bn3_fusion'])
    fc1 = dict(
        w=jnp.asarray(w1c, jnp.bfloat16),
        b=jnp.asarray(b1c.reshape(1, -1), jnp.float32),
        scale=jnp.asarray(np.concatenate([s3a, s3b]).reshape(1, -1), jnp.float32),
        shift=jnp.asarray(np.concatenate([t3a, t3b]).reshape(1, -1), jnp.float32),
    )

    tail = dict(
        fc0_w=jnp.asarray(np.asarray(prm['fc0'][0]).T, jnp.float32),
        fc0_b=jnp.asarray(prm['fc0'][1], jnp.float32),
        fc3_w=jnp.asarray(np.asarray(prm['fc3'][0]).T, jnp.float32),
        fc3_b=jnp.asarray(prm['fc3'][1], jnp.float32),
        fusion_coeff=jnp.asarray(prm['fusion_coeff'], jnp.float32),
    )
    return dict(stage1=stage1, stage2=stage2, fc1=fc1, tail=tail)


# ------------------------------ Pallas forward -------------------------------

def _transform_and_pack_images(x, symmetry_groups):
    """(B, k, C, H, W) -> (G_total*B, H, W*C) group-transformed, NHWC-flattened."""
    k = x.shape[1]
    parts = [group_transformed_input(x[:, i], symmetry_groups[i]) for i in range(k)]
    xg = jnp.concatenate(parts, axis=0)                 # (G_total, B, C, H, W)
    imgs = xg.reshape((-1,) + x.shape[2:])              # (G_total*B, C, H, W)
    n, c, h, w = imgs.shape
    return jnp.transpose(imgs, (0, 2, 3, 1)).reshape(n, h, w * c)


@functools.partial(jax.jit, static_argnames=('symmetry_groups', 'conv_channels', 'fusion'))
def gemini_forward_pallas(x, packed, *, symmetry_groups, conv_channels, fusion=True):
    B, k = x.shape[0], x.shape[1]
    cc2 = 2 * conv_channels
    group_sizes = [GROUP_SIZE[g] for g in symmetry_groups]
    g_total = sum(group_sizes)

    imgs = _transform_and_pack_images(x, symmetry_groups).astype(jnp.bfloat16)
    y1 = conv_pool_bn_stage(imgs, packed['stage1'], cin=x.shape[2], cout=cc2)
    y2 = conv_pool_bn_stage(y1, packed['stage2'], cin=cc2, cout=cc2)
    z = y2.reshape(y2.shape[0], -1)                     # (G_total*B, Hp*Wp*cc2), bf16

    # Per-symmetry-group mean expressed as a small matmul, fused into the fc1 kernel.
    gme = np.zeros((k * B, g_total * B), np.float32)
    off = 0
    for i, gs in enumerate(group_sizes):
        for g in range(off, off + gs):
            gme[i * B:(i + 1) * B, g * B:(g + 1) * B] = np.eye(B, dtype=np.float32) / gs
        off += gs
    gme = jnp.asarray(gme)

    fp = packed['fc1']
    xm = fc1_bn_group_mean(z, fp['w'], fp['b'], fp['scale'], fp['shift'], gme)
    lin = xm.shape[1] // 2
    xm = jnp.transpose(xm.reshape(k, B, 2 * lin), (1, 0, 2))      # (B, k, 2*lin)
    xk, xf = xm[..., :lin], xm[..., lin:]

    x_k = xk.reshape(B, k * lin)
    if fusion:
        xkf = (jnp.mean(xf, axis=1, keepdims=True) - xk).reshape(B, k * lin)
        c = packed['tail']['fusion_coeff']
        x_k = (x_k + c * xkf) / (1.0 + c)

    # Tiny tail GEMMs: left to XLA (per review).
    t = packed['tail']
    h = jnp.maximum(jnp.dot(x_k, t['fc0_w']) + t['fc0_b'], 0.0)   # fc0 + ReLU (+ dropout=id)
    return jnp.dot(h, t['fc3_w']) + t['fc3_b']                    # fc3 (type='classify')


# --------------------------- pure-JAX reference -----------------------------

def bn_affine(bn):
    gamma, beta, mean, var = bn
    scale = gamma / jnp.sqrt(var + 1e-5)
    return scale, beta - mean * scale


def _conv2d_valid_ref(x_nhwc, w_oihw, bias, mm_dtype):
    n, h, w, c = x_nhwc.shape
    cout, cin, kh, kw = w_oihw.shape
    ho, wo = h - kh + 1, w - kw + 1
    cols = [x_nhwc[:, di:di + ho, dj:dj + wo, :] for di in range(kh) for dj in range(kw)]
    p = jnp.stack(cols, axis=-1).reshape(n * ho * wo, c * kh * kw)
    wm = w_oihw.reshape(cout, cin * kh * kw).T
    y = jnp.dot(p.astype(mm_dtype), wm.astype(mm_dtype),
                preferred_element_type=jnp.float32) + bias
    return y.reshape(n, ho, wo, cout)


def _pool_bn_ref(y, scale, shift):
    n, h, w, c = y.shape
    m = jnp.max(y.reshape(n, h // 2, 2, w // 2, 2, c), axis=(2, 4))
    return m * scale.reshape(1, 1, 1, -1) + shift.reshape(1, 1, 1, -1)


def _branch_ref(x_imgs, prm, sfx, group_sizes, B, mm_dtype):
    cw1, cb1 = prm['conv1' + sfx]
    cw2, cb2 = prm['conv2' + sfx]
    fw1, fb1 = prm['fc1' + sfx]
    x = jnp.transpose(x_imgs, (0, 2, 3, 1))
    y = jnp.maximum(_conv2d_valid_ref(x, cw1, cb1, mm_dtype), 0.0)
    s, t = bn_affine(prm['bn1' + sfx]); y = _pool_bn_ref(y, s, t)
    y = jnp.maximum(_conv2d_valid_ref(y, cw2, cb2, mm_dtype), 0.0)
    s, t = bn_affine(prm['bn2' + sfx]); y = _pool_bn_ref(y, s, t)
    y = jnp.transpose(y, (0, 3, 1, 2)).reshape(y.shape[0], -1)       # NCHW flatten
    y = jnp.maximum(jnp.dot(y.astype(mm_dtype), fw1.T.astype(mm_dtype),
                            preferred_element_type=jnp.float32) + fb1, 0.0)
    s, t = bn_affine(prm['bn3' + sfx]); y = y * s + t
    L = y.shape[-1]
    y = y.reshape(-1, B, L)
    outs, off = [], 0
    for gs in group_sizes:
        outs.append(jnp.mean(y[off:off + gs], axis=0))
        off += gs
    return jnp.stack(outs, axis=1)                                   # (B, k, L)


def gemini_forward_ref(x, prm, symmetry_groups, fusion=True, mm_dtype=jnp.float32):
    B, k = x.shape[0], x.shape[1]
    group_sizes = [GROUP_SIZE[g] for g in symmetry_groups]
    parts = [group_transformed_input(x[:, i], symmetry_groups[i]) for i in range(k)]
    imgs = jnp.concatenate(parts, axis=0).reshape((-1,) + x.shape[2:])
    xk = _branch_ref(imgs, prm, '', group_sizes, B, mm_dtype)
    L = xk.shape[-1]
    x_k = xk.reshape(B, k * L)
    if fusion:
        xf = _branch_ref(imgs, prm, '_fusion', group_sizes, B, mm_dtype)
        xkf = (jnp.mean(xf, axis=1, keepdims=True) - xk).reshape(B, k * L)
        c = prm['fusion_coeff']
        x_k = (x_k + c * xkf) / (1.0 + c)
    fw0, fb0 = prm['fc0']
    fw3, fb3 = prm['fc3']
    h = jnp.maximum(jnp.dot(x_k, fw0.T) + fb0, 0.0)
    return jnp.dot(h, fw3.T) + fb3


# ------------------------------ parameters ----------------------------------

def init_params(key, in_channels, conv_channels, lin_channels, k, num_classes, fc1_in):
    def nrm(kk, shape, std=0.1):
        return std * jax.random.normal(kk, shape, dtype=jnp.float32)

    def bn(kk, c):
        k1, k2, k3, k4 = jax.random.split(kk, 4)
        gamma = 1.0 + 0.1 * jax.random.normal(k1, (c,), jnp.float32)
        beta = 0.1 * jax.random.normal(k2, (c,), jnp.float32)
        mean = 0.1 * jax.random.normal(k3, (c,), jnp.float32)
        var = 0.5 + jax.random.uniform(k4, (c,), jnp.float32)
        return (gamma, beta, mean, var)

    keys = iter(jax.random.split(key, 64))
    prm = {}
    for sfx in ('', '_fusion'):
        prm['conv1' + sfx] = (nrm(next(keys), (conv_channels, in_channels, 5, 5)),
                              nrm(next(keys), (conv_channels,)))
        prm['conv2' + sfx] = (nrm(next(keys), (conv_channels, conv_channels, 5, 5)),
                              nrm(next(keys), (conv_channels,)))
        prm['fc1' + sfx] = (nrm(next(keys), (lin_channels, fc1_in)),
                            nrm(next(keys), (lin_channels,)))
        prm['bn1' + sfx] = bn(next(keys), conv_channels)
        prm['bn2' + sfx] = bn(next(keys), conv_channels)
        prm['bn3' + sfx] = bn(next(keys), lin_channels)
    prm['fc0'] = (nrm(next(keys), (lin_channels, k * lin_channels)),
                  nrm(next(keys), (lin_channels,)))
    prm['fc3'] = (nrm(next(keys), (num_classes, lin_channels)),
                  nrm(next(keys), (num_classes,)))
    prm['fusion_coeff'] = jnp.float32(0.1)
    return prm


# --------------------------------- main --------------------------------------

if __name__ == "__main__":
    B, k = 2, 2
    in_channels, conv_channels, lin_channels = 3, 8, 32
    input_size, num_classes = 32, 5
    symmetry_groups = ('rot90', 'hflip')        # group sizes 4 and 2
    fc1_in = conv_channels * 5 * 5              # input_size == 32 path

    key = jax.random.PRNGKey(0)
    kx, kp = jax.random.split(key)
    x = jax.random.normal(kx, (B, k, in_channels, input_size, input_size), jnp.float32)
    prm = init_params(kp, in_channels, conv_channels, lin_channels, k, num_classes, fc1_in)
    packed = prepare_packed_params(prm, in_channels=in_channels,
                                   conv_channels=conv_channels, input_size=input_size)

    out = jax.block_until_ready(
        gemini_forward_pallas(x, packed, symmetry_groups=symmetry_groups,
                              conv_channels=conv_channels, fusion=True))

    # Numerics-matched reference (same bf16 GEMM operands, f32 accumulation).
    ref_bf16 = jax.block_until_ready(
        gemini_forward_ref(x, prm, symmetry_groups, fusion=True, mm_dtype=jnp.bfloat16))
    # Full-f32 reference (sanity check that the bf16 MXU choice stays accurate).
    ref_f32 = jax.block_until_ready(
        gemini_forward_ref(x, prm, symmetry_groups, fusion=True, mm_dtype=jnp.float32))

    assert out.shape == (B, num_classes)
    np.testing.assert_allclose(np.asarray(out), np.asarray(ref_bf16), rtol=1e-2, atol=1e-2)
    np.testing.assert_allclose(np.asarray(out), np.asarray(ref_f32), rtol=5e-2, atol=5e-2)
    print("KERNEL_OK")
</pallas_src>

<mosaic_0001>
module attributes {stable_mosaic.version = 11 : i64} {
  func.func @_conv_stage_kernel(%arg0: i32, %arg1: memref<1x32x96xbf16, #tpu.memory_space<vmem>>, %arg2: memref<25x84x448xbf16, #tpu.memory_space<vmem>>, %arg3: memref<14x28xf32, #tpu.memory_space<vmem>>, %arg4: memref<14x28xf32, #tpu.memory_space<vmem>>, %arg5: memref<448x224xf32, #tpu.memory_space<vmem>>, %arg6: memref<448x224xf32, #tpu.memory_space<vmem>>, %arg7: memref<1x448xf32, #tpu.memory_space<vmem>>, %arg8: memref<1x224xf32, #tpu.memory_space<vmem>>, %arg9: memref<1x224xf32, #tpu.memory_space<vmem>>, %arg10: memref<1x14x224xbf16, #tpu.memory_space<vmem>>) attributes {dimension_semantics = [#tpu.dimension_semantics<parallel>], iteration_bounds = array<i64: 12>, scalar_prefetch = 0 : i64, scratch_operands = 0 : i64, tpu.core_type = #tpu.core_type<tc>, window_params = [{transform_indices = @transform_0, window_bounds = array<i64: 1, 32, 96>}, {pipeline_mode = #tpu.pipeline_mode<synchronous>, transform_indices = @transform_1, window_bounds = array<i64: 25, 84, 448>}, {pipeline_mode = #tpu.pipeline_mode<synchronous>, transform_indices = @transform_2, window_bounds = array<i64: 14, 28>}, {pipeline_mode = #tpu.pipeline_mode<synchronous>, transform_indices = @transform_3, window_bounds = array<i64: 14, 28>}, {pipeline_mode = #tpu.pipeline_mode<synchronous>, transform_indices = @transform_4, window_bounds = array<i64: 448, 224>}, {pipeline_mode = #tpu.pipeline_mode<synchronous>, transform_indices = @transform_5, window_bounds = array<i64: 448, 224>}, {pipeline_mode = #tpu.pipeline_mode<synchronous>, transform_indices = @transform_6, window_bounds = array<i64: 1, 448>}, {pipeline_mode = #tpu.pipeline_mode<synchronous>, transform_indices = @transform_7, window_bounds = array<i64: 1, 224>}, {pipeline_mode = #tpu.pipeline_mode<synchronous>, transform_indices = @transform_8, window_bounds = array<i64: 1, 224>}, {transform_indices = @transform_9, window_bounds = array<i64: 1, 14, 224>}]} {
    %c0 = arith.constant 0 : index
    %c0_0 = arith.constant 0 : index
    %c0_1 = arith.constant 0 : index
    %0 = vector.load %arg1[%c0, %c0_0, %c0_1] : memref<1x32x96xbf16, #tpu.memory_space<vmem>>, vector<1x32x96xbf16>
    %1 = vector.shape_cast %0 : vector<1x32x96xbf16> to vector<32x96xbf16>
    %2 = arith.extf %1 : vector<32x96xbf16> to vector<32x96xf32>
    %cst = arith.constant 0.000000e+00 : f32
    %3 = vector.broadcast %cst : f32 to vector<28x448xf32>
    %4 = vector.extract_strided_slice %2 {offsets = [0, 0], sizes = [28, 84], strides = [1, 1]} : vector<32x96xf32> to vector<28x84xf32>
    %5 = arith.truncf %4 : vector<28x84xf32> to vector<28x84xbf16>
    %c0_2 = arith.constant 0 : index
    %c0_3 = arith.constant 0 : index
    %c0_4 = arith.constant 0 : index
    %6 = vector.load %arg2[%c0_2, %c0_3, %c0_4] : memref<25x84x448xbf16, #tpu.memory_space<vmem>>, vector<1x84x448xbf16>
    %7 = vector.shape_cast %6 : vector<1x84x448xbf16> to vector<84x448xbf16>
    %cst_5 = arith.constant dense<0.000000e+00> : vector<28x448xf32>
    %8 = tpu.matmul %5, %7, %cst_5 {dimension_numbers = #tpu.dot_dimension_numbers<[1], [0], [0], [1], [0, 0, 1, 1], [], []>} : vector<28x84xbf16>, vector<84x448xbf16>, vector<28x448xf32> -> vector<28x448xf32>
    %9 = arith.addf %3, %8 : vector<28x448xf32>
    %10 = vector.extract_strided_slice %2 {offsets = [0, 3], sizes = [28, 84], strides = [1, 1]} : vector<32x96xf32> to vector<28x84xf32>
    %11 = arith.truncf %10 : vector<28x84xf32> to vector<28x84xbf16>
    %c1 = arith.constant 1 : index
    %c0_6 = arith.constant 0 : index
    %c0_7 = arith.constant 0 : index
    %12 = vector.load %arg2[%c1, %c0_6, %c0_7] : memref<25x84x448xbf16, #tpu.memory_space<vmem>>, vector<1x84x448xbf16>
    %13 = vector.shape_cast %12 : vector<1x84x448xbf16> to vector<84x448xbf16>
    %cst_8 = arith.constant dense<0.000000e+00> : vector<28x448xf32>
    %14 = tpu.matmul %11, %13, %cst_8 {dimension_numbers = #tpu.dot_dimension_numbers<[1], [0], [0], [1], [0, 0, 1, 1], [], []>} : vector<28x84xbf16>, vector<84x448xbf16>, vector<28x448xf32> -> vector<28x448xf32>
    %15 = arith.addf %9, %14 : vector<28x448xf32>
    %16 = vector.extract_strided_slice %2 {offsets = [0, 6], sizes = [28, 84], strides = [1, 1]} : vector<32x96xf32> to vector<28x84xf32>
    %17 = arith.truncf %16 : vector<28x84xf32> to vector<28x84xbf16>
    %c2 = arith.constant 2 : index
    %c0_9 = arith.constant 0 : index
    %c0_10 = arith.constant 0 : index
    %18 = vector.load %arg2[%c2, %c0_9, %c0_10] : memref<25x84x448xbf16, #tpu.memory_space<vmem>>, vector<1x84x448xbf16>
    %19 = vector.shape_cast %18 : vector<1x84x448xbf16> to vector<84x448xbf16>
    %cst_11 = arith.constant dense<0.000000e+00> : vector<28x448xf32>
    %20 = tpu.matmul %17, %19, %cst_11 {dimension_numbers = #tpu.dot_dimension_numbers<[1], [0], [0], [1], [0, 0, 1, 1], [], []>} : vector<28x84xbf16>, vector<84x448xbf16>, vector<28x448xf32> -> vector<28x448xf32>
    %21 = arith.addf %15, %20 : vector<28x448xf32>
    %22 = vector.extract_strided_slice %2 {offsets = [0, 9], sizes = [28, 84], strides = [1, 1]} : vector<32x96xf32> to vector<28x84xf32>
    %23 = arith.truncf %22 : vector<28x84xf32> to vector<28x84xbf16>
    %c3 = arith.constant 3 : index
    %c0_12 = arith.constant 0 : index
    %c0_13 = arith.constant 0 : index
    %24 = vector.load %arg2[%c3, %c0_12, %c0_13] : memref<25x84x448xbf16, #tpu.memory_space<vmem>>, vector<1x84x448xbf16>
    %25 = vector.shape_cast %24 : vector<1x84x448xbf16> to vector<84x448xbf16>
    %cst_14 = arith.constant dense<0.000000e+00> : vector<28x448xf32>
    %26 = tpu.matmul %23, %25, %cst_14 {dimension_numbers = #tpu.dot_dimension_numbers<[1], [0], [0], [1], [0, 0, 1, 1], [], []>} : vector<28x84xbf16>, vector<84x448xbf16>, vector<28x448xf32> -> vector<28x448xf32>
    %27 = arith.addf %21, %26 : vector<28x448xf32>
    %28 = vector.extract_strided_slice %2 {offsets = [0, 12], sizes = [28, 84], strides = [1, 1]} : vector<32x96xf32> to vector<28x84xf32>
    %29 = arith.truncf %28 : vector<28x84xf32> to vector<28x84xbf16>
    %c4 = arith.constant 4 : index
    %c0_15 = arith.constant 0 : index
    %c0_16 = arith.constant 0 : index
    %30 = vector.load %arg2[%c4, %c0_15, %c0_16] : memref<25x84x448xbf16, #tpu.memory_space<vmem>>, vector<1x84x448xbf16>
    %31 = vector.shape_cast %30 : vector<1x84x448xbf16> to vector<84x448xbf16>
    %cst_17 = arith.constant dense<0.000000e+00> : vector<28x448xf32>
    %32 = tpu.matmul %29, %31, %cst_17 {dimension_numbers = #tpu.dot_dimension_numbers<[1], [0], [0], [1], [0, 0, 1, 1], [], []>} : vector<28x84xbf16>, vector<84x448xbf16>, vector<28x448xf32> -> vector<28x448xf32>
    %33 = arith.addf %27, %32 : vector<28x448xf32>
    %34 = vector.extract_strided_slice %2 {offsets = [1, 0], sizes = [28, 84], strides = [1, 1]} : vector<32x96xf32> to vector<28x84xf32>
    %35 = arith.truncf %34 : vector<28x84xf32> to vector<28x84xbf16>
    %c5 = arith.constant 5 : index
    %c0_18 = arith.constant 0 : index
    %c0_19 = arith.constant 0 : index
    %36 = vector.load %arg2[%c5, %c0_18, %c0_19] : memref<25x84x448xbf16, #tpu.memory_space<vmem>>, vector<1x84x448xbf16>
    %37 = vector.shape_cast %36 : vector<1x84x448xbf16> to vector<84x448xbf16>
    %cst_20 = arith.constant dense<0.000000e+00> : vector<28x448xf32>
    %38 = tpu.matmul %35, %37, %cst_20 {dimension_numbers = #tpu.dot_dimension_numbers<[1], [0], [0], [1], [0, 0, 1, 1], [], []>} : vector<28x84xbf16>, vector<84x448xbf16>, vector<28x448xf32> -> vector<28x448xf32>
    %39 = arith.addf %33, %38 : vector<28x448xf32>
    %40 = vector.extract_strided_slice %2 {offsets = [1, 3], sizes = [28, 84], strides = [1, 1]} : vector<32x96xf32> to vector<28x84xf32>
    %41 = arith.truncf %40 : vector<28x84xf32> to vector<28x84xbf16>
    %c6 = arith.constant 6 : index
    %c0_21 = arith.constant 0 : index
    %c0_22 = arith.constant 0 : index
    %42 = vector.load %arg2[%c6, %c0_21, %c0_22] : memref<25x84x448xbf16, #tpu.memory_space<vmem>>, vector<1x84x448xbf16>
    %43 = vector.shape_cast %42 : vector<1x84x448xbf16> to vector<84x448xbf16>
    %cst_23 = arith.constant dense<0.000000e+00> : vector<28x448xf32>
    %44 = tpu.matmul %41, %43, %cst_23 {dimension_numbers = #tpu.dot_dimension_numbers<[1], [0], [0], [1], [0, 0, 1, 1], [], []>} : vector<28x84xbf16>, vector<84x448xbf16>, vector<28x448xf32> -> vector<28x448xf32>
    %45 = arith.addf %39, %44 : vector<28x448xf32>
    %46 = vector.extract_strided_slice %2 {offsets = [1, 6], sizes = [28, 84], strides = [1, 1]} : vector<32x96xf32> to vector<28x84xf32>
    %47 = arith.truncf %46 : vector<28x84xf32> to vector<28x84xbf16>
    %c7 = arith.constant 7 : index
    %c0_24 = arith.constant 0 : index
    %c0_25 = arith.constant 0 : index
    %48 = vector.load %arg2[%c7, %c0_24, %c0_25] : memref<25x84x448xbf16, #tpu.memory_space<vmem>>, vector<1x84x448xbf16>
    %49 = vector.shape_cast %48 : vector<1x84x448xbf16> to vector<84x448xbf16>
    %cst_26 = arith.constant dense<0.000000e+00> : vector<28x448xf32>
    %50 = tpu.matmul %47, %49, %cst_26 {dimension_numbers = #tpu.dot_dimension_numbers<[1], [0], [0], [1], [0, 0, 1, 1], [], []>} : vector<28x84xbf16>, vector<84x448xbf16>, vector<28x448xf32> -> vector<28x448xf32>
    %51 = arith.addf %45, %50 : vector<28x448xf32>
    %52 = vector.extract_strided_slice %2 {offsets = [1, 9], sizes = [28, 84], strides = [1, 1]} : vector<32x96xf32> to vector<28x84xf32>
    %53 = arith.truncf %52 : vector<28x84xf32> to vector<28x84xbf16>
    %c8 = arith.constant 8 : index
    %c0_27 = arith.constant 0 : index
    %c0_28 = arith.constant 0 : index
    %54 = vector.load %arg2[%c8, %c0_27, %c0_28] : memref<25x84x448xbf16, #tpu.memory_space<vmem>>, vector<1x84x448xbf16>
    %55 = vector.shape_cast %54 : vector<1x84x448xbf16> to vector<84x448xbf16>
    %cst_29 = arith.constant dense<0.000000e+00> : vector<28x448xf32>
    %56 = tpu.matmul %53, %55, %cst_29 {dimension_numbers = #tpu.dot_dimension_numbers<[1], [0], [0], [1], [0, 0, 1, 1], [], []>} : vector<28x84xbf16>, vector<84x448xbf16>, vector<28x448xf32> -> vector<28x448xf32>
    %57 = arith.addf %51, %56 : vector<28x448xf32>
    %58 = vector.extract_strided_slice %2 {offsets = [1, 12], sizes = [28, 84], strides = [1, 1]} : vector<32x96xf32> to vector<28x84xf32>
    %59 = arith.truncf %58 : vector<28x84xf32> to vector<28x84xbf16>
    %c9 = arith.constant 9 : index
    %c0_30 = arith.constant 0 : index
    %c0_31 = arith.constant 0 : index
    %60 = vector.load %arg2[%c9, %c0_30, %c0_31] : memref<25x84x448xbf16, #tpu.memory_space<vmem>>, vector<1x84x448xbf16>
    %61 = vector.shape_cast %60 : vector<1x84x448xbf16> to vector<84x448xbf16>
    %cst_32 = arith.constant dense<0.000000e+00> : vector<28x448xf32>
    %62 = tpu.matmul %59, %61, %cst_32 {dimension_numbers = #tpu.dot_dimension_numbers<[1], [0], [0], [1], [0, 0, 1, 1], [], []>} : vector<28x84xbf16>, vector<84x448xbf16>, vector<28x448xf32> -> vector<28x448xf32>
    %63 = arith.addf %57, %62 : vector<28x448xf32>
    %64 = vector.extract_strided_slice %2 {offsets = [2, 0], sizes = [28, 84], strides = [1, 1]} : vector<32x96xf32> to vector<28x84xf32>
    %65 = arith.truncf %64 : vector<28x84xf32> to vector<28x84xbf16>
    %c10 = arith.constant 10 : index
    %c0_33 = arith.constant 0 : index
    %c0_34 = arith.constant 0 : index
    %66 = vector.load %arg2[%c10, %c0_33, %c0_34] : memref<25x84x448xbf16, #tpu.memory_space<vmem>>, vector<1x84x448xbf16>
    %67 = vector.shape_cast %66 : vector<1x84x448xbf16> to vector<84x448xbf16>
    %cst_35 = arith.constant dense<0.000000e+00> : vector<28x448xf32>
    %68 = tpu.matmul %65, %67, %cst_35 {dimension_numbers = #tpu.dot_dimension_numbers<[1], [0], [0], [1], [0, 0, 1, 1], [], []>} : vector<28x84xbf16>, vector<84x448xbf16>, vector<28x448xf32> -> vector<28x448xf32>
    %69 = arith.addf %63, %68 : vector<28x448xf32>
    %70 = vector.extract_strided_slice %2 {offsets = [2, 3], sizes = [28, 84], strides = [1, 1]} : vector<32x96xf32> to vector<28x84xf32>
    %71 = arith.truncf %70 : vector<28x84xf32> to vector<28x84xbf16>
    %c11 = arith.constant 11 : index
    %c0_36 = arith.constant 0 : index
    %c0_37 = arith.constant 0 : index
    %72 = vector.load %arg2[%c11, %c0_36, %c0_37] : memref<25x84x448xbf16, #tpu.memory_space<vmem>>, vector<1x84x448xbf16>
    %73 = vector.shape_cast %72 : vector<1x84x448xbf16> to vector<84x448xbf16>
    %cst_38 = arith.constant dense<0.000000e+00> : vector<28x448xf32>
    %74 = tpu.matmul %71, %73, %cst_38 {dimension_numbers = #tpu.dot_dimension_numbers<[1], [0], [0], [1], [0, 0, 1, 1], [], []>} : vector<28x84xbf16>, vector<84x448xbf16>, vector<28x448xf32> -> vector<28x448xf32>
    %75 = arith.addf %69, %74 : vector<28x448xf32>
    %76 = vector.extract_strided_slice %2 {offsets = [2, 6], sizes = [28, 84], strides = [1, 1]} : vector<32x96xf32> to vector<28x84xf32>
    %77 = arith.truncf %76 : vector<28x84xf32> to vector<28x84xbf16>
    %c12 = arith.constant 12 : index
    %c0_39 = arith.constant 0 : index
    %c0_40 = arith.constant 0 : index
    %78 = vector.load %arg2[%c12, %c0_39, %c0_40] : memref<25x84x448xbf16, #tpu.memory_space<vmem>>, vector<1x84x448xbf16>
    %79 = vector.shape_cast %78 : vector<1x84x448xbf16> to vector<84x448xbf16>
    %cst_41 = arith.constant dense<0.000000e+00> : vector<28x448xf32>
    %80 = tpu.matmul %77, %79, %cst_41 {dimension_numbers = #tpu.dot_dimension_numbers<[1], [0], [0], [1], [0, 0, 1, 1], [], []>} : vector<28x84xbf16>, vector<84x448xbf16>, vector<28x448xf32> -> vector<28x448xf32>
    %81 = arith.addf %75, %80 : vector<28x448xf32>
    %82 = vector.extract_strided_slice %2 {offsets = [2, 9], sizes = [28, 84], strides = [1, 1]} : vector<32x96xf32> to vector<28x84xf32>
    %83 = arith.truncf %82 : vector<28x84xf32> to vector<28x84xbf16>
    %c13 = arith.constant 13 : index
    %c0_42 = arith.constant 0 : index
    %c0_43 = arith.constant 0 : index
    %84 = vector.load %arg2[%c13, %c0_42, %c0_43] : memref<25x84x448xbf16, #tpu.memory_space<vmem>>, vector<1x84x448xbf16>
    %85 = vector.shape_cast %84 : vector<1x84x448xbf16> to vector<84x448xbf16>
    %cst_44 = arith.constant dense<0.000000e+00> : vector<28x448xf32>
    %86 = tpu.matmul %83, %85, %cst_44 {dimension_numbers = #tpu.dot_dimension_numbers<[1], [0], [0], [1], [0, 0, 1, 1], [], []>} : vector<28x84xbf16>, vector<84x448xbf16>, vector<28x448xf32> -> vector<28x448xf32>
    %87 = arith.addf %81, %86 : vector<28x448xf32>
    %88 = vector.extract_strided_slice %2 {offsets = [2, 12], sizes = [28, 84], strides = [1, 1]} : vector<32x96xf32> to vector<28x84xf32>
    %89 = arith.truncf %88 : vector<28x84xf32> to vector<28x84xbf16>
    %c14 = arith.constant 14 : index
    %c0_45 = arith.constant 0 : index
    %c0_46 = arith.constant 0 : index
    %90 = vector.load %arg2[%c14, %c0_45, %c0_46] : memref<25x84x448xbf16, #tpu.memory_space<vmem>>, vector<1x84x448xbf16>
    %91 = vector.shape_cast %90 : vector<1x84x448xbf16> to vector<84x448xbf16>
    %cst_47 = arith.constant dense<0.000000e+00> : vector<28x448xf32>
    %92 = tpu.matmul %89, %91, %cst_47 {dimension_numbers = #tpu.dot_dimension_numbers<[1], [0], [0], [1], [0, 0, 1, 1], [], []>} : vector<28x84xbf16>, vector<84x448xbf16>, vector<28x448xf32> -> vector<28x448xf32>
    %93 = arith.addf %87, %92 : vector<28x448xf32>
    %94 = vector.extract_strided_slice %2 {offsets = [3, 0], sizes = [28, 84], strides = [1, 1]} : vector<32x96xf32> to vector<28x84xf32>
    %95 = arith.truncf %94 : vector<28x84xf32> to vector<28x84xbf16>
    %c15 = arith.constant 15 : index
    %c0_48 = arith.constant 0 : index
    %c0_49 = arith.constant 0 : index
    %96 = vector.load %arg2[%c15, %c0_48, %c0_49] : memref<25x84x448xbf16, #tpu.memory_space<vmem>>, vector<1x84x448xbf16>
    %97 = vector.shape_cast %96 : vector<1x84x448xbf16> to vector<84x448xbf16>
    %cst_50 = arith.constant dense<0.000000e+00> : vector<28x448xf32>
    %98 = tpu.matmul %95, %97, %cst_50 {dimension_numbers = #tpu.dot_dimension_numbers<[1], [0], [0], [1], [0, 0, 1, 1], [], []>} : vector<28x84xbf16>, vector<84x448xbf16>, vector<28x448xf32> -> vector<28x448xf32>
    %99 = arith.addf %93, %98 : vector<28x448xf32>
    %100 = vector.extract_strided_slice %2 {offsets = [3, 3], sizes = [28, 84], strides = [1, 1]} : vector<32x96xf32> to vector<28x84xf32>
    %101 = arith.truncf %100 : vector<28x84xf32> to vector<28x84xbf16>
    %c16 = arith.constant 16 : index
    %c0_51 = arith.constant 0 : index
    %c0_52 = arith.constant 0 : index
    %102 = vector.load %arg2[%c16, %c0_51, %c0_52] : memref<25x84x448xbf16, #tpu.memory_space<vmem>>, vector<1x84x448xbf16>
    %103 = vector.shape_cast %102 : vector<1x84x448xbf16> to vector<84x448xbf16>
    %cst_53 = arith.constant dense<0.000000e+00> : vector<28x448xf32>
    %104 = tpu.matmul %101, %103, %cst_53 {dimension_numbers = #tpu.dot_dimension_numbers<[1], [0], [0], [1], [0, 0, 1, 1], [], []>} : vector<28x84xbf16>, vector<84x448xbf16>, vector<28x448xf32> -> vector<28x448xf32>
    %105 = arith.addf %99, %104 : vector<28x448xf32>
    %106 = vector.extract_strided_slice %2 {offsets = [3, 6], sizes = [28, 84], strides = [1, 1]} : vector<32x96xf32> to vector<28x84xf32>
    %107 = arith.truncf %106 : vector<28x84xf32> to vector<28x84xbf16>
    %c17 = arith.constant 17 : index
    %c0_54 = arith.constant 0 : index
    %c0_55 = arith.constant 0 : index
    %108 = vector.load %arg2[%c17, %c0_54, %c0_55] : memref<25x84x448xbf16, #tpu.memory_space<vmem>>, vector<1x84x448xbf16>
    %109 = vector.shape_cast %108 : vector<1x84x448xbf16> to vector<84x448xbf16>
    %cst_56 = arith.constant dense<0.000000e+00> : vector<28x448xf32>
    %110 = tpu.matmul %107, %109, %cst_56 {dimension_numbers = #tpu.dot_dimension_numbers<[1], [0], [0], [1], [0, 0, 1, 1], [], []>} : vector<28x84xbf16>, vector<84x448xbf16>, vector<28x448xf32> -> vector<28x448xf32>
    %111 = arith.addf %105, %110 : vector<28x448xf32>
    %112 = vector.extract_strided_slice %2 {offsets = [3, 9], sizes = [28, 84], strides = [1, 1]} : vector<32x96xf32> to vector<28x84xf32>
    %113 = arith.truncf %112 : vector<28x84xf32> to vector<28x84xbf16>
    %c18 = arith.constant 18 : index
    %c0_57 = arith.constant 0 : index
    %c0_58 = arith.constant 0 : index
    %114 = vector.load %arg2[%c18, %c0_57, %c0_58] : memref<25x84x448xbf16, #tpu.memory_space<vmem>>, vector<1x84x448xbf16>
    %115 = vector.shape_cast %114 : vector<1x84x448xbf16> to vector<84x448xbf16>
    %cst_59 = arith.constant dense<0.000000e+00> : vector<28x448xf32>
    %116 = tpu.matmul %113, %115, %cst_59 {dimension_numbers = #tpu.dot_dimension_numbers<[1], [0], [0], [1], [0, 0, 1, 1], [], []>} : vector<28x84xbf16>, vector<84x448xbf16>, vector<28x448xf32> -> vector<28x448xf32>
    %117 = arith.addf %111, %116 : vector<28x448xf32>
    %118 = vector.extract_strided_slice %2 {offsets = [3, 12], sizes = [28, 84], strides = [1, 1]} : vector<32x96xf32> to vector<28x84xf32>
    %119 = arith.truncf %118 : vector<28x84xf32> to vector<28x84xbf16>
    %c19 = arith.constant 19 : index
    %c0_60 = arith.constant 0 : index
    %c0_61 = arith.constant 0 : index
    %120 = vector.load %arg2[%c19, %c0_60, %c0_61] : memref<25x84x448xbf16, #tpu.memory_space<vmem>>, vector<1x84x448xbf16>
    %121 = vector.shape_cast %120 : vector<1x84x448xbf16> to vector<84x448xbf16>
    %cst_62 = arith.constant dense<0.000000e+00> : vector<28x448xf32>
    %122 = tpu.matmul %119, %121, %cst_62 {dimension_numbers = #tpu.dot_dimension_numbers<[1], [0], [0], [1], [0, 0, 1, 1], [], []>} : vector<28x84xbf16>, vector<84x448xbf16>, vector<28x448xf32> -> vector<28x448xf32>
    %123 = arith.addf %117, %122 : vector<28x448xf32>
    %124 = vector.extract_strided_slice %2 {offsets = [4, 0], sizes = [28, 84], strides = [1, 1]} : vector<32x96xf32> to vector<28x84xf32>
    %125 = arith.truncf %124 : vector<28x84xf32> to vector<28x84xbf16>
    %c20 = arith.constant 20 : index
    %c0_63 = arith.constant 0 : index
    %c0_64 = arith.constant 0 : index
    %126 = vector.load %arg2[%c20, %c0_63, %c0_64] : memref<25x84x448xbf16, #tpu.memory_space<vmem>>, vector<1x84x448xbf16>
    %127 = vector.shape_cast %126 : vector<1x84x448xbf16> to vector<84x448xbf16>
    %cst_65 = arith.constant dense<0.000000e+00> : vector<28x448xf32>
    %128 = tpu.matmul %125, %127, %cst_65 {dimension_numbers = #tpu.dot_dimension_numbers<[1], [0], [0], [1], [0, 0, 1, 1], [], []>} : vector<28x84xbf16>, vector<84x448xbf16>, vector<28x448xf32> -> vector<28x448xf32>
    %129 = arith.addf %123, %128 : vector<28x448xf32>
    %130 = vector.extract_strided_slice %2 {offsets = [4, 3], sizes = [28, 84], strides = [1, 1]} : vector<32x96xf32> to vector<28x84xf32>
    %131 = arith.truncf %130 : vector<28x84xf32> to vector<28x84xbf16>
    %c21 = arith.constant 21 : index
    %c0_66 = arith.constant 0 : index
    %c0_67 = arith.constant 0 : index
    %132 = vector.load %arg2[%c21, %c0_66, %c0_67] : memref<25x84x448xbf16, #tpu.memory_space<vmem>>, vector<1x84x448xbf16>
    %133 = vector.shape_cast %132 : vector<1x84x448xbf16> to vector<84x448xbf16>
    %cst_68 = arith.constant dense<0.000000e+00> : vector<28x448xf32>
    %134 = tpu.matmul %131, %133, %cst_68 {dimension_numbers = #tpu.dot_dimension_numbers<[1], [0], [0], [1], [0, 0, 1, 1], [], []>} : vector<28x84xbf16>, vector<84x448xbf16>, vector<28x448xf32> -> vector<28x448xf32>
    %135 = arith.addf %129, %134 : vector<28x448xf32>
    %136 = vector.extract_strided_slice %2 {offsets = [4, 6], sizes = [28, 84], strides = [1, 1]} : vector<32x96xf32> to vector<28x84xf32>
    %137 = arith.truncf %136 : vector<28x84xf32> to vector<28x84xbf16>
    %c22 = arith.constant 22 : index
    %c0_69 = arith.constant 0 : index
    %c0_70 = arith.constant 0 : index
    %138 = vector.load %arg2[%c22, %c0_69, %c0_70] : memref<25x84x448xbf16, #tpu.memory_space<vmem>>, vector<1x84x448xbf16>
    %139 = vector.shape_cast %138 : vector<1x84x448xbf16> to vector<84x448xbf16>
    %cst_71 = arith.constant dense<0.000000e+00> : vector<28x448xf32>
    %140 = tpu.matmul %137, %139, %cst_71 {dimension_numbers = #tpu.dot_dimension_numbers<[1], [0], [0], [1], [0, 0, 1, 1], [], []>} : vector<28x84xbf16>, vector<84x448xbf16>, vector<28x448xf32> -> vector<28x448xf32>
    %141 = arith.addf %135, %140 : vector<28x448xf32>
    %142 = vector.extract_strided_slice %2 {offsets = [4, 9], sizes = [28, 84], strides = [1, 1]} : vector<32x96xf32> to vector<28x84xf32>
    %143 = arith.truncf %142 : vector<28x84xf32> to vector<28x84xbf16>
    %c23 = arith.constant 23 : index
    %c0_72 = arith.constant 0 : index
    %c0_73 = arith.constant 0 : index
    %144 = vector.load %arg2[%c23, %c0_72, %c0_73] : memref<25x84x448xbf16, #tpu.memory_space<vmem>>, vector<1x84x448xbf16>
    %145 = vector.shape_cast %144 : vector<1x84x448xbf16> to vector<84x448xbf16>
    %cst_74 = arith.constant dense<0.000000e+00> : vector<28x448xf32>
    %146 = tpu.matmul %143, %145, %cst_74 {dimension_numbers = #tpu.dot_dimension_numbers<[1], [0], [0], [1], [0, 0, 1, 1], [], []>} : vector<28x84xbf16>, vector<84x448xbf16>, vector<28x448xf32> -> vector<28x448xf32>
    %147 = arith.addf %141, %146 : vector<28x448xf32>
    %148 = vector.extract_strided_slice %2 {offsets = [4, 12], sizes = [28, 84], strides = [1, 1]} : vector<32x96xf32> to vector<28x84xf32>
    %149 = arith.truncf %148 : vector<28x84xf32> to vector<28x84xbf16>
    %c24 = arith.constant 24 : index
    %c0_75 = arith.constant 0 : index
    %c0_76 = arith.constant 0 : index
    %150 = vector.load %arg2[%c24, %c0_75, %c0_76] : memref<25x84x448xbf16, #tpu.memory_space<vmem>>, vector<1x84x448xbf16>
    %151 = vector.shape_cast %150 : vector<1x84x448xbf16> to vector<84x448xbf16>
    %cst_77 = arith.constant dense<0.000000e+00> : vector<28x448xf32>
    %152 = tpu.matmul %149, %151, %cst_77 {dimension_numbers = #tpu.dot_dimension_numbers<[1], [0], [0], [1], [0, 0, 1, 1], [], []>} : vector<28x84xbf16>, vector<84x448xbf16>, vector<28x448xf32> -> vector<28x448xf32>
    %153 = arith.addf %147, %152 : vector<28x448xf32>
    %c0_78 = arith.constant 0 : index
    %c0_79 = arith.constant 0 : index
    %154 = vector.load %arg7[%c0_78, %c0_79] : memref<1x448xf32, #tpu.memory_space<vmem>>, vector<1x448xf32>
    %155 = vector.broadcast %154 : vector<1x448xf32> to vector<28x448xf32>
    %156 = arith.addf %153, %155 : vector<28x448xf32>
    %cst_80 = arith.constant 0.000000e+00 : f32
    %157 = vector.broadcast %cst_80 : f32 to vector<28x448xf32>
    %158 = arith.maximumf %156, %157 : vector<28x448xf32>
    %c0_81 = arith.constant 0 : index
    %c0_82 = arith.constant 0 : index
    %159 = vector.load %arg3[%c0_81, %c0_82] : memref<14x28xf32, #tpu.memory_space<vmem>>, vector<14x28xf32>
    %cst_83 = arith.constant dense<0.000000e+00> : vector<14x448xf32>
    %160 = tpu.matmul %159, %158, %cst_83 {dimension_numbers = #tpu.dot_dimension_numbers<[1], [0], [0], [1], [0, 0, 1, 1], [], []>} : vector<14x28xf32>, vector<28x448xf32>, vector<14x448xf32> -> vector<14x448xf32>
    %c0_84 = arith.constant 0 : index
    %c0_85 = arith.constant 0 : index
    %161 = vector.load %arg4[%c0_84, %c0_85] : memref<14x28xf32, #tpu.memory_space<vmem>>, vector<14x28xf32>
    %cst_86 = arith.constant dense<0.000000e+00> : vector<14x448xf32>
    %162 = tpu.matmul %161, %158, %cst_86 {dimension_numbers = #tpu.dot_dimension_numbers<[1], [0], [0], [1], [0, 0, 1, 1], [], []>} : vector<14x28xf32>, vector<28x448xf32>, vector<14x448xf32> -> vector<14x448xf32>
    %163 = arith.maximumf %160, %162 : vector<14x448xf32>
    %c0_87 = arith.constant 0 : index
    %c0_88 = arith.constant 0 : index
    %164 = vector.load %arg5[%c0_87, %c0_88] : memref<448x224xf32, #tpu.memory_space<vmem>>, vector<448x224xf32>
    %cst_89 = arith.constant dense<0.000000e+00> : vector<14x224xf32>
    %165 = tpu.matmul %163, %164, %cst_89 {dimension_numbers = #tpu.dot_dimension_numbers<[1], [0], [0], [1], [0, 0, 1, 1], [], []>} : vector<14x448xf32>, vector<448x224xf32>, vector<14x224xf32> -> vector<14x224xf32>
    %c0_90 = arith.constant 0 : index
    %c0_91 = arith.constant 0 : index
    %166 = vector.load %arg6[%c0_90, %c0_91] : memref<448x224xf32, #tpu.memory_space<vmem>>, vector<448x224xf32>
    %cst_92 = arith.constant dense<0.000000e+00> : vector<14x224xf32>
    %167 = tpu.matmul %163, %166, %cst_92 {dimension_numbers = #tpu.dot_dimension_numbers<[1], [0], [0], [1], [0, 0, 1, 1], [], []>} : vector<14x448xf32>, vector<448x224xf32>, vector<14x224xf32> -> vector<14x224xf32>
    %168 = arith.maximumf %165, %167 : vector<14x224xf32>
    %c0_93 = arith.constant 0 : index
    %c0_94 = arith.constant 0 : index
    %169 = vector.load %arg8[%c0_93, %c0_94] : memref<1x224xf32, #tpu.memory_space<vmem>>, vector<1x224xf32>
    %170 = vector.broadcast %169 : vector<1x224xf32> to vector<14x224xf32>
    %171 = arith.mulf %168, %170 : vector<14x224xf32>
    %c0_95 = arith.constant 0 : index
    %c0_96 = arith.constant 0 : index
    %172 = vector.load %arg9[%c0_95, %c0_96] : memref<1x224xf32, #tpu.memory_space<vmem>>, vector<1x224xf32>
    %173 = vector.broadcast %172 : vector<1x224xf32> to vector<14x224xf32>
    %174 = arith.addf %171, %173 : vector<14x224xf32>
    %175 = arith.truncf %174 : vector<14x224xf32> to vector<14x224xbf16>
    %c0_97 = arith.constant 0 : index
    %c0_98 = arith.constant 0 : index
    %c0_99 = arith.constant 0 : index
    %176 = vector.load %arg10[%c0_97, %c0_98, %c0_99] : memref<1x14x224xbf16, #tpu.memory_space<vmem>>, vector<1x14x224xbf16>
    %177 = vector.shape_cast %176 : vector<1x14x224xbf16> to vector<14x224xbf16>
    %178 = vector.shape_cast %175 : vector<14x224xbf16> to vector<1x14x224xbf16>
    tpu.vector_store %arg10[%c0_97, %c0_98, %c0_99], %178 {strides = array<i32>} : memref<1x14x224xbf16, #tpu.memory_space<vmem>>, vector<1x14x224xbf16>,
    return
  }
  func.func @transform_0(%arg0: i32) -> (i32, i32, i32) {
    %c0_i32 = arith.constant 0 : i32
    %c0_i32_0 = arith.constant 0 : i32
    %c0_i32_1 = arith.constant 0 : i32
    return %arg0, %c0_i32, %c0_i32_0 : i32, i32, i32
  }
  func.func @transform_1(%arg0: i32) -> (i32, i32, i32) {
    %c0_i32 = arith.constant 0 : i32
    %c0_i32_0 = arith.constant 0 : i32
    %c0_i32_1 = arith.constant 0 : i32
    %c0_i32_2 = arith.constant 0 : i32
    return %c0_i32, %c0_i32_0, %c0_i32_1 : i32, i32, i32
  }
  func.func @transform_2(%arg0: i32) -> (i32, i32) {
    %c0_i32 = arith.constant 0 : i32
    %c0_i32_0 = arith.constant 0 : i32
    %c0_i32_1 = arith.constant 0 : i32
    return %c0_i32, %c0_i32_0 : i32, i32
  }
  func.func @transform_3(%arg0: i32) -> (i32, i32) {
    %c0_i32 = arith.constant 0 : i32
    %c0_i32_0 = arith.constant 0 : i32
    %c0_i32_1 = arith.constant 0 : i32
    return %c0_i32, %c0_i32_0 : i32, i32
  }
  func.func @transform_4(%arg0: i32) -> (i32, i32) {
    %c0_i32 = arith.constant 0 : i32
    %c0_i32_0 = arith.constant 0 : i32
    %c0_i32_1 = arith.constant 0 : i32
    return %c0_i32, %c0_i32_0 : i32, i32
  }
  func.func @transform_5(%arg0: i32) -> (i32, i32) {
    %c0_i32 = arith.constant 0 : i32
    %c0_i32_0 = arith.constant 0 : i32
    %c0_i32_1 = arith.constant 0 : i32
    return %c0_i32, %c0_i32_0 : i32, i32
  }
  func.func @transform_6(%arg0: i32) -> (i32, i32) {
    %c0_i32 = arith.constant 0 : i32
    %c0_i32_0 = arith.constant 0 : i32
    %c0_i32_1 = arith.constant 0 : i32
    return %c0_i32, %c0_i32_0 : i32, i32
  }
  func.func @transform_7(%arg0: i32) -> (i32, i32) {
    %c0_i32 = arith.constant 0 : i32
    %c0_i32_0 = arith.constant 0 : i32
    %c0_i32_1 = arith.constant 0 : i32
    return %c0_i32, %c0_i32_0 : i32, i32
  }
  func.func @transform_8(%arg0: i32) -> (i32, i32) {
    %c0_i32 = arith.constant 0 : i32
    %c0_i32_0 = arith.constant 0 : i32
    %c0_i32_1 = arith.constant 0 : i32
    return %c0_i32, %c0_i32_0 : i32, i32
  }
  func.func @transform_9(%arg0: i32) -> (i32, i32, i32) {
    %c0_i32 = arith.constant 0 : i32
    %c0_i32_0 = arith.constant 0 : i32
    %c0_i32_1 = arith.constant 0 : i32
    return %arg0, %c0_i32, %c0_i32_0 : i32, i32, i32
  }
}

module attributes {stable_mosaic.version = 11 : i64} {
  func.func @_conv_stage_kernel(%arg0: i32, %arg1: memref<1x14x224xbf16, #tpu.memory_space<vmem>>, %arg2: memref<25x160x160xbf16, #tpu.memory_space<vmem>>, %arg3: memref<5x10xf32, #tpu.memory_space<vmem>>, %arg4: memref<5x10xf32, #tpu.memory_space<vmem>>, %arg5: memref<160x80xf32, #tpu.memory_space<vmem>>, %arg6: memref<160x80xf32, #tpu.memory_space<vmem>>, %arg7: memref<1x160xf32, #tpu.memory_space<vmem>>, %arg8: memref<1x80xf32, #tpu.memory_space<vmem>>, %arg9: memref<1x80xf32, #tpu.memory_space<vmem>>, %arg10: memref<1x5x80xbf16, #tpu.memory_space<vmem>>) attributes {dimension_semantics = [#tpu.dimension_semantics<parallel>], iteration_bounds = array<i64: 12>, scalar_prefetch = 0 : i64, scratch_operands = 0 : i64, tpu.core_type = #tpu.core_type<tc>, window_params = [{transform_indices = @transform_0, window_bounds = array<i64: 1, 14, 224>}, {pipeline_mode = #tpu.pipeline_mode<synchronous>, transform_indices = @transform_1, window_bounds = array<i64: 25, 160, 160>}, {pipeline_mode = #tpu.pipeline_mode<synchronous>, transform_indices = @transform_2, window_bounds = array<i64: 5, 10>}, {pipeline_mode = #tpu.pipeline_mode<synchronous>, transform_indices = @transform_3, window_bounds = array<i64: 5, 10>}, {pipeline_mode = #tpu.pipeline_mode<synchronous>, transform_indices = @transform_4, window_bounds = array<i64: 160, 80>}, {pipeline_mode = #tpu.pipeline_mode<synchronous>, transform_indices = @transform_5, window_bounds = array<i64: 160, 80>}, {pipeline_mode = #tpu.pipeline_mode<synchronous>, transform_indices = @transform_6, window_bounds = array<i64: 1, 160>}, {pipeline_mode = #tpu.pipeline_mode<synchronous>, transform_indices = @transform_7, window_bounds = array<i64: 1, 80>}, {pipeline_mode = #tpu.pipeline_mode<synchronous>, transform_indices = @transform_8, window_bounds = array<i64: 1, 80>}, {transform_indices = @transform_9, window_bounds = array<i64: 1, 5, 80>}]} {
    %c0 = arith.constant 0 : index
    %c0_0 = arith.constant 0 : index
    %c0_1 = arith.constant 0 : index
    %0 = vector.load %arg1[%c0, %c0_0, %c0_1] : memref<1x14x224xbf16, #tpu.memory_space<vmem>>, vector<1x14x224xbf16>
    %1 = vector.shape_cast %0 : vector<1x14x224xbf16> to vector<14x224xbf16>
    %2 = arith.extf %1 : vector<14x224xbf16> to vector<14x224xf32>
    %cst = arith.constant 0.000000e+00 : f32
    %3 = vector.broadcast %cst : f32 to vector<10x160xf32>
    %4 = vector.extract_strided_slice %2 {offsets = [0, 0], sizes = [10, 160], strides = [1, 1]} : vector<14x224xf32> to vector<10x160xf32>
    %5 = arith.truncf %4 : vector<10x160xf32> to vector<10x160xbf16>
    %c0_2 = arith.constant 0 : index
    %c0_3 = arith.constant 0 : index
    %c0_4 = arith.constant 0 : index
    %6 = vector.load %arg2[%c0_2, %c0_3, %c0_4] : memref<25x160x160xbf16, #tpu.memory_space<vmem>>, vector<1x160x160xbf16>
    %7 = vector.shape_cast %6 : vector<1x160x160xbf16> to vector<160x160xbf16>
    %cst_5 = arith.constant dense<0.000000e+00> : vector<10x160xf32>
    %8 = tpu.matmul %5, %7, %cst_5 {dimension_numbers = #tpu.dot_dimension_numbers<[1], [0], [0], [1], [0, 0, 1, 1], [], []>} : vector<10x160xbf16>, vector<160x160xbf16>, vector<10x160xf32> -> vector<10x160xf32>
    %9 = arith.addf %3, %8 : vector<10x160xf32>
    %10 = vector.extract_strided_slice %2 {offsets = [0, 16], sizes = [10, 160], strides = [1, 1]} : vector<14x224xf32> to vector<10x160xf32>
    %11 = arith.truncf %10 : vector<10x160xf32> to vector<10x160xbf16>
    %c1 = arith.constant 1 : index
    %c0_6 = arith.constant 0 : index
    %c0_7 = arith.constant 0 : index
    %12 = vector.load %arg2[%c1, %c0_6, %c0_7] : memref<25x160x160xbf16, #tpu.memory_space<vmem>>, vector<1x160x160xbf16>
    %13 = vector.shape_cast %12 : vector<1x160x160xbf16> to vector<160x160xbf16>
    %cst_8 = arith.constant dense<0.000000e+00> : vector<10x160xf32>
    %14 = tpu.matmul %11, %13, %cst_8 {dimension_numbers = #tpu.dot_dimension_numbers<[1], [0], [0], [1], [0, 0, 1, 1], [], []>} : vector<10x160xbf16>, vector<160x160xbf16>, vector<10x160xf32> -> vector<10x160xf32>
    %15 = arith.addf %9, %14 : vector<10x160xf32>
    %16 = vector.extract_strided_slice %2 {offsets = [0, 32], sizes = [10, 160], strides = [1, 1]} : vector<14x224xf32> to vector<10x160xf32>
    %17 = arith.truncf %16 : vector<10x160xf32> to vector<10x160xbf16>
    %c2 = arith.constant 2 : index
    %c0_9 = arith.constant 0 : index
    %c0_10 = arith.constant 0 : index
    %18 = vector.load %arg2[%c2, %c0_9, %c0_10] : memref<25x160x160xbf16, #tpu.memory_space<vmem>>, vector<1x160x160xbf16>
    %19 = vector.shape_cast %18 : vector<1x160x160xbf16> to vector<160x160xbf16>
    %cst_11 = arith.constant dense<0.000000e+00> : vector<10x160xf32>
    %20 = tpu.matmul %17, %19, %cst_11 {dimension_numbers = #tpu.dot_dimension_numbers<[1], [0], [0], [1], [0, 0, 1, 1], [], []>} : vector<10x160xbf16>, vector<160x160xbf16>, vector<10x160xf32> -> vector<10x160xf32>
    %21 = arith.addf %15, %20 : vector<10x160xf32>
    %22 = vector.extract_strided_slice %2 {offsets = [0, 48], sizes = [10, 160], strides = [1, 1]} : vector<14x224xf32> to vector<10x160xf32>
    %23 = arith.truncf %22 : vector<10x160xf32> to vector<10x160xbf16>
    %c3 = arith.constant 3 : index
    %c0_12 = arith.constant 0 : index
    %c0_13 = arith.constant 0 : index
    %24 = vector.load %arg2[%c3, %c0_12, %c0_13] : memref<25x160x160xbf16, #tpu.memory_space<vmem>>, vector<1x160x160xbf16>
    %25 = vector.shape_cast %24 : vector<1x160x160xbf16> to vector<160x160xbf16>
    %cst_14 = arith.constant dense<0.000000e+00> : vector<10x160xf32>
    %26 = tpu.matmul %23, %25, %cst_14 {dimension_numbers = #tpu.dot_dimension_numbers<[1], [0], [0], [1], [0, 0, 1, 1], [], []>} : vector<10x160xbf16>, vector<160x160xbf16>, vector<10x160xf32> -> vector<10x160xf32>
    %27 = arith.addf %21, %26 : vector<10x160xf32>
    %28 = vector.extract_strided_slice %2 {offsets = [0, 64], sizes = [10, 160], strides = [1, 1]} : vector<14x224xf32> to vector<10x160xf32>
    %29 = arith.truncf %28 : vector<10x160xf32> to vector<10x160xbf16>
    %c4 = arith.constant 4 : index
    %c0_15 = arith.constant 0 : index
    %c0_16 = arith.constant 0 : index
    %30 = vector.load %arg2[%c4, %c0_15, %c0_16] : memref<25x160x160xbf16, #tpu.memory_space<vmem>>, vector<1x160x160xbf16>
    %31 = vector.shape_cast %30 : vector<1x160x160xbf16> to vector<160x160xbf16>
    %cst_17 = arith.constant dense<0.000000e+00> : vector<10x160xf32>
    %32 = tpu.matmul %29, %31, %cst_17 {dimension_numbers = #tpu.dot_dimension_numbers<[1], [0], [0], [1], [0, 0, 1, 1], [], []>} : vector<10x160xbf16>, vector<160x160xbf16>, vector<10x160xf32> -> vector<10x160xf32>
    %33 = arith.addf %27, %32 : vector<10x160xf32>
    %34 = vector.extract_strided_slice %2 {offsets = [1, 0], sizes = [10, 160], strides = [1, 1]} : vector<14x224xf32> to vector<10x160xf32>
    %35 = arith.truncf %34 : vector<10x160xf32> to vector<10x160xbf16>
    %c5 = arith.constant 5 : index
    %c0_18 = arith.constant 0 : index
    %c0_19 = arith.constant 0 : index
    %36 = vector.load %arg2[%c5, %c0_18, %c0_19] : memref<25x160x160xbf16, #tpu.memory_space<vmem>>, vector<1x160x160xbf16>
    %37 = vector.shape_cast %36 : vector<1x160x160xbf16> to vector<160x160xbf16>
    %cst_20 = arith.constant dense<0.000000e+00> : vector<10x160xf32>
    %38 = tpu.matmul %35, %37, %cst_20 {dimension_numbers = #tpu.dot_dimension_numbers<[1], [0], [0], [1], [0, 0, 1, 1], [], []>} : vector<10x160xbf16>, vector<160x160xbf16>, vector<10x160xf32> -> vector<10x160xf32>
    %39 = arith.addf %33, %38 : vector<10x160xf32>
    %40 = vector.extract_strided_slice %2 {offsets = [1, 16], sizes = [10, 160], strides = [1, 1]} : vector<14x224xf32> to vector<10x160xf32>
    %41 = arith.truncf %40 : vector<10x160xf32> to vector<10x160xbf16>
    %c6 = arith.constant 6 : index
    %c0_21 = arith.constant 0 : index
    %c0_22 = arith.constant 0 : index
    %42 = vector.load %arg2[%c6, %c0_21, %c0_22] : memref<25x160x160xbf16, #tpu.memory_space<vmem>>, vector<1x160x160xbf16>
    %43 = vector.shape_cast %42 : vector<1x160x160xbf16> to vector<160x160xbf16>
    %cst_23 = arith.constant dense<0.000000e+00> : vector<10x160xf32>
    %44 = tpu.matmul %41, %43, %cst_23 {dimension_numbers = #tpu.dot_dimension_numbers<[1], [0], [0], [1], [0, 0, 1, 1], [], []>} : vector<10x160xbf16>, vector<160x160xbf16>, vector<10x160xf32> -> vector<10x160xf32>
    %45 = arith.addf %39, %44 : vector<10x160xf32>
    %46 = vector.extract_strided_slice %2 {offsets = [1, 32], sizes = [10, 160], strides = [1, 1]} : vector<14x224xf32> to vector<10x160xf32>
    %47 = arith.truncf %46 : vector<10x160xf32> to vector<10x160xbf16>
    %c7 = arith.constant 7 : index
    %c0_24 = arith.constant 0 : index
    %c0_25 = arith.constant 0 : index
    %48 = vector.load %arg2[%c7, %c0_24, %c0_25] : memref<25x160x160xbf16, #tpu.memory_space<vmem>>, vector<1x160x160xbf16>
    %49 = vector.shape_cast %48 : vector<1x160x160xbf16> to vector<160x160xbf16>
    %cst_26 = arith.constant dense<0.000000e+00> : vector<10x160xf32>
    %50 = tpu.matmul %47, %49, %cst_26 {dimension_numbers = #tpu.dot_dimension_numbers<[1], [0], [0], [1], [0, 0, 1, 1], [], []>} : vector<10x160xbf16>, vector<160x160xbf16>, vector<10x160xf32> -> vector<10x160xf32>
    %51 = arith.addf %45, %50 : vector<10x160xf32>
    %52 = vector.extract_strided_slice %2 {offsets = [1, 48], sizes = [10, 160], strides = [1, 1]} : vector<14x224xf32> to vector<10x160xf32>
    %53 = arith.truncf %52 : vector<10x160xf32> to vector<10x160xbf16>
    %c8 = arith.constant 8 : index
    %c0_27 = arith.constant 0 : index
    %c0_28 = arith.constant 0 : index
    %54 = vector.load %arg2[%c8, %c0_27, %c0_28] : memref<25x160x160xbf16, #tpu.memory_space<vmem>>, vector<1x160x160xbf16>
    %55 = vector.shape_cast %54 : vector<1x160x160xbf16> to vector<160x160xbf16>
    %cst_29 = arith.constant dense<0.000000e+00> : vector<10x160xf32>
    %56 = tpu.matmul %53, %55, %cst_29 {dimension_numbers = #tpu.dot_dimension_numbers<[1], [0], [0], [1], [0, 0, 1, 1], [], []>} : vector<10x160xbf16>, vector<160x160xbf16>, vector<10x160xf32> -> vector<10x160xf32>
    %57 = arith.addf %51, %56 : vector<10x160xf32>
    %58 = vector.extract_strided_slice %2 {offsets = [1, 64], sizes = [10, 160], strides = [1, 1]} : vector<14x224xf32> to vector<10x160xf32>
    %59 = arith.truncf %58 : vector<10x160xf32> to vector<10x160xbf16>
    %c9 = arith.constant 9 : index
    %c0_30 = arith.constant 0 : index
    %c0_31 = arith.constant 0 : index
    %60 = vector.load %arg2[%c9, %c0_30, %c0_31] : memref<25x160x160xbf16, #tpu.memory_space<vmem>>, vector<1x160x160xbf16>
    %61 = vector.shape_cast %60 : vector<1x160x160xbf16> to vector<160x160xbf16>
    %cst_32 = arith.constant dense<0.000000e+00> : vector<10x160xf32>
    %62 = tpu.matmul %59, %61, %cst_32 {dimension_numbers = #tpu.dot_dimension_numbers<[1], [0], [0], [1], [0, 0, 1, 1], [], []>} : vector<10x160xbf16>, vector<160x160xbf16>, vector<10x160xf32> -> vector<10x160xf32>
    %63 = arith.addf %57, %62 : vector<10x160xf32>
    %64 = vector.extract_strided_slice %2 {offsets = [2, 0], sizes = [10, 160], strides = [1, 1]} : vector<14x224xf32> to vector<10x160xf32>
    %65 = arith.truncf %64 : vector<10x160xf32> to vector<10x160xbf16>
    %c10 = arith.constant 10 : index
    %c0_33 = arith.constant 0 : index
    %c0_34 = arith.constant 0 : index
    %66 = vector.load %arg2[%c10, %c0_33, %c0_34] : memref<25x160x160xbf16, #tpu.memory_space<vmem>>, vector<1x160x160xbf16>
    %67 = vector.shape_cast %66 : vector<1x160x160xbf16> to vector<160x160xbf16>
    %cst_35 = arith.constant dense<0.000000e+00> : vector<10x160xf32>
    %68 = tpu.matmul %65, %67, %cst_35 {dimension_numbers = #tpu.dot_dimension_numbers<[1], [0], [0], [1], [0, 0, 1, 1], [], []>} : vector<10x160xbf16>, vector<160x160xbf16>, vector<10x160xf32> -> vector<10x160xf32>
    %69 = arith.addf %63, %68 : vector<10x160xf32>
    %70 = vector.extract_strided_slice %2 {offsets = [2, 16], sizes = [10, 160], strides = [1, 1]} : vector<14x224xf32> to vector<10x160xf32>
    %71 = arith.truncf %70 : vector<10x160xf32> to vector<10x160xbf16>
    %c11 = arith.constant 11 : index
    %c0_36 = arith.constant 0 : index
    %c0_37 = arith.constant 0 : index
    %72 = vector.load %arg2[%c11, %c0_36, %c0_37] : memref<25x160x160xbf16, #tpu.memory_space<vmem>>, vector<1x160x160xbf16>
    %73 = vector.shape_cast %72 : vector<1x160x160xbf16> to vector<160x160xbf16>
    %cst_38 = arith.constant dense<0.000000e+00> : vector<10x160xf32>
    %74 = tpu.matmul %71, %73, %cst_38 {dimension_numbers = #tpu.dot_dimension_numbers<[1], [0], [0], [1], [0, 0, 1, 1], [], []>} : vector<10x160xbf16>, vector<160x160xbf16>, vector<10x160xf32> -> vector<10x160xf32>
    %75 = arith.addf %69, %74 : vector<10x160xf32>
    %76 = vector.extract_strided_slice %2 {offsets = [2, 32], sizes = [10, 160], strides = [1, 1]} : vector<14x224xf32> to vector<10x160xf32>
    %77 = arith.truncf %76 : vector<10x160xf32> to vector<10x160xbf16>
    %c12 = arith.constant 12 : index
    %c0_39 = arith.constant 0 : index
    %c0_40 = arith.constant 0 : index
    %78 = vector.load %arg2[%c12, %c0_39, %c0_40] : memref<25x160x160xbf16, #tpu.memory_space<vmem>>, vector<1x160x160xbf16>
    %79 = vector.shape_cast %78 : vector<1x160x160xbf16> to vector<160x160xbf16>
    %cst_41 = arith.constant dense<0.000000e+00> : vector<10x160xf32>
    %80 = tpu.matmul %77, %79, %cst_41 {dimension_numbers = #tpu.dot_dimension_numbers<[1], [0], [0], [1], [0, 0, 1, 1], [], []>} : vector<10x160xbf16>, vector<160x160xbf16>, vector<10x160xf32> -> vector<10x160xf32>
    %81 = arith.addf %75, %80 : vector<10x160xf32>
    %82 = vector.extract_strided_slice %2 {offsets = [2, 48], sizes = [10, 160], strides = [1, 1]} : vector<14x224xf32> to vector<10x160xf32>
    %83 = arith.truncf %82 : vector<10x160xf32> to vector<10x160xbf16>
    %c13 = arith.constant 13 : index
    %c0_42 = arith.constant 0 : index
    %c0_43 = arith.constant 0 : index
    %84 = vector.load %arg2[%c13, %c0_42, %c0_43] : memref<25x160x160xbf16, #tpu.memory_space<vmem>>, vector<1x160x160xbf16>
    %85 = vector.shape_cast %84 : vector<1x160x160xbf16> to vector<160x160xbf16>
    %cst_44 = arith.constant dense<0.000000e+00> : vector<10x160xf32>
    %86 = tpu.matmul %83, %85, %cst_44 {dimension_numbers = #tpu.dot_dimension_numbers<[1], [0], [0], [1], [0, 0, 1, 1], [], []>} : vector<10x160xbf16>, vector<160x160xbf16>, vector<10x160xf32> -> vector<10x160xf32>
    %87 = arith.addf %81, %86 : vector<10x160xf32>
    %88 = vector.extract_strided_slice %2 {offsets = [2, 64], sizes = [10, 160], strides = [1, 1]} : vector<14x224xf32> to vector<10x160xf32>
    %89 = arith.truncf %88 : vector<10x160xf32> to vector<10x160xbf16>
    %c14 = arith.constant 14 : index
    %c0_45 = arith.constant 0 : index
    %c0_46 = arith.constant 0 : index
    %90 = vector.load %arg2[%c14, %c0_45, %c0_46] : memref<25x160x160xbf16, #tpu.memory_space<vmem>>, vector<1x160x160xbf16>
    %91 = vector.shape_cast %90 : vector<1x160x160xbf16> to vector<160x160xbf16>
    %cst_47 = arith.constant dense<0.000000e+00> : vector<10x160xf32>
    %92 = tpu.matmul %89, %91, %cst_47 {dimension_numbers = #tpu.dot_dimension_numbers<[1], [0], [0], [1], [0, 0, 1, 1], [], []>} : vector<10x160xbf16>, vector<160x160xbf16>, vector<10x160xf32> -> vector<10x160xf32>
    %93 = arith.addf %87, %92 : vector<10x160xf32>
    %94 = vector.extract_strided_slice %2 {offsets = [3, 0], sizes = [10, 160], strides = [1, 1]} : vector<14x224xf32> to vector<10x160xf32>
    %95 = arith.truncf %94 : vector<10x160xf32> to vector<10x160xbf16>
    %c15 = arith.constant 15 : index
    %c0_48 = arith.constant 0 : index
    %c0_49 = arith.constant 0 : index
    %96 = vector.load %arg2[%c15, %c0_48, %c0_49] : memref<25x160x160xbf16, #tpu.memory_space<vmem>>, vector<1x160x160xbf16>
    %97 = vector.shape_cast %96 : vector<1x160x160xbf16> to vector<160x160xbf16>
    %cst_50 = arith.constant dense<0.000000e+00> : vector<10x160xf32>
    %98 = tpu.matmul %95, %97, %cst_50 {dimension_numbers = #tpu.dot_dimension_numbers<[1], [0], [0], [1], [0, 0, 1, 1], [], []>} : vector<10x160xbf16>, vector<160x160xbf16>, vector<10x160xf32> -> vector<10x160xf32>
    %99 = arith.addf %93, %98 : vector<10x160xf32>
    %100 = vector.extract_strided_slice %2 {offsets = [3, 16], sizes = [10, 160], strides = [1, 1]} : vector<14x224xf32> to vector<10x160xf32>
    %101 = arith.truncf %100 : vector<10x160xf32> to vector<10x160xbf16>
    %c16 = arith.constant 16 : index
    %c0_51 = arith.constant 0 : index
    %c0_52 = arith.constant 0 : index
    %102 = vector.load %arg2[%c16, %c0_51, %c0_52] : memref<25x160x160xbf16, #tpu.memory_space<vmem>>, vector<1x160x160xbf16>
    %103 = vector.shape_cast %102 : vector<1x160x160xbf16> to vector<160x160xbf16>
    %cst_53 = arith.constant dense<0.000000e+00> : vector<10x160xf32>
    %104 = tpu.matmul %101, %103, %cst_53 {dimension_numbers = #tpu.dot_dimension_numbers<[1], [0], [0], [1], [0, 0, 1, 1], [], []>} : vector<10x160xbf16>, vector<160x160xbf16>, vector<10x160xf32> -> vector<10x160xf32>
    %105 = arith.addf %99, %104 : vector<10x160xf32>
    %106 = vector.extract_strided_slice %2 {offsets = [3, 32], sizes = [10, 160], strides = [1, 1]} : vector<14x224xf32> to vector<10x160xf32>
    %107 = arith.truncf %106 : vector<10x160xf32> to vector<10x160xbf16>
    %c17 = arith.constant 17 : index
    %c0_54 = arith.constant 0 : index
    %c0_55 = arith.constant 0 : index
    %108 = vector.load %arg2[%c17, %c0_54, %c0_55] : memref<25x160x160xbf16, #tpu.memory_space<vmem>>, vector<1x160x160xbf16>
    %109 = vector.shape_cast %108 : vector<1x160x160xbf16> to vector<160x160xbf16>
    %cst_56 = arith.constant dense<0.000000e+00> : vector<10x160xf32>
    %110 = tpu.matmul %107, %109, %cst_56 {dimension_numbers = #tpu.dot_dimension_numbers<[1], [0], [0], [1], [0, 0, 1, 1], [], []>} : vector<10x160xbf16>, vector<160x160xbf16>, vector<10x160xf32> -> vector<10x160xf32>
    %111 = arith.addf %105, %110 : vector<10x160xf32>
    %112 = vector.extract_strided_slice %2 {offsets = [3, 48], sizes = [10, 160], strides = [1, 1]} : vector<14x224xf32> to vector<10x160xf32>
    %113 = arith.truncf %112 : vector<10x160xf32> to vector<10x160xbf16>
    %c18 = arith.constant 18 : index
    %c0_57 = arith.constant 0 : index
    %c0_58 = arith.constant 0 : index
    %114 = vector.load %arg2[%c18, %c0_57, %c0_58] : memref<25x160x160xbf16, #tpu.memory_space<vmem>>, vector<1x160x160xbf16>
    %115 = vector.shape_cast %114 : vector<1x160x160xbf16> to vector<160x160xbf16>
    %cst_59 = arith.constant dense<0.000000e+00> : vector<10x160xf32>
    %116 = tpu.matmul %113, %115, %cst_59 {dimension_numbers = #tpu.dot_dimension_numbers<[1], [0], [0], [1], [0, 0, 1, 1], [], []>} : vector<10x160xbf16>, vector<160x160xbf16>, vector<10x160xf32> -> vector<10x160xf32>
    %117 = arith.addf %111, %116 : vector<10x160xf32>
    %118 = vector.extract_strided_slice %2 {offsets = [3, 64], sizes = [10, 160], strides = [1, 1]} : vector<14x224xf32> to vector<10x160xf32>
    %119 = arith.truncf %118 : vector<10x160xf32> to vector<10x160xbf16>
    %c19 = arith.constant 19 : index
    %c0_60 = arith.constant 0 : index
    %c0_61 = arith.constant 0 : index
    %120 = vector.load %arg2[%c19, %c0_60, %c0_61] : memref<25x160x160xbf16, #tpu.memory_space<vmem>>, vector<1x160x160xbf16>
    %121 = vector.shape_cast %120 : vector<1x160x160xbf16> to vector<160x160xbf16>
    %cst_62 = arith.constant dense<0.000000e+00> : vector<10x160xf32>
    %122 = tpu.matmul %119, %121, %cst_62 {dimension_numbers = #tpu.dot_dimension_numbers<[1], [0], [0], [1], [0, 0, 1, 1], [], []>} : vector<10x160xbf16>, vector<160x160xbf16>, vector<10x160xf32> -> vector<10x160xf32>
    %123 = arith.addf %117, %122 : vector<10x160xf32>
    %124 = vector.extract_strided_slice %2 {offsets = [4, 0], sizes = [10, 160], strides = [1, 1]} : vector<14x224xf32> to vector<10x160xf32>
    %125 = arith.truncf %124 : vector<10x160xf32> to vector<10x160xbf16>
    %c20 = arith.constant 20 : index
    %c0_63 = arith.constant 0 : index
    %c0_64 = arith.constant 0 : index
    %126 = vector.load %arg2[%c20, %c0_63, %c0_64] : memref<25x160x160xbf16, #tpu.memory_space<vmem>>, vector<1x160x160xbf16>
    %127 = vector.shape_cast %126 : vector<1x160x160xbf16> to vector<160x160xbf16>
    %cst_65 = arith.constant dense<0.000000e+00> : vector<10x160xf32>
    %128 = tpu.matmul %125, %127, %cst_65 {dimension_numbers = #tpu.dot_dimension_numbers<[1], [0], [0], [1], [0, 0, 1, 1], [], []>} : vector<10x160xbf16>, vector<160x160xbf16>, vector<10x160xf32> -> vector<10x160xf32>
    %129 = arith.addf %123, %128 : vector<10x160xf32>
    %130 = vector.extract_strided_slice %2 {offsets = [4, 16], sizes = [10, 160], strides = [1, 1]} : vector<14x224xf32> to vector<10x160xf32>
    %131 = arith.truncf %130 : vector<10x160xf32> to vector<10x160xbf16>
    %c21 = arith.constant 21 : index
    %c0_66 = arith.constant 0 : index
    %c0_67 = arith.constant 0 : index
    %132 = vector.load %arg2[%c21, %c0_66, %c0_67] : memref<25x160x160xbf16, #tpu.memory_space<vmem>>, vector<1x160x160xbf16>
    %133 = vector.shape_cast %132 : vector<1x160x160xbf16> to vector<160x160xbf16>
    %cst_68 = arith.constant dense<0.000000e+00> : vector<10x160xf32>
    %134 = tpu.matmul %131, %133, %cst_68 {dimension_numbers = #tpu.dot_dimension_numbers<[1], [0], [0], [1], [0, 0, 1, 1], [], []>} : vector<10x160xbf16>, vector<160x160xbf16>, vector<10x160xf32> -> vector<10x160xf32>
    %135 = arith.addf %129, %134 : vector<10x160xf32>
    %136 = vector.extract_strided_slice %2 {offsets = [4, 32], sizes = [10, 160], strides = [1, 1]} : vector<14x224xf32> to vector<10x160xf32>
    %137 = arith.truncf %136 : vector<10x160xf32> to vector<10x160xbf16>
    %c22 = arith.constant 22 : index
    %c0_69 = arith.constant 0 : index
    %c0_70 = arith.constant 0 : index
    %138 = vector.load %arg2[%c22, %c0_69, %c0_70] : memref<25x160x160xbf16, #tpu.memory_space<vmem>>, vector<1x160x160xbf16>
    %139 = vector.shape_cast %138 : vector<1x160x160xbf16> to vector<160x160xbf16>
    %cst_71 = arith.constant dense<0.000000e+00> : vector<10x160xf32>
    %140 = tpu.matmul %137, %139, %cst_71 {dimension_numbers = #tpu.dot_dimension_numbers<[1], [0], [0], [1], [0, 0, 1, 1], [], []>} : vector<10x160xbf16>, vector<160x160xbf16>, vector<10x160xf32> -> vector<10x160xf32>
    %141 = arith.addf %135, %140 : vector<10x160xf32>
    %142 = vector.extract_strided_slice %2 {offsets = [4, 48], sizes = [10, 160], strides = [1, 1]} : vector<14x224xf32> to vector<10x160xf32>
    %143 = arith.truncf %142 : vector<10x160xf32> to vector<10x160xbf16>
    %c23 = arith.constant 23 : index
    %c0_72 = arith.constant 0 : index
    %c0_73 = arith.constant 0 : index
    %144 = vector.load %arg2[%c23, %c0_72, %c0_73] : memref<25x160x160xbf16, #tpu.memory_space<vmem>>, vector<1x160x160xbf16>
    %145 = vector.shape_cast %144 : vector<1x160x160xbf16> to vector<160x160xbf16>
    %cst_74 = arith.constant dense<0.000000e+00> : vector<10x160xf32>
    %146 = tpu.matmul %143, %145, %cst_74 {dimension_numbers = #tpu.dot_dimension_numbers<[1], [0], [0], [1], [0, 0, 1, 1], [], []>} : vector<10x160xbf16>, vector<160x160xbf16>, vector<10x160xf32> -> vector<10x160xf32>
    %147 = arith.addf %141, %146 : vector<10x160xf32>
    %148 = vector.extract_strided_slice %2 {offsets = [4, 64], sizes = [10, 160], strides = [1, 1]} : vector<14x224xf32> to vector<10x160xf32>
    %149 = arith.truncf %148 : vector<10x160xf32> to vector<10x160xbf16>
    %c24 = arith.constant 24 : index
    %c0_75 = arith.constant 0 : index
    %c0_76 = arith.constant 0 : index
    %150 = vector.load %arg2[%c24, %c0_75, %c0_76] : memref<25x160x160xbf16, #tpu.memory_space<vmem>>, vector<1x160x160xbf16>
    %151 = vector.shape_cast %150 : vector<1x160x160xbf16> to vector<160x160xbf16>
    %cst_77 = arith.constant dense<0.000000e+00> : vector<10x160xf32>
    %152 = tpu.matmul %149, %151, %cst_77 {dimension_numbers = #tpu.dot_dimension_numbers<[1], [0], [0], [1], [0, 0, 1, 1], [], []>} : vector<10x160xbf16>, vector<160x160xbf16>, vector<10x160xf32> -> vector<10x160xf32>
    %153 = arith.addf %147, %152 : vector<10x160xf32>
    %c0_78 = arith.constant 0 : index
    %c0_79 = arith.constant 0 : index
    %154 = vector.load %arg7[%c0_78, %c0_79] : memref<1x160xf32, #tpu.memory_space<vmem>>, vector<1x160xf32>
    %155 = vector.broadcast %154 : vector<1x160xf32> to vector<10x160xf32>
    %156 = arith.addf %153, %155 : vector<10x160xf32>
    %cst_80 = arith.constant 0.000000e+00 : f32
    %157 = vector.broadcast %cst_80 : f32 to vector<10x160xf32>
    %158 = arith.maximumf %156, %157 : vector<10x160xf32>
    %c0_81 = arith.constant 0 : index
    %c0_82 = arith.constant 0 : index
    %159 = vector.load %arg3[%c0_81, %c0_82] : memref<5x10xf32, #tpu.memory_space<vmem>>, vector<5x10xf32>
    %cst_83 = arith.constant dense<0.000000e+00> : vector<5x160xf32>
    %160 = tpu.matmul %159, %158, %cst_83 {dimension_numbers = #tpu.dot_dimension_numbers<[1], [0], [0], [1], [0, 0, 1, 1], [], []>} : vector<5x10xf32>, vector<10x160xf32>, vector<5x160xf32> -> vector<5x160xf32>
    %c0_84 = arith.constant 0 : index
    %c0_85 = arith.constant 0 : index
    %161 = vector.load %arg4[%c0_84, %c0_85] : memref<5x10xf32, #tpu.memory_space<vmem>>, vector<5x10xf32>
    %cst_86 = arith.constant dense<0.000000e+00> : vector<5x160xf32>
    %162 = tpu.matmul %161, %158, %cst_86 {dimension_numbers = #tpu.dot_dimension_numbers<[1], [0], [0], [1], [0, 0, 1, 1], [], []>} : vector<5x10xf32>, vector<10x160xf32>, vector<5x160xf32> -> vector<5x160xf32>
    %163 = arith.maximumf %160, %162 : vector<5x160xf32>
    %c0_87 = arith.constant 0 : index
    %c0_88 = arith.constant 0 : index
    %164 = vector.load %arg5[%c0_87, %c0_88] : memref<160x80xf32, #tpu.memory_space<vmem>>, vector<160x80xf32>
    %cst_89 = arith.constant dense<0.000000e+00> : vector<5x80xf32>
    %165 = tpu.matmul %163, %164, %cst_89 {dimension_numbers = #tpu.dot_dimension_numbers<[1], [0], [0], [1], [0, 0, 1, 1], [], []>} : vector<5x160xf32>, vector<160x80xf32>, vector<5x80xf32> -> vector<5x80xf32>
    %c0_90 = arith.constant 0 : index
    %c0_91 = arith.constant 0 : index
    %166 = vector.load %arg6[%c0_90, %c0_91] : memref<160x80xf32, #tpu.memory_space<vmem>>, vector<160x80xf32>
    %cst_92 = arith.constant dense<0.000000e+00> : vector<5x80xf32>
    %167 = tpu.matmul %163, %166, %cst_92 {dimension_numbers = #tpu.dot_dimension_numbers<[1], [0], [0], [1], [0, 0, 1, 1], [], []>} : vector<5x160xf32>, vector<160x80xf32>, vector<5x80xf32> -> vector<5x80xf32>
    %168 = arith.maximumf %165, %167 : vector<5x80xf32>
    %c0_93 = arith.constant 0 : index
    %c0_94 = arith.constant 0 : index
    %169 = vector.load %arg8[%c0_93, %c0_94] : memref<1x80xf32, #tpu.memory_space<vmem>>, vector<1x80xf32>
    %170 = vector.broadcast %169 : vector<1x80xf32> to vector<5x80xf32>
    %171 = arith.mulf %168, %170 : vector<5x80xf32>
    %c0_95 = arith.constant 0 : index
    %c0_96 = arith.constant 0 : index
    %172 = vector.load %arg9[%c0_95, %c0_96] : memref<1x80xf32, #tpu.memory_space<vmem>>, vector<1x80xf32>
    %173 = vector.broadcast %172 : vector<1x80xf32> to vector<5x80xf32>
    %174 = arith.addf %171, %173 : vector<5x80xf32>
    %175 = arith.truncf %174 : vector<5x80xf32> to vector<5x80xbf16>
    %c0_97 = arith.constant 0 : index
    %c0_98 = arith.constant 0 : index
    %c0_99 = arith.constant 0 : index
    %176 = vector.load %arg10[%c0_97, %c0_98, %c0_99] : memref<1x5x80xbf16, #tpu.memory_space<vmem>>, vector<1x5x80xbf16>
    %177 = vector.shape_cast %176 : vector<1x5x80xbf16> to vector<5x80xbf16>
    %178 = vector.shape_cast %175 : vector<5x80xbf16> to vector<1x5x80xbf16>
    tpu.vector_store %arg10[%c0_97, %c0_98, %c0_99], %178 {strides = array<i32>} : memref<1x5x80xbf16, #tpu.memory_space<vmem>>, vector<1x5x80xbf16>,
    return
  }
  func.func @transform_0(%arg0: i32) -> (i32, i32, i32) {
    %c0_i32 = arith.constant 0 : i32
    %c0_i32_0 = arith.constant 0 : i32
    %c0_i32_1 = arith.constant 0 : i32
    return %arg0, %c0_i32, %c0_i32_0 : i32, i32, i32
  }
  func.func @transform_1(%arg0: i32) -> (i32, i32, i32) {
    %c0_i32 = arith.constant 0 : i32
    %c0_i32_0 = arith.constant 0 : i32
    %c0_i32_1 = arith.constant 0 : i32
    %c0_i32_2 = arith.constant 0 : i32
    return %c0_i32, %c0_i32_0, %c0_i32_1 : i32, i32, i32
  }
  func.func @transform_2(%arg0: i32) -> (i32, i32) {
    %c0_i32 = arith.constant 0 : i32
    %c0_i32_0 = arith.constant 0 : i32
    %c0_i32_1 = arith.constant 0 : i32
    return %c0_i32, %c0_i32_0 : i32, i32
  }
  func.func @transform_3(%arg0: i32) -> (i32, i32) {
    %c0_i32 = arith.constant 0 : i32
    %c0_i32_0 = arith.constant 0 : i32
    %c0_i32_1 = arith.constant 0 : i32
    return %c0_i32, %c0_i32_0 : i32, i32
  }
  func.func @transform_4(%arg0: i32) -> (i32, i32) {
    %c0_i32 = arith.constant 0 : i32
    %c0_i32_0 = arith.constant 0 : i32
    %c0_i32_1 = arith.constant 0 : i32
    return %c0_i32, %c0_i32_0 : i32, i32
  }
  func.func @transform_5(%arg0: i32) -> (i32, i32) {
    %c0_i32 = arith.constant 0 : i32
    %c0_i32_0 = arith.constant 0 : i32
    %c0_i32_1 = arith.constant 0 : i32
    return %c0_i32, %c0_i32_0 : i32, i32
  }
  func.func @transform_6(%arg0: i32) -> (i32, i32) {
    %c0_i32 = arith.constant 0 : i32
    %c0_i32_0 = arith.constant 0 : i32
    %c0_i32_1 = arith.constant 0 : i32
    return %c0_i32, %c0_i32_0 : i32, i32
  }
  func.func @transform_7(%arg0: i32) -> (i32, i32) {
    %c0_i32 = arith.constant 0 : i32
    %c0_i32_0 = arith.constant 0 : i32
    %c0_i32_1 = arith.constant 0 : i32
    return %c0_i32, %c0_i32_0 : i32, i32
  }
  func.func @transform_8(%arg0: i32) -> (i32, i32) {
    %c0_i32 = arith.constant 0 : i32
    %c0_i32_0 = arith.constant 0 : i32
    %c0_i32_1 = arith.constant 0 : i32
    return %c0_i32, %c0_i32_0 : i32, i32
  }
  func.func @transform_9(%arg0: i32) -> (i32, i32, i32) {
    %c0_i32 = arith.constant 0 : i32
    %c0_i32_0 = arith.constant 0 : i32
    %c0_i32_1 = arith.constant 0 : i32
    return %arg0, %c0_i32, %c0_i32_0 : i32, i32, i32
  }
}

module attributes {stable_mosaic.version = 11 : i64} {
  func.func @_fc1_group_mean_kernel(%arg0: i32, %arg1: memref<12x400xbf16, #tpu.memory_space<vmem>>, %arg2: memref<400x64xbf16, #tpu.memory_space<vmem>>, %arg3: memref<1x64xf32, #tpu.memory_space<vmem>>, %arg4: memref<1x64xf32, #tpu.memory_space<vmem>>, %arg5: memref<1x64xf32, #tpu.memory_space<vmem>>, %arg6: memref<4x12xf32, #tpu.memory_space<vmem>>, %arg7: memref<4x64xf32, #tpu.memory_space<vmem>>) attributes {dimension_semantics = [#tpu.dimension_semantics<arbitrary>], iteration_bounds = array<i64: 1>, scalar_prefetch = 0 : i64, scratch_operands = 0 : i64, tpu.core_type = #tpu.core_type<tc>, window_params = [{pipeline_mode = #tpu.pipeline_mode<synchronous>, transform_indices = @transform_0, window_bounds = array<i64: 12, 400>}, {pipeline_mode = #tpu.pipeline_mode<synchronous>, transform_indices = @transform_1, window_bounds = array<i64: 400, 64>}, {pipeline_mode = #tpu.pipeline_mode<synchronous>, transform_indices = @transform_2, window_bounds = array<i64: 1, 64>}, {pipeline_mode = #tpu.pipeline_mode<synchronous>, transform_indices = @transform_3, window_bounds = array<i64: 1, 64>}, {pipeline_mode = #tpu.pipeline_mode<synchronous>, transform_indices = @transform_4, window_bounds = array<i64: 1, 64>}, {pipeline_mode = #tpu.pipeline_mode<synchronous>, transform_indices = @transform_5, window_bounds = array<i64: 4, 12>}, {pipeline_mode = #tpu.pipeline_mode<synchronous>, transform_indices = @transform_6, window_bounds = array<i64: 4, 64>}]} {
    %c0 = arith.constant 0 : index
    %c0_0 = arith.constant 0 : index
    %0 = vector.load %arg1[%c0, %c0_0] : memref<12x400xbf16, #tpu.memory_space<vmem>>, vector<12x400xbf16>
    %c0_1 = arith.constant 0 : index
    %c0_2 = arith.constant 0 : index
    %1 = vector.load %arg2[%c0_1, %c0_2] : memref<400x64xbf16, #tpu.memory_space<vmem>>, vector<400x64xbf16>
    %cst = arith.constant dense<0.000000e+00> : vector<12x64xf32>
    %2 = tpu.matmul %0, %1, %cst {dimension_numbers = #tpu.dot_dimension_numbers<[1], [0], [0], [1], [0, 0, 1, 1], [], []>} : vector<12x400xbf16>, vector<400x64xbf16>, vector<12x64xf32> -> vector<12x64xf32>
    %c0_3 = arith.constant 0 : index
    %c0_4 = arith.constant 0 : index
    %3 = vector.load %arg3[%c0_3, %c0_4] : memref<1x64xf32, #tpu.memory_space<vmem>>, vector<1x64xf32>
    %4 = vector.broadcast %3 : vector<1x64xf32> to vector<12x64xf32>
    %5 = arith.addf %2, %4 : vector<12x64xf32>
    %cst_5 = arith.constant 0.000000e+00 : f32
    %6 = vector.broadcast %cst_5 : f32 to vector<12x64xf32>
    %7 = arith.maximumf %5, %6 : vector<12x64xf32>
    %c0_6 = arith.constant 0 : index
    %c0_7 = arith.constant 0 : index
    %8 = vector.load %arg4[%c0_6, %c0_7] : memref<1x64xf32, #tpu.memory_space<vmem>>, vector<1x64xf32>
    %9 = vector.broadcast %8 : vector<1x64xf32> to vector<12x64xf32>
    %10 = arith.mulf %7, %9 : vector<12x64xf32>
    %c0_8 = arith.constant 0 : index
    %c0_9 = arith.constant 0 : index
    %11 = vector.load %arg5[%c0_8, %c0_9] : memref<1x64xf32, #tpu.memory_space<vmem>>, vector<1x64xf32>
    %12 = vector.broadcast %11 : vector<1x64xf32> to vector<12x64xf32>
    %13 = arith.addf %10, %12 : vector<12x64xf32>
    %c0_10 = arith.constant 0 : index
    %c0_11 = arith.constant 0 : index
    %14 = vector.load %arg6[%c0_10, %c0_11] : memref<4x12xf32, #tpu.memory_space<vmem>>, vector<4x12xf32>
    %cst_12 = arith.constant dense<0.000000e+00> : vector<4x64xf32>
    %15 = tpu.matmul %14, %13, %cst_12 {dimension_numbers = #tpu.dot_dimension_numbers<[1], [0], [0], [1], [0, 0, 1, 1], [], []>} : vector<4x12xf32>, vector<12x64xf32>, vector<4x64xf32> -> vector<4x64xf32>
    %c0_13 = arith.constant 0 : index
    %c0_14 = arith.constant 0 : index
    %16 = vector.load %arg7[%c0_13, %c0_14] : memref<4x64xf32, #tpu.memory_space<vmem>>, vector<4x64xf32>
    tpu.vector_store %arg7[%c0_13, %c0_14], %15 {strides = array<i32>} : memref<4x64xf32, #tpu.memory_space<vmem>>, vector<4x64xf32>,
    return
  }
  func.func @transform_0(%arg0: i32) -> (i32, i32) {
    %c0_i32 = arith.constant 0 : i32
    %c0_i32_0 = arith.constant 0 : i32
    %c0_i32_1 = arith.constant 0 : i32
    return %c0_i32, %c0_i32_0 : i32, i32
  }
  func.func @transform_1(%arg0: i32) -> (i32, i32) {
    %c0_i32 = arith.constant 0 : i32
    %c0_i32_0 = arith.constant 0 : i32
    %c0_i32_1 = arith.constant 0 : i32
    return %c0_i32, %c0_i32_0 : i32, i32
  }
  func.func @transform_2(%arg0: i32) -> (i32, i32) {
    %c0_i32 = arith.constant 0 : i32
    %c0_i32_0 = arith.constant 0 : i32
    %c0_i32_1 = arith.constant 0 : i32
    return %c0_i32, %c0_i32_0 : i32, i32
  }
  func.func @transform_3(%arg0: i32) -> (i32, i32) {
    %c0_i32 = arith.constant 0 : i32
    %c0_i32_0 = arith.constant 0 : i32
    %c0_i32_1 = arith.constant 0 : i32
    return %c0_i32, %c0_i32_0 : i32, i32
  }
  func.func @transform_4(%arg0: i32) -> (i32, i32) {
    %c0_i32 = arith.constant 0 : i32
    %c0_i32_0 = arith.constant 0 : i32
    %c0_i32_1 = arith.constant 0 : i32
    return %c0_i32, %c0_i32_0 : i32, i32
  }
  func.func @transform_5(%arg0: i32) -> (i32, i32) {
    %c0_i32 = arith.constant 0 : i32
    %c0_i32_0 = arith.constant 0 : i32
    %c0_i32_1 = arith.constant 0 : i32
    return %c0_i32, %c0_i32_0 : i32, i32
  }
  func.func @transform_6(%arg0: i32) -> (i32, i32) {
    %c0_i32 = arith.constant 0 : i32
    %c0_i32_0 = arith.constant 0 : i32
    %c0_i32_1 = arith.constant 0 : i32
    return %c0_i32, %c0_i32_0 : i32, i32
  }
}

</mosaic_0001>

<bundles_post_ra>
// kernel: gemini_forward_pallas.5
= control target key start
LH: loop header
LB: loop body
LE: loop exit
PB: predicated region body
PF: predicated region fallthrough
CT: control target
= control target key end

     0   :  { %v552_v0 = vmov 0   ;;  %vm254_vm0 = vcmask 130048   ;;  %v553_v30 = vmov 0.0|0.0   ;;  %vm554_vm1 = vmmov 0   ;;  %s703_s1 = inlined_call_operand.vmem [shape: bf16[400,64], index: 1, kind: input, shape index: {}]   ;;  %s704_s0 = inlined_call_operand.vmem [shape: bf16[12,400], index: 0, kind: input, shape index: {}]   ;;  %s705_s2 = inlined_call_operand.vmem [shape: f32[1,64], index: 2, kind: input, shape index: {}]   ;;  %s706_s3 = inlined_call_operand.vmem [shape: f32[1,64], index: 3, kind: input, shape index: {}]   ;;  %s707_s4 = inlined_call_operand.vmem [shape: f32[1,64], index: 4, kind: input, shape index: {}]   ;;  %s708_s5 = inlined_call_operand.vmem [shape: f32[4,12], index: 5, kind: input, shape index: {}]   ;;  %s709_s6 = inlined_call_operand.vmem [shape: f32[4,64], index: 6, kind: output, shape index: {}]  }
   0x1   :  { %299 = vmatprep.subr.bf16.mxu1 %v552_v0  ;;  %v521_v1 = vld [vmem:[%s703_s1 + $0x40] sm:$0xff]   ;;  %v524_v4 = vld [vmem:[%s703_s1 + $0x48] sm:$0xff]   ;;  %v527_v7 = vld [vmem:[%s703_s1 + $0x50] sm:$0xff]   ;;  %v555_v31 = vmov 0.0   ;;  %vm365_vm2 = vcmask 1043456   ;;  %vm556_vm3 = vmmov 1  }
   0x2   :  { %v522_v2 = vld [vmem:[%s703_s1 + $0x80] sm:$0xff]   ;;  %480 = vmatprep.subr.bf16.mxu0 %v521_v1  ;;  %v525_v5 = vld [vmem:[%s703_s1 + $0x88] sm:$0xff]   ;;  %v528_v8 = vld [vmem:[%s703_s1 + $0x90] sm:$0xff]   ;;  %vm361_vm5 = vcmask 97280   ;;  %vm439_vm6 = vcmask 519168  }
   0x3   :  { %v523_v3 = vld [vmem:[%s703_s1] sm:$0xff]   ;;  %300 = vmatpush1.bf16.msra.mxu1 %v522_v2  ;;  %v526_v6 = vld [vmem:[%s703_s1 + $0x8] sm:$0xff]   ;;  %v529_v9 = vld [vmem:[%s703_s1 + $0x10] sm:$0xff]  }
   0x4   :  { %481 = vmatpush3.bf16.msra.mxu0 %v523_v3  ;;  %301 = vmatprep.subr.bf16.mxu1 %v552_v0  ;;  %v530_v10 = vld [vmem:[%s703_s1 + $0x58] sm:$0xff]   ;;  %v533_v13 = vld [vmem:[%s703_s1 + $0x60] sm:$0xff]   ;;  %v536_v16 = vld [vmem:[%s703_s1 + $0x68] sm:$0xff]  }
   0x5   :  { %482 = vmatprep.subr.bf16.mxu0 %v524_v4  ;;  %v531_v11 = vld [vmem:[%s703_s1 + $0x98] sm:$0xff]   ;;  %v534_v14 = vld [vmem:[%s703_s1 + $0xa0] sm:$0xff]   ;;  %v537_v17 = vld [vmem:[%s703_s1 + $0xa8] sm:$0xff]  }
   0x6   :  { %v532_v12 = vld [vmem:[%s703_s1 + $0x18] sm:$0xff]   ;;  %v535_v15 = vld [vmem:[%s703_s1 + $0x20] sm:$0xff]   ;;  %v538_v18 = vld [vmem:[%s703_s1 + $0x28] sm:$0xff]  }
   0x7   :  { %302 = vmatpush1.bf16.msra.mxu1 %v525_v5  ;;  %v539_v19 = vld [vmem:[%s703_s1 + $0x70] sm:$0xff]   ;;  %v542_v22 = vld [vmem:[%s703_s1 + $0x78] sm:$0xff]   ;;  %v548_v28 = vld [vmem:[%s703_s1 + $0xc0] sm:$0xff]  }
   0x8   :  { %483 = vmatpush3.bf16.msra.mxu0 %v526_v6  ;;  %303 = vmatprep.subr.bf16.mxu1 %v552_v0  ;;  %v540_v20 = vld [vmem:[%s703_s1 + $0xb0] sm:$0xff]   ;;  %v543_v24 = vld [vmem:[%s703_s1 + $0xb8] sm:$0xff]   ;;  %v445_v34 = vld [vmem:[%s705_s2] ss:$0 sm:$0xff] }
   0x9   :  { %484 = vmatprep.subr.bf16.mxu0 %v527_v7  ;;  %v541_v21 = vld [vmem:[%s703_s1 + $0x30] sm:$0xff]   ;;  %v551_v25 = vld [vmem:[%s704_s0 + $0xc] ss:$16 sps:$4 sm:$0x3f]   ;;  %v476_v46 = vld [vmem:[%s706_s3] ss:$0 sm:$0xff] }
   0xa   :  { %v547_v23 = vld [vmem:[%s704_s0 + $0x4] ss:$16 sps:$4 sm:$0x3f]   ;;  %v544_v26 = vld [vmem:[%s703_s1 + $0x38] sm:$0xff]   ;;  %475 = vmatprep.mubr.msk.bf16.mxu1 %vm254_vm0, %v551_v25  ;;  %v477_v51 = vld [vmem:[%s707_s4] ss:$0 sm:$0xff] }
   0xb   :  { %304 = vmatpush1.bf16.msra.mxu1 %v528_v8  ;;  %290 = vmatprep.mubr.bf16.mxu0 %v547_v23  ;;  %v545_v27 = vld [vmem:[%s704_s0] ss:$16 sps:$4 sm:$0x3f]   ;;  %v549_v29 = vld [vmem:[%s704_s0 + $0x8] ss:$16 sps:$4 sm:$0x3f]   ;;  %vm514_vm4 = vmpackc.low %vm365_vm2, %vm556_vm3 }
   0xc   :  { %485 = vmatpush3.bf16.msra.mxu0 %v529_v9  ;;  %305 = vmatprep.subr.bf16.mxu1 %v552_v0  ;;  %v360_v56 = vld [vmem:[%s708_s5] sm:$0xf] }
   0xd   :  { %486 = vmatprep.subr.bf16.mxu0 %v530_v10 }
   0xf   :  { %306 = vmatpush1.bf16.msra.mxu1 %v531_v11 }
  0x10   :  { %487 = vmatpush3.bf16.msra.mxu0 %v532_v12  ;;  %307 = vmatprep.subr.bf16.mxu1 %v552_v0 }
  0x11   :  { %488 = vmatprep.subr.bf16.mxu0 %v533_v13 }
  0x13   :  { %308 = vmatpush1.bf16.msra.mxu1 %v534_v14 }
  0x14   :  { %489 = vmatpush3.bf16.msra.mxu0 %v535_v15  ;;  %309 = vmatprep.subr.bf16.mxu1 %v552_v0 }
  0x15   :  { %490 = vmatprep.subr.bf16.mxu0 %v536_v16 }
  0x17   :  { %310 = vmatpush1.bf16.msra.mxu1 %v537_v17 }
  0x18   :  { %491 = vmatpush3.bf16.msra.mxu0 %v538_v18  ;;  %311 = vmatprep.subr.bf16.mxu1 %v552_v0 }
  0x19   :  { %492 = vmatprep.subr.bf16.mxu0 %v539_v19 }
  0x1b   :  { %312 = vmatpush1.bf16.msra.mxu1 %v540_v20 }
  0x1c   :  { %493 = vmatpush3.bf16.msra.mxu0 %v541_v21  ;;  %313 = vmatprep.subr.bf16.mxu1 %v552_v0 }
  0x1d   :  { %494 = vmatprep.subr.bf16.mxu0 %v542_v22 }
  0x1f   :  { %314 = vmatpush1.bf16.msra.mxu1 %v543_v24 }
  0x20   :  { %495 = vmatpush3.bf16.msra.mxu0 %v544_v26  ;;  %315 = vmatprep.subr.bf16.mxu1 %v552_v0 }
  0x21   :  { %512 = vmatprep.subr.bf16.mxu0 %v553_v30 }
  0x23   :  { %291 = vmatmul.mubr.bf16.vlgmr.msra.gmra.mrb[0].mxu0 %v545_v27  ;;  %316 = vmatpush1.bf16.msra.mxu1 %v548_v28 }
  0x24   :  { %509 = vmatprep.mubr.msk.f32.mxu0 %vm554_vm1, %v555_v31 }
  0x26   :  { %332 = vmatmul.mubr.bf16.vlgmr.msra.gmra.mrb[0].mxu1 %v549_v29 }
  0xf6   :  { %v496_v32 = vpop.f32.mrb[0].mxu0 }
  0xf7   :  { %v497_v33 = vpop.f32.mrb[1].mxu0 }
  0xf8   :  { %v498_v35 = vadd.f32 %v497_v33, %v496_v32  ;;  %v499_v36 = vpop.f32.mrb[2].mxu0 }
  0xf9   :  { %v500_v37 = vpop.f32.mrb[3].mxu0  ;;  %v333_v38 = vpop.f32.mrb[0].mxu1 }
  0xfa   :  { %v501_v39 = vadd.f32 %v500_v37, %v499_v36  ;;  %v293_v40 = vadd.f32 %v498_v35, %v445_v34  ;;  %v335_v41 = vpop.f32.mrb[1].mxu1 }
  0xfb   :  { %v336_v42 = vpop.f32.mrb[2].mxu1 }
  0xfc   :  { %v334_v43 = vadd.f32 %v333_v38, %v293_v40  ;;  %v296_v44 = vadd.f32 %v501_v39, %v445_v34  ;;  %v338_v45 = vpop.f32.mrb[3].mxu1 }
  0xfe   :  { %v340_v47 = vmax.f32 %v334_v43, 0.0  ;;  %v337_v48 = vadd.f32 %v336_v42, %v296_v44 }
 0x100   :  { %v349_v49 = vmul.f32 %v476_v46, %v340_v47  ;;  %v341_v50 = vmax.f32 %v337_v48, 0.0 }
 0x102   :  { %v350_v52 = vmul.f32 %v476_v46, %v341_v50  ;;  %v358_v53 = vadd.f32 %v477_v51, %v349_v49 }
 0x104   :  { %v359_v54 = vadd.f32 %v477_v51, %v350_v52 }
 0x106   :  { %v513_v55 = vpack.c.bf16 %v359_v54, %v358_v53 }
 0x108   :  { %515 = vmatpush3.bf16.msk.msra.mxu0 %vm514_vm4, %v513_v55 }
 0x10b   :  { %510 = vmatmul.mubr.msk.f32.vlgmr.msra.gmra.mrb[4].mxu0 %vm361_vm5, %v360_v56 }
 0x1de   :  { %v435_v57 = vpop.f32.mrb[4].mxu0 }
 0x1df   :  { %440 = vst.msk [vmem:[%s709_s6] sm:$0xf] %vm439_vm6, %v435_v57  ;;  %v511_v58 = vpop.f32.mrb[5].mxu0 }

// kernel: gemini_forward_pallas.4
= control target key start
LH: loop header
LB: loop body
LE: loop exit
PB: predicated region body
PF: predicated region fallthrough
CT: control target
= control target key end

     0   :  { %s7231_s30 = smov 0   ;;  %s9186_s0 = inlined_call_operand.vmem [shape: bf16[12,14,224], index: 0, kind: input, shape index: {}]   ;;  %s9187_s1 = inlined_call_operand.vmem [shape: bf16[25,160,160], index: 1, kind: input, shape index: {}]   ;;  %s9188_s2 = inlined_call_operand.vmem [shape: f32[5,10], index: 2, kind: input, shape index: {}]   ;;  %s9189_s3 = inlined_call_operand.vmem [shape: f32[5,10], index: 3, kind: input, shape index: {}]   ;;  %s9190_s4 = inlined_call_operand.vmem [shape: f32[160,80], index: 4, kind: input, shape index: {}]   ;;  %s9191_s5 = inlined_call_operand.vmem [shape: f32[160,80], index: 5, kind: input, shape index: {}]   ;;  %s9192_s6 = inlined_call_operand.vmem [shape: f32[1,160], index: 6, kind: input, shape index: {}]   ;;  %s9193_s7 = inlined_call_operand.vmem [shape: f32[1,80], index: 7, kind: input, shape index: {}]   ;;  %s9194_s8 = inlined_call_operand.vmem [shape: f32[1,80], index: 8, kind: input, shape index: {}]   ;;  %s9195_s9 = inlined_call_operand.vmem [shape: bf16[12,5,80], index: 9, kind: output, shape index: {}]  }
   0x1 LB: > { %s5200_s10 = sadd.s32 4294967295, %s7172_s30   ;;  %p5204_p0 = scmp.ge.s32.totalorder %s7172_s30, 1  ;;  %s7172_s30 = sphi %s7231_s30, %s19_s30  }
   0x2   : > { %p287_p1 = scmp.lt.s32.totalorder %s7172_s30, 13 }
   0x4   : > { %p288_p2 = pnand %p5204_p0, %p287_p1 }
   0x5   : > { %p322_p3 = scmp.lt.s32.totalorder (!%p288_p2), %s5200_s10, 11  ;;  %v6414_v0 = vld [vmem:[%s9187_s1 + $0x6e4] ss:$8 sps:$4 sm:$0xff] (!%p288_p2)   ;;  %v6416_v1 = vld [vmem:[%s9187_s1 + $0x6e0] ss:$8 sps:$4 sm:$0xff] (!%p288_p2)   ;;  %s7174_s18 = smov (!%p288_p2), 96  }
   0x6   : > { %291 = sbr.rel (%p288_p2) target bundleno = 1368 (0x558), region = 56  ;;  %2414 = vmatprep.subr.bf16.mxu0 (!%p288_p2), %v6414_v0  ;;  %v6417_v2 = vld [vmem:[%s9187_s1 + $0x6f4] ss:$8 sps:$4 sm:$0xff] (!%p288_p2)   ;;  %v6419_v3 = vld [vmem:[%s9187_s1 + $0x6f0] ss:$8 sps:$4 sm:$0xff] (!%p288_p2)   ;;  %s7175_s19 = smov (!%p288_p2), 112  }
   0x7   : > { %2415 = vmatpush1.bf16.msra.mxu0 (!%p288_p2), %v6416_v1  ;;  %v6420_v4 = vld [vmem:[%s9187_s1 + $0xa4] ss:$8 sps:$4 sm:$0xff] (!%p288_p2)   ;;  %v6424_v6 = vld [vmem:[%s9187_s1 + $0xa0] ss:$8 sps:$4 sm:$0xff] (!%p288_p2)   ;;  %v6426_v10 = vld [vmem:[%s9187_s1 + $0xb4] ss:$8 sps:$4 sm:$0xff] (!%p288_p2)  }
   0x8   : > { %2416 = vmatprep.subr.bf16.mxu0 (!%p288_p2), %v6417_v2  ;;  %v6422_v5 = vld [vmem:[%s9187_s1 + $0x704] ss:$8 sps:$4 sm:$0xff] (!%p288_p2)   ;;  %494 = vmatprep.subr.bf16.mxu1 (!%p288_p2), %v6420_v4  ;;  %v6425_v7 = vld [vmem:[%s9187_s1 + $0x700] ss:$8 sps:$4 sm:$0xff] (!%p288_p2)   ;;  %v6428_v12 = vld [vmem:[%s9187_s1 + $0x714] ss:$8 sps:$4 sm:$0xff] (!%p288_p2)  }
   0x9   : > { %495 = vmatpush1.bf16.msra.mxu1 (!%p288_p2), %v6424_v6  ;;  %v6430_v13 = vld [vmem:[%s9187_s1 + $0xb0] ss:$8 sps:$4 sm:$0xff] (!%p288_p2)   ;;  %v6432_v15 = vld [vmem:[%s9187_s1 + $0xc4] ss:$8 sps:$4 sm:$0xff] (!%p288_p2)   ;;  %v6436_v17 = vld [vmem:[%s9187_s1 + $0xc0] ss:$8 sps:$4 sm:$0xff] (!%p288_p2)  }
   0xa   : > { %496 = vmatprep.subr.bf16.mxu1 (!%p288_p2), %v6426_v10  ;;  %v6431_v16 = vld [vmem:[%s9187_s1 + $0x710] ss:$8 sps:$4 sm:$0xff] (!%p288_p2)   ;;  %v6434_v18 = vld [vmem:[%s9187_s1 + $0x724] ss:$8 sps:$4 sm:$0xff] (!%p288_p2)   ;;  %v6438_v19 = vld [vmem:[%s9187_s1 + $0xd4] ss:$8 sps:$4 sm:$0xff] (!%p288_p2)  }
   0xb   : > { %2417 = vmatpush1.bf16.msra.mxu0 (!%p288_p2), %v6419_v3  ;;  %v6437_v20 = vld [vmem:[%s9187_s1 + $0x720] ss:$8 sps:$4 sm:$0xff] (!%p288_p2)   ;;  %v6440_v21 = vld [vmem:[%s9187_s1 + $0x734] ss:$8 sps:$4 sm:$0xff] (!%p288_p2)   ;;  %v6442_v22 = vld [vmem:[%s9187_s1 + $0xd0] ss:$8 sps:$4 sm:$0xff] (!%p288_p2)  }
   0xc   : > { %2418 = vmatprep.subr.bf16.mxu0 (!%p288_p2), %v6422_v5  ;;  %v6444_v23 = vld [vmem:[%s9187_s1 + $0xe4] ss:$8 sps:$4 sm:$0xff] (!%p288_p2)   ;;  %v6443_v24 = vld [vmem:[%s9187_s1 + $0x730] ss:$8 sps:$4 sm:$0xff] (!%p288_p2)   ;;  %s7176_s24 = smov (!%p288_p2), 80   ;;  %s7177_s23 = smov (!%p288_p2), 64  }
   0xd   : > { %s9197_s10 = smov (!%p322_p3, %s5200_s10), 11  ;;  %497 = vmatpush1.bf16.msra.mxu1 %v6430_v13  ;;  %v6448_v25 = vld [vmem:[%s9187_s1 + $0xe0] ss:$8 sps:$4 sm:$0xff]   ;;  %v6446_v26 = vld [vmem:[%s9187_s1 + $0x744] ss:$8 sps:$4 sm:$0xff]   ;;  %vm490_vm0 = vcmask 261120  }
   0xe   : > { %s6227_s21 = sshll.u32 %s9197_s10, 4  ;;  %498 = vmatprep.subr.bf16.mxu1 %v6432_v15  ;;  %v6450_v27 = vld [vmem:[%s9187_s1 + $0xf4] ss:$8 sps:$4 sm:$0xff]   ;;  %v6449_v30 = vld [vmem:[%s9187_s1 + $0x740] ss:$8 sps:$4 sm:$0xff]   ;;  %vm387_vm1 = vcmask 916480  }
   0xf   : > { %s7266_s28 = scalar_lea.vmem %s9186_s0, %s6227_s21  ;;  %2419 = vmatpush1.bf16.msra.mxu0 %v6425_v7  ;;  %v6452_v31 = vld [vmem:[%s9187_s1 + $0x754] ss:$8 sps:$4 sm:$0xff]   ;;  %v6454_v32 = vld [vmem:[%s9187_s1 + $0xf0] ss:$8 sps:$4 sm:$0xff]   ;;  %v6456_v33 = vld [vmem:[%s9187_s1 + $0x104] ss:$8 sps:$4 sm:$0xff]  }
  0x10   : > { %v7272_v8 = vld [vmem:[%s7266_s28] ss:$8 sps:$4 sm:$0x7f]   ;;  %v7275_v9 = vld [vmem:[%s7266_s28 + $0x4] ss:$8 sps:$4 sm:$0x7f]   ;;  %2420 = vmatprep.subr.bf16.mxu0 %v6428_v12 }
  0x11   : > { %v7281_v11 = vrot.slane %v7272_v8, 1  ;;  %v7294_v14 = vrot.slane %v7275_v9, 1  ;;  %499 = vmatpush1.bf16.msra.mxu1 %v6436_v17  ;;  %v1245_v28 = vshrl.u32 %v7275_v9, 16  ;;  %v1247_v29 = vshll.u32 %v7275_v9, 16  ;;  %v6455_v36 = vld [vmem:[%s9187_s1 + $0x750] ss:$8 sps:$4 sm:$0xff]  }
  0x12   : > { %500 = vmatprep.subr.bf16.mxu1 %v6438_v19  ;;  %v1239_v34 = vshrl.u32 %v7272_v8, 16  ;;  %v1241_v35 = vshll.u32 %v7272_v8, 16  ;;  %v6458_v37 = vld [vmem:[%s9187_s1 + $0x764] ss:$8 sps:$4 sm:$0xff]   ;;  %v6460_v40 = vld [vmem:[%s9187_s1 + $0x100] ss:$8 sps:$4 sm:$0xff]  }
  0x13   : > { %2482 = vrot.lane.b32.xlu1 %v7281_v11, %s7174_s18  ;;  %2305 = vrot.lane.b32.xlu0 %v7281_v11, %s7175_s19  ;;  %v3016_v38 = vrot.slane %v1245_v28, 1  ;;  %v3017_v39 = vrot.slane %v1247_v29, 2  ;;  %v6462_v41 = vld [vmem:[%s9187_s1 + $0x114] ss:$8 sps:$4 sm:$0xff]   ;;  %v6461_v44 = vld [vmem:[%s9187_s1 + $0x760] ss:$8 sps:$4 sm:$0xff]  }
  0x14   : > { %2421 = vmatpush1.bf16.msra.mxu0 %v6431_v16  ;;  %v3013_v42 = vrot.slane %v1239_v34, 1  ;;  %v3014_v43 = vrot.slane %v1241_v35, 2  ;;  %v6466_v46 = vld [vmem:[%s9187_s1 + $0x110] ss:$8 sps:$4 sm:$0xff]   ;;  %v6464_v47 = vld [vmem:[%s9187_s1 + $0x774] ss:$8 sps:$4 sm:$0xff]  }
  0x15   : > { %2422 = vmatprep.subr.bf16.mxu0 %v6434_v18  ;;  %501 = vmatpush1.bf16.msra.mxu1 %v6442_v22  ;;  %v7394_v45 = vor.u32 %v3017_v39, %v3016_v38  ;;  %v6468_v48 = vld [vmem:[%s9187_s1 + $0x124] ss:$8 sps:$4 sm:$0xff]   ;;  %v6467_v50 = vld [vmem:[%s9187_s1 + $0x770] ss:$8 sps:$4 sm:$0xff]   ;;  %v6473_v51 = vld [vmem:[%s9187_s1 + $0x120] ss:$8 sps:$4 sm:$0xff]  }
  0x16   : > { %502 = vmatprep.subr.bf16.mxu1 %v6444_v23  ;;  %v7405_v49 = vor.u32 %v3014_v43, %v3013_v42  ;;  %v6472_v52 = vld [vmem:[%s9187_s1 + $0x784] ss:$8 sps:$4 sm:$0xff]   ;;  %v6474_v53 = vld [vmem:[%s9187_s1 + $0x134] ss:$8 sps:$4 sm:$0xff]   ;;  %v6479_v54 = vld [vmem:[%s9187_s1 + $0x130] ss:$8 sps:$4 sm:$0xff]  }
  0x17   : > { %2484 = vrot.lane.b32.xlu1 %v7294_v14, %s7174_s18  ;;  %2307 = vrot.lane.b32.xlu0 %v7294_v14, %s7175_s19  ;;  %v6482_v55 = vld [vmem:[%s9187_s1 + $0x4] ss:$8 sps:$4 sm:$0xff]   ;;  %v6470_v58 = vld [vmem:[%s9187_s1 + $0x780] ss:$8 sps:$4 sm:$0xff]   ;;  %vm886_vm2 = vcmask 654336   ;;  %v1249_v0 = vrot.slane %v1247_v29, 1 }
  0x18   : > { %2423 = vmatpush1.bf16.msra.mxu0 %v6437_v20  ;;  %v6478_v61 = vld [vmem:[%s9187_s1 + $0x794] ss:$8 sps:$4 sm:$0xff]   ;;  %v6476_v63 = vld [vmem:[%s9187_s1 + $0x790] ss:$8 sps:$4 sm:$0xff]   ;;  %v1243_v1 = vrot.slane %v1241_v35, 1  ;;  %vm708_vm3 = vcmask 785408  }
  0x19   : > { %2424 = vmatprep.subr.bf16.mxu0 %v6440_v21  ;;  %503 = vmatpush1.bf16.msra.mxu1 %v6448_v25  ;;  %v6485_v4 = vld [vmem:[%s9187_s1 + $0x7a4] ss:$8 sps:$4 sm:$0xff]   ;;  %v7481_v6 = vor.u32 %v1249_v0, %v1245_v28  ;;  %v6480_v10 = vld [vmem:[%s9187_s1] ss:$8 sps:$4 sm:$0xff]   ;;  %v6491_v16 = vld [vmem:[%s9187_s1 + $0x7b4] ss:$8 sps:$4 sm:$0xff]  }
  0x1a   : > { %504 = vmatprep.subr.bf16.mxu1 %v6450_v27  ;;  %v7485_v7 = vor.u32 %v1243_v1, %v1239_v34  ;;  %v6483_v12 = vld [vmem:[%s9187_s1 + $0x7a0] ss:$8 sps:$4 sm:$0xff]   ;;  %v6486_v18 = vld [vmem:[%s9187_s1 + $0x10] ss:$8 sps:$4 sm:$0xff]   ;;  %v6494_v20 = vld [vmem:[%s9187_s1 + $0x24] ss:$8 sps:$4 sm:$0xff]  }
  0x1b   : > { %2661 = vrot.lane.b32.xlu1 %v7294_v14, %s7176_s24  ;;  %2659 = vrot.lane.b32.xlu0 %v7281_v11, %s7176_s24  ;;  %v6489_v19 = vld [vmem:[%s9187_s1 + $0x7b0] ss:$8 sps:$4 sm:$0xff]   ;;  %v6497_v21 = vld [vmem:[%s9187_s1 + $0x7c4] ss:$8 sps:$4 sm:$0xff]   ;;  %vm1064_vm4 = vcmask 523264   ;;  %vm4785_vm5 = vcmask 1041408  }
  0x1c   : > { %2425 = vmatpush1.bf16.msra.mxu0 %v6443_v24  ;;  %v6492_v22 = vld [vmem:[%s9187_s1 + $0x20] ss:$8 sps:$4 sm:$0xff]   ;;  %v6503_v24 = vld [vmem:[%s9187_s1 + $0x7d4] ss:$8 sps:$4 sm:$0xff]   ;;  %v6498_v25 = vld [vmem:[%s9187_s1 + $0x30] ss:$8 sps:$4 sm:$0xff]  }
  0x1d   : > { %2426 = vmatprep.subr.bf16.mxu0 %v6446_v26  ;;  %505 = vmatpush1.bf16.msra.mxu1 %v6454_v32  ;;  %v6495_v23 = vld [vmem:[%s9187_s1 + $0x7c0] ss:$8 sps:$4 sm:$0xff]   ;;  %v6501_v26 = vld [vmem:[%s9187_s1 + $0x7d0] ss:$8 sps:$4 sm:$0xff]   ;;  %v6506_v27 = vld [vmem:[%s9187_s1 + $0x44] ss:$8 sps:$4 sm:$0xff]  }
  0x1e   : > { %506 = vmatprep.subr.bf16.mxu1 %v6456_v33  ;;  %v6509_v28 = vld [vmem:[%s9187_s1 + $0x7e4] ss:$8 sps:$4 sm:$0xff]   ;;  %v6504_v29 = vld [vmem:[%s9187_s1 + $0x40] ss:$8 sps:$4 sm:$0xff]   ;;  %v6515_v32 = vld [vmem:[%s9187_s1 + $0x7f4] ss:$8 sps:$4 sm:$0xff]  }
  0x1f   : > { %385 = vrot.lane.b32.xlu1 %v7275_v9, %s7175_s19  ;;  %383 = vrot.lane.b32.xlu0 %v7272_v8, %s7175_s19  ;;  %v6510_v33 = vld [vmem:[%s9187_s1 + $0x50] ss:$8 sps:$4 sm:$0xff]   ;;  %v6518_v35 = vld [vmem:[%s9187_s1 + $0x64] ss:$8 sps:$4 sm:$0xff]   ;;  %vm7179_vm6 = vmmov 1   ;;  %vm4781_vm8 = vcmask 80896  }
  0x20   : > { %2427 = vmatpush1.bf16.msra.mxu0 %v6449_v30  ;;  %v6507_v30 = vld [vmem:[%s9187_s1 + $0x7e0] ss:$8 sps:$4 sm:$0xff]   ;;  %v6513_v34 = vld [vmem:[%s9187_s1 + $0x7f0] ss:$8 sps:$4 sm:$0xff]   ;;  %v6524_v39 = vld [vmem:[%s9187_s1 + $0x74] ss:$8 sps:$4 sm:$0xff]  }
  0x21   : > { %2428 = vmatprep.subr.bf16.mxu0 %v6452_v31  ;;  %507 = vmatpush1.bf16.msra.mxu1 %v6460_v40  ;;  %v6512_v31 = vld [vmem:[%s9187_s1 + $0x54] ss:$8 sps:$4 sm:$0xff]   ;;  %v6519_v38 = vld [vmem:[%s9187_s1 + $0x800] ss:$8 sps:$4 sm:$0xff]   ;;  %v6525_v42 = vld [vmem:[%s9187_s1 + $0x810] ss:$8 sps:$4 sm:$0xff]  }
  0x22   : > { %508 = vmatprep.subr.bf16.mxu1 %v6462_v41  ;;  %v6527_v40 = vld [vmem:[%s9187_s1 + $0x814] ss:$8 sps:$4 sm:$0xff]   ;;  %v6522_v41 = vld [vmem:[%s9187_s1 + $0x70] ss:$8 sps:$4 sm:$0xff]   ;;  %v6530_v43 = vld [vmem:[%s9187_s1 + $0x84] ss:$8 sps:$4 sm:$0xff]  }
  0x23   : > { %2838 = vrot.lane.b32.xlu1 %v7294_v14, %s7177_s23  ;;  %2836 = vrot.lane.b32.xlu0 %v7281_v11, %s7177_s23  ;;  %v6549_v0 = vld [vmem:[%s9187_s1 + $0x850] ss:$8 sps:$4 sm:$0xff]   ;;  %v6554_v1 = vld [vmem:[%s9187_s1 + $0x164] ss:$8 sps:$4 sm:$0xff]   ;;  %vm6229_vm7 = vmpackc.low %vm4785_vm5, %vm7179_vm6  ;;  %s5207_s27 = sshll.u32 %s9197_s10, 2  ;;  %vm5141_vm9 = vcmask 649216  }
  0x24   : > { %2429 = vmatpush1.bf16.msra.mxu0 %v6455_v36  ;;  %v6521_v36 = vld [vmem:[%s9187_s1 + $0x804] ss:$8 sps:$4 sm:$0xff]   ;;  %s330_s13 = scalar_lea.vmem %s9195_s9, %s5207_s27  ;;  %vm5142_vm10 = vsmask.f32 2304 }
  0x25   : > { %2430 = vmatprep.subr.bf16.mxu0 %v6458_v37  ;;  %509 = vmatpush1.bf16.msra.mxu1 %v6466_v46  ;;  %v6516_v37 = vld [vmem:[%s9187_s1 + $0x60] ss:$8 sps:$4 sm:$0xff]   ;;  %vm5143_vm11 = vmand %vm5141_vm9, %vm5142_vm10 }
  0x26   : > { %510 = vmatprep.subr.bf16.mxu1 %v6468_v48  ;;  %v6528_v46 = vld [vmem:[%s9187_s1 + $0x80] ss:$8 sps:$4 sm:$0xff]   ;;  %v6536_v48 = vld [vmem:[%s9187_s1 + $0x94] ss:$8 sps:$4 sm:$0xff]  }
  0x27   : > { %706 = vrot.lane.b32.xlu1 %v7275_v9, %s7174_s18  ;;  %704 = vrot.lane.b32.xlu0 %v7272_v8, %s7174_s18 }
  0x28   : > { %2431 = vmatpush1.bf16.msra.mxu0 %v6461_v44  ;;  %v6533_v44 = vld [vmem:[%s9187_s1 + $0x824] ss:$8 sps:$4 sm:$0xff]  }
  0x29   : > { %2432 = vmatprep.subr.bf16.mxu0 %v6464_v47  ;;  %511 = vmatpush1.bf16.msra.mxu1 %v6473_v51  ;;  %v6531_v47 = vld [vmem:[%s9187_s1 + $0x820] ss:$8 sps:$4 sm:$0xff]  }
  0x2a   : > { %512 = vmatprep.subr.bf16.mxu1 %v6474_v53  ;;  %v6537_v53 = vld [vmem:[%s9187_s1 + $0x830] ss:$8 sps:$4 sm:$0xff]  }
  0x2b   : > { %3193 = vrot.lane.b32.xlu1 %v7394_v45, %s7175_s19  ;;  %3191 = vrot.lane.b32.xlu0 %v7405_v49, %s7175_s19 }
  0x2c   : > { %2433 = vmatpush1.bf16.msra.mxu0 %v6467_v50  ;;  %v6539_v50 = vld [vmem:[%s9187_s1 + $0x834] ss:$8 sps:$4 sm:$0xff]  }
  0x2d   : > { %2591 = vmatprep.subr.bf16.mxu0 %v6472_v52  ;;  %513 = vmatpush1.bf16.msra.mxu1 %v6479_v54  ;;  %v6534_v52 = vld [vmem:[%s9187_s1 + $0x90] ss:$8 sps:$4 sm:$0xff]   ;;  %v6542_v54 = vld [vmem:[%s9187_s1 + $0x144] ss:$8 sps:$4 sm:$0xff]  }
  0x2e   : > { %640 = vmatprep.subr.bf16.mxu1 %v6482_v55  ;;  %v6545_v55 = vld [vmem:[%s9187_s1 + $0x844] ss:$8 sps:$4 sm:$0xff]  }
  0x2f   : > { %884 = vrot.lane.b32.xlu1 %v7275_v9, %s7176_s24  ;;  %882 = vrot.lane.b32.xlu0 %v7272_v8, %s7176_s24 }
  0x33   : > { %3370 = vrot.lane.b32.xlu1 %v7394_v45, %s7174_s18  ;;  %3368 = vrot.lane.b32.xlu0 %v7405_v49, %s7174_s18 }
  0x37   : > { %1062 = vrot.lane.b32.xlu1 %v7275_v9, %s7177_s23  ;;  %1060 = vrot.lane.b32.xlu0 %v7272_v8, %s7177_s23  ;;  %v6488_v8 = vld [vmem:[%s9187_s1 + $0x14] ss:$8 sps:$4 sm:$0xff]  }
  0x3b   : > { %3547 = vrot.lane.b32.xlu1 %v7394_v45, %s7176_s24  ;;  %3545 = vrot.lane.b32.xlu0 %v7405_v49, %s7176_s24 }
  0x3f   : > { %3724 = vrot.lane.b32.xlu1 %v7394_v45, %s7177_s23  ;;  %3722 = vrot.lane.b32.xlu0 %v7405_v49, %s7177_s23 }
  0x43   : > { %1425 = vrot.lane.b32.xlu1 %v7481_v6, %s7175_s19  ;;  %1423 = vrot.lane.b32.xlu0 %v7485_v7, %s7175_s19 }
  0x47   : > { %1602 = vrot.lane.b32.xlu1 %v7481_v6, %s7174_s18  ;;  %1600 = vrot.lane.b32.xlu0 %v7485_v7, %s7174_s18 }
  0x85   : > { %v7449_v56 = vpop.permute.xlu1 %2482  ;;  %v2306_v57 = vpop.permute.xlu0 %2305 }
  0x89   : > { %v7454_v59 = vpop.permute.xlu1 %2484  ;;  %v2308_v60 = vpop.permute.xlu0 %2307 }
  0x8a   : > { %5681 = vmatprep.mubr.msk.bf16.mxu0 %vm490_vm0, %v2308_v60  ;;  %v2309_v62 = vsel %vm387_vm1, %v2306_v57, %v2308_v60  ;;  %v2486_v51 = vsel %vm708_vm3, %v7449_v56, %v7454_v59  ;;  %v6540_v57 = vld [vmem:[%s9187_s1 + $0x140] ss:$8 sps:$4 sm:$0xff]   ;;  %v6551_v60 = vld [vmem:[%s9187_s1 + $0x854] ss:$8 sps:$4 sm:$0xff]  }
  0x8b   : > { %2447 = vmatmul.mubr.bf16.vlgmr.msra.gmra.mrb[0].mxu0 %v2309_v62 }
  0x8c   : > { %2592 = vmatpush1.bf16.msra.mxu0 %v6470_v58  ;;  %5722 = vmatprep.mubr.msk.bf16.mxu0 %vm490_vm0, %v7454_v59  ;;  %v6543_v58 = vld [vmem:[%s9187_s1 + $0x840] ss:$8 sps:$4 sm:$0xff]   ;;  %v6548_v59 = vld [vmem:[%s9187_s1 + $0x154] ss:$8 sps:$4 sm:$0xff]  }
  0x8d   : > { %v7470_v2 = vpop.permute.xlu1 %2661  ;;  %v2660_v3 = vpop.permute.xlu0 %2659  ;;  %2593 = vmatprep.subr.bf16.mxu0 %v6478_v61  ;;  %v7639_v61 = vld [vmem:[%s7266_s28] ss:$8 sps:$4 sm:$0x7f]  }
  0x8e   : > { %v7477_v5 = vsel %vm886_vm2, %v2660_v3, %v7470_v2  ;;  %v6552_v3 = vld [vmem:[%s9187_s1 + $0x160] ss:$8 sps:$4 sm:$0xff]  }
  0x90   : > { %2594 = vmatpush1.bf16.msra.mxu0 %v6476_v63  ;;  %v6546_v63 = vld [vmem:[%s9187_s1 + $0x150] ss:$8 sps:$4 sm:$0xff]  }
  0x91   : > { %v386_v13 = vpop.permute.xlu1 %385  ;;  %v384_v15 = vpop.permute.xlu0 %383  ;;  %2595 = vmatprep.subr.bf16.mxu0 %v6485_v4  ;;  %v6555_v4 = vld [vmem:[%s9187_s1 + $0x860] ss:$8 sps:$4 sm:$0xff]  }
  0x92   : > { %5250 = vmatprep.mubr.msk.bf16.mxu1 %vm490_vm0, %v386_v13  ;;  %v388_v17 = vsel %vm387_vm1, %v384_v15, %v386_v13  ;;  %v6558_v13 = vld [vmem:[%s9187_s1 + $0x170] ss:$8 sps:$4 sm:$0xff]  }
  0x93   : > { %527 = vmatmul.mubr.bf16.vlgmr.msra.gmra.mrb[0].mxu1 %v388_v17  ;;  %v6561_v15 = vld [vmem:[%s9187_s1 + $0x870] ss:$8 sps:$4 sm:$0xff]   ;;  %v6564_v17 = vld [vmem:[%s9187_s1 + $0x180] ss:$8 sps:$4 sm:$0xff]  }
  0x94   : > { %641 = vmatpush1.bf16.msra.mxu1 %v6480_v10  ;;  %2596 = vmatpush1.bf16.msra.mxu0 %v6483_v12  ;;  %v6560_v10 = vld [vmem:[%s9187_s1 + $0x174] ss:$8 sps:$4 sm:$0xff]  }
  0x95   : > { %642 = vmatprep.subr.bf16.mxu1 %v6488_v8  ;;  %2597 = vmatprep.subr.bf16.mxu0 %v6491_v16  ;;  %v7622_v56 = vpop.permute.xlu1 %2838  ;;  %v6563_v12 = vld [vmem:[%s9187_s1 + $0x874] ss:$8 sps:$4 sm:$0xff]   ;;  %v6566_v8 = vld [vmem:[%s9187_s1 + $0x184] ss:$8 sps:$4 sm:$0xff]  }
  0x96   : > { %5271 = vmatprep.mubr.msk.bf16.mxu1 %vm490_vm0, %v7275_v9  ;;  %v6500_v9 = vld [vmem:[%s9187_s1 + $0x34] ss:$8 sps:$4 sm:$0xff]   ;;  %v6569_v16 = vld [vmem:[%s9187_s1 + $0x884] ss:$8 sps:$4 sm:$0xff]  }
  0x98   : > { %643 = vmatpush1.bf16.msra.mxu1 %v6486_v18  ;;  %2598 = vmatpush1.bf16.msra.mxu0 %v6489_v19  ;;  %v6567_v18 = vld [vmem:[%s9187_s1 + $0x880] ss:$8 sps:$4 sm:$0xff]   ;;  %v6572_v19 = vld [vmem:[%s9187_s1 + $0x194] ss:$8 sps:$4 sm:$0xff]  }
  0x99   : > { %644 = vmatprep.subr.bf16.mxu1 %v6494_v20  ;;  %2599 = vmatprep.subr.bf16.mxu0 %v6497_v21  ;;  %v7642_v62 = vpop.permute.xlu1 %706  ;;  %v6575_v20 = vld [vmem:[%s9187_s1 + $0x894] ss:$8 sps:$4 sm:$0xff]   ;;  %v6570_v21 = vld [vmem:[%s9187_s1 + $0x190] ss:$8 sps:$4 sm:$0xff]  }
  0x9c   : > { %645 = vmatpush1.bf16.msra.mxu1 %v6492_v22  ;;  %2600 = vmatpush1.bf16.msra.mxu0 %v6495_v23  ;;  %v6573_v22 = vld [vmem:[%s9187_s1 + $0x890] ss:$8 sps:$4 sm:$0xff]   ;;  %v6578_v23 = vld [vmem:[%s9187_s1 + $0x1a4] ss:$8 sps:$4 sm:$0xff]  }
  0x9d   : > { %646 = vmatprep.subr.bf16.mxu1 %v6500_v9  ;;  %2601 = vmatprep.subr.bf16.mxu0 %v6503_v24  ;;  %v6581_v9 = vld [vmem:[%s9187_s1 + $0x8a4] ss:$8 sps:$4 sm:$0xff]   ;;  %v6576_v24 = vld [vmem:[%s9187_s1 + $0x1a0] ss:$8 sps:$4 sm:$0xff]  }
  0xa0   : > { %647 = vmatpush1.bf16.msra.mxu1 %v6498_v25  ;;  %2602 = vmatpush1.bf16.msra.mxu0 %v6501_v26  ;;  %v6579_v25 = vld [vmem:[%s9187_s1 + $0x8a0] ss:$8 sps:$4 sm:$0xff]   ;;  %v6584_v26 = vld [vmem:[%s9187_s1 + $0x1b4] ss:$8 sps:$4 sm:$0xff]  }
  0xa1   : > { %648 = vmatprep.subr.bf16.mxu1 %v6506_v27  ;;  %2603 = vmatprep.subr.bf16.mxu0 %v6509_v28  ;;  %v6587_v27 = vld [vmem:[%s9187_s1 + $0x8b4] ss:$8 sps:$4 sm:$0xff]   ;;  %v6582_v28 = vld [vmem:[%s9187_s1 + $0x1b0] ss:$8 sps:$4 sm:$0xff]  }
  0xa4   : > { %649 = vmatpush1.bf16.msra.mxu1 %v6504_v29  ;;  %2604 = vmatpush1.bf16.msra.mxu0 %v6507_v30  ;;  %v6585_v29 = vld [vmem:[%s9187_s1 + $0x8b0] ss:$8 sps:$4 sm:$0xff]   ;;  %v6590_v30 = vld [vmem:[%s9187_s1 + $0x1c4] ss:$8 sps:$4 sm:$0xff]  }
  0xa5   : > { %650 = vmatprep.subr.bf16.mxu1 %v6512_v31  ;;  %2605 = vmatprep.subr.bf16.mxu0 %v6515_v32  ;;  %v6593_v31 = vld [vmem:[%s9187_s1 + $0x8c4] ss:$8 sps:$4 sm:$0xff]   ;;  %v7730_v32 = vpop.permute.xlu0 %2836 }
  0xa8   : > { %651 = vmatpush1.bf16.msra.mxu1 %v6510_v33  ;;  %2606 = vmatpush1.bf16.msra.mxu0 %v6513_v34  ;;  %v6588_v33 = vld [vmem:[%s9187_s1 + $0x1c0] ss:$8 sps:$4 sm:$0xff]  }
  0xa9   : > { %652 = vmatprep.subr.bf16.mxu1 %v6518_v35  ;;  %2607 = vmatprep.subr.bf16.mxu0 %v6521_v36  ;;  %v6591_v34 = vld [vmem:[%s9187_s1 + $0x8c0] ss:$8 sps:$4 sm:$0xff]   ;;  %v6596_v35 = vld [vmem:[%s9187_s1 + $0x1d4] ss:$8 sps:$4 sm:$0xff]  }
  0xaa   : > { %v6599_v36 = vld [vmem:[%s9187_s1 + $0x8d4] ss:$8 sps:$4 sm:$0xff]  }
  0xac   : > { %653 = vmatpush1.bf16.msra.mxu1 %v6516_v37  ;;  %2608 = vmatpush1.bf16.msra.mxu0 %v6519_v38  ;;  %v7165_v37 = vld [vmem:[%s7266_s28 + $0x4] ss:$8 sps:$4 sm:$0x7f]  }
  0xad   : > { %654 = vmatprep.subr.bf16.mxu1 %v6524_v39  ;;  %2609 = vmatprep.subr.bf16.mxu0 %v6527_v40  ;;  %v7745_v38 = vrot.slane %v7165_v37, 2  ;;  %v7748_v39 = vrot.slane %v7639_v61, 2  ;;  %v6594_v40 = vld [vmem:[%s9187_s1 + $0x1d0] ss:$8 sps:$4 sm:$0xff]   ;;  %v6668_v37 = vld [vmem:[%s9187_s1 + $0x294] ss:$8 sps:$4 sm:$0xff]  }
  0xaf   : > { %4075 = vrot.lane.b32.xlu1 %v7745_v38, %s7175_s19  ;;  %4073 = vrot.lane.b32.xlu0 %v7748_v39, %s7175_s19 }
  0xb0   : > { %655 = vmatpush1.bf16.msra.mxu1 %v6522_v41  ;;  %2610 = vmatpush1.bf16.msra.mxu0 %v6525_v42  ;;  %v6597_v41 = vld [vmem:[%s9187_s1 + $0x8d0] ss:$8 sps:$4 sm:$0xff]   ;;  %v705_v42 = vpop.permute.xlu0 %704 }
  0xb1   : > { %656 = vmatprep.subr.bf16.mxu1 %v6530_v43  ;;  %2768 = vmatprep.subr.bf16.mxu0 %v6533_v44  ;;  %v6605_v43 = vld [vmem:[%s9187_s1 + $0x8e4] ss:$8 sps:$4 sm:$0xff]   ;;  %v7765_v44 = vpop.permute.xlu1 %3193 }
  0xb3   : > { %2624 = vmatmul.mubr.bf16.vlgmr.msra.gmra.mrb[0].mxu0 %v2486_v51  ;;  %1779 = vrot.lane.b32.xlu1 %v7481_v6, %s7176_s24  ;;  %v6611_v51 = vld [vmem:[%s9187_s1 + $0x8f4] ss:$8 sps:$4 sm:$0xff]  }
  0xb4   : > { %657 = vmatpush1.bf16.msra.mxu1 %v6528_v46  ;;  %2769 = vmatpush1.bf16.msra.mxu0 %v6531_v47  ;;  %v709_v46 = vsel %vm708_vm3, %v705_v42, %v7642_v62  ;;  %v6600_v47 = vld [vmem:[%s9187_s1 + $0x1e0] ss:$8 sps:$4 sm:$0xff]   ;;  %v6669_v42 = vld [vmem:[%s9187_s1 + $0x990] ss:$8 sps:$4 sm:$0xff]  }
  0xb5   : > { %658 = vmatprep.subr.bf16.mxu1 %v6536_v48  ;;  %2770 = vmatprep.subr.bf16.mxu0 %v6539_v50  ;;  %v6603_v48 = vld [vmem:[%s9187_s1 + $0x8e0] ss:$8 sps:$4 sm:$0xff]   ;;  %v6608_v50 = vld [vmem:[%s9187_s1 + $0x1f4] ss:$8 sps:$4 sm:$0xff]  }
  0xb6   : > { %5763 = vmatprep.mubr.msk.bf16.mxu0 %vm490_vm0, %v7470_v2  ;;  %v6557_v2 = vld [vmem:[%s9187_s1 + $0x864] ss:$8 sps:$4 sm:$0xff]   ;;  %1777 = vrot.lane.b32.xlu0 %v7485_v7, %s7176_s24 }
  0xb7   : > { %4252 = vrot.lane.b32.xlu1 %v7745_v38, %s7174_s18 }
  0xb8   : > { %659 = vmatpush1.bf16.msra.mxu1 %v6534_v52  ;;  %2771 = vmatpush1.bf16.msra.mxu0 %v6537_v53  ;;  %v7789_v52 = vpop.permute.xlu1 %884  ;;  %v6606_v53 = vld [vmem:[%s9187_s1 + $0x1f0] ss:$8 sps:$4 sm:$0xff]  }
  0xb9   : > { %814 = vmatprep.subr.bf16.mxu1 %v6542_v54  ;;  %2772 = vmatprep.subr.bf16.mxu0 %v6545_v55  ;;  %v6609_v54 = vld [vmem:[%s9187_s1 + $0x8f0] ss:$8 sps:$4 sm:$0xff]   ;;  %v6614_v55 = vld [vmem:[%s9187_s1 + $0x204] ss:$8 sps:$4 sm:$0xff]  }
  0xba   : > { %4250 = vrot.lane.b32.xlu0 %v7748_v39, %s7174_s18 }
  0xbb   : > { %673 = vmatmul.mubr.bf16.vlgmr.msra.gmra.mrb[0].mxu1 %v7639_v61  ;;  %1956 = vrot.lane.b32.xlu1 %v7481_v6, %s7177_s23  ;;  %v6623_v61 = vld [vmem:[%s9187_s1 + $0x914] ss:$8 sps:$4 sm:$0xff]  }
  0xbc   : > { %815 = vmatpush1.bf16.msra.mxu1 %v6540_v57  ;;  %2773 = vmatpush1.bf16.msra.mxu0 %v6543_v58  ;;  %v6617_v57 = vld [vmem:[%s9187_s1 + $0x904] ss:$8 sps:$4 sm:$0xff]   ;;  %v6612_v58 = vld [vmem:[%s9187_s1 + $0x200] ss:$8 sps:$4 sm:$0xff]  }
  0xbd   : > { %816 = vmatprep.subr.bf16.mxu1 %v6548_v59  ;;  %2774 = vmatprep.subr.bf16.mxu0 %v6551_v60  ;;  %v6615_v59 = vld [vmem:[%s9187_s1 + $0x900] ss:$8 sps:$4 sm:$0xff]   ;;  %v6620_v60 = vld [vmem:[%s9187_s1 + $0x214] ss:$8 sps:$4 sm:$0xff]  }
  0xbe   : > { %5312 = vmatprep.mubr.msk.bf16.mxu1 %vm490_vm0, %v7642_v62  ;;  %1954 = vrot.lane.b32.xlu0 %v7485_v7, %s7177_s23  ;;  %v6618_v62 = vld [vmem:[%s9187_s1 + $0x210] ss:$8 sps:$4 sm:$0xff]  }
  0xbf   : > { %4429 = vrot.lane.b32.xlu1 %v7745_v38, %s7176_s24 }
  0xc0   : > { %817 = vmatpush1.bf16.msra.mxu1 %v6546_v63  ;;  %2775 = vmatpush1.bf16.msra.mxu0 %v6549_v0  ;;  %v6621_v63 = vld [vmem:[%s9187_s1 + $0x910] ss:$8 sps:$4 sm:$0xff]   ;;  %v6626_v0 = vld [vmem:[%s9187_s1 + $0x224] ss:$8 sps:$4 sm:$0xff]  }
  0xc1   : > { %818 = vmatprep.subr.bf16.mxu1 %v6554_v1  ;;  %2776 = vmatprep.subr.bf16.mxu0 %v6557_v2  ;;  %v6629_v1 = vld [vmem:[%s9187_s1 + $0x924] ss:$8 sps:$4 sm:$0xff]   ;;  %v6624_v2 = vld [vmem:[%s9187_s1 + $0x220] ss:$8 sps:$4 sm:$0xff]  }
  0xc2   : > { %4427 = vrot.lane.b32.xlu0 %v7748_v39, %s7176_s24 }
  0xc3   : > { %4606 = vrot.lane.b32.xlu1 %v7745_v38, %s7177_s23 }
  0xc4   : > { %819 = vmatpush1.bf16.msra.mxu1 %v6552_v3  ;;  %2777 = vmatpush1.bf16.msra.mxu0 %v6555_v4  ;;  %v6627_v3 = vld [vmem:[%s9187_s1 + $0x920] ss:$8 sps:$4 sm:$0xff]   ;;  %v6632_v4 = vld [vmem:[%s9187_s1 + $0x234] ss:$8 sps:$4 sm:$0xff]  }
  0xc5   : > { %820 = vmatprep.subr.bf16.mxu1 %v6560_v10  ;;  %2778 = vmatprep.subr.bf16.mxu0 %v6563_v12  ;;  %v6635_v10 = vld [vmem:[%s9187_s1 + $0x934] ss:$8 sps:$4 sm:$0xff]   ;;  %v6630_v12 = vld [vmem:[%s9187_s1 + $0x230] ss:$8 sps:$4 sm:$0xff]  }
  0xc6   : > { %4604 = vrot.lane.b32.xlu0 %v7748_v39, %s7177_s23 }
  0xc8   : > { %821 = vmatpush1.bf16.msra.mxu1 %v6558_v13  ;;  %2779 = vmatpush1.bf16.msra.mxu0 %v6561_v15  ;;  %v6633_v13 = vld [vmem:[%s9187_s1 + $0x930] ss:$8 sps:$4 sm:$0xff]   ;;  %v6638_v15 = vld [vmem:[%s9187_s1 + $0x244] ss:$8 sps:$4 sm:$0xff]  }
  0xc9   : > { %822 = vmatprep.subr.bf16.mxu1 %v6566_v8  ;;  %2780 = vmatprep.subr.bf16.mxu0 %v6569_v16  ;;  %v6641_v8 = vld [vmem:[%s9187_s1 + $0x944] ss:$8 sps:$4 sm:$0xff]   ;;  %v6636_v16 = vld [vmem:[%s9187_s1 + $0x240] ss:$8 sps:$4 sm:$0xff]  }
  0xcc   : > { %823 = vmatpush1.bf16.msra.mxu1 %v6564_v17  ;;  %2781 = vmatpush1.bf16.msra.mxu0 %v6567_v18  ;;  %v6639_v17 = vld [vmem:[%s9187_s1 + $0x940] ss:$8 sps:$4 sm:$0xff]   ;;  %v6644_v18 = vld [vmem:[%s9187_s1 + $0x254] ss:$8 sps:$4 sm:$0xff]  }
  0xcd   : > { %824 = vmatprep.subr.bf16.mxu1 %v6572_v19  ;;  %2782 = vmatprep.subr.bf16.mxu0 %v6575_v20  ;;  %v6647_v19 = vld [vmem:[%s9187_s1 + $0x954] ss:$8 sps:$4 sm:$0xff]   ;;  %v6642_v20 = vld [vmem:[%s9187_s1 + $0x250] ss:$8 sps:$4 sm:$0xff]  }
  0xd0   : > { %825 = vmatpush1.bf16.msra.mxu1 %v6570_v21  ;;  %2783 = vmatpush1.bf16.msra.mxu0 %v6573_v22  ;;  %v6645_v21 = vld [vmem:[%s9187_s1 + $0x950] ss:$8 sps:$4 sm:$0xff]   ;;  %v6650_v22 = vld [vmem:[%s9187_s1 + $0x264] ss:$8 sps:$4 sm:$0xff]  }
  0xd1   : > { %826 = vmatprep.subr.bf16.mxu1 %v6578_v23  ;;  %2784 = vmatprep.subr.bf16.mxu0 %v6581_v9  ;;  %v6653_v23 = vld [vmem:[%s9187_s1 + $0x964] ss:$8 sps:$4 sm:$0xff]   ;;  %v7893_v9 = vpop.permute.xlu0 %3191 }
  0xd4   : > { %827 = vmatpush1.bf16.msra.mxu1 %v6576_v24  ;;  %2785 = vmatpush1.bf16.msra.mxu0 %v6579_v25  ;;  %v2840_v24 = vsel %vm1064_vm4, %v7730_v32, %v7622_v56  ;;  %v6648_v25 = vld [vmem:[%s9187_s1 + $0x260] ss:$8 sps:$4 sm:$0xff]   ;;  %v6665_v32 = vld [vmem:[%s9187_s1 + $0x984] ss:$8 sps:$4 sm:$0xff]  }
  0xd5   : > { %828 = vmatprep.subr.bf16.mxu1 %v6584_v26  ;;  %2786 = vmatprep.subr.bf16.mxu0 %v6587_v27  ;;  %v6651_v26 = vld [vmem:[%s9187_s1 + $0x960] ss:$8 sps:$4 sm:$0xff]   ;;  %v6656_v27 = vld [vmem:[%s9187_s1 + $0x274] ss:$8 sps:$4 sm:$0xff]  }
  0xd8   : > { %829 = vmatpush1.bf16.msra.mxu1 %v6582_v28  ;;  %2787 = vmatpush1.bf16.msra.mxu0 %v6585_v29  ;;  %v6654_v28 = vld [vmem:[%s9187_s1 + $0x270] ss:$8 sps:$4 sm:$0xff]  }
  0xd9   : > { %830 = vmatprep.subr.bf16.mxu1 %v6590_v30  ;;  %2945 = vmatprep.subr.bf16.mxu0 %v6593_v31  ;;  %v6657_v29 = vld [vmem:[%s9187_s1 + $0x970] ss:$8 sps:$4 sm:$0xff]   ;;  %v883_v30 = vpop.permute.xlu0 %882  ;;  %v6662_v31 = vld [vmem:[%s9187_s1 + $0x284] ss:$8 sps:$4 sm:$0xff]  }
  0xdb   : > { %2801 = vmatmul.mubr.bf16.vlgmr.msra.gmra.mrb[0].mxu0 %v7477_v5  ;;  %v6602_v5 = vld [vmem:[%s9187_s1 + $0x1e4] ss:$8 sps:$4 sm:$0xff]  }
  0xdc   : > { %831 = vmatpush1.bf16.msra.mxu1 %v6588_v33  ;;  %2946 = vmatpush1.bf16.msra.mxu0 %v6591_v34  ;;  %v7922_v33 = vpop.permute.xlu1 %3370  ;;  %v887_v34 = vsel %vm886_vm2, %v883_v30, %v7789_v52  ;;  %v6737_v30 = vld [vmem:[%s9187_s1 + $0xa44] ss:$8 sps:$4 sm:$0xff]  }
  0xdd   : > { %832 = vmatprep.subr.bf16.mxu1 %v6596_v35  ;;  %2947 = vmatprep.subr.bf16.mxu0 %v6599_v36  ;;  %v6660_v35 = vld [vmem:[%s9187_s1 + $0x280] ss:$8 sps:$4 sm:$0xff]  }
  0xde   : > { %5804 = vmatprep.mubr.msk.bf16.mxu0 %vm490_vm0, %v7622_v56  ;;  %v6659_v56 = vld [vmem:[%s9187_s1 + $0x974] ss:$8 sps:$4 sm:$0xff]   ;;  %v6663_v36 = vld [vmem:[%s9187_s1 + $0x980] ss:$8 sps:$4 sm:$0xff]  }
  0xe0   : > { %833 = vmatpush1.bf16.msra.mxu1 %v6594_v40  ;;  %2948 = vmatpush1.bf16.msra.mxu0 %v6597_v41  ;;  %v7940_v40 = vpop.permute.xlu1 %1062  ;;  %v6666_v41 = vld [vmem:[%s9187_s1 + $0x290] ss:$8 sps:$4 sm:$0xff]  }
  0xe1   : > { %992 = vmatprep.subr.bf16.mxu1 %v6602_v5  ;;  %2949 = vmatprep.subr.bf16.mxu0 %v6605_v43  ;;  %v6674_v5 = vld [vmem:[%s9187_s1 + $0x2a4] ss:$8 sps:$4 sm:$0xff]  }
  0xe2   : > { %v6677_v43 = vld [vmem:[%s9187_s1 + $0x9a4] ss:$8 sps:$4 sm:$0xff]  }
  0xe3   : > { %847 = vmatmul.mubr.bf16.vlgmr.msra.gmra.mrb[0].mxu1 %v709_v46  ;;  %v6672_v46 = vld [vmem:[%s9187_s1 + $0x2a0] ss:$8 sps:$4 sm:$0xff]  }
  0xe4   : > { %993 = vmatpush1.bf16.msra.mxu1 %v6600_v47  ;;  %2950 = vmatpush1.bf16.msra.mxu0 %v6603_v48  ;;  %v6675_v47 = vld [vmem:[%s9187_s1 + $0x9a0] ss:$8 sps:$4 sm:$0xff]   ;;  %v6680_v48 = vld [vmem:[%s9187_s1 + $0x2b4] ss:$8 sps:$4 sm:$0xff]  }
  0xe5   : > { %994 = vmatprep.subr.bf16.mxu1 %v6608_v50  ;;  %2951 = vmatprep.subr.bf16.mxu0 %v6611_v51  ;;  %v6683_v50 = vld [vmem:[%s9187_s1 + $0x9b4] ss:$8 sps:$4 sm:$0xff]   ;;  %v6678_v51 = vld [vmem:[%s9187_s1 + $0x2b0] ss:$8 sps:$4 sm:$0xff]  }
  0xe6   : > { %5353 = vmatprep.mubr.msk.bf16.mxu1 %vm490_vm0, %v7789_v52  ;;  %v6681_v52 = vld [vmem:[%s9187_s1 + $0x9b0] ss:$8 sps:$4 sm:$0xff]  }
  0xe8   : > { %995 = vmatpush1.bf16.msra.mxu1 %v6606_v53  ;;  %2952 = vmatpush1.bf16.msra.mxu0 %v6609_v54  ;;  %v6686_v53 = vld [vmem:[%s9187_s1 + $0x2c4] ss:$8 sps:$4 sm:$0xff]  }
  0xe9   : > { %996 = vmatprep.subr.bf16.mxu1 %v6614_v55  ;;  %2953 = vmatprep.subr.bf16.mxu0 %v6617_v57  ;;  %v6689_v54 = vld [vmem:[%s9187_s1 + $0x9c4] ss:$8 sps:$4 sm:$0xff]   ;;  %v6684_v55 = vld [vmem:[%s9187_s1 + $0x2c0] ss:$8 sps:$4 sm:$0xff]  }
  0xea   : > { %v6687_v57 = vld [vmem:[%s9187_s1 + $0x9c0] ss:$8 sps:$4 sm:$0xff]  }
  0xec   : > { %997 = vmatpush1.bf16.msra.mxu1 %v6612_v58  ;;  %2954 = vmatpush1.bf16.msra.mxu0 %v6615_v59  ;;  %v6692_v58 = vld [vmem:[%s9187_s1 + $0x2d4] ss:$8 sps:$4 sm:$0xff]  }
  0xed   : > { %998 = vmatprep.subr.bf16.mxu1 %v6620_v60  ;;  %2955 = vmatprep.subr.bf16.mxu0 %v6623_v61  ;;  %v6695_v59 = vld [vmem:[%s9187_s1 + $0x9d4] ss:$8 sps:$4 sm:$0xff]   ;;  %v6690_v60 = vld [vmem:[%s9187_s1 + $0x2d0] ss:$8 sps:$4 sm:$0xff]  }
  0xee   : > { %v6693_v61 = vld [vmem:[%s9187_s1 + $0x9d0] ss:$8 sps:$4 sm:$0xff]  }
  0xf0   : > { %999 = vmatpush1.bf16.msra.mxu1 %v6618_v62  ;;  %2956 = vmatpush1.bf16.msra.mxu0 %v6621_v63  ;;  %v6698_v62 = vld [vmem:[%s9187_s1 + $0x2e4] ss:$8 sps:$4 sm:$0xff]  }
  0xf1   : > { %1000 = vmatprep.subr.bf16.mxu1 %v6626_v0  ;;  %2957 = vmatprep.subr.bf16.mxu0 %v6629_v1  ;;  %v6701_v63 = vld [vmem:[%s9187_s1 + $0x9e4] ss:$8 sps:$4 sm:$0xff]   ;;  %v6696_v0 = vld [vmem:[%s9187_s1 + $0x2e0] ss:$8 sps:$4 sm:$0xff]  }
  0xf2   : > { %v6699_v1 = vld [vmem:[%s9187_s1 + $0x9e0] ss:$8 sps:$4 sm:$0xff]  }
  0xf4   : > { %1001 = vmatpush1.bf16.msra.mxu1 %v6624_v2  ;;  %2958 = vmatpush1.bf16.msra.mxu0 %v6627_v3  ;;  %v6704_v2 = vld [vmem:[%s9187_s1 + $0x2f4] ss:$8 sps:$4 sm:$0xff]  }
  0xf5   : > { %1002 = vmatprep.subr.bf16.mxu1 %v6632_v4  ;;  %2959 = vmatprep.subr.bf16.mxu0 %v6635_v10  ;;  %v6707_v3 = vld [vmem:[%s9187_s1 + $0x9f4] ss:$8 sps:$4 sm:$0xff]   ;;  %v6702_v4 = vld [vmem:[%s9187_s1 + $0x2f0] ss:$8 sps:$4 sm:$0xff]  }
  0xf6   : > { %v6705_v10 = vld [vmem:[%s9187_s1 + $0x9f0] ss:$8 sps:$4 sm:$0xff]  }
  0xf8   : > { %1003 = vmatpush1.bf16.msra.mxu1 %v6630_v12  ;;  %2960 = vmatpush1.bf16.msra.mxu0 %v6633_v13  ;;  %v6710_v12 = vld [vmem:[%s9187_s1 + $0x304] ss:$8 sps:$4 sm:$0xff]  }
  0xf9   : > { %1004 = vmatprep.subr.bf16.mxu1 %v6638_v15  ;;  %2961 = vmatprep.subr.bf16.mxu0 %v6641_v8  ;;  %v6713_v13 = vld [vmem:[%s9187_s1 + $0xa04] ss:$8 sps:$4 sm:$0xff]   ;;  %v8028_v15 = vpop.permute.xlu0 %3368  ;;  %v6708_v8 = vld [vmem:[%s9187_s1 + $0x300] ss:$8 sps:$4 sm:$0xff]  }
  0xfc   : > { %1005 = vmatpush1.bf16.msra.mxu1 %v6636_v16  ;;  %2962 = vmatpush1.bf16.msra.mxu0 %v6639_v17  ;;  %v6711_v16 = vld [vmem:[%s9187_s1 + $0xa00] ss:$8 sps:$4 sm:$0xff]   ;;  %v6716_v17 = vld [vmem:[%s9187_s1 + $0x314] ss:$8 sps:$4 sm:$0xff]  }
  0xfd   : > { %1006 = vmatprep.subr.bf16.mxu1 %v6644_v18  ;;  %2963 = vmatprep.subr.bf16.mxu0 %v6647_v19  ;;  %v6719_v18 = vld [vmem:[%s9187_s1 + $0xa14] ss:$8 sps:$4 sm:$0xff]   ;;  %v6714_v19 = vld [vmem:[%s9187_s1 + $0x310] ss:$8 sps:$4 sm:$0xff]  }
 0x100   : > { %1007 = vmatpush1.bf16.msra.mxu1 %v6642_v20  ;;  %2964 = vmatpush1.bf16.msra.mxu0 %v6645_v21  ;;  %v6717_v20 = vld [vmem:[%s9187_s1 + $0xa10] ss:$8 sps:$4 sm:$0xff]   ;;  %v1061_v21 = vpop.permute.xlu0 %1060 }
 0x101   : > { %1008 = vmatprep.subr.bf16.mxu1 %v6650_v22  ;;  %3123 = vmatprep.subr.bf16.mxu0 %v6653_v23  ;;  %v6722_v22 = vld [vmem:[%s9187_s1 + $0x324] ss:$8 sps:$4 sm:$0xff]   ;;  %v1065_v23 = vsel %vm1064_vm4, %v1061_v21, %v7940_v40  ;;  %v6800_v21 = vld [vmem:[%s9187_s1 + $0x3f4] ss:$8 sps:$4 sm:$0xff]  }
 0x103   : > { %2978 = vmatmul.mubr.bf16.vlgmr.msra.gmra.mrb[0].mxu0 %v2840_v24  ;;  %v6720_v24 = vld [vmem:[%s9187_s1 + $0x320] ss:$8 sps:$4 sm:$0xff]  }
 0x104   : > { %1009 = vmatpush1.bf16.msra.mxu1 %v6648_v25  ;;  %3124 = vmatpush1.bf16.msra.mxu0 %v6651_v26  ;;  %v6723_v25 = vld [vmem:[%s9187_s1 + $0xa20] ss:$8 sps:$4 sm:$0xff]   ;;  %v6728_v26 = vld [vmem:[%s9187_s1 + $0x334] ss:$8 sps:$4 sm:$0xff]  }
 0x105   : > { %1010 = vmatprep.subr.bf16.mxu1 %v6656_v27  ;;  %3125 = vmatprep.subr.bf16.mxu0 %v6659_v56  ;;  %v6731_v27 = vld [vmem:[%s9187_s1 + $0xa34] ss:$8 sps:$4 sm:$0xff]   ;;  %v6726_v56 = vld [vmem:[%s9187_s1 + $0x330] ss:$8 sps:$4 sm:$0xff]  }
 0x106   : > { %5845 = vmatprep.mubr.msk.bf16.mxu0 %vm490_vm0, %v7394_v45  ;;  %v6671_v45 = vld [vmem:[%s9187_s1 + $0x994] ss:$8 sps:$4 sm:$0xff]  }
 0x108   : > { %1011 = vmatpush1.bf16.msra.mxu1 %v6654_v28  ;;  %3126 = vmatpush1.bf16.msra.mxu0 %v6657_v29  ;;  %v6729_v28 = vld [vmem:[%s9187_s1 + $0xa30] ss:$8 sps:$4 sm:$0xff]   ;;  %v6734_v29 = vld [vmem:[%s9187_s1 + $0x344] ss:$8 sps:$4 sm:$0xff]  }
 0x109   : > { %1170 = vmatprep.subr.bf16.mxu1 %v6662_v31  ;;  %3127 = vmatprep.subr.bf16.mxu0 %v6665_v32  ;;  %v6732_v31 = vld [vmem:[%s9187_s1 + $0x340] ss:$8 sps:$4 sm:$0xff]  }
 0x10a   : > { %v6735_v32 = vld [vmem:[%s9187_s1 + $0xa40] ss:$8 sps:$4 sm:$0xff]  }
 0x10b   : > { %1025 = vmatmul.mubr.bf16.vlgmr.msra.gmra.mrb[0].mxu1 %v887_v34  ;;  %v6740_v34 = vld [vmem:[%s9187_s1 + $0x354] ss:$8 sps:$4 sm:$0xff]  }
 0x10c   : > { %3128 = vmatpush1.bf16.msra.mxu0 %v6663_v36  ;;  %1171 = vmatpush1.bf16.msra.mxu1 %v6660_v35  ;;  %v6738_v35 = vld [vmem:[%s9187_s1 + $0x350] ss:$8 sps:$4 sm:$0xff]  }
 0x10d   : > { %1172 = vmatprep.subr.bf16.mxu1 %v6668_v37  ;;  %3129 = vmatprep.subr.bf16.mxu0 %v6671_v45  ;;  %v6741_v36 = vld [vmem:[%s9187_s1 + $0xa50] ss:$8 sps:$4 sm:$0xff]   ;;  %v6746_v37 = vld [vmem:[%s9187_s1 + $0x364] ss:$8 sps:$4 sm:$0xff]  }
 0x10e   : > { %5394 = vmatprep.mubr.msk.bf16.mxu1 %vm490_vm0, %v7940_v40  ;;  %v6749_v45 = vld [vmem:[%s9187_s1 + $0xa64] ss:$8 sps:$4 sm:$0xff]   ;;  %v6744_v40 = vld [vmem:[%s9187_s1 + $0x360] ss:$8 sps:$4 sm:$0xff]  }
 0x110   : > { %1173 = vmatpush1.bf16.msra.mxu1 %v6666_v41  ;;  %3130 = vmatpush1.bf16.msra.mxu0 %v6669_v42  ;;  %v6747_v41 = vld [vmem:[%s9187_s1 + $0xa60] ss:$8 sps:$4 sm:$0xff]   ;;  %v6752_v42 = vld [vmem:[%s9187_s1 + $0x374] ss:$8 sps:$4 sm:$0xff]  }
 0x111   : > { %1174 = vmatprep.subr.bf16.mxu1 %v6674_v5  ;;  %3131 = vmatprep.subr.bf16.mxu0 %v6677_v43  ;;  %v6755_v5 = vld [vmem:[%s9187_s1 + $0xa74] ss:$8 sps:$4 sm:$0xff]   ;;  %v6750_v43 = vld [vmem:[%s9187_s1 + $0x370] ss:$8 sps:$4 sm:$0xff]  }
 0x114   : > { %1175 = vmatpush1.bf16.msra.mxu1 %v6672_v46  ;;  %3132 = vmatpush1.bf16.msra.mxu0 %v6675_v47  ;;  %v6753_v46 = vld [vmem:[%s9187_s1 + $0xa70] ss:$8 sps:$4 sm:$0xff]   ;;  %v6758_v47 = vld [vmem:[%s9187_s1 + $0x384] ss:$8 sps:$4 sm:$0xff]  }
 0x115   : > { %1176 = vmatprep.subr.bf16.mxu1 %v6680_v48  ;;  %3133 = vmatprep.subr.bf16.mxu0 %v6683_v50  ;;  %v6761_v48 = vld [vmem:[%s9187_s1 + $0xa84] ss:$8 sps:$4 sm:$0xff]   ;;  %v6756_v50 = vld [vmem:[%s9187_s1 + $0x380] ss:$8 sps:$4 sm:$0xff]  }
 0x118   : > { %1177 = vmatpush1.bf16.msra.mxu1 %v6678_v51  ;;  %3134 = vmatpush1.bf16.msra.mxu0 %v6681_v52  ;;  %v6759_v51 = vld [vmem:[%s9187_s1 + $0xa80] ss:$8 sps:$4 sm:$0xff]   ;;  %v6764_v52 = vld [vmem:[%s9187_s1 + $0x394] ss:$8 sps:$4 sm:$0xff]  }
 0x119   : > { %1178 = vmatprep.subr.bf16.mxu1 %v6686_v53  ;;  %3135 = vmatprep.subr.bf16.mxu0 %v6689_v54  ;;  %v6767_v53 = vld [vmem:[%s9187_s1 + $0xa94] ss:$8 sps:$4 sm:$0xff]   ;;  %v6762_v54 = vld [vmem:[%s9187_s1 + $0x390] ss:$8 sps:$4 sm:$0xff]  }
 0x11c   : > { %1179 = vmatpush1.bf16.msra.mxu1 %v6684_v55  ;;  %3136 = vmatpush1.bf16.msra.mxu0 %v6687_v57  ;;  %v6765_v55 = vld [vmem:[%s9187_s1 + $0xa90] ss:$8 sps:$4 sm:$0xff]   ;;  %v6770_v57 = vld [vmem:[%s9187_s1 + $0x3a4] ss:$8 sps:$4 sm:$0xff]  }
 0x11d   : > { %1180 = vmatprep.subr.bf16.mxu1 %v6692_v58  ;;  %3137 = vmatprep.subr.bf16.mxu0 %v6695_v59  ;;  %v6773_v58 = vld [vmem:[%s9187_s1 + $0xaa4] ss:$8 sps:$4 sm:$0xff]   ;;  %v8157_v59 = vpop.permute.xlu1 %3547 }
 0x120   : > { %1181 = vmatpush1.bf16.msra.mxu1 %v6690_v60  ;;  %3138 = vmatpush1.bf16.msra.mxu0 %v6693_v61  ;;  %v3195_v60 = vsel %vm387_vm1, %v7893_v9, %v7765_v44  ;;  %v6768_v61 = vld [vmem:[%s9187_s1 + $0x3a0] ss:$8 sps:$4 sm:$0xff]   ;;  %v6774_v9 = vld [vmem:[%s9187_s1 + $0x3b0] ss:$8 sps:$4 sm:$0xff]  }
 0x121   : > { %1182 = vmatprep.subr.bf16.mxu1 %v6698_v62  ;;  %3139 = vmatprep.subr.bf16.mxu0 %v6701_v63  ;;  %v6771_v62 = vld [vmem:[%s9187_s1 + $0xaa0] ss:$8 sps:$4 sm:$0xff]   ;;  %v6776_v63 = vld [vmem:[%s9187_s1 + $0x3b4] ss:$8 sps:$4 sm:$0xff]  }
 0x124   : > { %1183 = vmatpush1.bf16.msra.mxu1 %v6696_v0  ;;  %3140 = vmatpush1.bf16.msra.mxu0 %v6699_v1  ;;  %v6777_v0 = vld [vmem:[%s9187_s1 + $0xab0] ss:$8 sps:$4 sm:$0xff]   ;;  %v6782_v1 = vld [vmem:[%s9187_s1 + $0x3c4] ss:$8 sps:$4 sm:$0xff]  }
 0x125   : > { %1184 = vmatprep.subr.bf16.mxu1 %v6704_v2  ;;  %3141 = vmatprep.subr.bf16.mxu0 %v6707_v3  ;;  %v6785_v2 = vld [vmem:[%s9187_s1 + $0xac4] ss:$8 sps:$4 sm:$0xff]   ;;  %v8186_v3 = vpop.permute.xlu1 %3724 }
 0x128   : > { %1185 = vmatpush1.bf16.msra.mxu1 %v6702_v4  ;;  %3142 = vmatpush1.bf16.msra.mxu0 %v6705_v10  ;;  %v6780_v4 = vld [vmem:[%s9187_s1 + $0x3c0] ss:$8 sps:$4 sm:$0xff]  }
 0x129   : > { %1186 = vmatprep.subr.bf16.mxu1 %v6710_v12  ;;  %3300 = vmatprep.subr.bf16.mxu0 %v6713_v13  ;;  %v6783_v10 = vld [vmem:[%s9187_s1 + $0xac0] ss:$8 sps:$4 sm:$0xff]   ;;  %v6788_v12 = vld [vmem:[%s9187_s1 + $0x3d4] ss:$8 sps:$4 sm:$0xff]  }
 0x12a   : > { %v6791_v13 = vld [vmem:[%s9187_s1 + $0xad4] ss:$8 sps:$4 sm:$0xff]  }
 0x12b   : > { %3156 = vmatmul.mubr.bf16.vlgmr.msra.gmra.mrb[0].mxu0 %v7405_v49  ;;  %v6725_v49 = vld [vmem:[%s9187_s1 + $0xa24] ss:$8 sps:$4 sm:$0xff]  }
 0x12c   : > { %1187 = vmatpush1.bf16.msra.mxu1 %v6708_v8  ;;  %3301 = vmatpush1.bf16.msra.mxu0 %v6711_v16  ;;  %v8203_v8 = vpop.permute.xlu1 %1425  ;;  %v6786_v16 = vld [vmem:[%s9187_s1 + $0x3d0] ss:$8 sps:$4 sm:$0xff]  }
 0x12d   : > { %1188 = vmatprep.subr.bf16.mxu1 %v6716_v17  ;;  %3302 = vmatprep.subr.bf16.mxu0 %v6719_v18  ;;  %v6789_v17 = vld [vmem:[%s9187_s1 + $0xad0] ss:$8 sps:$4 sm:$0xff]   ;;  %v6794_v18 = vld [vmem:[%s9187_s1 + $0x3e4] ss:$8 sps:$4 sm:$0xff]  }
 0x12e   : > { %5886 = vmatprep.mubr.msk.bf16.mxu0 %vm490_vm0, %v7765_v44  ;;  %v6779_v44 = vld [vmem:[%s9187_s1 + $0xab4] ss:$8 sps:$4 sm:$0xff]  }
 0x130   : > { %1189 = vmatpush1.bf16.msra.mxu1 %v6714_v19  ;;  %3303 = vmatpush1.bf16.msra.mxu0 %v6717_v20  ;;  %v6792_v19 = vld [vmem:[%s9187_s1 + $0x3e0] ss:$8 sps:$4 sm:$0xff]  }
 0x131   : > { %1355 = vmatprep.subr.bf16.mxu1 %v6722_v22  ;;  %3304 = vmatprep.subr.bf16.mxu0 %v6725_v49  ;;  %v6795_v20 = vld [vmem:[%s9187_s1 + $0xae0] ss:$8 sps:$4 sm:$0xff]   ;;  %v6803_v22 = vld [vmem:[%s9187_s1 + $0xaf4] ss:$8 sps:$4 sm:$0xff]   ;;  %v6798_v49 = vld [vmem:[%s9187_s1 + $0x3f0] ss:$8 sps:$4 sm:$0xff]  }
 0x133   : > { %1203 = vmatmul.mubr.bf16.vlgmr.msra.gmra.mrb[0].mxu1 %v1065_v23  ;;  %v6801_v23 = vld [vmem:[%s9187_s1 + $0xaf0] ss:$8 sps:$4 sm:$0xff]  }
 0x134   : > { %1356 = vmatpush1.bf16.msra.mxu1 %v6720_v24  ;;  %3305 = vmatpush1.bf16.msra.mxu0 %v6723_v25  ;;  %v6806_v24 = vld [vmem:[%s9187_s1 + $0x404] ss:$8 sps:$4 sm:$0xff]  }
 0x135   : > { %1357 = vmatprep.subr.bf16.mxu1 %v6728_v26  ;;  %3306 = vmatprep.subr.bf16.mxu0 %v6731_v27  ;;  %v6809_v25 = vld [vmem:[%s9187_s1 + $0xb04] ss:$8 sps:$4 sm:$0xff]   ;;  %v6804_v26 = vld [vmem:[%s9187_s1 + $0x400] ss:$8 sps:$4 sm:$0xff]  }
 0x136   : > { %5435 = vmatprep.mubr.msk.bf16.mxu1 %vm490_vm0, %v7481_v6  ;;  %v6743_v6 = vld [vmem:[%s9187_s1 + $0xa54] ss:$8 sps:$4 sm:$0xff]   ;;  %v6807_v27 = vld [vmem:[%s9187_s1 + $0xb00] ss:$8 sps:$4 sm:$0xff]  }
 0x138   : > { %1358 = vmatpush1.bf16.msra.mxu1 %v6726_v56  ;;  %3307 = vmatpush1.bf16.msra.mxu0 %v6729_v28  ;;  %v6812_v56 = vld [vmem:[%s9187_s1 + $0x414] ss:$8 sps:$4 sm:$0xff]  }
 0x139   : > { %1359 = vmatprep.subr.bf16.mxu1 %v6734_v29  ;;  %3308 = vmatprep.subr.bf16.mxu0 %v6737_v30  ;;  %v6815_v28 = vld [vmem:[%s9187_s1 + $0xb14] ss:$8 sps:$4 sm:$0xff]   ;;  %v6810_v29 = vld [vmem:[%s9187_s1 + $0x410] ss:$8 sps:$4 sm:$0xff]  }
 0x13a   : > { %v6813_v30 = vld [vmem:[%s9187_s1 + $0xb10] ss:$8 sps:$4 sm:$0xff]  }
 0x13c   : > { %1360 = vmatpush1.bf16.msra.mxu1 %v6732_v31  ;;  %3309 = vmatpush1.bf16.msra.mxu0 %v6735_v32  ;;  %v6818_v31 = vld [vmem:[%s9187_s1 + $0x424] ss:$8 sps:$4 sm:$0xff]  }
 0x13d   : > { %1361 = vmatprep.subr.bf16.mxu1 %v6740_v34  ;;  %3310 = vmatprep.subr.bf16.mxu0 %v6743_v6  ;;  %v6821_v32 = vld [vmem:[%s9187_s1 + $0xb24] ss:$8 sps:$4 sm:$0xff]   ;;  %v6816_v34 = vld [vmem:[%s9187_s1 + $0x420] ss:$8 sps:$4 sm:$0xff]  }
 0x13e   : > { %v6819_v6 = vld [vmem:[%s9187_s1 + $0xb20] ss:$8 sps:$4 sm:$0xff]  }
 0x140   : > { %1362 = vmatpush1.bf16.msra.mxu1 %v6738_v35  ;;  %3311 = vmatpush1.bf16.msra.mxu0 %v6741_v36  ;;  %v6824_v35 = vld [vmem:[%s9187_s1 + $0x434] ss:$8 sps:$4 sm:$0xff]  }
 0x141   : > { %1363 = vmatprep.subr.bf16.mxu1 %v6746_v37  ;;  %3312 = vmatprep.subr.bf16.mxu0 %v6749_v45  ;;  %v6827_v36 = vld [vmem:[%s9187_s1 + $0xb34] ss:$8 sps:$4 sm:$0xff]   ;;  %v8279_v37 = vpop.permute.xlu0 %3545  ;;  %v6822_v45 = vld [vmem:[%s9187_s1 + $0x430] ss:$8 sps:$4 sm:$0xff]  }
 0x144   : > { %1364 = vmatpush1.bf16.msra.mxu1 %v6744_v40  ;;  %3313 = vmatpush1.bf16.msra.mxu0 %v6747_v41  ;;  %v6825_v40 = vld [vmem:[%s9187_s1 + $0xb30] ss:$8 sps:$4 sm:$0xff]   ;;  %v6830_v41 = vld [vmem:[%s9187_s1 + $0x444] ss:$8 sps:$4 sm:$0xff]  }
 0x145   : > { %1365 = vmatprep.subr.bf16.mxu1 %v6752_v42  ;;  %3314 = vmatprep.subr.bf16.mxu0 %v6755_v5  ;;  %v6833_v42 = vld [vmem:[%s9187_s1 + $0xb44] ss:$8 sps:$4 sm:$0xff]   ;;  %v8293_v5 = vpop.permute.xlu0 %3722 }
 0x148   : > { %1366 = vmatpush1.bf16.msra.mxu1 %v6750_v43  ;;  %3315 = vmatpush1.bf16.msra.mxu0 %v6753_v46  ;;  %v3372_v43 = vsel %vm708_vm3, %v8028_v15, %v7922_v33  ;;  %v6828_v46 = vld [vmem:[%s9187_s1 + $0x440] ss:$8 sps:$4 sm:$0xff]   ;;  %v6834_v15 = vld [vmem:[%s9187_s1 + $0x450] ss:$8 sps:$4 sm:$0xff]  }
 0x149   : > { %1367 = vmatprep.subr.bf16.mxu1 %v6758_v47  ;;  %3316 = vmatprep.subr.bf16.mxu0 %v6761_v48  ;;  %v6831_v47 = vld [vmem:[%s9187_s1 + $0xb40] ss:$8 sps:$4 sm:$0xff]   ;;  %v6836_v48 = vld [vmem:[%s9187_s1 + $0x454] ss:$8 sps:$4 sm:$0xff]  }
 0x14c   : > { %1368 = vmatpush1.bf16.msra.mxu1 %v6756_v50  ;;  %3317 = vmatpush1.bf16.msra.mxu0 %v6759_v51  ;;  %v6837_v50 = vld [vmem:[%s9187_s1 + $0xb50] ss:$8 sps:$4 sm:$0xff]   ;;  %v1424_v51 = vpop.permute.xlu0 %1423 }
 0x14d   : > { %1369 = vmatprep.subr.bf16.mxu1 %v6764_v52  ;;  %3318 = vmatprep.subr.bf16.mxu0 %v6767_v53  ;;  %v6842_v52 = vld [vmem:[%s9187_s1 + $0x464] ss:$8 sps:$4 sm:$0xff]  }
 0x14e   : > { %v6845_v53 = vld [vmem:[%s9187_s1 + $0xb64] ss:$8 sps:$4 sm:$0xff]  }
 0x150   : > { %1370 = vmatpush1.bf16.msra.mxu1 %v6762_v54  ;;  %3319 = vmatpush1.bf16.msra.mxu0 %v6765_v55  ;;  %v1427_v54 = vsel %vm387_vm1, %v1424_v51, %v8203_v8  ;;  %v6840_v55 = vld [vmem:[%s9187_s1 + $0x460] ss:$8 sps:$4 sm:$0xff]  }
 0x151   : > { %1371 = vmatprep.subr.bf16.mxu1 %v6770_v57  ;;  %3477 = vmatprep.subr.bf16.mxu0 %v6773_v58  ;;  %v6843_v57 = vld [vmem:[%s9187_s1 + $0xb60] ss:$8 sps:$4 sm:$0xff]   ;;  %v6848_v58 = vld [vmem:[%s9187_s1 + $0x474] ss:$8 sps:$4 sm:$0xff]  }
 0x152   : > { %v6912_v51 = vld [vmem:[%s9187_s1 + $0x520] ss:$8 sps:$4 sm:$0xff]  }
 0x153   : > { %3333 = vmatmul.mubr.bf16.vlgmr.msra.gmra.mrb[0].mxu0 %v3195_v60  ;;  %v6851_v60 = vld [vmem:[%s9187_s1 + $0xb74] ss:$8 sps:$4 sm:$0xff]  }
 0x154   : > { %1372 = vmatpush1.bf16.msra.mxu1 %v6768_v61  ;;  %3478 = vmatpush1.bf16.msra.mxu0 %v6771_v62  ;;  %v8338_v61 = vpop.permute.xlu1 %1602  ;;  %v6846_v62 = vld [vmem:[%s9187_s1 + $0x470] ss:$8 sps:$4 sm:$0xff]  }
 0x155   : > { %1373 = vmatprep.subr.bf16.mxu1 %v6776_v63  ;;  %3479 = vmatprep.subr.bf16.mxu0 %v6779_v44  ;;  %v6849_v63 = vld [vmem:[%s9187_s1 + $0xb70] ss:$8 sps:$4 sm:$0xff]   ;;  %v6854_v44 = vld [vmem:[%s9187_s1 + $0x484] ss:$8 sps:$4 sm:$0xff]  }
 0x156   : > { %5927 = vmatprep.mubr.msk.bf16.mxu0 %vm490_vm0, %v7922_v33  ;;  %v6839_v33 = vld [vmem:[%s9187_s1 + $0xb54] ss:$8 sps:$4 sm:$0xff]  }
 0x158   : > { %1374 = vmatpush1.bf16.msra.mxu1 %v6774_v9  ;;  %3480 = vmatpush1.bf16.msra.mxu0 %v6777_v0  ;;  %v6857_v9 = vld [vmem:[%s9187_s1 + $0xb84] ss:$8 sps:$4 sm:$0xff]   ;;  %v6852_v0 = vld [vmem:[%s9187_s1 + $0x480] ss:$8 sps:$4 sm:$0xff]  }
 0x159   : > { %1532 = vmatprep.subr.bf16.mxu1 %v6782_v1  ;;  %3481 = vmatprep.subr.bf16.mxu0 %v6785_v2  ;;  %v6855_v1 = vld [vmem:[%s9187_s1 + $0xb80] ss:$8 sps:$4 sm:$0xff]   ;;  %v6860_v2 = vld [vmem:[%s9187_s1 + $0x494] ss:$8 sps:$4 sm:$0xff]  }
 0x15b   : > { %1388 = vmatmul.mubr.bf16.vlgmr.msra.gmra.mrb[0].mxu1 %v7485_v7  ;;  %v6797_v7 = vld [vmem:[%s9187_s1 + $0xae4] ss:$8 sps:$4 sm:$0xff]  }
 0x15c   : > { %3482 = vmatpush1.bf16.msra.mxu0 %v6783_v10  ;;  %1533 = vmatpush1.bf16.msra.mxu1 %v6780_v4  ;;  %v6863_v4 = vld [vmem:[%s9187_s1 + $0xb94] ss:$8 sps:$4 sm:$0xff]   ;;  %v6858_v10 = vld [vmem:[%s9187_s1 + $0x490] ss:$8 sps:$4 sm:$0xff]  }
 0x15d   : > { %1534 = vmatprep.subr.bf16.mxu1 %v6788_v12  ;;  %3483 = vmatprep.subr.bf16.mxu0 %v6791_v13  ;;  %v6861_v12 = vld [vmem:[%s9187_s1 + $0xb90] ss:$8 sps:$4 sm:$0xff]   ;;  %v6866_v13 = vld [vmem:[%s9187_s1 + $0x4a4] ss:$8 sps:$4 sm:$0xff]  }
 0x15e   : > { %5476 = vmatprep.mubr.msk.bf16.mxu1 %vm490_vm0, %v8203_v8  ;;  %v6869_v8 = vld [vmem:[%s9187_s1 + $0xba4] ss:$8 sps:$4 sm:$0xff]  }
 0x160   : > { %3484 = vmatpush1.bf16.msra.mxu0 %v6789_v17  ;;  %1535 = vmatpush1.bf16.msra.mxu1 %v6786_v16  ;;  %v6864_v16 = vld [vmem:[%s9187_s1 + $0x4a0] ss:$8 sps:$4 sm:$0xff]  }
 0x161   : > { %1536 = vmatprep.subr.bf16.mxu1 %v6794_v18  ;;  %3485 = vmatprep.subr.bf16.mxu0 %v6797_v7  ;;  %v6867_v17 = vld [vmem:[%s9187_s1 + $0xba0] ss:$8 sps:$4 sm:$0xff]   ;;  %v6872_v18 = vld [vmem:[%s9187_s1 + $0x4b4] ss:$8 sps:$4 sm:$0xff]  }
 0x162   : > { %v6875_v7 = vld [vmem:[%s9187_s1 + $0xbb4] ss:$8 sps:$4 sm:$0xff]  }
 0x164   : > { %1537 = vmatpush1.bf16.msra.mxu1 %v6792_v19  ;;  %3486 = vmatpush1.bf16.msra.mxu0 %v6795_v20  ;;  %v6870_v19 = vld [vmem:[%s9187_s1 + $0x4b0] ss:$8 sps:$4 sm:$0xff]  }
 0x165   : > { %1538 = vmatprep.subr.bf16.mxu1 %v6800_v21  ;;  %3487 = vmatprep.subr.bf16.mxu0 %v6803_v22  ;;  %v6873_v20 = vld [vmem:[%s9187_s1 + $0xbb0] ss:$8 sps:$4 sm:$0xff]   ;;  %v6878_v21 = vld [vmem:[%s9187_s1 + $0x4c4] ss:$8 sps:$4 sm:$0xff]  }
 0x166   : > { %v6881_v22 = vld [vmem:[%s9187_s1 + $0xbc4] ss:$8 sps:$4 sm:$0xff]  }
 0x168   : > { %1539 = vmatpush1.bf16.msra.mxu1 %v6798_v49  ;;  %3488 = vmatpush1.bf16.msra.mxu0 %v6801_v23  ;;  %v6876_v49 = vld [vmem:[%s9187_s1 + $0x4c0] ss:$8 sps:$4 sm:$0xff]  }
 0x169   : > { %1540 = vmatprep.subr.bf16.mxu1 %v6806_v24  ;;  %3489 = vmatprep.subr.bf16.mxu0 %v6809_v25  ;;  %v6879_v23 = vld [vmem:[%s9187_s1 + $0xbc0] ss:$8 sps:$4 sm:$0xff]   ;;  %v6884_v24 = vld [vmem:[%s9187_s1 + $0x4d4] ss:$8 sps:$4 sm:$0xff]  }
 0x16a   : > { %v6887_v25 = vld [vmem:[%s9187_s1 + $0xbd4] ss:$8 sps:$4 sm:$0xff]  }
 0x16c   : > { %1541 = vmatpush1.bf16.msra.mxu1 %v6804_v26  ;;  %3490 = vmatpush1.bf16.msra.mxu0 %v6807_v27  ;;  %v6882_v26 = vld [vmem:[%s9187_s1 + $0x4d0] ss:$8 sps:$4 sm:$0xff]  }
 0x16d   : > { %1542 = vmatprep.subr.bf16.mxu1 %v6812_v56  ;;  %3491 = vmatprep.subr.bf16.mxu0 %v6815_v28  ;;  %v6885_v27 = vld [vmem:[%s9187_s1 + $0xbd0] ss:$8 sps:$4 sm:$0xff]   ;;  %v6890_v56 = vld [vmem:[%s9187_s1 + $0x4e4] ss:$8 sps:$4 sm:$0xff]  }
 0x16e   : > { %v6893_v28 = vld [vmem:[%s9187_s1 + $0xbe4] ss:$8 sps:$4 sm:$0xff]  }
 0x170   : > { %1543 = vmatpush1.bf16.msra.mxu1 %v6810_v29  ;;  %3492 = vmatpush1.bf16.msra.mxu0 %v6813_v30  ;;  %v3549_v29 = vsel %vm886_vm2, %v8279_v37, %v8157_v59  ;;  %v6888_v30 = vld [vmem:[%s9187_s1 + $0x4e0] ss:$8 sps:$4 sm:$0xff]   ;;  %v6905_v37 = vld [vmem:[%s9187_s1 + $0xc04] ss:$8 sps:$4 sm:$0xff]  }
 0x171   : > { %1544 = vmatprep.subr.bf16.mxu1 %v6818_v31  ;;  %3493 = vmatprep.subr.bf16.mxu0 %v6821_v32  ;;  %v6891_v31 = vld [vmem:[%s9187_s1 + $0xbe0] ss:$8 sps:$4 sm:$0xff]   ;;  %v6896_v32 = vld [vmem:[%s9187_s1 + $0x4f4] ss:$8 sps:$4 sm:$0xff]  }
 0x174   : > { %1545 = vmatpush1.bf16.msra.mxu1 %v6816_v34  ;;  %3494 = vmatpush1.bf16.msra.mxu0 %v6819_v6  ;;  %v6894_v34 = vld [vmem:[%s9187_s1 + $0x4f0] ss:$8 sps:$4 sm:$0xff]  }
 0x175   : > { %1546 = vmatprep.subr.bf16.mxu1 %v6824_v35  ;;  %3495 = vmatprep.subr.bf16.mxu0 %v6827_v36  ;;  %v6897_v6 = vld [vmem:[%s9187_s1 + $0xbf0] ss:$8 sps:$4 sm:$0xff]   ;;  %v1601_v35 = vpop.permute.xlu0 %1600  ;;  %v6902_v36 = vld [vmem:[%s9187_s1 + $0x504] ss:$8 sps:$4 sm:$0xff]  }
 0x178   : > { %1547 = vmatpush1.bf16.msra.mxu1 %v6822_v45  ;;  %3496 = vmatpush1.bf16.msra.mxu0 %v6825_v40  ;;  %v8453_v45 = vpop.permute.xlu1 %4075  ;;  %v1604_v40 = vsel %vm708_vm3, %v1601_v35, %v8338_v61  ;;  %v6975_v35 = vld [vmem:[%s9187_s1 + $0xcc0] ss:$8 sps:$4 sm:$0xff]  }
 0x179   : > { %1548 = vmatprep.subr.bf16.mxu1 %v6830_v41  ;;  %3654 = vmatprep.subr.bf16.mxu0 %v6833_v42  ;;  %v6900_v41 = vld [vmem:[%s9187_s1 + $0x500] ss:$8 sps:$4 sm:$0xff]  }
 0x17a   : > { %v6903_v42 = vld [vmem:[%s9187_s1 + $0xc00] ss:$8 sps:$4 sm:$0xff]  }
 0x17b   : > { %3510 = vmatmul.mubr.bf16.vlgmr.msra.gmra.mrb[0].mxu0 %v3372_v43  ;;  %v6908_v43 = vld [vmem:[%s9187_s1 + $0x514] ss:$8 sps:$4 sm:$0xff]  }
 0x17c   : > { %1549 = vmatpush1.bf16.msra.mxu1 %v6828_v46  ;;  %3655 = vmatpush1.bf16.msra.mxu0 %v6831_v47  ;;  %v6911_v46 = vld [vmem:[%s9187_s1 + $0xc14] ss:$8 sps:$4 sm:$0xff]   ;;  %v8471_v47 = vpop.permute.xlu1 %1779 }
 0x17d   : > { %1550 = vmatprep.subr.bf16.mxu1 %v6836_v48  ;;  %3656 = vmatprep.subr.bf16.mxu0 %v6839_v33  ;;  %v6906_v48 = vld [vmem:[%s9187_s1 + $0x510] ss:$8 sps:$4 sm:$0xff]  }
 0x17e   : > { %5968 = vmatprep.mubr.msk.bf16.mxu0 %vm490_vm0, %v8157_v59  ;;  %v6899_v59 = vld [vmem:[%s9187_s1 + $0xbf4] ss:$8 sps:$4 sm:$0xff]   ;;  %v6909_v33 = vld [vmem:[%s9187_s1 + $0xc10] ss:$8 sps:$4 sm:$0xff]  }
 0x180   : > { %1551 = vmatpush1.bf16.msra.mxu1 %v6834_v15  ;;  %3657 = vmatpush1.bf16.msra.mxu0 %v6837_v50  ;;  %v6914_v15 = vld [vmem:[%s9187_s1 + $0x524] ss:$8 sps:$4 sm:$0xff]  }
 0x181   : > { %1709 = vmatprep.subr.bf16.mxu1 %v6842_v52  ;;  %3658 = vmatprep.subr.bf16.mxu0 %v6845_v53  ;;  %v6917_v50 = vld [vmem:[%s9187_s1 + $0xc24] ss:$8 sps:$4 sm:$0xff]   ;;  %v6915_v52 = vld [vmem:[%s9187_s1 + $0xc20] ss:$8 sps:$4 sm:$0xff]   ;;  %v6920_v53 = vld [vmem:[%s9187_s1 + $0x534] ss:$8 sps:$4 sm:$0xff]  }
 0x183   : > { %1565 = vmatmul.mubr.bf16.vlgmr.msra.gmra.mrb[0].mxu1 %v1427_v54  ;;  %v6923_v54 = vld [vmem:[%s9187_s1 + $0xc34] ss:$8 sps:$4 sm:$0xff]  }
 0x184   : > { %3659 = vmatpush1.bf16.msra.mxu0 %v6843_v57  ;;  %1710 = vmatpush1.bf16.msra.mxu1 %v6840_v55  ;;  %v6918_v55 = vld [vmem:[%s9187_s1 + $0x530] ss:$8 sps:$4 sm:$0xff]  }
 0x185   : > { %1711 = vmatprep.subr.bf16.mxu1 %v6848_v58  ;;  %3660 = vmatprep.subr.bf16.mxu0 %v6851_v60  ;;  %v6921_v57 = vld [vmem:[%s9187_s1 + $0xc30] ss:$8 sps:$4 sm:$0xff]   ;;  %v6926_v58 = vld [vmem:[%s9187_s1 + $0x544] ss:$8 sps:$4 sm:$0xff]  }
 0x186   : > { %5517 = vmatprep.mubr.msk.bf16.mxu1 %vm490_vm0, %v8338_v61  ;;  %v6929_v60 = vld [vmem:[%s9187_s1 + $0xc44] ss:$8 sps:$4 sm:$0xff]   ;;  %v6924_v61 = vld [vmem:[%s9187_s1 + $0x540] ss:$8 sps:$4 sm:$0xff]  }
 0x188   : > { %3661 = vmatpush1.bf16.msra.mxu0 %v6849_v63  ;;  %1712 = vmatpush1.bf16.msra.mxu1 %v6846_v62  ;;  %v6927_v62 = vld [vmem:[%s9187_s1 + $0xc40] ss:$8 sps:$4 sm:$0xff]   ;;  %v6932_v63 = vld [vmem:[%s9187_s1 + $0x554] ss:$8 sps:$4 sm:$0xff]  }
 0x189   : > { %1713 = vmatprep.subr.bf16.mxu1 %v6854_v44  ;;  %3662 = vmatprep.subr.bf16.mxu0 %v6857_v9  ;;  %v6935_v44 = vld [vmem:[%s9187_s1 + $0xc54] ss:$8 sps:$4 sm:$0xff]   ;;  %v6930_v9 = vld [vmem:[%s9187_s1 + $0x550] ss:$8 sps:$4 sm:$0xff]  }
 0x18c   : > { %1714 = vmatpush1.bf16.msra.mxu1 %v6852_v0  ;;  %3663 = vmatpush1.bf16.msra.mxu0 %v6855_v1  ;;  %v6933_v0 = vld [vmem:[%s9187_s1 + $0xc50] ss:$8 sps:$4 sm:$0xff]   ;;  %v6938_v1 = vld [vmem:[%s9187_s1 + $0x564] ss:$8 sps:$4 sm:$0xff]  }
 0x18d   : > { %1715 = vmatprep.subr.bf16.mxu1 %v6860_v2  ;;  %3664 = vmatprep.subr.bf16.mxu0 %v6863_v4  ;;  %v6941_v2 = vld [vmem:[%s9187_s1 + $0xc64] ss:$8 sps:$4 sm:$0xff]   ;;  %v6936_v4 = vld [vmem:[%s9187_s1 + $0x560] ss:$8 sps:$4 sm:$0xff]  }
 0x190   : > { %1716 = vmatpush1.bf16.msra.mxu1 %v6858_v10  ;;  %3665 = vmatpush1.bf16.msra.mxu0 %v6861_v12  ;;  %v6939_v10 = vld [vmem:[%s9187_s1 + $0xc60] ss:$8 sps:$4 sm:$0xff]   ;;  %v6944_v12 = vld [vmem:[%s9187_s1 + $0x574] ss:$8 sps:$4 sm:$0xff]  }
 0x191   : > { %1717 = vmatprep.subr.bf16.mxu1 %v6866_v13  ;;  %3666 = vmatprep.subr.bf16.mxu0 %v6869_v8  ;;  %v6947_v13 = vld [vmem:[%s9187_s1 + $0xc74] ss:$8 sps:$4 sm:$0xff]   ;;  %v6942_v8 = vld [vmem:[%s9187_s1 + $0x570] ss:$8 sps:$4 sm:$0xff]  }
 0x194   : > { %1718 = vmatpush1.bf16.msra.mxu1 %v6864_v16  ;;  %3667 = vmatpush1.bf16.msra.mxu0 %v6867_v17  ;;  %v6945_v16 = vld [vmem:[%s9187_s1 + $0xc70] ss:$8 sps:$4 sm:$0xff]   ;;  %v6950_v17 = vld [vmem:[%s9187_s1 + $0x584] ss:$8 sps:$4 sm:$0xff]  }
 0x195   : > { %1719 = vmatprep.subr.bf16.mxu1 %v6872_v18  ;;  %3668 = vmatprep.subr.bf16.mxu0 %v6875_v7  ;;  %v6953_v18 = vld [vmem:[%s9187_s1 + $0xc84] ss:$8 sps:$4 sm:$0xff]   ;;  %v8559_v7 = vpop.permute.xlu0 %4073 }
 0x198   : > { %1720 = vmatpush1.bf16.msra.mxu1 %v6870_v19  ;;  %3669 = vmatpush1.bf16.msra.mxu0 %v6873_v20  ;;  %v3726_v19 = vsel %vm1064_vm4, %v8293_v5, %v8186_v3  ;;  %v6948_v20 = vld [vmem:[%s9187_s1 + $0x580] ss:$8 sps:$4 sm:$0xff]   ;;  %v6954_v5 = vld [vmem:[%s9187_s1 + $0x590] ss:$8 sps:$4 sm:$0xff]  }
 0x199   : > { %1721 = vmatprep.subr.bf16.mxu1 %v6878_v21  ;;  %3670 = vmatprep.subr.bf16.mxu0 %v6881_v22  ;;  %v6951_v21 = vld [vmem:[%s9187_s1 + $0xc80] ss:$8 sps:$4 sm:$0xff]   ;;  %v6956_v22 = vld [vmem:[%s9187_s1 + $0x594] ss:$8 sps:$4 sm:$0xff]  }
 0x19c   : > { %1722 = vmatpush1.bf16.msra.mxu1 %v6876_v49  ;;  %3671 = vmatpush1.bf16.msra.mxu0 %v6879_v23  ;;  %v6957_v49 = vld [vmem:[%s9187_s1 + $0xc90] ss:$8 sps:$4 sm:$0xff]   ;;  %v1778_v23 = vpop.permute.xlu0 %1777 }
 0x19d   : > { %1723 = vmatprep.subr.bf16.mxu1 %v6884_v24  ;;  %3672 = vmatprep.subr.bf16.mxu0 %v6887_v25  ;;  %v6962_v24 = vld [vmem:[%s9187_s1 + $0x5a4] ss:$8 sps:$4 sm:$0xff]  }
 0x19e   : > { %v6965_v25 = vld [vmem:[%s9187_s1 + $0xca4] ss:$8 sps:$4 sm:$0xff]  }
 0x1a0   : > { %1724 = vmatpush1.bf16.msra.mxu1 %v6882_v26  ;;  %3673 = vmatpush1.bf16.msra.mxu0 %v6885_v27  ;;  %v8588_v26 = vpop.permute.xlu1 %4252  ;;  %v1781_v27 = vsel %vm886_vm2, %v1778_v23, %v8471_v47  ;;  %v7038_v23 = vld [vmem:[%s9187_s1 + $0x670] ss:$8 sps:$4 sm:$0xff]  }
 0x1a1   : > { %1725 = vmatprep.subr.bf16.mxu1 %v6890_v56  ;;  %3831 = vmatprep.subr.bf16.mxu0 %v6893_v28  ;;  %v6960_v56 = vld [vmem:[%s9187_s1 + $0x5a0] ss:$8 sps:$4 sm:$0xff]  }
 0x1a2   : > { %v6963_v28 = vld [vmem:[%s9187_s1 + $0xca0] ss:$8 sps:$4 sm:$0xff]  }
 0x1a3   : > { %3687 = vmatmul.mubr.bf16.vlgmr.msra.gmra.mrb[0].mxu0 %v3549_v29  ;;  %v6968_v29 = vld [vmem:[%s9187_s1 + $0x5b4] ss:$8 sps:$4 sm:$0xff]  }
 0x1a4   : > { %1726 = vmatpush1.bf16.msra.mxu1 %v6888_v30  ;;  %3832 = vmatpush1.bf16.msra.mxu0 %v6891_v31  ;;  %v8606_v30 = vpop.permute.xlu1 %1956  ;;  %v6966_v31 = vld [vmem:[%s9187_s1 + $0x5b0] ss:$8 sps:$4 sm:$0xff]  }
 0x1a5   : > { %1727 = vmatprep.subr.bf16.mxu1 %v6896_v32  ;;  %3833 = vmatprep.subr.bf16.mxu0 %v6899_v59  ;;  %v6969_v32 = vld [vmem:[%s9187_s1 + $0xcb0] ss:$8 sps:$4 sm:$0xff]   ;;  %v6974_v59 = vld [vmem:[%s9187_s1 + $0x5c4] ss:$8 sps:$4 sm:$0xff]  }
 0x1a6   : > { %6009 = vmatprep.mubr.msk.bf16.mxu0 %vm490_vm0, %v8186_v3  ;;  %v6959_v3 = vld [vmem:[%s9187_s1 + $0xc94] ss:$8 sps:$4 sm:$0xff]  }
 0x1a8   : > { %1728 = vmatpush1.bf16.msra.mxu1 %v6894_v34  ;;  %3834 = vmatpush1.bf16.msra.mxu0 %v6897_v6  ;;  %v6977_v34 = vld [vmem:[%s9187_s1 + $0xcc4] ss:$8 sps:$4 sm:$0xff]   ;;  %v6972_v6 = vld [vmem:[%s9187_s1 + $0x5c0] ss:$8 sps:$4 sm:$0xff]  }
 0x1a9   : > { %1886 = vmatprep.subr.bf16.mxu1 %v6902_v36  ;;  %3835 = vmatprep.subr.bf16.mxu0 %v6905_v37  ;;  %v6980_v36 = vld [vmem:[%s9187_s1 + $0x5d4] ss:$8 sps:$4 sm:$0xff]  }
 0x1aa   : > { %v6983_v37 = vld [vmem:[%s9187_s1 + $0xcd4] ss:$8 sps:$4 sm:$0xff]  }
 0x1ab   : > { %1742 = vmatmul.mubr.bf16.vlgmr.msra.gmra.mrb[0].mxu1 %v1604_v40  ;;  %v6978_v40 = vld [vmem:[%s9187_s1 + $0x5d0] ss:$8 sps:$4 sm:$0xff]  }
 0x1ac   : > { %1887 = vmatpush1.bf16.msra.mxu1 %v6900_v41  ;;  %3836 = vmatpush1.bf16.msra.mxu0 %v6903_v42  ;;  %v6981_v41 = vld [vmem:[%s9187_s1 + $0xcd0] ss:$8 sps:$4 sm:$0xff]   ;;  %v6986_v42 = vld [vmem:[%s9187_s1 + $0x5e4] ss:$8 sps:$4 sm:$0xff]  }
 0x1ad   : > { %1888 = vmatprep.subr.bf16.mxu1 %v6908_v43  ;;  %3837 = vmatprep.subr.bf16.mxu0 %v6911_v46  ;;  %v6989_v43 = vld [vmem:[%s9187_s1 + $0xce4] ss:$8 sps:$4 sm:$0xff]   ;;  %v6984_v46 = vld [vmem:[%s9187_s1 + $0x5e0] ss:$8 sps:$4 sm:$0xff]  }
 0x1ae   : > { %5558 = vmatprep.mubr.msk.bf16.mxu1 %vm490_vm0, %v8471_v47  ;;  %v6987_v47 = vld [vmem:[%s9187_s1 + $0xce0] ss:$8 sps:$4 sm:$0xff]  }
 0x1b0   : > { %1889 = vmatpush1.bf16.msra.mxu1 %v6906_v48  ;;  %3838 = vmatpush1.bf16.msra.mxu0 %v6909_v33  ;;  %v6992_v48 = vld [vmem:[%s9187_s1 + $0x5f4] ss:$8 sps:$4 sm:$0xff]  }
 0x1b1   : > { %1890 = vmatprep.subr.bf16.mxu1 %v6914_v15  ;;  %3839 = vmatprep.subr.bf16.mxu0 %v6917_v50  ;;  %v6995_v33 = vld [vmem:[%s9187_s1 + $0xcf4] ss:$8 sps:$4 sm:$0xff]   ;;  %v6990_v15 = vld [vmem:[%s9187_s1 + $0x5f0] ss:$8 sps:$4 sm:$0xff]  }
 0x1b2   : > { %v6993_v50 = vld [vmem:[%s9187_s1 + $0xcf0] ss:$8 sps:$4 sm:$0xff]  }
 0x1b4   : > { %1891 = vmatpush1.bf16.msra.mxu1 %v6912_v51  ;;  %3840 = vmatpush1.bf16.msra.mxu0 %v6915_v52  ;;  %v6998_v51 = vld [vmem:[%s9187_s1 + $0x604] ss:$8 sps:$4 sm:$0xff]  }
 0x1b5   : > { %1892 = vmatprep.subr.bf16.mxu1 %v6920_v53  ;;  %3841 = vmatprep.subr.bf16.mxu0 %v6923_v54  ;;  %v7001_v52 = vld [vmem:[%s9187_s1 + $0xd04] ss:$8 sps:$4 sm:$0xff]   ;;  %v6996_v53 = vld [vmem:[%s9187_s1 + $0x600] ss:$8 sps:$4 sm:$0xff]  }
 0x1b6   : > { %v6999_v54 = vld [vmem:[%s9187_s1 + $0xd00] ss:$8 sps:$4 sm:$0xff]  }
 0x1b8   : > { %1893 = vmatpush1.bf16.msra.mxu1 %v6918_v55  ;;  %3842 = vmatpush1.bf16.msra.mxu0 %v6921_v57  ;;  %v7004_v55 = vld [vmem:[%s9187_s1 + $0x614] ss:$8 sps:$4 sm:$0xff]  }
 0x1b9   : > { %1894 = vmatprep.subr.bf16.mxu1 %v6926_v58  ;;  %3843 = vmatprep.subr.bf16.mxu0 %v6929_v60  ;;  %v7007_v57 = vld [vmem:[%s9187_s1 + $0xd14] ss:$8 sps:$4 sm:$0xff]   ;;  %v7002_v58 = vld [vmem:[%s9187_s1 + $0x610] ss:$8 sps:$4 sm:$0xff]  }
 0x1ba   : > { %v7005_v60 = vld [vmem:[%s9187_s1 + $0xd10] ss:$8 sps:$4 sm:$0xff]  }
 0x1bc   : > { %1895 = vmatpush1.bf16.msra.mxu1 %v6924_v61  ;;  %3844 = vmatpush1.bf16.msra.mxu0 %v6927_v62  ;;  %v7010_v61 = vld [vmem:[%s9187_s1 + $0x624] ss:$8 sps:$4 sm:$0xff]  }
 0x1bd   : > { %1896 = vmatprep.subr.bf16.mxu1 %v6932_v63  ;;  %3845 = vmatprep.subr.bf16.mxu0 %v6935_v44  ;;  %v7013_v62 = vld [vmem:[%s9187_s1 + $0xd24] ss:$8 sps:$4 sm:$0xff]   ;;  %v8694_v63 = vpop.permute.xlu0 %4250  ;;  %v7008_v44 = vld [vmem:[%s9187_s1 + $0x620] ss:$8 sps:$4 sm:$0xff]  }
 0x1c0   : > { %1897 = vmatpush1.bf16.msra.mxu1 %v6930_v9  ;;  %3846 = vmatpush1.bf16.msra.mxu0 %v6933_v0  ;;  %v7011_v9 = vld [vmem:[%s9187_s1 + $0xd20] ss:$8 sps:$4 sm:$0xff]   ;;  %v7016_v0 = vld [vmem:[%s9187_s1 + $0x634] ss:$8 sps:$4 sm:$0xff]  }
 0x1c1   : > { %1898 = vmatprep.subr.bf16.mxu1 %v6938_v1  ;;  %3847 = vmatprep.subr.bf16.mxu0 %v6941_v2  ;;  %v7019_v1 = vld [vmem:[%s9187_s1 + $0xd34] ss:$8 sps:$4 sm:$0xff]   ;;  %v7014_v2 = vld [vmem:[%s9187_s1 + $0x630] ss:$8 sps:$4 sm:$0xff]  }
 0x1c4   : > { %1899 = vmatpush1.bf16.msra.mxu1 %v6936_v4  ;;  %3848 = vmatpush1.bf16.msra.mxu0 %v6939_v10  ;;  %v7017_v4 = vld [vmem:[%s9187_s1 + $0xd30] ss:$8 sps:$4 sm:$0xff]   ;;  %v1955_v10 = vpop.permute.xlu0 %1954 }
 0x1c5   : > { %1900 = vmatprep.subr.bf16.mxu1 %v6944_v12  ;;  %3849 = vmatprep.subr.bf16.mxu0 %v6947_v13  ;;  %v7022_v12 = vld [vmem:[%s9187_s1 + $0x644] ss:$8 sps:$4 sm:$0xff]   ;;  %v1958_v13 = vsel %vm1064_vm4, %v1955_v10, %v8606_v30  ;;  %v7109_v10 = vld [vmem:[%s9187_s1 + $0xe74] ss:$8 sps:$4 sm:$0xff]  }
 0x1c8   : > { %1901 = vmatpush1.bf16.msra.mxu1 %v6942_v8  ;;  %3850 = vmatpush1.bf16.msra.mxu0 %v6945_v16  ;;  %v7020_v8 = vld [vmem:[%s9187_s1 + $0x640] ss:$8 sps:$4 sm:$0xff]  }
 0x1c9   : > { %1902 = vmatprep.subr.bf16.mxu1 %v6950_v17  ;;  %4005 = vmatprep.subr.bf16.mxu0 %v6953_v18  ;;  %v7023_v16 = vld [vmem:[%s9187_s1 + $0xd40] ss:$8 sps:$4 sm:$0xff]   ;;  %v7028_v17 = vld [vmem:[%s9187_s1 + $0x654] ss:$8 sps:$4 sm:$0xff]  }
 0x1ca   : > { %v7031_v18 = vld [vmem:[%s9187_s1 + $0xd54] ss:$8 sps:$4 sm:$0xff]  }
 0x1cb   : > { %3864 = vmatmul.mubr.bf16.vlgmr.msra.gmra.mrb[0].mxu0 %v3726_v19  ;;  %v7026_v19 = vld [vmem:[%s9187_s1 + $0x650] ss:$8 sps:$4 sm:$0xff]  }
 0x1cc   : > { %1903 = vmatpush1.bf16.msra.mxu1 %v6948_v20  ;;  %4006 = vmatpush1.bf16.msra.mxu0 %v6951_v21  ;;  %v7029_v20 = vld [vmem:[%s9187_s1 + $0xd50] ss:$8 sps:$4 sm:$0xff]   ;;  %v7034_v21 = vld [vmem:[%s9187_s1 + $0x664] ss:$8 sps:$4 sm:$0xff]  }
 0x1cd   : > { %1904 = vmatprep.subr.bf16.mxu1 %v6956_v22  ;;  %4007 = vmatprep.subr.bf16.mxu0 %v6959_v3  ;;  %v7037_v22 = vld [vmem:[%s9187_s1 + $0xd64] ss:$8 sps:$4 sm:$0xff]   ;;  %v7032_v3 = vld [vmem:[%s9187_s1 + $0x660] ss:$8 sps:$4 sm:$0xff]  }
 0x1ce   : > { %6050 = vmatprep.mubr.msk.bf16.mxu0 %vm490_vm0, %v7745_v38  ;;  %v6971_v38 = vld [vmem:[%s9187_s1 + $0xcb4] ss:$8 sps:$4 sm:$0xff]  }
 0x1d0   : > { %1905 = vmatpush1.bf16.msra.mxu1 %v6954_v5  ;;  %4008 = vmatpush1.bf16.msra.mxu0 %v6957_v49  ;;  %v7035_v5 = vld [vmem:[%s9187_s1 + $0xd60] ss:$8 sps:$4 sm:$0xff]   ;;  %v7040_v49 = vld [vmem:[%s9187_s1 + $0x674] ss:$8 sps:$4 sm:$0xff]  }
 0x1d1   : > { %2063 = vmatprep.subr.bf16.mxu1 %v6962_v24  ;;  %4009 = vmatprep.subr.bf16.mxu0 %v6965_v25  ;;  %v7041_v24 = vld [vmem:[%s9187_s1 + $0xd70] ss:$8 sps:$4 sm:$0xff]   ;;  %v7046_v25 = vld [vmem:[%s9187_s1 + $0x684] ss:$8 sps:$4 sm:$0xff]  }
 0x1d3   : > { %1919 = vmatmul.mubr.bf16.vlgmr.msra.gmra.mrb[0].mxu1 %v1781_v27  ;;  %v7049_v27 = vld [vmem:[%s9187_s1 + $0xd84] ss:$8 sps:$4 sm:$0xff]  }
 0x1d4   : > { %2064 = vmatpush1.bf16.msra.mxu1 %v6960_v56  ;;  %4010 = vmatpush1.bf16.msra.mxu0 %v6963_v28  ;;  %v7044_v56 = vld [vmem:[%s9187_s1 + $0x680] ss:$8 sps:$4 sm:$0xff]  }
 0x1d5   : > { %2065 = vmatprep.subr.bf16.mxu1 %v6968_v29  ;;  %4011 = vmatprep.subr.bf16.mxu0 %v6971_v38  ;;  %v7047_v28 = vld [vmem:[%s9187_s1 + $0xd80] ss:$8 sps:$4 sm:$0xff]   ;;  %v7052_v29 = vld [vmem:[%s9187_s1 + $0x694] ss:$8 sps:$4 sm:$0xff]  }
 0x1d6   : > { %5599 = vmatprep.mubr.msk.bf16.mxu1 %vm490_vm0, %v8606_v30  ;;  %v7055_v38 = vld [vmem:[%s9187_s1 + $0xd94] ss:$8 sps:$4 sm:$0xff]   ;;  %v7050_v30 = vld [vmem:[%s9187_s1 + $0x690] ss:$8 sps:$4 sm:$0xff]  }
 0x1d8   : > { %2066 = vmatpush1.bf16.msra.mxu1 %v6966_v31  ;;  %4012 = vmatpush1.bf16.msra.mxu0 %v6969_v32  ;;  %v7053_v31 = vld [vmem:[%s9187_s1 + $0xd90] ss:$8 sps:$4 sm:$0xff]   ;;  %v7058_v32 = vld [vmem:[%s9187_s1 + $0x6a4] ss:$8 sps:$4 sm:$0xff]  }
 0x1d9   : > { %2067 = vmatprep.subr.bf16.mxu1 %v6974_v59  ;;  %4013 = vmatprep.subr.bf16.mxu0 %v6977_v34  ;;  %v7061_v59 = vld [vmem:[%s9187_s1 + $0xda4] ss:$8 sps:$4 sm:$0xff]   ;;  %v7056_v34 = vld [vmem:[%s9187_s1 + $0x6a0] ss:$8 sps:$4 sm:$0xff]  }
 0x1dc   : > { %2068 = vmatpush1.bf16.msra.mxu1 %v6972_v6  ;;  %4014 = vmatpush1.bf16.msra.mxu0 %v6975_v35  ;;  %v7059_v6 = vld [vmem:[%s9187_s1 + $0xda0] ss:$8 sps:$4 sm:$0xff]   ;;  %v7064_v35 = vld [vmem:[%s9187_s1 + $0x6b4] ss:$8 sps:$4 sm:$0xff]  }
 0x1dd   : > { %2069 = vmatprep.subr.bf16.mxu1 %v6980_v36  ;;  %4015 = vmatprep.subr.bf16.mxu0 %v6983_v37  ;;  %v7067_v36 = vld [vmem:[%s9187_s1 + $0xdb4] ss:$8 sps:$4 sm:$0xff]   ;;  %v7062_v37 = vld [vmem:[%s9187_s1 + $0x6b0] ss:$8 sps:$4 sm:$0xff]  }
 0x1e0   : > { %2070 = vmatpush1.bf16.msra.mxu1 %v6978_v40  ;;  %4016 = vmatpush1.bf16.msra.mxu0 %v6981_v41  ;;  %v7065_v40 = vld [vmem:[%s9187_s1 + $0xdb0] ss:$8 sps:$4 sm:$0xff]   ;;  %v7070_v41 = vld [vmem:[%s9187_s1 + $0x6c4] ss:$8 sps:$4 sm:$0xff]  }
 0x1e1   : > { %2071 = vmatprep.subr.bf16.mxu1 %v6986_v42  ;;  %4017 = vmatprep.subr.bf16.mxu0 %v6989_v43  ;;  %v7073_v42 = vld [vmem:[%s9187_s1 + $0xdc4] ss:$8 sps:$4 sm:$0xff]   ;;  %v4077_v43 = vsel %vm387_vm1, %v8559_v7, %v8453_v45  ;;  %v7074_v7 = vld [vmem:[%s9187_s1 + $0x6d0] ss:$8 sps:$4 sm:$0xff]  }
 0x1e4   : > { %2072 = vmatpush1.bf16.msra.mxu1 %v6984_v46  ;;  %4018 = vmatpush1.bf16.msra.mxu0 %v6987_v47  ;;  %v7068_v46 = vld [vmem:[%s9187_s1 + $0x6c0] ss:$8 sps:$4 sm:$0xff]  }
 0x1e5   : > { %2073 = vmatprep.subr.bf16.mxu1 %v6992_v48  ;;  %4019 = vmatprep.subr.bf16.mxu0 %v6995_v33  ;;  %v7071_v47 = vld [vmem:[%s9187_s1 + $0xdc0] ss:$8 sps:$4 sm:$0xff]   ;;  %v7076_v48 = vld [vmem:[%s9187_s1 + $0x6d4] ss:$8 sps:$4 sm:$0xff]   ;;  %v7077_v33 = vld [vmem:[%s9187_s1 + $0xdd0] ss:$8 sps:$4 sm:$0xff]  }
 0x1e8   : > { %2074 = vmatpush1.bf16.msra.mxu1 %v6990_v15  ;;  %4020 = vmatpush1.bf16.msra.mxu0 %v6993_v50  ;;  %v7082_v15 = vld [vmem:[%s9187_s1 + $0xde4] ss:$8 sps:$4 sm:$0xff]   ;;  %v7080_v50 = vld [vmem:[%s9187_s1 + $0xde0] ss:$8 sps:$4 sm:$0xff]  }
 0x1e9   : > { %2075 = vmatprep.subr.bf16.mxu1 %v6998_v51  ;;  %4021 = vmatprep.subr.bf16.mxu0 %v7001_v52  ;;  %v7085_v51 = vld [vmem:[%s9187_s1 + $0xdf4] ss:$8 sps:$4 sm:$0xff]   ;;  %v7083_v52 = vld [vmem:[%s9187_s1 + $0xdf0] ss:$8 sps:$4 sm:$0xff]  }
 0x1ec   : > { %2076 = vmatpush1.bf16.msra.mxu1 %v6996_v53  ;;  %4022 = vmatpush1.bf16.msra.mxu0 %v6999_v54  ;;  %v7088_v53 = vld [vmem:[%s9187_s1 + $0xe04] ss:$8 sps:$4 sm:$0xff]   ;;  %v7086_v54 = vld [vmem:[%s9187_s1 + $0xe00] ss:$8 sps:$4 sm:$0xff]  }
 0x1ed   : > { %2077 = vmatprep.subr.bf16.mxu1 %v7004_v55  ;;  %4023 = vmatprep.subr.bf16.mxu0 %v7007_v57  ;;  %v7089_v55 = vld [vmem:[%s9187_s1 + $0xe10] ss:$8 sps:$4 sm:$0xff]   ;;  %v7094_v57 = vld [vmem:[%s9187_s1 + $0xe24] ss:$8 sps:$4 sm:$0xff]  }
 0x1f0   : > { %2078 = vmatpush1.bf16.msra.mxu1 %v7002_v58  ;;  %4024 = vmatpush1.bf16.msra.mxu0 %v7005_v60  ;;  %v7092_v58 = vld [vmem:[%s9187_s1 + $0xe20] ss:$8 sps:$4 sm:$0xff]   ;;  %v7097_v60 = vld [vmem:[%s9187_s1 + $0xe34] ss:$8 sps:$4 sm:$0xff]  }
 0x1f1   : > { %2079 = vmatprep.subr.bf16.mxu1 %v7010_v61  ;;  %4182 = vmatprep.subr.bf16.mxu0 %v7013_v62  ;;  %v7095_v61 = vld [vmem:[%s9187_s1 + $0xe30] ss:$8 sps:$4 sm:$0xff]   ;;  %v7100_v62 = vld [vmem:[%s9187_s1 + $0xe44] ss:$8 sps:$4 sm:$0xff]  }
 0x1f3   : > { %4038 = vmatmul.mubr.bf16.vlgmr.msra.gmra.mrb[0].mxu0 %v7748_v39  ;;  %v7025_v39 = vld [vmem:[%s9187_s1 + $0xd44] ss:$8 sps:$4 sm:$0xff]  }
 0x1f4   : > { %2080 = vmatpush1.bf16.msra.mxu1 %v7008_v44  ;;  %4183 = vmatpush1.bf16.msra.mxu0 %v7011_v9  ;;  %v7098_v44 = vld [vmem:[%s9187_s1 + $0xe40] ss:$8 sps:$4 sm:$0xff]   ;;  %v7103_v9 = vld [vmem:[%s9187_s1 + $0xe54] ss:$8 sps:$4 sm:$0xff]  }
 0x1f5   : > { %2081 = vmatprep.subr.bf16.mxu1 %v7016_v0  ;;  %4184 = vmatprep.subr.bf16.mxu0 %v7019_v1  ;;  %v7101_v0 = vld [vmem:[%s9187_s1 + $0xe50] ss:$8 sps:$4 sm:$0xff]   ;;  %v7106_v1 = vld [vmem:[%s9187_s1 + $0xe64] ss:$8 sps:$4 sm:$0xff]  }
 0x1f6   : > { %6091 = vmatprep.mubr.msk.bf16.mxu0 %vm490_vm0, %v8453_v45  ;;  %v7079_v45 = vld [vmem:[%s9187_s1 + $0xdd4] ss:$8 sps:$4 sm:$0xff]  }
 0x1f8   : > { %4185 = vmatpush1.bf16.msra.mxu0 %v7017_v4  ;;  %2082 = vmatpush1.bf16.msra.mxu1 %v7014_v2  ;;  %v4254_v2 = vsel %vm708_vm3, %v8694_v63, %v8588_v26  ;;  %v7104_v4 = vld [vmem:[%s9187_s1 + $0xe60] ss:$8 sps:$4 sm:$0xff]  }
 0x1f9   : > { %2237 = vmatprep.subr.bf16.mxu1 %v7022_v12  ;;  %4186 = vmatprep.subr.bf16.mxu0 %v7025_v39  ;;  %v4430_v12 = vpop.permute.xlu1 %4429  ;;  %v7107_v39 = vld [vmem:[%s9187_s1 + $0xe70] ss:$8 sps:$4 sm:$0xff]   ;;  %v7110_v63 = vld [vmem:[%s9187_s1 + $0xe80] ss:$8 sps:$4 sm:$0xff]  }
 0x1fb   : > { %2096 = vmatmul.mubr.bf16.vlgmr.msra.gmra.mrb[0].mxu1 %v1958_v13  ;;  %v7115_v13 = vld [vmem:[%s9187_s1 + $0xe94] ss:$8 sps:$4 sm:$0xff]  }
 0x1fc   : > { %2238 = vmatpush1.bf16.msra.mxu1 %v7020_v8  ;;  %4187 = vmatpush1.bf16.msra.mxu0 %v7023_v16  ;;  %v7113_v8 = vld [vmem:[%s9187_s1 + $0xe90] ss:$8 sps:$4 sm:$0xff]   ;;  %v7118_v16 = vld [vmem:[%s9187_s1 + $0xea4] ss:$8 sps:$4 sm:$0xff]  }
 0x1fd   : > { %2239 = vmatprep.subr.bf16.mxu1 %v7028_v17  ;;  %4188 = vmatprep.subr.bf16.mxu0 %v7031_v18  ;;  %v7116_v17 = vld [vmem:[%s9187_s1 + $0xea0] ss:$8 sps:$4 sm:$0xff]   ;;  %v7121_v18 = vld [vmem:[%s9187_s1 + $0xeb4] ss:$8 sps:$4 sm:$0xff]  }
 0x1fe   : > { %5640 = vmatprep.mubr.msk.bf16.mxu1 %vm490_vm0, %v7294_v14  ;;  %v7043_v14 = vld [vmem:[%s9187_s1 + $0xd74] ss:$8 sps:$4 sm:$0xff]  }
 0x200   : > { %2240 = vmatpush1.bf16.msra.mxu1 %v7026_v19  ;;  %4189 = vmatpush1.bf16.msra.mxu0 %v7029_v20  ;;  %v7119_v19 = vld [vmem:[%s9187_s1 + $0xeb0] ss:$8 sps:$4 sm:$0xff]   ;;  %v7124_v20 = vld [vmem:[%s9187_s1 + $0xec4] ss:$8 sps:$4 sm:$0xff]  }
 0x201   : > { %2241 = vmatprep.subr.bf16.mxu1 %v7034_v21  ;;  %4190 = vmatprep.subr.bf16.mxu0 %v7037_v22  ;;  %v7122_v21 = vld [vmem:[%s9187_s1 + $0xec0] ss:$8 sps:$4 sm:$0xff]   ;;  %v7127_v22 = vld [vmem:[%s9187_s1 + $0xed4] ss:$8 sps:$4 sm:$0xff]  }
 0x204   : > { %2242 = vmatpush1.bf16.msra.mxu1 %v7032_v3  ;;  %4191 = vmatpush1.bf16.msra.mxu0 %v7035_v5  ;;  %v7125_v3 = vld [vmem:[%s9187_s1 + $0xed0] ss:$8 sps:$4 sm:$0xff]   ;;  %v7130_v5 = vld [vmem:[%s9187_s1 + $0xee4] ss:$8 sps:$4 sm:$0xff]  }
 0x205   : > { %2243 = vmatprep.subr.bf16.mxu1 %v7040_v49  ;;  %4192 = vmatprep.subr.bf16.mxu0 %v7043_v14  ;;  %v7128_v49 = vld [vmem:[%s9187_s1 + $0xee0] ss:$8 sps:$4 sm:$0xff]   ;;  %v7133_v14 = vld [vmem:[%s9187_s1 + $0xef4] ss:$8 sps:$4 sm:$0xff]  }
 0x208   : > { %2244 = vmatpush1.bf16.msra.mxu1 %v7038_v23  ;;  %4193 = vmatpush1.bf16.msra.mxu0 %v7041_v24  ;;  %v7131_v23 = vld [vmem:[%s9187_s1 + $0xef0] ss:$8 sps:$4 sm:$0xff]   ;;  %v4428_v24 = vpop.permute.xlu0 %4427 }
 0x209   : > { %2245 = vmatprep.subr.bf16.mxu1 %v7046_v25  ;;  %4194 = vmatprep.subr.bf16.mxu0 %v7049_v27  ;;  %v7136_v25 = vld [vmem:[%s9187_s1 + $0xf04] ss:$8 sps:$4 sm:$0xff]   ;;  %v4431_v27 = vsel %vm886_vm2, %v4428_v24, %v4430_v12 }
 0x20a   : > { %v4944_v24 = vld [vmem:[%s9190_s4 + $0x20] sm:$0xff] }
 0x20c   : > { %2246 = vmatpush1.bf16.msra.mxu1 %v7044_v56  ;;  %4195 = vmatpush1.bf16.msra.mxu0 %v7047_v28  ;;  %v7134_v56 = vld [vmem:[%s9187_s1 + $0xf00] ss:$8 sps:$4 sm:$0xff]   ;;  %v7139_v28 = vld [vmem:[%s9187_s1 + $0xf14] ss:$8 sps:$4 sm:$0xff]  }
 0x20d   : > { %2247 = vmatprep.subr.bf16.mxu1 %v7052_v29  ;;  %4196 = vmatprep.subr.bf16.mxu0 %v7055_v38  ;;  %v4607_v29 = vpop.permute.xlu1 %4606  ;;  %v7137_v38 = vld [vmem:[%s9187_s1 + $0xf10] ss:$8 sps:$4 sm:$0xff]  }
 0x210   : > { %2248 = vmatpush1.bf16.msra.mxu1 %v7050_v30  ;;  %4197 = vmatpush1.bf16.msra.mxu0 %v7053_v31  ;;  %v7142_v30 = vld [vmem:[%s9187_s1 + $0xf24] ss:$8 sps:$4 sm:$0xff]   ;;  %v7140_v31 = vld [vmem:[%s9187_s1 + $0xf20] ss:$8 sps:$4 sm:$0xff]  }
 0x211   : > { %2249 = vmatprep.subr.bf16.mxu1 %v7058_v32  ;;  %4198 = vmatprep.subr.bf16.mxu0 %v7061_v59  ;;  %v7145_v32 = vld [vmem:[%s9187_s1 + $0xf34] ss:$8 sps:$4 sm:$0xff]   ;;  %v7143_v59 = vld [vmem:[%s9187_s1 + $0xf30] ss:$8 sps:$4 sm:$0xff]  }
 0x214   : > { %2250 = vmatpush1.bf16.msra.mxu1 %v7056_v34  ;;  %4199 = vmatpush1.bf16.msra.mxu0 %v7059_v6  ;;  %v7148_v34 = vld [vmem:[%s9187_s1 + $0xf44] ss:$8 sps:$4 sm:$0xff]   ;;  %v7146_v6 = vld [vmem:[%s9187_s1 + $0xf40] ss:$8 sps:$4 sm:$0xff]  }
 0x215   : > { %2251 = vmatprep.subr.bf16.mxu1 %v7064_v35  ;;  %4200 = vmatprep.subr.bf16.mxu0 %v7067_v36  ;;  %v7151_v35 = vld [vmem:[%s9187_s1 + $0xf54] ss:$8 sps:$4 sm:$0xff]   ;;  %v7149_v36 = vld [vmem:[%s9187_s1 + $0xf50] ss:$8 sps:$4 sm:$0xff]  }
 0x218   : > { %2252 = vmatpush1.bf16.msra.mxu1 %v7062_v37  ;;  %4201 = vmatpush1.bf16.msra.mxu0 %v7065_v40  ;;  %v7154_v37 = vld [vmem:[%s9187_s1 + $0xf64] ss:$8 sps:$4 sm:$0xff]   ;;  %v7152_v40 = vld [vmem:[%s9187_s1 + $0xf60] ss:$8 sps:$4 sm:$0xff]  }
 0x219   : > { %2253 = vmatprep.subr.bf16.mxu1 %v7070_v41  ;;  %4359 = vmatprep.subr.bf16.mxu0 %v7073_v42  ;;  %v7157_v41 = vld [vmem:[%s9187_s1 + $0xf74] ss:$8 sps:$4 sm:$0xff]   ;;  %v7155_v42 = vld [vmem:[%s9187_s1 + $0xf70] ss:$8 sps:$4 sm:$0xff]  }
 0x21b   : > { %4215 = vmatmul.mubr.bf16.vlgmr.msra.gmra.mrb[0].mxu0 %v4077_v43  ;;  %v7160_v43 = vld [vmem:[%s9187_s1 + $0xf84] ss:$8 sps:$4 sm:$0xff]  }
 0x21c   : > { %2254 = vmatpush1.bf16.msra.mxu1 %v7068_v46  ;;  %4360 = vmatpush1.bf16.msra.mxu0 %v7071_v47  ;;  %v7158_v46 = vld [vmem:[%s9187_s1 + $0xf80] ss:$8 sps:$4 sm:$0xff]   ;;  %v7163_v47 = vld [vmem:[%s9187_s1 + $0xf94] ss:$8 sps:$4 sm:$0xff]  }
 0x21d   : > { %2255 = vmatprep.subr.bf16.mxu1 %v7076_v48  ;;  %4361 = vmatprep.subr.bf16.mxu0 %v7079_v45  ;;  %v7161_v48 = vld [vmem:[%s9187_s1 + $0xf90] ss:$8 sps:$4 sm:$0xff]   ;;  %v4605_v45 = vpop.permute.xlu0 %4604 }
 0x21e   : > { %6132 = vmatprep.mubr.msk.bf16.mxu0 %vm490_vm0, %v8588_v26  ;;  %v7112_v26 = vld [vmem:[%s9187_s1 + $0xe84] ss:$8 sps:$4 sm:$0xff]  }
 0x220   : > { %2256 = vmatpush1.bf16.msra.mxu1 %v7074_v7  ;;  %4362 = vmatpush1.bf16.msra.mxu0 %v7077_v33  ;;  %v4608_v7 = vsel %vm1064_vm4, %v4605_v45, %v4607_v29  ;;  %v7178_v33 = vmov 0.0  }
 0x221   : > { %4363 = vmatprep.subr.bf16.mxu0 %v7082_v15 }
 0x223   : > { %2270 = vmatmul.mubr.bf16.vlgmr.msra.gmra.mrb[0].mxu1 %v7281_v11  ;;  %v7091_v11 = vld [vmem:[%s9187_s1 + $0xe14] ss:$8 sps:$4 sm:$0xff]  }
 0x224   : > { %4364 = vmatpush1.bf16.msra.mxu0 %v7080_v50  ;;  %4856 = vmatprep.mubr.f32.mxu1 %v7178_v33 }
 0x225   : > { %4365 = vmatprep.subr.bf16.mxu0 %v7085_v51 }
 0x228   : > { %4366 = vmatpush1.bf16.msra.mxu0 %v7083_v52 }
 0x229   : > { %4367 = vmatprep.subr.bf16.mxu0 %v7088_v53  ;;  %v4762_v53 = vlaneseq }
 0x22c   : > { %4368 = vmatpush1.bf16.msra.mxu0 %v7086_v54  ;;  %v4763_v54 = vshrl.u32 %v4762_v53, 7 }
 0x22d   : > { %4369 = vmatprep.subr.bf16.mxu0 %v7091_v11 }
 0x22e   : > { %v4764_v11 = vsub.s32 0, %v4763_v54 }
 0x230   : > { %4370 = vmatpush1.bf16.msra.mxu0 %v7089_v55  ;;  %v4760_v55 = vld [vmem:[%s9192_s6] sm:$0x3] }
 0x231   : > { %4371 = vmatprep.subr.bf16.mxu0 %v7094_v57  ;;  %v4768_v57 = vsub.s32 1, %v4763_v54 }
 0x234   : > { %4372 = vmatpush1.bf16.msra.mxu0 %v7092_v58  ;;  %v4765_v58 = vrot.slane %v4760_v55, %v4764_v11 }
 0x235   : > { %4373 = vmatprep.subr.bf16.mxu0 %v7097_v60 }
 0x238   : > { %4374 = vmatpush1.bf16.msra.mxu0 %v7095_v61  ;;  %v4769_v61 = vrot.slane %v4760_v55, %v4768_v57  ;;  %v5035_v55 = vld [vmem:[%s9191_s5 + $0x10] sm:$0xff]  ;;  %v5036_v57 = vld [vmem:[%s9191_s5 + $0x18] sm:$0xff] }
 0x239   : > { %4375 = vmatprep.subr.bf16.mxu0 %v7100_v62 }
 0x23c   : > { %4376 = vmatpush1.bf16.msra.mxu0 %v7098_v44 }
 0x23d   : > { %4377 = vmatprep.subr.bf16.mxu0 %v7103_v9 }
 0x240   : > { %4378 = vmatpush1.bf16.msra.mxu0 %v7101_v0 }
 0x241   : > { %4536 = vmatprep.subr.bf16.mxu0 %v7106_v1 }
 0x243   : > { %4392 = vmatmul.mubr.bf16.vlgmr.msra.gmra.mrb[0].mxu0 %v4254_v2 }
 0x244   : > { %4537 = vmatpush1.bf16.msra.mxu0 %v7104_v4  ;;  %6173 = vmatprep.mubr.msk.bf16.mxu0 %vm490_vm0, %v4430_v12 }
 0x245   : > { %4538 = vmatprep.subr.bf16.mxu0 %v7109_v10 }
 0x248   : > { %4539 = vmatpush1.bf16.msra.mxu0 %v7107_v39 }
 0x249   : > { %4540 = vmatprep.subr.bf16.mxu0 %v7112_v26 }
 0x24c   : > { %4541 = vmatpush1.bf16.msra.mxu0 %v7110_v63 }
 0x24d   : > { %4542 = vmatprep.subr.bf16.mxu0 %v7115_v13 }
 0x250   : > { %4543 = vmatpush1.bf16.msra.mxu0 %v7113_v8 }
 0x251   : > { %4544 = vmatprep.subr.bf16.mxu0 %v7118_v16 }
 0x254   : > { %4545 = vmatpush1.bf16.msra.mxu0 %v7116_v17 }
 0x255   : > { %4546 = vmatprep.subr.bf16.mxu0 %v7121_v18 }
 0x258   : > { %4547 = vmatpush1.bf16.msra.mxu0 %v7119_v19  ;;  %v4780_v19 = vld [vmem:[%s9188_s2] sm:$0x1f] }
 0x259   : > { %4548 = vmatprep.subr.bf16.mxu0 %v7124_v20  ;;  %v4940_v20 = vld [vmem:[%s9190_s4] sm:$0xff] }
 0x25c   : > { %4549 = vmatpush1.bf16.msra.mxu0 %v7122_v21  ;;  %v4941_v21 = vld [vmem:[%s9190_s4 + $0x8] sm:$0xff] }
 0x25d   : > { %4550 = vmatprep.subr.bf16.mxu0 %v7127_v22  ;;  %v4863_v22 = vld [vmem:[%s9189_s3] sm:$0x1f] }
 0x260   : > { %4551 = vmatpush1.bf16.msra.mxu0 %v7125_v3  ;;  %v6241_v3 = vpack.c.bf16 %v4941_v21, %v4940_v20  ;;  %v5051_v21 = vld [vmem:[%s9191_s5 + $0x90] sm:$0xff] }
 0x261   : > { %4552 = vmatprep.subr.bf16.mxu0 %v7130_v5  ;;  %v7180_v5 = vmov 0.0|0.0  }
 0x264   : > { %4553 = vmatpush1.bf16.msra.mxu0 %v7128_v49  ;;  %v4942_v49 = vld [vmem:[%s9190_s4 + $0x10] sm:$0xff] }
 0x265   : > { %4554 = vmatprep.subr.bf16.mxu0 %v7133_v14  ;;  %v4943_v14 = vld [vmem:[%s9190_s4 + $0x18] sm:$0xff] }
 0x268   : > { %4555 = vmatpush1.bf16.msra.mxu0 %v7131_v23  ;;  %v6244_v23 = vpack.c.bf16 %v4943_v14, %v4942_v49 }
 0x269   : > { %4713 = vmatprep.subr.bf16.mxu0 %v7136_v25  ;;  %v4945_v25 = vld [vmem:[%s9190_s4 + $0x28] sm:$0xff] }
 0x26b   : > { %4569 = vmatmul.mubr.bf16.vlgmr.msra.gmra.mrb[0].mxu0 %v4431_v27  ;;  %v6247_v27 = vpack.c.bf16 %v4945_v25, %v4944_v24  ;;  %v6223_v24 = vld [vmem:[%s9193_s7] ss:$0 sm:$0xff] }
 0x26c   : > { %4714 = vmatpush1.bf16.msra.mxu0 %v7134_v56  ;;  %6214 = vmatprep.mubr.msk.bf16.mxu0 %vm490_vm0, %v4607_v29  ;;  %v4946_v56 = vld [vmem:[%s9190_s4 + $0x30] sm:$0xff] }
 0x26d   : > { %4715 = vmatprep.subr.bf16.mxu0 %v7139_v28  ;;  %v4947_v28 = vld [vmem:[%s9190_s4 + $0x38] sm:$0xff] }
 0x26e   : > { %v6250_v29 = vpack.c.bf16 %v4947_v28, %v4946_v56  ;;  %v6224_v56 = vld [vmem:[%s9194_s8] ss:$0 sm:$0xff] }
 0x270   : > { %4716 = vmatpush1.bf16.msra.mxu0 %v7137_v38  ;;  %v4948_v38 = vld [vmem:[%s9190_s4 + $0x40] sm:$0xff] }
 0x271   : > { %4717 = vmatprep.subr.bf16.mxu0 %v7142_v30  ;;  %v4949_v30 = vld [vmem:[%s9190_s4 + $0x48] sm:$0xff] }
 0x274   : > { %4718 = vmatpush1.bf16.msra.mxu0 %v7140_v31  ;;  %v6253_v31 = vpack.c.bf16 %v4949_v30, %v4948_v38 }
 0x275   : > { %4719 = vmatprep.subr.bf16.mxu0 %v7145_v32  ;;  %v4950_v32 = vld [vmem:[%s9190_s4 + $0x50] sm:$0xff] }
 0x278   : > { %4720 = vmatpush1.bf16.msra.mxu0 %v7143_v59  ;;  %v4951_v59 = vld [vmem:[%s9190_s4 + $0x58] sm:$0xff] }
 0x279   : > { %4721 = vmatprep.subr.bf16.mxu0 %v7148_v34  ;;  %v6256_v34 = vpack.c.bf16 %v4951_v59, %v4950_v32 }
 0x27c   : > { %4722 = vmatpush1.bf16.msra.mxu0 %v7146_v6  ;;  %v4952_v6 = vld [vmem:[%s9190_s4 + $0x60] sm:$0xff] }
 0x27d   : > { %4723 = vmatprep.subr.bf16.mxu0 %v7151_v35  ;;  %v4953_v35 = vld [vmem:[%s9190_s4 + $0x68] sm:$0xff] }
 0x280   : > { %4724 = vmatpush1.bf16.msra.mxu0 %v7149_v36  ;;  %v6259_v36 = vpack.c.bf16 %v4953_v35, %v4952_v6 }
 0x281   : > { %4725 = vmatprep.subr.bf16.mxu0 %v7154_v37  ;;  %v4954_v37 = vld [vmem:[%s9190_s4 + $0x70] sm:$0xff] }
 0x284   : > { %4726 = vmatpush1.bf16.msra.mxu0 %v7152_v40  ;;  %v4955_v40 = vld [vmem:[%s9190_s4 + $0x78] sm:$0xff] }
 0x285   : > { %4727 = vmatprep.subr.bf16.mxu0 %v7157_v41  ;;  %v6262_v41 = vpack.c.bf16 %v4955_v40, %v4954_v37 }
 0x288   : > { %4728 = vmatpush1.bf16.msra.mxu0 %v7155_v42  ;;  %v4956_v42 = vld [vmem:[%s9190_s4 + $0x80] sm:$0xff] }
 0x289   : > { %4729 = vmatprep.subr.bf16.mxu0 %v7160_v43  ;;  %v4957_v43 = vld [vmem:[%s9190_s4 + $0x88] sm:$0xff] }
 0x28c   : > { %4730 = vmatpush1.bf16.msra.mxu0 %v7158_v46  ;;  %v6265_v46 = vpack.c.bf16 %v4957_v43, %v4956_v42 }
 0x28d   : > { %4731 = vmatprep.subr.bf16.mxu0 %v7163_v47  ;;  %v4958_v47 = vld [vmem:[%s9190_s4 + $0x90] sm:$0xff] }
 0x290   : > { %4732 = vmatpush1.bf16.msra.mxu0 %v7161_v48  ;;  %v4959_v48 = vld [vmem:[%s9190_s4 + $0x98] sm:$0xff] }
 0x291   : > { %v6268_v45 = vpack.c.bf16 %v4959_v48, %v4958_v47 }
 0x293   : > { %4746 = vmatmul.mubr.bf16.vlgmr.msra.gmra.mrb[0].mxu0 %v4608_v7 }
 0x2f6   : > { %v2271_v15 = vpop.f32.mrb[0].mxu1 }
 0x2f7   : > { %v2273_v50 = vpop.f32.mrb[1].mxu1 }
 0x2f8   : > { %v2275_v51 = vpop.f32.mrb[2].mxu1 }
 0x2f9   : > { %v2277_v52 = vpop.f32.mrb[3].mxu1 }
 0x366   : > { %v4747_v60 = vpop.f32.mrb[0].mxu0 }
 0x367   : > { %v6300_v62 = vadd.f32 %v4747_v60, %v2271_v15  ;;  %v4749_v44 = vpop.f32.mrb[1].mxu0  ;;  %v5033_v15 = vld [vmem:[%s9191_s5] sm:$0xff] }
 0x368   : > { %v6301_v9 = vadd.f32 %v4749_v44, %v2273_v50  ;;  %v4751_v0 = vpop.f32.mrb[2].mxu0  ;;  %v5034_v50 = vld [vmem:[%s9191_s5 + $0x8] sm:$0xff]  ;;  %v5037_v60 = vld [vmem:[%s9191_s5 + $0x20] sm:$0xff]  ;;  %v5039_v44 = vld [vmem:[%s9191_s5 + $0x30] sm:$0xff] }
 0x369   : > { %v4772_v1 = vadd.f32 %v6300_v62, %v4765_v58  ;;  %v6302_v2 = vadd.f32 %v4751_v0, %v2275_v51  ;;  %v4753_v4 = vpop.f32.mrb[3].mxu0  ;;  %v6271_v11 = vpack.c.bf16 %v5034_v50, %v5033_v15 }
 0x36a   : > { %v4773_v10 = vadd.f32 %v6301_v9, %v4769_v61  ;;  %v6303_v12 = vadd.f32 %v4753_v4, %v2277_v52  ;;  %v5040_v9 = vld [vmem:[%s9191_s5 + $0x38] sm:$0xff] }
 0x36b   : > { %v4774_v39 = vadd.f32 %v6302_v2, %v4765_v58  ;;  %v4776_v63 = vmax.f32 %v4772_v1, 0.0  ;;  %v6274_v58 = vpack.c.bf16 %v5036_v57, %v5035_v55  ;;  %v6280_v0 = vpack.c.bf16 %v5040_v9, %v5039_v44  ;;  %v5041_v1 = vld [vmem:[%s9191_s5 + $0x40] sm:$0xff]  ;;  %v5042_v2 = vld [vmem:[%s9191_s5 + $0x48] sm:$0xff] }
 0x36c   : > { %v4775_v26 = vadd.f32 %v6303_v12, %v4769_v61  ;;  %v4777_v8 = vmax.f32 %v4773_v10, 0.0  ;;  %v5038_v61 = vld [vmem:[%s9191_s5 + $0x28] sm:$0xff]  ;;  %v6283_v4 = vpack.c.bf16 %v5042_v2, %v5041_v1  ;;  %v5043_v10 = vld [vmem:[%s9191_s5 + $0x50] sm:$0xff]  ;;  %v5044_v12 = vld [vmem:[%s9191_s5 + $0x58] sm:$0xff] }
 0x36d   : > { %v4778_v13 = vmax.f32 %v4774_v39, 0.0  ;;  %v6277_v62 = vpack.c.bf16 %v5038_v61, %v5037_v60  ;;  %v6286_v39 = vpack.c.bf16 %v5044_v12, %v5043_v10 }
 0x36e   : > { %v4779_v16 = vmax.f32 %v4775_v26, 0.0  ;;  %v5045_v26 = vld [vmem:[%s9191_s5 + $0x60] sm:$0xff] }
 0x36f   : > { %v6231_v17 = vpack.c.bf16 %v4778_v13, %v4776_v63  ;;  %v5046_v63 = vld [vmem:[%s9191_s5 + $0x68] sm:$0xff] }
 0x370   : > { %v6228_v18 = vpack.c.bf16 %v4779_v16, %v4777_v8  ;;  %v6289_v13 = vpack.c.bf16 %v5046_v63, %v5045_v26  ;;  %v5047_v8 = vld [vmem:[%s9191_s5 + $0x70] sm:$0xff]  ;;  %v5048_v16 = vld [vmem:[%s9191_s5 + $0x78] sm:$0xff] }
 0x372   : > { %6230 = vmatprep.subr.msk.bf16.mxu1 %vm6229_vm7, %v6228_v18 }
 0x373   : > { %6233 = vmatpush1.bf16.msk.msra.mxu1 %vm6229_vm7, %v6231_v17 }
 0x374   : > { %6236 = vmatprep.subr.msk.bf16.mxu1 %vm6229_vm7, %v6228_v18  ;;  %v5049_v18 = vld [vmem:[%s9191_s5 + $0x80] sm:$0xff] }
 0x376   : > { %6217 = vmatmul.mubr.msk.f32.vlgmr.msra.gmra.mrb[4].mxu1 %vm4781_vm8, %v4780_v19  ;;  %v5050_v19 = vld [vmem:[%s9191_s5 + $0x88] sm:$0xff] }
 0x377   : > { %6239 = vmatpush1.bf16.msk.msra.mxu1 %vm6229_vm7, %v6231_v17  ;;  %4931 = vmatprep.mubr.f32.mxu1 %v7178_v33  ;;  %v6292_v17 = vpack.c.bf16 %v5048_v16, %v5047_v8  ;;  %v6295_v20 = vpack.c.bf16 %v5050_v19, %v5049_v18 }
 0x378   : > { %6240 = vmatprep.subr.bf16.mxu1 %v7180_v5 }
 0x37a   : > { %6220 = vmatmul.mubr.msk.f32.vlgmr.msra.gmra.mrb[6].mxu1 %vm4781_vm8, %v4863_v22  ;;  %v5052_v22 = vld [vmem:[%s9191_s5 + $0x98] sm:$0xff] }
 0x37b   : > { %6242 = vmatpush1.bf16.msra.mxu1 %v6241_v3  ;;  %v6298_v3 = vpack.c.bf16 %v5052_v22, %v5051_v21 }
 0x37c   : > { %6243 = vmatprep.subr.bf16.mxu1 %v7180_v5 }
 0x37f   : > { %6245 = vmatpush1.bf16.msra.mxu1 %v6244_v23 }
 0x380   : > { %6246 = vmatprep.subr.bf16.mxu1 %v7180_v5 }
 0x383   : > { %6248 = vmatpush1.bf16.msra.mxu1 %v6247_v27 }
 0x384   : > { %6249 = vmatprep.subr.bf16.mxu1 %v7180_v5 }
 0x387   : > { %6251 = vmatpush1.bf16.msra.mxu1 %v6250_v29  ;;  %v5144_v29 = vld [vmem:[%s330_s13] sm:$0x7] }
 0x388   : > { %6252 = vmatprep.subr.bf16.mxu1 %v7180_v5 }
 0x38b   : > { %6254 = vmatpush1.bf16.msra.mxu1 %v6253_v31 }
 0x38c   : > { %6255 = vmatprep.subr.bf16.mxu1 %v7180_v5 }
 0x38f   : > { %6257 = vmatpush1.bf16.msra.mxu1 %v6256_v34 }
 0x390   : > { %6258 = vmatprep.subr.bf16.mxu1 %v7180_v5 }
 0x393   : > { %6260 = vmatpush1.bf16.msra.mxu1 %v6259_v36 }
 0x394   : > { %6261 = vmatprep.subr.bf16.mxu1 %v7180_v5 }
 0x397   : > { %6263 = vmatpush1.bf16.msra.mxu1 %v6262_v41 }
 0x398   : > { %6264 = vmatprep.subr.bf16.mxu1 %v7180_v5 }
 0x39b   : > { %6266 = vmatpush1.bf16.msra.mxu1 %v6265_v46 }
 0x39c   : > { %6267 = vmatprep.subr.bf16.mxu1 %v7180_v5 }
 0x39f   : > { %6269 = vmatpush1.bf16.msra.mxu1 %v6268_v45 }
 0x3a0   : > { %6270 = vmatprep.subr.bf16.mxu1 %v7180_v5 }
 0x449   : > { %v4858_v7 = vpop.f32.mrb[4].mxu1 }
 0x44a   : > { %v4860_v33 = vpop.f32.mrb[5].mxu1 }
 0x44d   : > { %v4933_v51 = vpop.f32.mrb[6].mxu1 }
 0x44e   : > { %v4938_v52 = vmax.f32 %v4858_v7, %v4933_v51  ;;  %v4935_v53 = vpop.f32.mrb[7].mxu1 }
 0x44f   : > { %v4939_v54 = vmax.f32 %v4860_v33, %v4935_v53 }
 0x451   : > { %6221 = vmatprep.mubr.msk.f32.mxu1 %vm490_vm0, %v4939_v54 }
 0x452   : > { %5028 = vmatmul.mubr.f32.vlgmr.msra.gmra.mrb[8].mxu1 %v4938_v52 }
 0x453   : > { %6272 = vmatpush1.bf16.msra.mxu1 %v6271_v11  ;;  %6222 = vmatprep.mubr.msk.f32.mxu1 %vm490_vm0, %v4939_v54 }
 0x454   : > { %6273 = vmatprep.subr.bf16.mxu1 %v7180_v5 }
 0x457   : > { %6275 = vmatpush1.bf16.msra.mxu1 %v6274_v58 }
 0x458   : > { %6276 = vmatprep.subr.bf16.mxu1 %v7180_v5 }
 0x45b   : > { %6278 = vmatpush1.bf16.msra.mxu1 %v6277_v62 }
 0x45c   : > { %6279 = vmatprep.subr.bf16.mxu1 %v7180_v5 }
 0x45f   : > { %6281 = vmatpush1.bf16.msra.mxu1 %v6280_v0 }
 0x460   : > { %6282 = vmatprep.subr.bf16.mxu1 %v7180_v5 }
 0x463   : > { %6284 = vmatpush1.bf16.msra.mxu1 %v6283_v4 }
 0x464   : > { %6285 = vmatprep.subr.bf16.mxu1 %v7180_v5 }
 0x467   : > { %6287 = vmatpush1.bf16.msra.mxu1 %v6286_v39 }
 0x468   : > { %6288 = vmatprep.subr.bf16.mxu1 %v7180_v5 }
 0x46b   : > { %6290 = vmatpush1.bf16.msra.mxu1 %v6289_v13 }
 0x46c   : > { %6291 = vmatprep.subr.bf16.mxu1 %v7180_v5 }
 0x46f   : > { %6293 = vmatpush1.bf16.msra.mxu1 %v6292_v17 }
 0x470   : > { %6294 = vmatprep.subr.bf16.mxu1 %v7180_v5 }
 0x473   : > { %6296 = vmatpush1.bf16.msra.mxu1 %v6295_v20 }
 0x474   : > { %6297 = vmatprep.subr.bf16.mxu1 %v7180_v5 }
 0x477   : > { %6299 = vmatpush1.bf16.msra.mxu1 %v6298_v3 }
 0x47a   : > { %5118 = vmatmul.mubr.f32.vlgmr.msra.gmra.mrb[10].mxu1 %v4938_v52 }
 0x525   : > { %v5029_v49 = vpop.f32.mrb[8].mxu1 }
 0x526   : > { %v5031_v14 = vpop.f32.mrb[9].mxu1 }
 0x54d   : > { %v5119_v23 = vpop.f32.mrb[10].mxu1 }
 0x54e   : > { %v5123_v25 = vmax.f32 %v5029_v49, %v5119_v23  ;;  %v5121_v27 = vpop.f32.mrb[11].mxu1 }
 0x550   : > { %v5131_v5 = vmul.f32 %v6223_v24, %v5123_v25 }
 0x552   : > { %v5139_v28 = vadd.f32 %v6224_v56, %v5131_v5 }
 0x554   : > { %v5140_v38 = vpack.c.bf16 %v5139_v28, %v5139_v28 }
 0x556   : > { %v5145_v30 = vsel %vm5143_vm11, %v5140_v38, %v5144_v29 }
 0x557   : > { %5146 = vst [vmem:[%s330_s13] sm:$0x7] %v5145_v30 }
 0x558 PF: > { %s19_s30 = sadd.s32 1, %s7172_s30  }
 0x559   : > { %p16_p4 = scmp.ge.s32.totalorder %s19_s30, 14  }
 0x55b   :  { %18 = sbr.rel (!%p16_p4) target bundleno = 1 (0x1), region = 110 }

// kernel: gemini_forward_pallas.3
= control target key start
LH: loop header
LB: loop body
LE: loop exit
PB: predicated region body
PF: predicated region fallthrough
CT: control target
= control target key end

     0   :  { %s11206_s30 = smov 0   ;;  %s14080_s0 = inlined_call_operand.vmem [shape: bf16[12,32,96], index: 0, kind: input, shape index: {}]   ;;  %s14081_s1 = inlined_call_operand.vmem [shape: bf16[25,84,448], index: 1, kind: input, shape index: {}]   ;;  %s14082_s2 = inlined_call_operand.vmem [shape: f32[14,28], index: 2, kind: input, shape index: {}]   ;;  %s14083_s3 = inlined_call_operand.vmem [shape: f32[14,28], index: 3, kind: input, shape index: {}]   ;;  %s14084_s4 = inlined_call_operand.vmem [shape: f32[448,224], index: 4, kind: input, shape index: {}]   ;;  %s14085_s5 = inlined_call_operand.vmem [shape: f32[448,224], index: 5, kind: input, shape index: {}]   ;;  %s14086_s6 = inlined_call_operand.vmem [shape: f32[1,448], index: 6, kind: input, shape index: {}]   ;;  %s14087_s7 = inlined_call_operand.vmem [shape: f32[1,224], index: 7, kind: input, shape index: {}]   ;;  %s14088_s8 = inlined_call_operand.vmem [shape: f32[1,224], index: 8, kind: input, shape index: {}]   ;;  %s14089_s9 = inlined_call_operand.vmem [shape: bf16[12,14,224], index: 9, kind: output, shape index: {}]  }
   0x1 LB: > { %s8299_s10 = sadd.s32 4294967295, %s11147_s30   ;;  %p8303_p0 = scmp.ge.s32.totalorder %s11147_s30, 1  ;;  %s11147_s30 = sphi %s11206_s30, %s19_s30  }
   0x2   : > { %p287_p1 = scmp.lt.s32.totalorder %s11147_s30, 13 }
   0x4   : > { %p288_p2 = pnand %p8303_p0, %p287_p1 }
   0x5   : > { %p323_p3 = scmp.lt.s32.totalorder (!%p288_p2), %s8299_s10, 11  ;;  %v10289_v0 = vld [vmem:[%s14081_s1 + $0xb4] ss:$16 sps:$4 sm:$0xff] (!%p288_p2)   ;;  %v10291_v1 = vld [vmem:[%s14081_s1 + $0xbc] ss:$16 sps:$4 sm:$0xff] (!%p288_p2)   ;;  %v11149_v9 = vmov (!%p288_p2), 0  }
   0x6   : > { %291 = sbr.rel (%p288_p2) target bundleno = 1439 (0x59f), region = 56  ;;  %525 = vmatprep.subr.bf16.mxu0 (!%p288_p2), %v10289_v0  ;;  %v10293_v2 = vld [vmem:[%s14081_s1 + $0xb0] ss:$16 sps:$4 sm:$0xff] (!%p288_p2)   ;;  %v10294_v3 = vld [vmem:[%s14081_s1 + $0xb8] ss:$16 sps:$4 sm:$0xff] (!%p288_p2)   ;;  %578 = vmatprep.subr.bf16.mxu1 (!%p288_p2), %v10291_v1  ;;  %s11150_s12 = smov (!%p288_p2), 125  }
   0x7   : > { %v10295_v4 = vld [vmem:[%s14081_s1 + $0xd4] ss:$16 sps:$4 sm:$0xff] (!%p288_p2)   ;;  %526 = vmatpush1.bf16.msra.mxu0 (!%p288_p2), %v10293_v2  ;;  %579 = vmatpush1.bf16.msra.mxu1 (!%p288_p2), %v10294_v3  ;;  %v10297_v5 = vld [vmem:[%s14081_s1 + $0xdc] ss:$16 sps:$4 sm:$0xff] (!%p288_p2)   ;;  %v10299_v6 = vld [vmem:[%s14081_s1 + $0xd0] ss:$16 sps:$4 sm:$0xff] (!%p288_p2)  }
   0x8   : > { %527 = vmatprep.subr.bf16.mxu0 (!%p288_p2), %v10295_v4  ;;  %v10300_v7 = vld [vmem:[%s14081_s1 + $0xd8] ss:$16 sps:$4 sm:$0xff] (!%p288_p2)   ;;  %580 = vmatprep.subr.bf16.mxu1 (!%p288_p2), %v10297_v5  ;;  %s11151_s13 = smov (!%p288_p2), 122   ;;  %v10301_v11 = vld [vmem:[%s14081_s1 + $0xf4] ss:$16 sps:$4 sm:$0xff] (!%p288_p2)   ;;  %s11152_s22 = smov (!%p288_p2), 119  }
   0x9   : > { %557 = vmatprep.mubr.bf16.mxu0 (!%p288_p2), %v11149_v9  ;;  %610 = vmatprep.mubr.bf16.mxu1 (!%p288_p2), %v11149_v9  ;;  %v10303_v12 = vld [vmem:[%s14081_s1 + $0xfc] ss:$16 sps:$4 sm:$0xff] (!%p288_p2)   ;;  %v10305_v13 = vld [vmem:[%s14081_s1 + $0xf0] ss:$16 sps:$4 sm:$0xff] (!%p288_p2)   ;;  %v10306_v14 = vld [vmem:[%s14081_s1 + $0xf8] ss:$16 sps:$4 sm:$0xff] (!%p288_p2)  }
   0xa   : > { %v10307_v15 = vld [vmem:[%s14081_s1 + $0x114] ss:$16 sps:$4 sm:$0xff] (!%p288_p2)   ;;  %v10309_v16 = vld [vmem:[%s14081_s1 + $0x11c] ss:$16 sps:$4 sm:$0xff] (!%p288_p2)   ;;  %v10311_v17 = vld [vmem:[%s14081_s1 + $0x110] ss:$16 sps:$4 sm:$0xff] (!%p288_p2)  }
   0xb   : > { %528 = vmatpush1.bf16.msra.mxu0 (!%p288_p2), %v10299_v6  ;;  %581 = vmatpush1.bf16.msra.mxu1 (!%p288_p2), %v10300_v7  ;;  %v10312_v18 = vld [vmem:[%s14081_s1 + $0x118] ss:$16 sps:$4 sm:$0xff] (!%p288_p2)   ;;  %v10313_v19 = vld [vmem:[%s14081_s1 + $0x134] ss:$16 sps:$4 sm:$0xff] (!%p288_p2)   ;;  %v10315_v20 = vld [vmem:[%s14081_s1 + $0x13c] ss:$16 sps:$4 sm:$0xff] (!%p288_p2)  }
   0xc   : > { %529 = vmatprep.subr.bf16.mxu0 (!%p288_p2), %v10301_v11  ;;  %582 = vmatprep.subr.bf16.mxu1 (!%p288_p2), %v10303_v12  ;;  %v10317_v21 = vld [vmem:[%s14081_s1 + $0x130] ss:$16 sps:$4 sm:$0xff] (!%p288_p2)   ;;  %v8331_v23 = vld [vmem:[%s14081_s1 + $0x158] sm:$0x33] (!%p288_p2)  ;;  %vm512_vm0 = vcmask (!%p288_p2), 1041408   ;;  %s11153_s11 = smov (!%p288_p2), 116  }
   0xd   : > { %s14093_s10 = smov (!%p323_p3, %s8299_s10), 11  ;;  %v8330_v22 = vld [vmem:[%s14081_s1 + $0x150] sm:$0x33]  ;;  %v10318_v24 = vld [vmem:[%s14081_s1 + $0x138] ss:$16 sps:$4 sm:$0xff]   ;;  %v8355_v26 = vcombine.high %v8331_v23, %v8331_v23  ;;  %v8354_v28 = vcombine.low %v8331_v23, %v8331_v23  ;;  %vm505_vm2 = vcmask 687104  }
   0xe   : > { %s9612_s21 = sshll.u32 %s14093_s10, 4  ;;  %v8353_v25 = vcombine.high %v8330_v22, %v8330_v22  ;;  %v8352_v27 = vcombine.low %v8330_v22, %v8330_v22  ;;  %v10325_v32 = vld [vmem:[%s14081_s1 + $0x4] ss:$16 sps:$4 sm:$0xff]   ;;  %v10328_v36 = vld [vmem:[%s14081_s1 + $0xc] ss:$16 sps:$4 sm:$0xff]   ;;  %vm3114_vm3 = vcmask 1046528  }
   0xf   : > { %s11243_s28 = scalar_lea.vmem %s14080_s0, %s9612_s21  ;;  %530 = vmatpush1.bf16.msra.mxu0 %v10305_v13  ;;  %583 = vmatpush1.bf16.msra.mxu1 %v10306_v14  ;;  %v520_v35 = vsel %vm512_vm0, %v8354_v28, 0  ;;  %vm1719_vm1 = vsmask.f32 7424  ;;  %v10323_v45 = vld [vmem:[%s14081_s1] ss:$16 sps:$4 sm:$0xff]   ;;  %vm5888_vm5 = vcmask 1045504   ;;  %s332_s16 = scalar_lea.vmem %s14089_s9, %s9612_s21 }
  0x10   : > { %v11249_v8 = vld [vmem:[%s11243_s28] sm:$0xff]   ;;  %v11253_v10 = vld [vmem:[%s11243_s28 + $0x8] sm:$0xff]   ;;  %531 = vmatprep.subr.bf16.mxu0 %v10307_v15  ;;  %584 = vmatprep.subr.bf16.mxu1 %v10309_v16  ;;  %v514_v34 = vsel %vm512_vm0, %v8352_v27, 0  ;;  %vm4499_vm4 = vsmask.f32 6400  ;;  %vm7313_vm6 = vcmask 1043456  }
  0x11   : > { %391 = vrot.lane.b32.xlu0 %v11249_v8, %s11150_s12  ;;  %888 = vrot.lane.b32.xlu1 %v11249_v8, %s11151_s13  ;;  %v1722_v29 = vshll.u32 %v11249_v8, 16  ;;  %v1720_v30 = vshrl.u32 %v11249_v8, 16  ;;  %v1726_v33 = vshll.u32 %v11253_v10, 16  ;;  %v1730_v40 = vshrl.u32 %v11253_v10, 16  ;;  %v10326_v46 = vld [vmem:[%s14081_s1 + $0x8] ss:$16 sps:$4 sm:$0xff]  }
  0x12   : > { %v10331_v47 = vld [vmem:[%s14081_s1 + $0x24] ss:$16 sps:$4 sm:$0xff]   ;;  %v10334_v48 = vld [vmem:[%s14081_s1 + $0x2c] ss:$16 sps:$4 sm:$0xff]   ;;  %v10329_v50 = vld [vmem:[%s14081_s1 + $0x20] ss:$16 sps:$4 sm:$0xff]  }
  0x13   : > { %532 = vmatpush1.bf16.msra.mxu0 %v10311_v17  ;;  %585 = vmatpush1.bf16.msra.mxu1 %v10312_v18  ;;  %v1724_v31 = vrot.slane %v1722_v29, 1  ;;  %v1728_v38 = vrot.slane %v1726_v33, 1  ;;  %v4504_v41 = vrot.slane %v1726_v33, 2  ;;  %v4503_v43 = vrot.slane %v1730_v40, 1  ;;  %v10332_v51 = vld [vmem:[%s14081_s1 + $0x28] ss:$16 sps:$4 sm:$0xff]  }
  0x14   : > { %533 = vmatprep.subr.bf16.mxu0 %v10313_v19  ;;  %586 = vmatprep.subr.bf16.mxu1 %v10315_v20  ;;  %v10337_v52 = vld [vmem:[%s14081_s1 + $0x44] ss:$16 sps:$4 sm:$0xff]   ;;  %v10340_v53 = vld [vmem:[%s14081_s1 + $0x4c] ss:$16 sps:$4 sm:$0xff]   ;;  %v10335_v54 = vld [vmem:[%s14081_s1 + $0x40] ss:$16 sps:$4 sm:$0xff]  }
  0x15   : > { %393 = vrot.lane.b32.xlu0 %v11253_v10, %s11150_s12  ;;  %890 = vrot.lane.b32.xlu1 %v11253_v10, %s11151_s13  ;;  %v1725_v37 = vor.u32 %v1724_v31, %v1720_v30  ;;  %v11334_v42 = vor.u32 %v1730_v40, %v1728_v38  ;;  %v11338_v44 = vor.u32 %v4504_v41, %v4503_v43  ;;  %v10338_v55 = vld [vmem:[%s14081_s1 + $0x48] ss:$16 sps:$4 sm:$0xff]   ;;  %v10343_v57 = vld [vmem:[%s14081_s1 + $0x64] ss:$16 sps:$4 sm:$0xff]   ;;  %v3115_v14 = vrot.slane %v11249_v8, 1 }
  0x16   : > { %v10346_v58 = vld [vmem:[%s14081_s1 + $0x6c] ss:$16 sps:$4 sm:$0xff]   ;;  %v10341_v59 = vld [vmem:[%s14081_s1 + $0x60] ss:$16 sps:$4 sm:$0xff]   ;;  %v10344_v60 = vld [vmem:[%s14081_s1 + $0x68] ss:$16 sps:$4 sm:$0xff]  }
  0x17   : > { %534 = vmatpush1.bf16.msra.mxu0 %v10317_v21  ;;  %587 = vmatpush1.bf16.msra.mxu1 %v10318_v24  ;;  %v11331_v39 = vsel %vm1719_vm1, %v1725_v37, %v1728_v38  ;;  %v10349_v61 = vld [vmem:[%s14081_s1 + $0x84] ss:$16 sps:$4 sm:$0xff]   ;;  %v10352_v62 = vld [vmem:[%s14081_s1 + $0x8c] ss:$16 sps:$4 sm:$0xff]   ;;  %v10347_v1 = vld [vmem:[%s14081_s1 + $0x80] ss:$16 sps:$4 sm:$0xff]  }
  0x18   : > { %8356 = vmatprep.subr.msk.bf16.mxu0 %vm512_vm0, %v8353_v25  ;;  %8359 = vmatprep.subr.msk.bf16.mxu1 %vm512_vm0, %v8355_v26  ;;  %v364_v63 = vld [vmem:[%s14081_s1 + $0xa0] sm:$0x33]  ;;  %v365_v0 = vld [vmem:[%s14081_s1 + $0xa8] sm:$0x33]  ;;  %v11434_v15 = vrot.slane %v11253_v10, 1  ;;  %vm11155_vm7 = vmmov 1  }
  0x19   : > { %1165 = vrot.lane.b32.xlu0 %v11249_v8, %s11152_s22  ;;  %1167 = vrot.lane.b32.xlu1 %v11253_v10, %s11152_s22  ;;  %v10350_v2 = vld [vmem:[%s14081_s1 + $0x88] ss:$16 sps:$4 sm:$0xff]   ;;  %v8383_v3 = vcombine.high %v364_v63, %v364_v63  ;;  %v8385_v4 = vcombine.high %v365_v0, %v365_v0  ;;  %v8382_v5 = vcombine.low %v364_v63, %v364_v63  ;;  %v10359_v7 = vld [vmem:[%s14081_s1 + $0x164] ss:$16 sps:$4 sm:$0xff]   ;;  %vm13327_vm8 = vmpackc.low %vm7313_vm6, %vm11155_vm7  ;;  %vm7306_vm9 = vcmask 228352  }
  0x1a   : > { %v8384_v6 = vcombine.low %v365_v0, %v365_v0  ;;  %v10362_v13 = vld [vmem:[%s14081_s1 + $0x16c] ss:$16 sps:$4 sm:$0xff]   ;;  %v10357_v16 = vld [vmem:[%s14081_s1 + $0x160] ss:$16 sps:$4 sm:$0xff]   ;;  %v10360_v17 = vld [vmem:[%s14081_s1 + $0x168] ss:$16 sps:$4 sm:$0xff]   ;;  %v11443_v18 = vsel %vm3114_vm3, %v3115_v14, %v11434_v15 }
  0x1b   : > { %536 = vmatpush1.bf16.msra.mxu0 %v514_v34  ;;  %589 = vmatpush1.bf16.msra.mxu1 %v520_v35  ;;  %v748_v11 = vsel %vm512_vm0, %v8382_v5, 0  ;;  %v10365_v19 = vld [vmem:[%s14081_s1 + $0x184] ss:$16 sps:$4 sm:$0xff]   ;;  %v10368_v20 = vld [vmem:[%s14081_s1 + $0x18c] ss:$16 sps:$4 sm:$0xff]   ;;  %vm7762_vm10 = vcmask 523264  }
  0x1c   : > { %759 = vmatprep.subr.bf16.mxu0 %v10325_v32  ;;  %812 = vmatprep.subr.bf16.mxu1 %v10328_v36  ;;  %v754_v12 = vsel %vm512_vm0, %v8384_v6, 0  ;;  %v10363_v21 = vld [vmem:[%s14081_s1 + $0x180] ss:$16 sps:$4 sm:$0xff]   ;;  %v10366_v22 = vld [vmem:[%s14081_s1 + $0x188] ss:$16 sps:$4 sm:$0xff]   ;;  %vm8237_vm11 = vcmask 785412  }
  0x1d   : > { %1442 = vrot.lane.b32.xlu0 %v11249_v8, %s11153_s11  ;;  %1444 = vrot.lane.b32.xlu1 %v11253_v10, %s11153_s11  ;;  %v10371_v23 = vld [vmem:[%s14081_s1 + $0x1a4] ss:$16 sps:$4 sm:$0xff]   ;;  %v10374_v24 = vld [vmem:[%s14081_s1 + $0x1ac] ss:$16 sps:$4 sm:$0xff]   ;;  %vm8238_vm12 = vmor %vm8237_vm11, %vm7313_vm6  ;;  %vm8240_vm13 = vcmask 1042432   ;;  %vm8241_vm14 = vcmask 784388  }
  0x1e   : > { %v10369_v25 = vld [vmem:[%s14081_s1 + $0x1a0] ss:$16 sps:$4 sm:$0xff]   ;;  %v10372_v26 = vld [vmem:[%s14081_s1 + $0x1a8] ss:$16 sps:$4 sm:$0xff]   ;;  %v10377_v27 = vld [vmem:[%s14081_s1 + $0x1c4] ss:$16 sps:$4 sm:$0xff]  }
  0x1f   : > { %v10380_v28 = vld [vmem:[%s14081_s1 + $0x1cc] ss:$16 sps:$4 sm:$0xff]   ;;  %v10375_v31 = vld [vmem:[%s14081_s1 + $0x1c0] ss:$16 sps:$4 sm:$0xff]   ;;  %v10378_v32 = vld [vmem:[%s14081_s1 + $0x1c8] ss:$16 sps:$4 sm:$0xff]  }
  0x20   : > { %v10383_v33 = vld [vmem:[%s14081_s1 + $0x1e4] ss:$16 sps:$4 sm:$0xff]   ;;  %v10386_v34 = vld [vmem:[%s14081_s1 + $0x1ec] ss:$16 sps:$4 sm:$0xff]   ;;  %v10384_v37 = vld [vmem:[%s14081_s1 + $0x1e8] ss:$16 sps:$4 sm:$0xff]  }
  0x21   : > { %2006 = vrot.lane.b32.xlu0 %v11331_v39, %s11150_s12  ;;  %2008 = vrot.lane.b32.xlu1 %v11334_v42, %s11150_s12  ;;  %v8412_v35 = vld [vmem:[%s14081_s1 + $0x200] sm:$0x33]  ;;  %v8413_v36 = vld [vmem:[%s14081_s1 + $0x208] sm:$0x33]  ;;  %vm8242_vm15 = vmor %vm8241_vm14, %vm8240_vm13 }
  0x22   : > { %v8435_v38 = vcombine.high %v8412_v35, %v8412_v35  ;;  %v8437_v40 = vcombine.high %v8413_v36, %v8413_v36  ;;  %v8434_v41 = vcombine.low %v8412_v35, %v8412_v35  ;;  %v8436_v43 = vcombine.low %v8413_v36, %v8413_v36  ;;  %v10409_v63 = vld [vmem:[%s14081_s1 + $0x270] ss:$16 sps:$4 sm:$0xff]   ;;  %v10412_v0 = vld [vmem:[%s14081_s1 + $0x278] ss:$16 sps:$4 sm:$0xff]   ;;  %v10448_v35 = vld [vmem:[%s14081_s1 + $0x32c] ss:$16 sps:$4 sm:$0xff]  }
  0x23   : > { %v10415_v5 = vld [vmem:[%s14081_s1 + $0x290] ss:$16 sps:$4 sm:$0xff]   ;;  %v10418_v6 = vld [vmem:[%s14081_s1 + $0x298] ss:$16 sps:$4 sm:$0xff]  }
  0x24   : > { %v10443_v36 = vld [vmem:[%s14081_s1 + $0x320] ss:$16 sps:$4 sm:$0xff]  }
  0x25   : > { %2283 = vrot.lane.b32.xlu0 %v11331_v39, %s11151_s13  ;;  %2285 = vrot.lane.b32.xlu1 %v11334_v42, %s11151_s13 }
  0x29   : > { %2560 = vrot.lane.b32.xlu0 %v11331_v39, %s11152_s22  ;;  %2562 = vrot.lane.b32.xlu1 %v11334_v42, %s11152_s22 }
  0x2d   : > { %2837 = vrot.lane.b32.xlu0 %v11331_v39, %s11153_s11  ;;  %2839 = vrot.lane.b32.xlu1 %v11334_v42, %s11153_s11 }
  0x31   : > { %3391 = vrot.lane.b32.xlu0 %v11443_v18, %s11150_s12  ;;  %3393 = vrot.lane.b32.xlu1 %v11434_v15, %s11150_s12 }
  0x35   : > { %3668 = vrot.lane.b32.xlu0 %v11443_v18, %s11151_s13  ;;  %3670 = vrot.lane.b32.xlu1 %v11434_v15, %s11151_s13 }
  0x39   : > { %3945 = vrot.lane.b32.xlu0 %v11443_v18, %s11152_s22  ;;  %3947 = vrot.lane.b32.xlu1 %v11434_v15, %s11152_s22 }
  0x3d   : > { %4222 = vrot.lane.b32.xlu0 %v11443_v18, %s11153_s11  ;;  %4224 = vrot.lane.b32.xlu1 %v11434_v15, %s11153_s11 }
  0x41   : > { %4782 = vrot.lane.b32.xlu1 %v11338_v44, %s11150_s12 }
  0x45   : > { %5059 = vrot.lane.b32.xlu1 %v11338_v44, %s11151_s13 }
  0x49   : > { %5336 = vrot.lane.b32.xlu1 %v11338_v44, %s11152_s22 }
  0x4d   : > { %5613 = vrot.lane.b32.xlu1 %v11338_v44, %s11153_s11 }
  0x83   : > { %v392_v49 = vpop.permute.xlu0 %391 }
  0x84   : > { %8357 = vmatmul.mubr.msk.bf16.vlgmr.msra.gmra.mrb[0].mxu0 %vm505_vm2, %v392_v49  ;;  %8360 = vmatmul.mubr.msk.bf16.vlgmr.msra.gmra.mrb[0].mxu1 %vm505_vm2, %v392_v49  ;;  %v889_v49 = vpop.permute.xlu1 %888 }
  0x85   : > { %760 = vmatpush1.bf16.msra.mxu0 %v10323_v45  ;;  %813 = vmatpush1.bf16.msra.mxu1 %v10326_v46  ;;  %v10393_v45 = vld [vmem:[%s14081_s1 + $0x214] ss:$16 sps:$4 sm:$0xff]   ;;  %v1009_v46 = vsel %vm512_vm0, %v8434_v41, 0  ;;  %v8517_v41 = vld [vmem:[%s14081_s1 + $0x368] sm:$0x33] }
  0x86   : > { %761 = vmatprep.subr.bf16.mxu0 %v10331_v47  ;;  %814 = vmatprep.subr.bf16.mxu1 %v10334_v48  ;;  %v1015_v47 = vsel %vm512_vm0, %v8436_v43, 0  ;;  %v10396_v48 = vld [vmem:[%s14081_s1 + $0x21c] ss:$16 sps:$4 sm:$0xff]   ;;  %v10449_v43 = vld [vmem:[%s14081_s1 + $0x340] ss:$16 sps:$4 sm:$0xff]  }
  0x87   : > { %567 = vmatprep.mubr.bf16.mxu0 %v11149_v9  ;;  %620 = vmatprep.mubr.bf16.mxu1 %v11149_v9  ;;  %v394_v56 = vpop.permute.xlu0 %393 }
  0x89   : > { %762 = vmatpush1.bf16.msra.mxu0 %v10329_v50  ;;  %815 = vmatpush1.bf16.msra.mxu1 %v10332_v51  ;;  %v10391_v50 = vld [vmem:[%s14081_s1 + $0x210] ss:$16 sps:$4 sm:$0xff]   ;;  %v10394_v51 = vld [vmem:[%s14081_s1 + $0x218] ss:$16 sps:$4 sm:$0xff]  }
  0x8a   : > { %763 = vmatprep.subr.bf16.mxu0 %v10337_v52  ;;  %816 = vmatprep.subr.bf16.mxu1 %v10340_v53  ;;  %v10399_v52 = vld [vmem:[%s14081_s1 + $0x234] ss:$16 sps:$4 sm:$0xff]   ;;  %v10402_v53 = vld [vmem:[%s14081_s1 + $0x23c] ss:$16 sps:$4 sm:$0xff]  }
  0x8c   : > { %8358 = vmatmul.mubr.msk.bf16.gmra.mrb[4].mxu0 %vm505_vm2, %v394_v56  ;;  %8361 = vmatmul.mubr.msk.bf16.gmra.mrb[4].mxu1 %vm505_vm2, %v394_v56  ;;  %v10405_v56 = vld [vmem:[%s14081_s1 + $0x254] ss:$16 sps:$4 sm:$0xff]  }
  0x8d   : > { %764 = vmatpush1.bf16.msra.mxu0 %v10335_v54  ;;  %817 = vmatpush1.bf16.msra.mxu1 %v10338_v55  ;;  %v10397_v54 = vld [vmem:[%s14081_s1 + $0x230] ss:$16 sps:$4 sm:$0xff]   ;;  %v10400_v55 = vld [vmem:[%s14081_s1 + $0x238] ss:$16 sps:$4 sm:$0xff]  }
  0x8e   : > { %765 = vmatprep.subr.bf16.mxu0 %v10343_v57  ;;  %818 = vmatprep.subr.bf16.mxu1 %v10346_v58  ;;  %v10408_v57 = vld [vmem:[%s14081_s1 + $0x25c] ss:$16 sps:$4 sm:$0xff]   ;;  %v10403_v58 = vld [vmem:[%s14081_s1 + $0x250] ss:$16 sps:$4 sm:$0xff]  }
  0x8f   : > { %791 = vmatprep.mubr.bf16.mxu0 %v11149_v9  ;;  %844 = vmatprep.mubr.bf16.mxu1 %v11149_v9 }
  0x91   : > { %766 = vmatpush1.bf16.msra.mxu0 %v10341_v59  ;;  %819 = vmatpush1.bf16.msra.mxu1 %v10344_v60  ;;  %v10406_v59 = vld [vmem:[%s14081_s1 + $0x258] ss:$16 sps:$4 sm:$0xff]   ;;  %v891_v60 = vpop.permute.xlu1 %890 }
  0x92   : > { %767 = vmatprep.subr.bf16.mxu0 %v10349_v61  ;;  %820 = vmatprep.subr.bf16.mxu1 %v10352_v62  ;;  %v10411_v61 = vld [vmem:[%s14081_s1 + $0x274] ss:$16 sps:$4 sm:$0xff]   ;;  %v10414_v62 = vld [vmem:[%s14081_s1 + $0x27c] ss:$16 sps:$4 sm:$0xff]  }
  0x95   : > { %768 = vmatpush1.bf16.msra.mxu0 %v10347_v1  ;;  %821 = vmatpush1.bf16.msra.mxu1 %v10350_v2  ;;  %v10417_v1 = vld [vmem:[%s14081_s1 + $0x294] ss:$16 sps:$4 sm:$0xff]   ;;  %v10420_v2 = vld [vmem:[%s14081_s1 + $0x29c] ss:$16 sps:$4 sm:$0xff]  }
  0x96   : > { %8386 = vmatprep.subr.msk.bf16.mxu0 %vm512_vm0, %v8383_v3  ;;  %8389 = vmatprep.subr.msk.bf16.mxu1 %vm512_vm0, %v8385_v4  ;;  %v8464_v3 = vld [vmem:[%s14081_s1 + $0x2b0] sm:$0x33]  ;;  %v8465_v4 = vld [vmem:[%s14081_s1 + $0x2b8] sm:$0x33] }
  0x99   : > { %770 = vmatpush1.bf16.msra.mxu0 %v748_v11  ;;  %823 = vmatpush1.bf16.msra.mxu1 %v754_v12  ;;  %v8487_v11 = vcombine.high %v8464_v3, %v8464_v3  ;;  %v8489_v12 = vcombine.high %v8465_v4, %v8465_v4 }
  0x9a   : > { %1020 = vmatprep.subr.bf16.mxu0 %v10359_v7  ;;  %1073 = vmatprep.subr.bf16.mxu1 %v10362_v13  ;;  %v8486_v7 = vcombine.low %v8464_v3, %v8464_v3  ;;  %v8488_v13 = vcombine.low %v8465_v4, %v8465_v4  ;;  %v10482_v3 = vld [vmem:[%s14081_s1 + $0x3dc] ss:$16 sps:$4 sm:$0xff]   ;;  %v10477_v4 = vld [vmem:[%s14081_s1 + $0x3d0] ss:$16 sps:$4 sm:$0xff]  }
  0x9c   : > { %8387 = vmatmul.mubr.msk.bf16.vlgmr.msra.gmra.mrb[0].mxu0 %vm505_vm2, %v11249_v8  ;;  %8390 = vmatmul.mubr.msk.bf16.vlgmr.msra.gmra.mrb[0].mxu1 %vm505_vm2, %v11249_v8  ;;  %v1286_v14 = vsel %vm512_vm0, %v8486_v7, 0  ;;  %v10488_v7 = vld [vmem:[%s14081_s1 + $0x3fc] ss:$16 sps:$4 sm:$0xff]  }
  0x9d   : > { %1021 = vmatpush1.bf16.msra.mxu0 %v10357_v16  ;;  %1074 = vmatpush1.bf16.msra.mxu1 %v10360_v17  ;;  %v1292_v16 = vsel %vm512_vm0, %v8488_v13, 0  ;;  %v10427_v17 = vld [vmem:[%s14081_s1 + $0x2c4] ss:$16 sps:$4 sm:$0xff]   ;;  %v10483_v13 = vld [vmem:[%s14081_s1 + $0x3f0] ss:$16 sps:$4 sm:$0xff]  }
  0x9e   : > { %1022 = vmatprep.subr.bf16.mxu0 %v10365_v19  ;;  %1075 = vmatprep.subr.bf16.mxu1 %v10368_v20  ;;  %v10430_v19 = vld [vmem:[%s14081_s1 + $0x2cc] ss:$16 sps:$4 sm:$0xff]   ;;  %v10425_v20 = vld [vmem:[%s14081_s1 + $0x2c0] ss:$16 sps:$4 sm:$0xff]  }
  0x9f   : > { %801 = vmatprep.mubr.bf16.mxu0 %v11149_v9  ;;  %854 = vmatprep.mubr.bf16.mxu1 %v11149_v9 }
  0xa1   : > { %1023 = vmatpush1.bf16.msra.mxu0 %v10363_v21  ;;  %1076 = vmatpush1.bf16.msra.mxu1 %v10366_v22  ;;  %v10428_v21 = vld [vmem:[%s14081_s1 + $0x2c8] ss:$16 sps:$4 sm:$0xff]   ;;  %v1166_v22 = vpop.permute.xlu0 %1165 }
  0xa2   : > { %1024 = vmatprep.subr.bf16.mxu0 %v10371_v23  ;;  %1077 = vmatprep.subr.bf16.mxu1 %v10374_v24  ;;  %v10433_v23 = vld [vmem:[%s14081_s1 + $0x2e4] ss:$16 sps:$4 sm:$0xff]   ;;  %v10436_v24 = vld [vmem:[%s14081_s1 + $0x2ec] ss:$16 sps:$4 sm:$0xff]  }
  0xa4   : > { %8388 = vmatmul.mubr.msk.bf16.gmra.mrb[4].mxu0 %vm505_vm2, %v11253_v10  ;;  %8391 = vmatmul.mubr.msk.bf16.gmra.mrb[4].mxu1 %vm505_vm2, %v11253_v10  ;;  %v10381_v10 = vld [vmem:[%s14081_s1 + $0x1e0] ss:$16 sps:$4 sm:$0xff]  }
  0xa5   : > { %1025 = vmatpush1.bf16.msra.mxu0 %v10369_v25  ;;  %1078 = vmatpush1.bf16.msra.mxu1 %v10372_v26  ;;  %v10431_v25 = vld [vmem:[%s14081_s1 + $0x2e0] ss:$16 sps:$4 sm:$0xff]   ;;  %v10434_v26 = vld [vmem:[%s14081_s1 + $0x2e8] ss:$16 sps:$4 sm:$0xff]  }
  0xa6   : > { %1026 = vmatprep.subr.bf16.mxu0 %v10377_v27  ;;  %1079 = vmatprep.subr.bf16.mxu1 %v10380_v28  ;;  %v10439_v27 = vld [vmem:[%s14081_s1 + $0x304] ss:$16 sps:$4 sm:$0xff]   ;;  %v10442_v28 = vld [vmem:[%s14081_s1 + $0x30c] ss:$16 sps:$4 sm:$0xff]  }
  0xa7   : > { %1052 = vmatprep.mubr.bf16.mxu0 %v11149_v9  ;;  %1105 = vmatprep.mubr.bf16.mxu1 %v11149_v9 }
  0xa9   : > { %1027 = vmatpush1.bf16.msra.mxu0 %v10375_v31  ;;  %1080 = vmatpush1.bf16.msra.mxu1 %v10378_v32  ;;  %v10437_v31 = vld [vmem:[%s14081_s1 + $0x300] ss:$16 sps:$4 sm:$0xff]   ;;  %v10440_v32 = vld [vmem:[%s14081_s1 + $0x308] ss:$16 sps:$4 sm:$0xff]  }
  0xaa   : > { %1028 = vmatprep.subr.bf16.mxu0 %v10383_v33  ;;  %1081 = vmatprep.subr.bf16.mxu1 %v10386_v34  ;;  %v1168_v33 = vpop.permute.xlu1 %1167  ;;  %v10445_v34 = vld [vmem:[%s14081_s1 + $0x324] ss:$16 sps:$4 sm:$0xff]  }
  0xad   : > { %1029 = vmatpush1.bf16.msra.mxu0 %v10381_v10  ;;  %1082 = vmatpush1.bf16.msra.mxu1 %v10384_v37  ;;  %v10446_v10 = vld [vmem:[%s14081_s1 + $0x328] ss:$16 sps:$4 sm:$0xff]   ;;  %v10451_v37 = vld [vmem:[%s14081_s1 + $0x344] ss:$16 sps:$4 sm:$0xff]  }
  0xae   : > { %8438 = vmatprep.subr.msk.bf16.mxu0 %vm512_vm0, %v8435_v38  ;;  %8441 = vmatprep.subr.msk.bf16.mxu1 %vm512_vm0, %v8437_v40  ;;  %v10454_v38 = vld [vmem:[%s14081_s1 + $0x34c] ss:$16 sps:$4 sm:$0xff]   ;;  %v8516_v40 = vld [vmem:[%s14081_s1 + $0x360] sm:$0x33] }
  0xb1   : > { %1031 = vmatpush1.bf16.msra.mxu0 %v1009_v46  ;;  %1084 = vmatpush1.bf16.msra.mxu1 %v1015_v47  ;;  %v8538_v46 = vcombine.low %v8516_v40, %v8516_v40  ;;  %v8539_v47 = vcombine.high %v8516_v40, %v8516_v40  ;;  %v10519_v40 = vld [vmem:[%s14081_s1 + $0x4a4] ss:$16 sps:$4 sm:$0xff]  }
  0xb2   : > { %1297 = vmatprep.subr.bf16.mxu0 %v10393_v45  ;;  %1350 = vmatprep.subr.bf16.mxu1 %v10396_v48  ;;  %v10452_v45 = vld [vmem:[%s14081_s1 + $0x348] ss:$16 sps:$4 sm:$0xff]   ;;  %v8541_v48 = vcombine.high %v8517_v41, %v8517_v41 }
  0xb4   : > { %8439 = vmatmul.mubr.msk.bf16.vlgmr.msra.gmra.mrb[0].mxu0 %vm505_vm2, %v889_v49  ;;  %8442 = vmatmul.mubr.msk.bf16.vlgmr.msra.gmra.mrb[0].mxu1 %vm505_vm2, %v889_v49  ;;  %v8540_v49 = vcombine.low %v8517_v41, %v8517_v41  ;;  %v10522_v41 = vld [vmem:[%s14081_s1 + $0x4ac] ss:$16 sps:$4 sm:$0xff]  }
  0xb5   : > { %1298 = vmatpush1.bf16.msra.mxu0 %v10391_v50  ;;  %1351 = vmatpush1.bf16.msra.mxu1 %v10394_v51  ;;  %v1563_v50 = vsel %vm512_vm0, %v8538_v46, 0  ;;  %v10520_v46 = vld [vmem:[%s14081_s1 + $0x4a8] ss:$16 sps:$4 sm:$0xff]  }
  0xb6   : > { %1299 = vmatprep.subr.bf16.mxu0 %v10399_v52  ;;  %1352 = vmatprep.subr.bf16.mxu1 %v10402_v53  ;;  %v1569_v51 = vsel %vm512_vm0, %v8540_v49, 0  ;;  %v10461_v52 = vld [vmem:[%s14081_s1 + $0x374] ss:$16 sps:$4 sm:$0xff]   ;;  %v10464_v53 = vld [vmem:[%s14081_s1 + $0x37c] ss:$16 sps:$4 sm:$0xff]  }
  0xb7   : > { %1062 = vmatprep.mubr.bf16.mxu0 %v11149_v9  ;;  %1115 = vmatprep.mubr.bf16.mxu1 %v11149_v9 }
  0xb9   : > { %1300 = vmatpush1.bf16.msra.mxu0 %v10397_v54  ;;  %1353 = vmatpush1.bf16.msra.mxu1 %v10400_v55  ;;  %v10459_v54 = vld [vmem:[%s14081_s1 + $0x370] ss:$16 sps:$4 sm:$0xff]   ;;  %v10462_v55 = vld [vmem:[%s14081_s1 + $0x378] ss:$16 sps:$4 sm:$0xff]  }
  0xba   : > { %1301 = vmatprep.subr.bf16.mxu0 %v10405_v56  ;;  %1354 = vmatprep.subr.bf16.mxu1 %v10408_v57  ;;  %v1443_v56 = vpop.permute.xlu0 %1442  ;;  %v10467_v57 = vld [vmem:[%s14081_s1 + $0x394] ss:$16 sps:$4 sm:$0xff]  }
  0xbc   : > { %8440 = vmatmul.mubr.msk.bf16.gmra.mrb[4].mxu0 %vm505_vm2, %v891_v60  ;;  %8443 = vmatmul.mubr.msk.bf16.gmra.mrb[4].mxu1 %vm505_vm2, %v891_v60  ;;  %v10468_v60 = vld [vmem:[%s14081_s1 + $0x398] ss:$16 sps:$4 sm:$0xff]  }
  0xbd   : > { %1302 = vmatpush1.bf16.msra.mxu0 %v10403_v58  ;;  %1355 = vmatpush1.bf16.msra.mxu1 %v10406_v59  ;;  %v10470_v58 = vld [vmem:[%s14081_s1 + $0x39c] ss:$16 sps:$4 sm:$0xff]   ;;  %v10465_v59 = vld [vmem:[%s14081_s1 + $0x390] ss:$16 sps:$4 sm:$0xff]  }
  0xbe   : > { %1303 = vmatprep.subr.bf16.mxu0 %v10411_v61  ;;  %1356 = vmatprep.subr.bf16.mxu1 %v10414_v62  ;;  %v10473_v61 = vld [vmem:[%s14081_s1 + $0x3b4] ss:$16 sps:$4 sm:$0xff]   ;;  %v10476_v62 = vld [vmem:[%s14081_s1 + $0x3bc] ss:$16 sps:$4 sm:$0xff]   ;;  %v2007_v8 = vpop.permute.xlu0 %2006 }
  0xbf   : > { %1329 = vmatprep.mubr.bf16.mxu0 %v11149_v9  ;;  %1382 = vmatprep.mubr.bf16.mxu1 %v11149_v9 }
  0xc1   : > { %1304 = vmatpush1.bf16.msra.mxu0 %v10409_v63  ;;  %1357 = vmatpush1.bf16.msra.mxu1 %v10412_v0  ;;  %v10471_v63 = vld [vmem:[%s14081_s1 + $0x3b0] ss:$16 sps:$4 sm:$0xff]   ;;  %v10474_v0 = vld [vmem:[%s14081_s1 + $0x3b8] ss:$16 sps:$4 sm:$0xff]  }
  0xc2   : > { %1305 = vmatprep.subr.bf16.mxu0 %v10417_v1  ;;  %1358 = vmatprep.subr.bf16.mxu1 %v10420_v2  ;;  %v1445_v1 = vpop.permute.xlu1 %1444  ;;  %v10479_v2 = vld [vmem:[%s14081_s1 + $0x3d4] ss:$16 sps:$4 sm:$0xff]  }
  0xc5   : > { %1306 = vmatpush1.bf16.msra.mxu0 %v10415_v5  ;;  %1359 = vmatpush1.bf16.msra.mxu1 %v10418_v6  ;;  %v10480_v5 = vld [vmem:[%s14081_s1 + $0x3d8] ss:$16 sps:$4 sm:$0xff]   ;;  %v10485_v6 = vld [vmem:[%s14081_s1 + $0x3f4] ss:$16 sps:$4 sm:$0xff]  }
  0xc6   : > { %8490 = vmatprep.subr.msk.bf16.mxu0 %vm512_vm0, %v8487_v11  ;;  %8493 = vmatprep.subr.msk.bf16.mxu1 %vm512_vm0, %v8489_v12  ;;  %v8568_v11 = vld [vmem:[%s14081_s1 + $0x410] sm:$0x33]  ;;  %v8569_v12 = vld [vmem:[%s14081_s1 + $0x418] sm:$0x33] }
  0xc9   : > { %1308 = vmatpush1.bf16.msra.mxu0 %v1286_v14  ;;  %1361 = vmatpush1.bf16.msra.mxu1 %v1292_v16  ;;  %v10486_v14 = vld [vmem:[%s14081_s1 + $0x3f8] ss:$16 sps:$4 sm:$0xff]   ;;  %v8590_v16 = vcombine.low %v8568_v11, %v8568_v11 }
  0xca   : > { %1574 = vmatprep.subr.bf16.mxu0 %v10427_v17  ;;  %1627 = vmatprep.subr.bf16.mxu1 %v10430_v19  ;;  %v8591_v17 = vcombine.high %v8568_v11, %v8568_v11  ;;  %v8593_v19 = vcombine.high %v8569_v12, %v8569_v12  ;;  %v10553_v11 = vld [vmem:[%s14081_s1 + $0x554] ss:$16 sps:$4 sm:$0xff]  }
  0xcc   : > { %8491 = vmatmul.mubr.msk.bf16.vlgmr.msra.gmra.mrb[0].mxu0 %vm505_vm2, %v1166_v22  ;;  %8494 = vmatmul.mubr.msk.bf16.vlgmr.msra.gmra.mrb[0].mxu1 %vm505_vm2, %v1166_v22 }
  0xcd   : > { %1575 = vmatpush1.bf16.msra.mxu0 %v10425_v20  ;;  %1628 = vmatpush1.bf16.msra.mxu1 %v10428_v21  ;;  %v8592_v20 = vcombine.low %v8569_v12, %v8569_v12  ;;  %v1850_v21 = vsel %vm512_vm0, %v8590_v16, 0  ;;  %v10556_v12 = vld [vmem:[%s14081_s1 + $0x55c] ss:$16 sps:$4 sm:$0xff]   ;;  %v10551_v16 = vld [vmem:[%s14081_s1 + $0x550] ss:$16 sps:$4 sm:$0xff]  }
  0xce   : > { %1576 = vmatprep.subr.bf16.mxu0 %v10433_v23  ;;  %1629 = vmatprep.subr.bf16.mxu1 %v10436_v24  ;;  %v10495_v23 = vld [vmem:[%s14081_s1 + $0x424] ss:$16 sps:$4 sm:$0xff]   ;;  %v10498_v24 = vld [vmem:[%s14081_s1 + $0x42c] ss:$16 sps:$4 sm:$0xff]  }
  0xcf   : > { %1339 = vmatprep.mubr.bf16.mxu0 %v11149_v9  ;;  %1392 = vmatprep.mubr.bf16.mxu1 %v11149_v9  ;;  %v1856_v22 = vsel %vm512_vm0, %v8592_v20, 0 }
  0xd1   : > { %1577 = vmatpush1.bf16.msra.mxu0 %v10431_v25  ;;  %1630 = vmatpush1.bf16.msra.mxu1 %v10434_v26  ;;  %v10493_v25 = vld [vmem:[%s14081_s1 + $0x420] ss:$16 sps:$4 sm:$0xff]   ;;  %v10496_v26 = vld [vmem:[%s14081_s1 + $0x428] ss:$16 sps:$4 sm:$0xff]  }
  0xd2   : > { %1578 = vmatprep.subr.bf16.mxu0 %v10439_v27  ;;  %1631 = vmatprep.subr.bf16.mxu1 %v10442_v28  ;;  %v10501_v27 = vld [vmem:[%s14081_s1 + $0x444] ss:$16 sps:$4 sm:$0xff]   ;;  %v10504_v28 = vld [vmem:[%s14081_s1 + $0x44c] ss:$16 sps:$4 sm:$0xff]  }
  0xd4   : > { %8492 = vmatmul.mubr.msk.bf16.gmra.mrb[4].mxu0 %vm505_vm2, %v1168_v33  ;;  %8495 = vmatmul.mubr.msk.bf16.gmra.mrb[4].mxu1 %vm505_vm2, %v1168_v33  ;;  %v10507_v33 = vld [vmem:[%s14081_s1 + $0x464] ss:$16 sps:$4 sm:$0xff]  }
  0xd5   : > { %1579 = vmatpush1.bf16.msra.mxu0 %v10437_v31  ;;  %1632 = vmatpush1.bf16.msra.mxu1 %v10440_v32  ;;  %v10499_v31 = vld [vmem:[%s14081_s1 + $0x440] ss:$16 sps:$4 sm:$0xff]   ;;  %v10502_v32 = vld [vmem:[%s14081_s1 + $0x448] ss:$16 sps:$4 sm:$0xff]  }
  0xd6   : > { %1580 = vmatprep.subr.bf16.mxu0 %v10445_v34  ;;  %1633 = vmatprep.subr.bf16.mxu1 %v10448_v35  ;;  %v10505_v34 = vld [vmem:[%s14081_s1 + $0x460] ss:$16 sps:$4 sm:$0xff]   ;;  %v10508_v35 = vld [vmem:[%s14081_s1 + $0x468] ss:$16 sps:$4 sm:$0xff]  }
  0xd7   : > { %1606 = vmatprep.mubr.bf16.mxu0 %v11149_v9  ;;  %1659 = vmatprep.mubr.bf16.mxu1 %v11149_v9 }
  0xd9   : > { %1581 = vmatpush1.bf16.msra.mxu0 %v10443_v36  ;;  %1634 = vmatpush1.bf16.msra.mxu1 %v10446_v10  ;;  %v10513_v36 = vld [vmem:[%s14081_s1 + $0x484] ss:$16 sps:$4 sm:$0xff]   ;;  %v10516_v10 = vld [vmem:[%s14081_s1 + $0x48c] ss:$16 sps:$4 sm:$0xff]  }
  0xda   : > { %1582 = vmatprep.subr.bf16.mxu0 %v10451_v37  ;;  %1635 = vmatprep.subr.bf16.mxu1 %v10454_v38  ;;  %v10511_v37 = vld [vmem:[%s14081_s1 + $0x480] ss:$16 sps:$4 sm:$0xff]   ;;  %v10514_v38 = vld [vmem:[%s14081_s1 + $0x488] ss:$16 sps:$4 sm:$0xff]  }
  0xdd   : > { %1583 = vmatpush1.bf16.msra.mxu0 %v10449_v43  ;;  %1636 = vmatpush1.bf16.msra.mxu1 %v10452_v45  ;;  %v8620_v43 = vld [vmem:[%s14081_s1 + $0x4c0] sm:$0x33]  ;;  %v8621_v45 = vld [vmem:[%s14081_s1 + $0x4c8] sm:$0x33] }
  0xde   : > { %8542 = vmatprep.subr.msk.bf16.mxu0 %vm512_vm0, %v8539_v47  ;;  %8545 = vmatprep.subr.msk.bf16.mxu1 %vm512_vm0, %v8541_v48  ;;  %v8642_v47 = vcombine.low %v8620_v43, %v8620_v43  ;;  %v8643_v48 = vcombine.high %v8620_v43, %v8620_v43  ;;  %v8645_v49 = vcombine.high %v8621_v45, %v8621_v45  ;;  %v10579_v43 = vld [vmem:[%s14081_s1 + $0x5e0] ss:$16 sps:$4 sm:$0xff]  }
  0xe1   : > { %1585 = vmatpush1.bf16.msra.mxu0 %v1563_v50  ;;  %1638 = vmatpush1.bf16.msra.mxu1 %v1569_v51  ;;  %v8644_v50 = vcombine.low %v8621_v45, %v8621_v45  ;;  %v2127_v51 = vsel %vm512_vm0, %v8642_v47, 0  ;;  %v10582_v45 = vld [vmem:[%s14081_s1 + $0x5e8] ss:$16 sps:$4 sm:$0xff]   ;;  %v8724_v47 = vld [vmem:[%s14081_s1 + $0x620] sm:$0x33] }
  0xe2   : > { %1861 = vmatprep.subr.bf16.mxu0 %v10461_v52  ;;  %1914 = vmatprep.subr.bf16.mxu1 %v10464_v53  ;;  %v4500_v52 = vrot.slane %v1720_v30, 1  ;;  %v4501_v53 = vrot.slane %v1722_v29, 2  ;;  %v10527_v29 = vld [vmem:[%s14081_s1 + $0x4d0] ss:$16 sps:$4 sm:$0xff]   ;;  %v10530_v30 = vld [vmem:[%s14081_s1 + $0x4d8] ss:$16 sps:$4 sm:$0xff]  }
  0xe4   : > { %8543 = vmatmul.mubr.msk.bf16.vlgmr.msra.gmra.mrb[0].mxu0 %vm505_vm2, %v1443_v56  ;;  %8546 = vmatmul.mubr.msk.bf16.vlgmr.msra.gmra.mrb[0].mxu1 %vm505_vm2, %v1443_v56  ;;  %v10532_v56 = vld [vmem:[%s14081_s1 + $0x4dc] ss:$16 sps:$4 sm:$0xff]  }
  0xe5   : > { %1862 = vmatpush1.bf16.msra.mxu0 %v10459_v54  ;;  %1915 = vmatpush1.bf16.msra.mxu1 %v10462_v55  ;;  %v2133_v54 = vsel %vm512_vm0, %v8644_v50, 0  ;;  %v10529_v55 = vld [vmem:[%s14081_s1 + $0x4d4] ss:$16 sps:$4 sm:$0xff]   ;;  %v10588_v50 = vld [vmem:[%s14081_s1 + $0x608] ss:$16 sps:$4 sm:$0xff]  }
  0xe6   : > { %1863 = vmatprep.subr.bf16.mxu0 %v10467_v57  ;;  %1916 = vmatprep.subr.bf16.mxu1 %v10470_v58  ;;  %v4502_v57 = vor.u32 %v4501_v53, %v4500_v52  ;;  %v8746_v53 = vcombine.low %v8724_v47, %v8724_v47 }
  0xe7   : > { %1616 = vmatprep.mubr.bf16.mxu0 %v11149_v9  ;;  %1669 = vmatprep.mubr.bf16.mxu1 %v11149_v9 }
  0xe8   : > { %v11872_v58 = vsel %vm4499_vm4, %v4502_v57, %v11338_v44  ;;  %v10597_v57 = vld [vmem:[%s14081_s1 + $0x634] ss:$16 sps:$4 sm:$0xff]  }
  0xe9   : > { %1864 = vmatpush1.bf16.msra.mxu0 %v10465_v59  ;;  %1917 = vmatpush1.bf16.msra.mxu1 %v10468_v60  ;;  %v10535_v59 = vld [vmem:[%s14081_s1 + $0x4f4] ss:$16 sps:$4 sm:$0xff]   ;;  %v10538_v60 = vld [vmem:[%s14081_s1 + $0x4fc] ss:$16 sps:$4 sm:$0xff]  }
  0xea   : > { %1865 = vmatprep.subr.bf16.mxu0 %v10473_v61  ;;  %1918 = vmatprep.subr.bf16.mxu1 %v10476_v62  ;;  %v10533_v61 = vld [vmem:[%s14081_s1 + $0x4f0] ss:$16 sps:$4 sm:$0xff]   ;;  %v10536_v62 = vld [vmem:[%s14081_s1 + $0x4f8] ss:$16 sps:$4 sm:$0xff]  }
  0xeb   : > { %4780 = vrot.lane.b32.xlu0 %v11872_v58, %s11150_s12 }
  0xec   : > { %8544 = vmatmul.mubr.msk.bf16.gmra.mrb[4].mxu0 %vm505_vm2, %v1445_v1  ;;  %8547 = vmatmul.mubr.msk.bf16.gmra.mrb[4].mxu1 %vm505_vm2, %v1445_v1  ;;  %v10539_v1 = vld [vmem:[%s14081_s1 + $0x510] ss:$16 sps:$4 sm:$0xff]  }
  0xed   : > { %1866 = vmatpush1.bf16.msra.mxu0 %v10471_v63  ;;  %1919 = vmatpush1.bf16.msra.mxu1 %v10474_v0  ;;  %v10541_v63 = vld [vmem:[%s14081_s1 + $0x514] ss:$16 sps:$4 sm:$0xff]   ;;  %v10544_v0 = vld [vmem:[%s14081_s1 + $0x51c] ss:$16 sps:$4 sm:$0xff]  }
  0xee   : > { %1867 = vmatprep.subr.bf16.mxu0 %v10479_v2  ;;  %1920 = vmatprep.subr.bf16.mxu1 %v10482_v3  ;;  %v10542_v2 = vld [vmem:[%s14081_s1 + $0x518] ss:$16 sps:$4 sm:$0xff]   ;;  %v2009_v3 = vpop.permute.xlu1 %2008 }
  0xef   : > { %1893 = vmatprep.mubr.bf16.mxu0 %v11149_v9  ;;  %1946 = vmatprep.mubr.bf16.mxu1 %v11149_v9 }
  0xf0   : > { %5057 = vrot.lane.b32.xlu0 %v11872_v58, %s11151_s13 }
  0xf1   : > { %1868 = vmatpush1.bf16.msra.mxu0 %v10477_v4  ;;  %1921 = vmatpush1.bf16.msra.mxu1 %v10480_v5  ;;  %v10547_v4 = vld [vmem:[%s14081_s1 + $0x534] ss:$16 sps:$4 sm:$0xff]   ;;  %v10550_v5 = vld [vmem:[%s14081_s1 + $0x53c] ss:$16 sps:$4 sm:$0xff]  }
  0xf2   : > { %1869 = vmatprep.subr.bf16.mxu0 %v10485_v6  ;;  %1922 = vmatprep.subr.bf16.mxu1 %v10488_v7  ;;  %v10545_v6 = vld [vmem:[%s14081_s1 + $0x530] ss:$16 sps:$4 sm:$0xff]   ;;  %v10548_v7 = vld [vmem:[%s14081_s1 + $0x538] ss:$16 sps:$4 sm:$0xff]  }
  0xf4   : > { %5334 = vrot.lane.b32.xlu0 %v11872_v58, %s11152_s22 }
  0xf5   : > { %1870 = vmatpush1.bf16.msra.mxu0 %v10483_v13  ;;  %1923 = vmatpush1.bf16.msra.mxu1 %v10486_v14  ;;  %v8672_v13 = vld [vmem:[%s14081_s1 + $0x570] sm:$0x33]  ;;  %v8673_v14 = vld [vmem:[%s14081_s1 + $0x578] sm:$0x33] }
  0xf6   : > { %8594 = vmatprep.subr.msk.bf16.mxu0 %vm512_vm0, %v8591_v17  ;;  %8597 = vmatprep.subr.msk.bf16.mxu1 %vm512_vm0, %v8593_v19  ;;  %v10554_v17 = vld [vmem:[%s14081_s1 + $0x558] ss:$16 sps:$4 sm:$0xff]   ;;  %v8695_v19 = vcombine.high %v8672_v13, %v8672_v13  ;;  %v8697_v20 = vcombine.high %v8673_v14, %v8673_v14 }
  0xf8   : > { %5611 = vrot.lane.b32.xlu0 %v11872_v58, %s11153_s11 }
  0xf9   : > { %1872 = vmatpush1.bf16.msra.mxu0 %v1850_v21  ;;  %1925 = vmatpush1.bf16.msra.mxu1 %v1856_v22  ;;  %v8694_v21 = vcombine.low %v8672_v13, %v8672_v13  ;;  %v8696_v22 = vcombine.low %v8673_v14, %v8673_v14  ;;  %v10624_v13 = vld [vmem:[%s14081_s1 + $0x6bc] ss:$16 sps:$4 sm:$0xff]   ;;  %v8776_v14 = vld [vmem:[%s14081_s1 + $0x6d0] sm:$0x33] }
  0xfa   : > { %2138 = vmatprep.subr.bf16.mxu0 %v10495_v23  ;;  %2191 = vmatprep.subr.bf16.mxu1 %v10498_v24 }
  0xfb   : > { %v2404_v23 = vsel %vm512_vm0, %v8694_v21, 0  ;;  %v2410_v24 = vsel %vm512_vm0, %v8696_v22, 0  ;;  %v8798_v22 = vcombine.low %v8776_v14, %v8776_v14 }
  0xfc   : > { %8595 = vmatmul.mubr.msk.bf16.vlgmr.msra.gmra.mrb[0].mxu0 %vm505_vm2, %v11331_v39  ;;  %8598 = vmatmul.mubr.msk.bf16.vlgmr.msra.gmra.mrb[0].mxu1 %vm505_vm2, %v11331_v39  ;;  %v10510_v39 = vld [vmem:[%s14081_s1 + $0x46c] ss:$16 sps:$4 sm:$0xff]  }
  0xfd   : > { %2139 = vmatpush1.bf16.msra.mxu0 %v10493_v25  ;;  %2192 = vmatpush1.bf16.msra.mxu1 %v10496_v26  ;;  %v10563_v25 = vld [vmem:[%s14081_s1 + $0x584] ss:$16 sps:$4 sm:$0xff]   ;;  %v10566_v26 = vld [vmem:[%s14081_s1 + $0x58c] ss:$16 sps:$4 sm:$0xff]  }
  0xfe   : > { %2140 = vmatprep.subr.bf16.mxu0 %v10501_v27  ;;  %2193 = vmatprep.subr.bf16.mxu1 %v10504_v28  ;;  %v2284_v27 = vpop.permute.xlu0 %2283  ;;  %v10561_v28 = vld [vmem:[%s14081_s1 + $0x580] ss:$16 sps:$4 sm:$0xff]  }
  0xff   : > { %1903 = vmatprep.mubr.bf16.mxu0 %v11149_v9  ;;  %1956 = vmatprep.mubr.bf16.mxu1 %v11149_v9 }
 0x101   : > { %2141 = vmatpush1.bf16.msra.mxu0 %v10499_v31  ;;  %2194 = vmatpush1.bf16.msra.mxu1 %v10502_v32  ;;  %v10564_v31 = vld [vmem:[%s14081_s1 + $0x588] ss:$16 sps:$4 sm:$0xff]   ;;  %v10569_v32 = vld [vmem:[%s14081_s1 + $0x5a4] ss:$16 sps:$4 sm:$0xff]  }
 0x102   : > { %2142 = vmatprep.subr.bf16.mxu0 %v10507_v33  ;;  %2195 = vmatprep.subr.bf16.mxu1 %v10510_v39  ;;  %v10572_v33 = vld [vmem:[%s14081_s1 + $0x5ac] ss:$16 sps:$4 sm:$0xff]   ;;  %v10567_v39 = vld [vmem:[%s14081_s1 + $0x5a0] ss:$16 sps:$4 sm:$0xff]  }
 0x104   : > { %8596 = vmatmul.mubr.msk.bf16.gmra.mrb[4].mxu0 %vm505_vm2, %v11334_v42  ;;  %8599 = vmatmul.mubr.msk.bf16.gmra.mrb[4].mxu1 %vm505_vm2, %v11334_v42  ;;  %v10517_v42 = vld [vmem:[%s14081_s1 + $0x4a0] ss:$16 sps:$4 sm:$0xff]  }
 0x105   : > { %2143 = vmatpush1.bf16.msra.mxu0 %v10505_v34  ;;  %2196 = vmatpush1.bf16.msra.mxu1 %v10508_v35  ;;  %v10570_v34 = vld [vmem:[%s14081_s1 + $0x5a8] ss:$16 sps:$4 sm:$0xff]   ;;  %v10575_v35 = vld [vmem:[%s14081_s1 + $0x5c4] ss:$16 sps:$4 sm:$0xff]  }
 0x106   : > { %2144 = vmatprep.subr.bf16.mxu0 %v10513_v36  ;;  %2197 = vmatprep.subr.bf16.mxu1 %v10516_v10  ;;  %v10578_v36 = vld [vmem:[%s14081_s1 + $0x5cc] ss:$16 sps:$4 sm:$0xff]   ;;  %v10573_v10 = vld [vmem:[%s14081_s1 + $0x5c0] ss:$16 sps:$4 sm:$0xff]  }
 0x107   : > { %2170 = vmatprep.mubr.bf16.mxu0 %v11149_v9  ;;  %2223 = vmatprep.mubr.bf16.mxu1 %v11149_v9 }
 0x109   : > { %2145 = vmatpush1.bf16.msra.mxu0 %v10511_v37  ;;  %2198 = vmatpush1.bf16.msra.mxu1 %v10514_v38  ;;  %v10576_v37 = vld [vmem:[%s14081_s1 + $0x5c8] ss:$16 sps:$4 sm:$0xff]   ;;  %v2286_v38 = vpop.permute.xlu1 %2285 }
 0x10a   : > { %2146 = vmatprep.subr.bf16.mxu0 %v10519_v40  ;;  %2199 = vmatprep.subr.bf16.mxu1 %v10522_v41  ;;  %v10581_v40 = vld [vmem:[%s14081_s1 + $0x5e4] ss:$16 sps:$4 sm:$0xff]   ;;  %v10584_v41 = vld [vmem:[%s14081_s1 + $0x5ec] ss:$16 sps:$4 sm:$0xff]  }
 0x10d   : > { %2147 = vmatpush1.bf16.msra.mxu0 %v10517_v42  ;;  %2200 = vmatpush1.bf16.msra.mxu1 %v10520_v46  ;;  %v10587_v42 = vld [vmem:[%s14081_s1 + $0x604] ss:$16 sps:$4 sm:$0xff]   ;;  %v10590_v46 = vld [vmem:[%s14081_s1 + $0x60c] ss:$16 sps:$4 sm:$0xff]  }
 0x10e   : > { %8646 = vmatprep.subr.msk.bf16.mxu0 %vm512_vm0, %v8643_v48  ;;  %8649 = vmatprep.subr.msk.bf16.mxu1 %vm512_vm0, %v8645_v49  ;;  %v8725_v48 = vld [vmem:[%s14081_s1 + $0x628] sm:$0x33]  ;;  %v10585_v49 = vld [vmem:[%s14081_s1 + $0x600] ss:$16 sps:$4 sm:$0xff]  }
 0x10f   : > { %v8749_v52 = vcombine.high %v8725_v48, %v8725_v48 }
 0x111   : > { %2149 = vmatpush1.bf16.msra.mxu0 %v2127_v51  ;;  %2202 = vmatpush1.bf16.msra.mxu1 %v2133_v54  ;;  %v8747_v51 = vcombine.high %v8724_v47, %v8724_v47  ;;  %v8748_v54 = vcombine.low %v8725_v48, %v8725_v48  ;;  %v10658_v47 = vld [vmem:[%s14081_s1 + $0x76c] ss:$16 sps:$4 sm:$0xff]   ;;  %v8828_v48 = vld [vmem:[%s14081_s1 + $0x780] sm:$0x33] }
 0x112   : > { %2415 = vmatprep.subr.bf16.mxu0 %v10529_v55  ;;  %2468 = vmatprep.subr.bf16.mxu1 %v10532_v56  ;;  %v2681_v55 = vsel %vm512_vm0, %v8746_v53, 0 }
 0x113   : > { %v2687_v56 = vsel %vm512_vm0, %v8748_v54, 0  ;;  %v8850_v54 = vcombine.low %v8828_v48, %v8828_v48 }
 0x114   : > { %8647 = vmatmul.mubr.msk.bf16.vlgmr.msra.gmra.mrb[0].mxu0 %vm505_vm2, %v2007_v8  ;;  %8650 = vmatmul.mubr.msk.bf16.vlgmr.msra.gmra.mrb[0].mxu1 %vm505_vm2, %v2007_v8  ;;  %v10600_v8 = vld [vmem:[%s14081_s1 + $0x63c] ss:$16 sps:$4 sm:$0xff]  }
 0x115   : > { %2416 = vmatpush1.bf16.msra.mxu0 %v10527_v29  ;;  %2469 = vmatpush1.bf16.msra.mxu1 %v10530_v30  ;;  %v2561_v29 = vpop.permute.xlu0 %2560  ;;  %v10595_v30 = vld [vmem:[%s14081_s1 + $0x630] ss:$16 sps:$4 sm:$0xff]  }
 0x116   : > { %2417 = vmatprep.subr.bf16.mxu0 %v10535_v59  ;;  %2470 = vmatprep.subr.bf16.mxu1 %v10538_v60  ;;  %v10598_v59 = vld [vmem:[%s14081_s1 + $0x638] ss:$16 sps:$4 sm:$0xff]   ;;  %v10603_v60 = vld [vmem:[%s14081_s1 + $0x654] ss:$16 sps:$4 sm:$0xff]  }
 0x117   : > { %2180 = vmatprep.mubr.bf16.mxu0 %v11149_v9  ;;  %2233 = vmatprep.mubr.bf16.mxu1 %v11149_v9 }
 0x119   : > { %2418 = vmatpush1.bf16.msra.mxu0 %v10533_v61  ;;  %2471 = vmatpush1.bf16.msra.mxu1 %v10536_v62  ;;  %v10606_v61 = vld [vmem:[%s14081_s1 + $0x65c] ss:$16 sps:$4 sm:$0xff]   ;;  %v10601_v62 = vld [vmem:[%s14081_s1 + $0x650] ss:$16 sps:$4 sm:$0xff]  }
 0x11a   : > { %2419 = vmatprep.subr.bf16.mxu0 %v10541_v63  ;;  %2472 = vmatprep.subr.bf16.mxu1 %v10544_v0  ;;  %v10604_v63 = vld [vmem:[%s14081_s1 + $0x658] ss:$16 sps:$4 sm:$0xff]   ;;  %v10609_v0 = vld [vmem:[%s14081_s1 + $0x674] ss:$16 sps:$4 sm:$0xff]  }
 0x11c   : > { %8648 = vmatmul.mubr.msk.bf16.gmra.mrb[4].mxu0 %vm505_vm2, %v2009_v3  ;;  %8651 = vmatmul.mubr.msk.bf16.gmra.mrb[4].mxu1 %vm505_vm2, %v2009_v3  ;;  %v10610_v3 = vld [vmem:[%s14081_s1 + $0x678] ss:$16 sps:$4 sm:$0xff]  }
 0x11d   : > { %2420 = vmatpush1.bf16.msra.mxu0 %v10539_v1  ;;  %2473 = vmatpush1.bf16.msra.mxu1 %v10542_v2  ;;  %v10612_v1 = vld [vmem:[%s14081_s1 + $0x67c] ss:$16 sps:$4 sm:$0xff]   ;;  %v10607_v2 = vld [vmem:[%s14081_s1 + $0x670] ss:$16 sps:$4 sm:$0xff]  }
 0x11e   : > { %2421 = vmatprep.subr.bf16.mxu0 %v10547_v4  ;;  %2474 = vmatprep.subr.bf16.mxu1 %v10550_v5  ;;  %v2563_v4 = vpop.permute.xlu1 %2562  ;;  %v10615_v5 = vld [vmem:[%s14081_s1 + $0x694] ss:$16 sps:$4 sm:$0xff]  }
 0x11f   : > { %2447 = vmatprep.mubr.bf16.mxu0 %v11149_v9  ;;  %2500 = vmatprep.mubr.bf16.mxu1 %v11149_v9 }
 0x121   : > { %2422 = vmatpush1.bf16.msra.mxu0 %v10545_v6  ;;  %2475 = vmatpush1.bf16.msra.mxu1 %v10548_v7  ;;  %v10618_v6 = vld [vmem:[%s14081_s1 + $0x69c] ss:$16 sps:$4 sm:$0xff]   ;;  %v10613_v7 = vld [vmem:[%s14081_s1 + $0x690] ss:$16 sps:$4 sm:$0xff]  }
 0x122   : > { %2423 = vmatprep.subr.bf16.mxu0 %v10553_v11  ;;  %2476 = vmatprep.subr.bf16.mxu1 %v10556_v12  ;;  %v10616_v11 = vld [vmem:[%s14081_s1 + $0x698] ss:$16 sps:$4 sm:$0xff]   ;;  %v10621_v12 = vld [vmem:[%s14081_s1 + $0x6b4] ss:$16 sps:$4 sm:$0xff]  }
 0x125   : > { %2424 = vmatpush1.bf16.msra.mxu0 %v10551_v16  ;;  %2477 = vmatpush1.bf16.msra.mxu1 %v10554_v17  ;;  %v8777_v16 = vld [vmem:[%s14081_s1 + $0x6d8] sm:$0x33]  ;;  %v10619_v17 = vld [vmem:[%s14081_s1 + $0x6b0] ss:$16 sps:$4 sm:$0xff]  }
 0x126   : > { %8698 = vmatprep.subr.msk.bf16.mxu0 %vm512_vm0, %v8695_v19  ;;  %8701 = vmatprep.subr.msk.bf16.mxu1 %vm512_vm0, %v8697_v20  ;;  %v10622_v19 = vld [vmem:[%s14081_s1 + $0x6b8] ss:$16 sps:$4 sm:$0xff]   ;;  %v8799_v20 = vcombine.high %v8776_v14, %v8776_v14  ;;  %v8801_v21 = vcombine.high %v8777_v16, %v8777_v16 }
 0x127   : > { %v10690_v14 = vld [vmem:[%s14081_s1 + $0x818] ss:$16 sps:$4 sm:$0xff]  }
 0x129   : > { %2426 = vmatpush1.bf16.msra.mxu0 %v2404_v23  ;;  %2479 = vmatpush1.bf16.msra.mxu1 %v2410_v24  ;;  %v8800_v23 = vcombine.low %v8777_v16, %v8777_v16  ;;  %v2958_v24 = vsel %vm512_vm0, %v8798_v22, 0 }
 0x12a   : > { %2692 = vmatprep.subr.bf16.mxu0 %v10563_v25  ;;  %2745 = vmatprep.subr.bf16.mxu1 %v10566_v26  ;;  %v10631_v26 = vld [vmem:[%s14081_s1 + $0x6e4] ss:$16 sps:$4 sm:$0xff]  }
 0x12b   : > { %v2964_v25 = vsel %vm512_vm0, %v8800_v23, 0  ;;  %v10699_v23 = vld [vmem:[%s14081_s1 + $0x844] ss:$16 sps:$4 sm:$0xff]  }
 0x12c   : > { %8699 = vmatmul.mubr.msk.bf16.vlgmr.msra.gmra.mrb[0].mxu0 %vm505_vm2, %v2284_v27  ;;  %8702 = vmatmul.mubr.msk.bf16.vlgmr.msra.gmra.mrb[0].mxu1 %vm505_vm2, %v2284_v27  ;;  %v10634_v27 = vld [vmem:[%s14081_s1 + $0x6ec] ss:$16 sps:$4 sm:$0xff]  }
 0x12d   : > { %2693 = vmatpush1.bf16.msra.mxu0 %v10561_v28  ;;  %2746 = vmatpush1.bf16.msra.mxu1 %v10564_v31  ;;  %v2838_v28 = vpop.permute.xlu0 %2837  ;;  %v10629_v31 = vld [vmem:[%s14081_s1 + $0x6e0] ss:$16 sps:$4 sm:$0xff]  }
 0x12e   : > { %2694 = vmatprep.subr.bf16.mxu0 %v10569_v32  ;;  %2747 = vmatprep.subr.bf16.mxu1 %v10572_v33  ;;  %v10632_v32 = vld [vmem:[%s14081_s1 + $0x6e8] ss:$16 sps:$4 sm:$0xff]   ;;  %v10637_v33 = vld [vmem:[%s14081_s1 + $0x704] ss:$16 sps:$4 sm:$0xff]  }
 0x12f   : > { %2457 = vmatprep.mubr.bf16.mxu0 %v11149_v9  ;;  %2510 = vmatprep.mubr.bf16.mxu1 %v11149_v9 }
 0x131   : > { %2695 = vmatpush1.bf16.msra.mxu0 %v10567_v39  ;;  %2748 = vmatpush1.bf16.msra.mxu1 %v10570_v34  ;;  %v10640_v39 = vld [vmem:[%s14081_s1 + $0x70c] ss:$16 sps:$4 sm:$0xff]   ;;  %v10635_v34 = vld [vmem:[%s14081_s1 + $0x700] ss:$16 sps:$4 sm:$0xff]  }
 0x132   : > { %2696 = vmatprep.subr.bf16.mxu0 %v10575_v35  ;;  %2749 = vmatprep.subr.bf16.mxu1 %v10578_v36  ;;  %v10638_v35 = vld [vmem:[%s14081_s1 + $0x708] ss:$16 sps:$4 sm:$0xff]   ;;  %v10643_v36 = vld [vmem:[%s14081_s1 + $0x724] ss:$16 sps:$4 sm:$0xff]  }
 0x134   : > { %8700 = vmatmul.mubr.msk.bf16.gmra.mrb[4].mxu0 %vm505_vm2, %v2286_v38  ;;  %8703 = vmatmul.mubr.msk.bf16.gmra.mrb[4].mxu1 %vm505_vm2, %v2286_v38  ;;  %v10644_v38 = vld [vmem:[%s14081_s1 + $0x728] ss:$16 sps:$4 sm:$0xff]  }
 0x135   : > { %2697 = vmatpush1.bf16.msra.mxu0 %v10573_v10  ;;  %2750 = vmatpush1.bf16.msra.mxu1 %v10576_v37  ;;  %v10646_v10 = vld [vmem:[%s14081_s1 + $0x72c] ss:$16 sps:$4 sm:$0xff]   ;;  %v10641_v37 = vld [vmem:[%s14081_s1 + $0x720] ss:$16 sps:$4 sm:$0xff]  }
 0x136   : > { %2698 = vmatprep.subr.bf16.mxu0 %v10581_v40  ;;  %2751 = vmatprep.subr.bf16.mxu1 %v10584_v41  ;;  %v2840_v40 = vpop.permute.xlu1 %2839  ;;  %v10649_v41 = vld [vmem:[%s14081_s1 + $0x744] ss:$16 sps:$4 sm:$0xff]  }
 0x137   : > { %2724 = vmatprep.mubr.bf16.mxu0 %v11149_v9  ;;  %2777 = vmatprep.mubr.bf16.mxu1 %v11149_v9 }
 0x139   : > { %2699 = vmatpush1.bf16.msra.mxu0 %v10579_v43  ;;  %2752 = vmatpush1.bf16.msra.mxu1 %v10582_v45  ;;  %v10652_v43 = vld [vmem:[%s14081_s1 + $0x74c] ss:$16 sps:$4 sm:$0xff]   ;;  %v10647_v45 = vld [vmem:[%s14081_s1 + $0x740] ss:$16 sps:$4 sm:$0xff]  }
 0x13a   : > { %2700 = vmatprep.subr.bf16.mxu0 %v10587_v42  ;;  %2753 = vmatprep.subr.bf16.mxu1 %v10590_v46  ;;  %v10650_v42 = vld [vmem:[%s14081_s1 + $0x748] ss:$16 sps:$4 sm:$0xff]   ;;  %v10655_v46 = vld [vmem:[%s14081_s1 + $0x764] ss:$16 sps:$4 sm:$0xff]  }
 0x13d   : > { %2701 = vmatpush1.bf16.msra.mxu0 %v10585_v49  ;;  %2754 = vmatpush1.bf16.msra.mxu1 %v10588_v50  ;;  %v8829_v49 = vld [vmem:[%s14081_s1 + $0x788] sm:$0x33]  ;;  %v10653_v50 = vld [vmem:[%s14081_s1 + $0x760] ss:$16 sps:$4 sm:$0xff]  }
 0x13e   : > { %8750 = vmatprep.subr.msk.bf16.mxu0 %vm512_vm0, %v8747_v51  ;;  %8753 = vmatprep.subr.msk.bf16.mxu1 %vm512_vm0, %v8749_v52  ;;  %v10656_v51 = vld [vmem:[%s14081_s1 + $0x768] ss:$16 sps:$4 sm:$0xff]   ;;  %v8851_v52 = vcombine.high %v8828_v48, %v8828_v48  ;;  %v8853_v53 = vcombine.high %v8829_v49, %v8829_v49  ;;  %v10723_v48 = vld [vmem:[%s14081_s1 + $0x8c4] ss:$16 sps:$4 sm:$0xff]  }
 0x141   : > { %2703 = vmatpush1.bf16.msra.mxu0 %v2681_v55  ;;  %2756 = vmatpush1.bf16.msra.mxu1 %v2687_v56  ;;  %v8852_v55 = vcombine.low %v8829_v49, %v8829_v49  ;;  %v3235_v56 = vsel %vm512_vm0, %v8850_v54, 0  ;;  %v10726_v49 = vld [vmem:[%s14081_s1 + $0x8cc] ss:$16 sps:$4 sm:$0xff]  }
 0x142   : > { %2969 = vmatprep.subr.bf16.mxu0 %v10597_v57  ;;  %3022 = vmatprep.subr.bf16.mxu1 %v10600_v8  ;;  %v10665_v8 = vld [vmem:[%s14081_s1 + $0x794] ss:$16 sps:$4 sm:$0xff]  }
 0x143   : > { %v3241_v57 = vsel %vm512_vm0, %v8852_v55, 0 }
 0x144   : > { %8751 = vmatmul.mubr.msk.bf16.vlgmr.msra.gmra.mrb[0].mxu0 %vm505_vm2, %v2561_v29  ;;  %8754 = vmatmul.mubr.msk.bf16.vlgmr.msra.gmra.mrb[0].mxu1 %vm505_vm2, %v2561_v29  ;;  %v10668_v29 = vld [vmem:[%s14081_s1 + $0x79c] ss:$16 sps:$4 sm:$0xff]  }
 0x145   : > { %2970 = vmatpush1.bf16.msra.mxu0 %v10595_v30  ;;  %3023 = vmatpush1.bf16.msra.mxu1 %v10598_v59  ;;  %v10663_v30 = vld [vmem:[%s14081_s1 + $0x790] ss:$16 sps:$4 sm:$0xff]   ;;  %v10666_v59 = vld [vmem:[%s14081_s1 + $0x798] ss:$16 sps:$4 sm:$0xff]  }
 0x146   : > { %2971 = vmatprep.subr.bf16.mxu0 %v10603_v60  ;;  %3024 = vmatprep.subr.bf16.mxu1 %v10606_v61  ;;  %v10671_v60 = vld [vmem:[%s14081_s1 + $0x7b4] ss:$16 sps:$4 sm:$0xff]   ;;  %v10674_v61 = vld [vmem:[%s14081_s1 + $0x7bc] ss:$16 sps:$4 sm:$0xff]  }
 0x147   : > { %2734 = vmatprep.mubr.bf16.mxu0 %v11149_v9  ;;  %2787 = vmatprep.mubr.bf16.mxu1 %v11149_v9 }
 0x149   : > { %2972 = vmatpush1.bf16.msra.mxu0 %v10601_v62  ;;  %3025 = vmatpush1.bf16.msra.mxu1 %v10604_v63  ;;  %v10669_v62 = vld [vmem:[%s14081_s1 + $0x7b0] ss:$16 sps:$4 sm:$0xff]   ;;  %v10672_v63 = vld [vmem:[%s14081_s1 + $0x7b8] ss:$16 sps:$4 sm:$0xff]  }
 0x14a   : > { %2973 = vmatprep.subr.bf16.mxu0 %v10609_v0  ;;  %3026 = vmatprep.subr.bf16.mxu1 %v10612_v1  ;;  %v10677_v0 = vld [vmem:[%s14081_s1 + $0x7d4] ss:$16 sps:$4 sm:$0xff]   ;;  %v10675_v1 = vld [vmem:[%s14081_s1 + $0x7d0] ss:$16 sps:$4 sm:$0xff]  }
 0x14c   : > { %8752 = vmatmul.mubr.msk.bf16.gmra.mrb[4].mxu0 %vm505_vm2, %v2563_v4  ;;  %8755 = vmatmul.mubr.msk.bf16.gmra.mrb[4].mxu1 %vm505_vm2, %v2563_v4  ;;  %v10686_v4 = vld [vmem:[%s14081_s1 + $0x7fc] ss:$16 sps:$4 sm:$0xff]  }
 0x14d   : > { %2974 = vmatpush1.bf16.msra.mxu0 %v10607_v2  ;;  %3027 = vmatpush1.bf16.msra.mxu1 %v10610_v3  ;;  %v10678_v2 = vld [vmem:[%s14081_s1 + $0x7d8] ss:$16 sps:$4 sm:$0xff]   ;;  %v10683_v3 = vld [vmem:[%s14081_s1 + $0x7f4] ss:$16 sps:$4 sm:$0xff]  }
 0x14e   : > { %2975 = vmatprep.subr.bf16.mxu0 %v10615_v5  ;;  %3028 = vmatprep.subr.bf16.mxu1 %v10618_v6  ;;  %v10681_v5 = vld [vmem:[%s14081_s1 + $0x7f0] ss:$16 sps:$4 sm:$0xff]   ;;  %v10684_v6 = vld [vmem:[%s14081_s1 + $0x7f8] ss:$16 sps:$4 sm:$0xff]  }
 0x14f   : > { %3001 = vmatprep.mubr.bf16.mxu0 %v11149_v9  ;;  %3054 = vmatprep.mubr.bf16.mxu1 %v11149_v9 }
 0x151   : > { %2976 = vmatpush1.bf16.msra.mxu0 %v10613_v7  ;;  %3029 = vmatpush1.bf16.msra.mxu1 %v10616_v11  ;;  %v10689_v7 = vld [vmem:[%s14081_s1 + $0x814] ss:$16 sps:$4 sm:$0xff]  }
 0x152   : > { %2977 = vmatprep.subr.bf16.mxu0 %v10621_v12  ;;  %3030 = vmatprep.subr.bf16.mxu1 %v10624_v13  ;;  %v8880_v11 = vld [vmem:[%s14081_s1 + $0x830] sm:$0x33]  ;;  %v8881_v12 = vld [vmem:[%s14081_s1 + $0x838] sm:$0x33] }
 0x153   : > { %v10687_v13 = vld [vmem:[%s14081_s1 + $0x810] ss:$16 sps:$4 sm:$0xff]   ;;  %v8903_v16 = vcombine.high %v8880_v11, %v8880_v11 }
 0x155   : > { %2978 = vmatpush1.bf16.msra.mxu0 %v10619_v17  ;;  %3031 = vmatpush1.bf16.msra.mxu1 %v10622_v19  ;;  %v8905_v17 = vcombine.high %v8881_v12, %v8881_v12  ;;  %v8902_v19 = vcombine.low %v8880_v11, %v8880_v11  ;;  %v10749_v11 = vld [vmem:[%s14081_s1 + $0x950] ss:$16 sps:$4 sm:$0xff]  }
 0x156   : > { %8802 = vmatprep.subr.msk.bf16.mxu0 %vm512_vm0, %v8799_v20  ;;  %8805 = vmatprep.subr.msk.bf16.mxu1 %vm512_vm0, %v8801_v21  ;;  %v8904_v20 = vcombine.low %v8881_v12, %v8881_v12  ;;  %v10752_v12 = vld [vmem:[%s14081_s1 + $0x958] ss:$16 sps:$4 sm:$0xff]  }
 0x157   : > { %v3512_v21 = vsel %vm512_vm0, %v8902_v19, 0  ;;  %v10755_v19 = vld [vmem:[%s14081_s1 + $0x970] ss:$16 sps:$4 sm:$0xff]  }
 0x158   : > { %v3518_v22 = vsel %vm512_vm0, %v8904_v20, 0  ;;  %v10758_v20 = vld [vmem:[%s14081_s1 + $0x978] ss:$16 sps:$4 sm:$0xff]  }
 0x159   : > { %2980 = vmatpush1.bf16.msra.mxu0 %v2958_v24  ;;  %3033 = vmatpush1.bf16.msra.mxu1 %v2964_v25  ;;  %v10702_v24 = vld [vmem:[%s14081_s1 + $0x84c] ss:$16 sps:$4 sm:$0xff]   ;;  %v11139_v25 = vld [vmem:[%s11243_s28] sm:$0xff]  }
 0x15a   : > { %3246 = vmatprep.subr.bf16.mxu0 %v10631_v26  ;;  %3299 = vmatprep.subr.bf16.mxu1 %v10634_v27  ;;  %v5889_v26 = vrot.slane %v11139_v25, 2  ;;  %v11140_v27 = vld [vmem:[%s11243_s28 + $0x8] sm:$0xff]  }
 0x15c   : > { %8803 = vmatmul.mubr.msk.bf16.vlgmr.msra.gmra.mrb[0].mxu0 %vm505_vm2, %v2838_v28  ;;  %8806 = vmatmul.mubr.msk.bf16.vlgmr.msra.gmra.mrb[0].mxu1 %vm505_vm2, %v2838_v28  ;;  %v12272_v28 = vrot.slane %v11140_v27, 2  ;;  %v10767_v27 = vld [vmem:[%s14081_s1 + $0x9a4] ss:$16 sps:$4 sm:$0xff]  }
 0x15d   : > { %3247 = vmatpush1.bf16.msra.mxu0 %v10629_v31  ;;  %3300 = vmatpush1.bf16.msra.mxu1 %v10632_v32  ;;  %v3392_v31 = vpop.permute.xlu0 %3391  ;;  %v10697_v32 = vld [vmem:[%s14081_s1 + $0x840] ss:$16 sps:$4 sm:$0xff]  }
 0x15e   : > { %3248 = vmatprep.subr.bf16.mxu0 %v10637_v33  ;;  %3301 = vmatprep.subr.bf16.mxu1 %v10640_v39  ;;  %v10700_v33 = vld [vmem:[%s14081_s1 + $0x848] ss:$16 sps:$4 sm:$0xff]   ;;  %v12281_v39 = vsel %vm5888_vm5, %v5889_v26, %v12272_v28 }
 0x15f   : > { %3011 = vmatprep.mubr.bf16.mxu0 %v11149_v9  ;;  %3064 = vmatprep.mubr.bf16.mxu1 %v11149_v9 }
 0x160   : > { %6165 = vrot.lane.b32.xlu0 %v12281_v39, %s11150_s12  ;;  %6167 = vrot.lane.b32.xlu1 %v12272_v28, %s11150_s12 }
 0x161   : > { %3249 = vmatpush1.bf16.msra.mxu0 %v10635_v34  ;;  %3302 = vmatpush1.bf16.msra.mxu1 %v10638_v35  ;;  %v10705_v34 = vld [vmem:[%s14081_s1 + $0x864] ss:$16 sps:$4 sm:$0xff]   ;;  %v10708_v35 = vld [vmem:[%s14081_s1 + $0x86c] ss:$16 sps:$4 sm:$0xff]  }
 0x162   : > { %3250 = vmatprep.subr.bf16.mxu0 %v10643_v36  ;;  %3303 = vmatprep.subr.bf16.mxu1 %v10646_v10  ;;  %v10703_v36 = vld [vmem:[%s14081_s1 + $0x860] ss:$16 sps:$4 sm:$0xff]   ;;  %v10706_v10 = vld [vmem:[%s14081_s1 + $0x868] ss:$16 sps:$4 sm:$0xff]  }
 0x164   : > { %8804 = vmatmul.mubr.msk.bf16.gmra.mrb[4].mxu0 %vm505_vm2, %v2840_v40  ;;  %8807 = vmatmul.mubr.msk.bf16.gmra.mrb[4].mxu1 %vm505_vm2, %v2840_v40  ;;  %v10709_v40 = vld [vmem:[%s14081_s1 + $0x880] ss:$16 sps:$4 sm:$0xff]  }
 0x165   : > { %3251 = vmatpush1.bf16.msra.mxu0 %v10641_v37  ;;  %3304 = vmatpush1.bf16.msra.mxu1 %v10644_v38  ;;  %v10711_v37 = vld [vmem:[%s14081_s1 + $0x884] ss:$16 sps:$4 sm:$0xff]   ;;  %v10714_v38 = vld [vmem:[%s14081_s1 + $0x88c] ss:$16 sps:$4 sm:$0xff]  }
 0x166   : > { %3252 = vmatprep.subr.bf16.mxu0 %v10649_v41  ;;  %3305 = vmatprep.subr.bf16.mxu1 %v10652_v43  ;;  %v10712_v41 = vld [vmem:[%s14081_s1 + $0x888] ss:$16 sps:$4 sm:$0xff]   ;;  %v3394_v43 = vpop.permute.xlu1 %3393 }
 0x167   : > { %3278 = vmatprep.mubr.bf16.mxu0 %v11149_v9  ;;  %3331 = vmatprep.mubr.bf16.mxu1 %v11149_v9 }
 0x168   : > { %6442 = vrot.lane.b32.xlu0 %v12281_v39, %s11151_s13  ;;  %6444 = vrot.lane.b32.xlu1 %v12272_v28, %s11151_s13 }
 0x169   : > { %3253 = vmatpush1.bf16.msra.mxu0 %v10647_v45  ;;  %3306 = vmatpush1.bf16.msra.mxu1 %v10650_v42  ;;  %v10717_v45 = vld [vmem:[%s14081_s1 + $0x8a4] ss:$16 sps:$4 sm:$0xff]   ;;  %v10720_v42 = vld [vmem:[%s14081_s1 + $0x8ac] ss:$16 sps:$4 sm:$0xff]  }
 0x16a   : > { %3254 = vmatprep.subr.bf16.mxu0 %v10655_v46  ;;  %3307 = vmatprep.subr.bf16.mxu1 %v10658_v47  ;;  %v10715_v46 = vld [vmem:[%s14081_s1 + $0x8a0] ss:$16 sps:$4 sm:$0xff]   ;;  %v10718_v47 = vld [vmem:[%s14081_s1 + $0x8a8] ss:$16 sps:$4 sm:$0xff]  }
 0x16c   : > { %6719 = vrot.lane.b32.xlu0 %v12281_v39, %s11152_s22  ;;  %6721 = vrot.lane.b32.xlu1 %v12272_v28, %s11152_s22 }
 0x16d   : > { %3255 = vmatpush1.bf16.msra.mxu0 %v10653_v50  ;;  %3308 = vmatpush1.bf16.msra.mxu1 %v10656_v51  ;;  %v8932_v50 = vld [vmem:[%s14081_s1 + $0x8e0] sm:$0x33]  ;;  %v8933_v51 = vld [vmem:[%s14081_s1 + $0x8e8] sm:$0x33] }
 0x16e   : > { %8854 = vmatprep.subr.msk.bf16.mxu0 %vm512_vm0, %v8851_v52  ;;  %8857 = vmatprep.subr.msk.bf16.mxu1 %vm512_vm0, %v8853_v53  ;;  %v10721_v52 = vld [vmem:[%s14081_s1 + $0x8c0] ss:$16 sps:$4 sm:$0xff]   ;;  %v10724_v53 = vld [vmem:[%s14081_s1 + $0x8c8] ss:$16 sps:$4 sm:$0xff]   ;;  %v8955_v54 = vcombine.high %v8932_v50, %v8932_v50  ;;  %v8957_v55 = vcombine.high %v8933_v51, %v8933_v51 }
 0x170   : > { %6996 = vrot.lane.b32.xlu0 %v12281_v39, %s11153_s11  ;;  %6998 = vrot.lane.b32.xlu1 %v12272_v28, %s11153_s11 }
 0x171   : > { %3257 = vmatpush1.bf16.msra.mxu0 %v3235_v56  ;;  %3310 = vmatpush1.bf16.msra.mxu1 %v3241_v57  ;;  %v8954_v56 = vcombine.low %v8932_v50, %v8932_v50  ;;  %v8956_v57 = vcombine.low %v8933_v51, %v8933_v51  ;;  %v10794_v50 = vld [vmem:[%s14081_s1 + $0xa2c] ss:$16 sps:$4 sm:$0xff]   ;;  %v9036_v51 = vld [vmem:[%s14081_s1 + $0xa40] sm:$0x33] }
 0x172   : > { %3523 = vmatprep.subr.bf16.mxu0 %v10665_v8  ;;  %3576 = vmatprep.subr.bf16.mxu1 %v10668_v29 }
 0x173   : > { %v3789_v8 = vsel %vm512_vm0, %v8954_v56, 0  ;;  %v3795_v29 = vsel %vm512_vm0, %v8956_v57, 0  ;;  %v9058_v57 = vcombine.low %v9036_v51, %v9036_v51 }
 0x174   : > { %8855 = vmatmul.mubr.msk.bf16.vlgmr.msra.gmra.mrb[0].mxu0 %vm505_vm2, %v11443_v18  ;;  %8858 = vmatmul.mubr.msk.bf16.vlgmr.msra.gmra.mrb[0].mxu1 %vm505_vm2, %v11443_v18  ;;  %v10680_v18 = vld [vmem:[%s14081_s1 + $0x7dc] ss:$16 sps:$4 sm:$0xff]  }
 0x175   : > { %3524 = vmatpush1.bf16.msra.mxu0 %v10663_v30  ;;  %3577 = vmatpush1.bf16.msra.mxu1 %v10666_v59  ;;  %v10733_v30 = vld [vmem:[%s14081_s1 + $0x8f4] ss:$16 sps:$4 sm:$0xff]   ;;  %v10736_v59 = vld [vmem:[%s14081_s1 + $0x8fc] ss:$16 sps:$4 sm:$0xff]  }
 0x176   : > { %3525 = vmatprep.subr.bf16.mxu0 %v10671_v60  ;;  %3578 = vmatprep.subr.bf16.mxu1 %v10674_v61  ;;  %v3669_v60 = vpop.permute.xlu0 %3668  ;;  %v10731_v61 = vld [vmem:[%s14081_s1 + $0x8f0] ss:$16 sps:$4 sm:$0xff]  }
 0x177   : > { %3288 = vmatprep.mubr.bf16.mxu0 %v11149_v9  ;;  %3341 = vmatprep.mubr.bf16.mxu1 %v11149_v9 }
 0x179   : > { %3526 = vmatpush1.bf16.msra.mxu0 %v10669_v62  ;;  %3579 = vmatpush1.bf16.msra.mxu1 %v10672_v63  ;;  %v10734_v62 = vld [vmem:[%s14081_s1 + $0x8f8] ss:$16 sps:$4 sm:$0xff]   ;;  %v10739_v63 = vld [vmem:[%s14081_s1 + $0x914] ss:$16 sps:$4 sm:$0xff]  }
 0x17a   : > { %3527 = vmatprep.subr.bf16.mxu0 %v10677_v0  ;;  %3580 = vmatprep.subr.bf16.mxu1 %v10680_v18  ;;  %v10742_v0 = vld [vmem:[%s14081_s1 + $0x91c] ss:$16 sps:$4 sm:$0xff]   ;;  %v10737_v18 = vld [vmem:[%s14081_s1 + $0x910] ss:$16 sps:$4 sm:$0xff]  }
 0x17c   : > { %8856 = vmatmul.mubr.msk.bf16.gmra.mrb[4].mxu0 %vm505_vm2, %v11434_v15  ;;  %8859 = vmatmul.mubr.msk.bf16.gmra.mrb[4].mxu1 %vm505_vm2, %v11434_v15  ;;  %v10692_v15 = vld [vmem:[%s14081_s1 + $0x81c] ss:$16 sps:$4 sm:$0xff]  }
 0x17d   : > { %3528 = vmatpush1.bf16.msra.mxu0 %v10675_v1  ;;  %3581 = vmatpush1.bf16.msra.mxu1 %v10678_v2  ;;  %v10740_v1 = vld [vmem:[%s14081_s1 + $0x918] ss:$16 sps:$4 sm:$0xff]   ;;  %v10745_v2 = vld [vmem:[%s14081_s1 + $0x934] ss:$16 sps:$4 sm:$0xff]  }
 0x17e   : > { %3529 = vmatprep.subr.bf16.mxu0 %v10683_v3  ;;  %3582 = vmatprep.subr.bf16.mxu1 %v10686_v4  ;;  %v10748_v3 = vld [vmem:[%s14081_s1 + $0x93c] ss:$16 sps:$4 sm:$0xff]   ;;  %v10743_v4 = vld [vmem:[%s14081_s1 + $0x930] ss:$16 sps:$4 sm:$0xff]  }
 0x17f   : > { %3555 = vmatprep.mubr.bf16.mxu0 %v11149_v9  ;;  %3608 = vmatprep.mubr.bf16.mxu1 %v11149_v9 }
 0x181   : > { %3530 = vmatpush1.bf16.msra.mxu0 %v10681_v5  ;;  %3583 = vmatpush1.bf16.msra.mxu1 %v10684_v6  ;;  %v10746_v5 = vld [vmem:[%s14081_s1 + $0x938] ss:$16 sps:$4 sm:$0xff]   ;;  %v3671_v6 = vpop.permute.xlu1 %3670 }
 0x182   : > { %3531 = vmatprep.subr.bf16.mxu0 %v10689_v7  ;;  %3584 = vmatprep.subr.bf16.mxu1 %v10692_v15  ;;  %v10751_v7 = vld [vmem:[%s14081_s1 + $0x954] ss:$16 sps:$4 sm:$0xff]   ;;  %v10754_v15 = vld [vmem:[%s14081_s1 + $0x95c] ss:$16 sps:$4 sm:$0xff]  }
 0x185   : > { %3532 = vmatpush1.bf16.msra.mxu0 %v10687_v13  ;;  %3585 = vmatpush1.bf16.msra.mxu1 %v10690_v14  ;;  %v10757_v13 = vld [vmem:[%s14081_s1 + $0x974] ss:$16 sps:$4 sm:$0xff]   ;;  %v10760_v14 = vld [vmem:[%s14081_s1 + $0x97c] ss:$16 sps:$4 sm:$0xff]  }
 0x186   : > { %8906 = vmatprep.subr.msk.bf16.mxu0 %vm512_vm0, %v8903_v16  ;;  %8909 = vmatprep.subr.msk.bf16.mxu1 %vm512_vm0, %v8905_v17  ;;  %v8984_v16 = vld [vmem:[%s14081_s1 + $0x990] sm:$0x33]  ;;  %v8985_v17 = vld [vmem:[%s14081_s1 + $0x998] sm:$0x33] }
 0x189   : > { %3534 = vmatpush1.bf16.msra.mxu0 %v3512_v21  ;;  %3587 = vmatpush1.bf16.msra.mxu1 %v3518_v22  ;;  %v9007_v21 = vcombine.high %v8984_v16, %v8984_v16  ;;  %v9009_v22 = vcombine.high %v8985_v17, %v8985_v17 }
 0x18a   : > { %3800 = vmatprep.subr.bf16.mxu0 %v10699_v23  ;;  %3853 = vmatprep.subr.bf16.mxu1 %v10702_v24  ;;  %v9006_v23 = vcombine.low %v8984_v16, %v8984_v16  ;;  %v9008_v24 = vcombine.low %v8985_v17, %v8985_v17  ;;  %v10828_v16 = vld [vmem:[%s14081_s1 + $0xadc] ss:$16 sps:$4 sm:$0xff]   ;;  %v9088_v17 = vld [vmem:[%s14081_s1 + $0xaf0] sm:$0x33] }
 0x18c   : > { %8907 = vmatmul.mubr.msk.bf16.vlgmr.msra.gmra.mrb[0].mxu0 %vm505_vm2, %v3392_v31  ;;  %8910 = vmatmul.mubr.msk.bf16.vlgmr.msra.gmra.mrb[0].mxu1 %vm505_vm2, %v3392_v31  ;;  %v4066_v25 = vsel %vm512_vm0, %v9006_v23, 0  ;;  %v4072_v26 = vsel %vm512_vm0, %v9008_v24, 0  ;;  %v10770_v31 = vld [vmem:[%s14081_s1 + $0x9ac] ss:$16 sps:$4 sm:$0xff]   ;;  %v9110_v24 = vcombine.low %v9088_v17, %v9088_v17 }
 0x18d   : > { %3801 = vmatpush1.bf16.msra.mxu0 %v10697_v32  ;;  %3854 = vmatpush1.bf16.msra.mxu1 %v10700_v33  ;;  %v3946_v32 = vpop.permute.xlu0 %3945  ;;  %v10765_v33 = vld [vmem:[%s14081_s1 + $0x9a0] ss:$16 sps:$4 sm:$0xff]  }
 0x18e   : > { %3802 = vmatprep.subr.bf16.mxu0 %v10705_v34  ;;  %3855 = vmatprep.subr.bf16.mxu1 %v10708_v35  ;;  %v10768_v34 = vld [vmem:[%s14081_s1 + $0x9a8] ss:$16 sps:$4 sm:$0xff]   ;;  %v10773_v35 = vld [vmem:[%s14081_s1 + $0x9c4] ss:$16 sps:$4 sm:$0xff]  }
 0x18f   : > { %3565 = vmatprep.mubr.bf16.mxu0 %v11149_v9  ;;  %3618 = vmatprep.mubr.bf16.mxu1 %v11149_v9 }
 0x191   : > { %3803 = vmatpush1.bf16.msra.mxu0 %v10703_v36  ;;  %3856 = vmatpush1.bf16.msra.mxu1 %v10706_v10  ;;  %v10776_v36 = vld [vmem:[%s14081_s1 + $0x9cc] ss:$16 sps:$4 sm:$0xff]   ;;  %v10771_v10 = vld [vmem:[%s14081_s1 + $0x9c0] ss:$16 sps:$4 sm:$0xff]  }
 0x192   : > { %3804 = vmatprep.subr.bf16.mxu0 %v10711_v37  ;;  %3857 = vmatprep.subr.bf16.mxu1 %v10714_v38  ;;  %v10774_v37 = vld [vmem:[%s14081_s1 + $0x9c8] ss:$16 sps:$4 sm:$0xff]   ;;  %v10779_v38 = vld [vmem:[%s14081_s1 + $0x9e4] ss:$16 sps:$4 sm:$0xff]  }
 0x194   : > { %8908 = vmatmul.mubr.msk.bf16.gmra.mrb[4].mxu0 %vm505_vm2, %v3394_v43  ;;  %8911 = vmatmul.mubr.msk.bf16.gmra.mrb[4].mxu1 %vm505_vm2, %v3394_v43  ;;  %v10780_v43 = vld [vmem:[%s14081_s1 + $0x9e8] ss:$16 sps:$4 sm:$0xff]  }
 0x195   : > { %3805 = vmatpush1.bf16.msra.mxu0 %v10709_v40  ;;  %3858 = vmatpush1.bf16.msra.mxu1 %v10712_v41  ;;  %v10782_v40 = vld [vmem:[%s14081_s1 + $0x9ec] ss:$16 sps:$4 sm:$0xff]   ;;  %v10777_v41 = vld [vmem:[%s14081_s1 + $0x9e0] ss:$16 sps:$4 sm:$0xff]  }
 0x196   : > { %3806 = vmatprep.subr.bf16.mxu0 %v10717_v45  ;;  %3859 = vmatprep.subr.bf16.mxu1 %v10720_v42  ;;  %v3948_v45 = vpop.permute.xlu1 %3947  ;;  %v10785_v42 = vld [vmem:[%s14081_s1 + $0xa04] ss:$16 sps:$4 sm:$0xff]  }
 0x197   : > { %3832 = vmatprep.mubr.bf16.mxu0 %v11149_v9  ;;  %3885 = vmatprep.mubr.bf16.mxu1 %v11149_v9 }
 0x199   : > { %3807 = vmatpush1.bf16.msra.mxu0 %v10715_v46  ;;  %3860 = vmatpush1.bf16.msra.mxu1 %v10718_v47  ;;  %v10788_v46 = vld [vmem:[%s14081_s1 + $0xa0c] ss:$16 sps:$4 sm:$0xff]   ;;  %v10783_v47 = vld [vmem:[%s14081_s1 + $0xa00] ss:$16 sps:$4 sm:$0xff]  }
 0x19a   : > { %3808 = vmatprep.subr.bf16.mxu0 %v10723_v48  ;;  %3861 = vmatprep.subr.bf16.mxu1 %v10726_v49  ;;  %v10786_v48 = vld [vmem:[%s14081_s1 + $0xa08] ss:$16 sps:$4 sm:$0xff]   ;;  %v10791_v49 = vld [vmem:[%s14081_s1 + $0xa24] ss:$16 sps:$4 sm:$0xff]  }
 0x19d   : > { %3809 = vmatpush1.bf16.msra.mxu0 %v10721_v52  ;;  %3862 = vmatpush1.bf16.msra.mxu1 %v10724_v53  ;;  %v9037_v52 = vld [vmem:[%s14081_s1 + $0xa48] sm:$0x33]  ;;  %v10789_v53 = vld [vmem:[%s14081_s1 + $0xa20] ss:$16 sps:$4 sm:$0xff]  }
 0x19e   : > { %8958 = vmatprep.subr.msk.bf16.mxu0 %vm512_vm0, %v8955_v54  ;;  %8961 = vmatprep.subr.msk.bf16.mxu1 %vm512_vm0, %v8957_v55  ;;  %v10792_v54 = vld [vmem:[%s14081_s1 + $0xa28] ss:$16 sps:$4 sm:$0xff]   ;;  %v9059_v55 = vcombine.high %v9036_v51, %v9036_v51  ;;  %v9061_v56 = vcombine.high %v9037_v52, %v9037_v52 }
 0x19f   : > { %v10860_v51 = vld [vmem:[%s14081_s1 + $0xb88] ss:$16 sps:$4 sm:$0xff]  }
 0x1a1   : > { %3811 = vmatpush1.bf16.msra.mxu0 %v3789_v8  ;;  %3864 = vmatpush1.bf16.msra.mxu1 %v3795_v29  ;;  %v9060_v8 = vcombine.low %v9037_v52, %v9037_v52  ;;  %v4343_v29 = vsel %vm512_vm0, %v9058_v57, 0 }
 0x1a2   : > { %4077 = vmatprep.subr.bf16.mxu0 %v10733_v30  ;;  %4130 = vmatprep.subr.bf16.mxu1 %v10736_v59  ;;  %v10801_v59 = vld [vmem:[%s14081_s1 + $0xa54] ss:$16 sps:$4 sm:$0xff]  }
 0x1a3   : > { %v4349_v30 = vsel %vm512_vm0, %v9060_v8, 0  ;;  %v10869_v8 = vld [vmem:[%s14081_s1 + $0xbb4] ss:$16 sps:$4 sm:$0xff]  }
 0x1a4   : > { %8959 = vmatmul.mubr.msk.bf16.vlgmr.msra.gmra.mrb[0].mxu0 %vm505_vm2, %v3669_v60  ;;  %8962 = vmatmul.mubr.msk.bf16.vlgmr.msra.gmra.mrb[0].mxu1 %vm505_vm2, %v3669_v60  ;;  %v10804_v60 = vld [vmem:[%s14081_s1 + $0xa5c] ss:$16 sps:$4 sm:$0xff]  }
 0x1a5   : > { %4078 = vmatpush1.bf16.msra.mxu0 %v10731_v61  ;;  %4131 = vmatpush1.bf16.msra.mxu1 %v10734_v62  ;;  %v4223_v61 = vpop.permute.xlu0 %4222  ;;  %v10799_v62 = vld [vmem:[%s14081_s1 + $0xa50] ss:$16 sps:$4 sm:$0xff]  }
 0x1a6   : > { %4079 = vmatprep.subr.bf16.mxu0 %v10739_v63  ;;  %4132 = vmatprep.subr.bf16.mxu1 %v10742_v0  ;;  %v10802_v63 = vld [vmem:[%s14081_s1 + $0xa58] ss:$16 sps:$4 sm:$0xff]   ;;  %v10807_v0 = vld [vmem:[%s14081_s1 + $0xa74] ss:$16 sps:$4 sm:$0xff]  }
 0x1a7   : > { %3842 = vmatprep.mubr.bf16.mxu0 %v11149_v9  ;;  %3895 = vmatprep.mubr.bf16.mxu1 %v11149_v9 }
 0x1a9   : > { %4080 = vmatpush1.bf16.msra.mxu0 %v10737_v18  ;;  %4133 = vmatpush1.bf16.msra.mxu1 %v10740_v1  ;;  %v10810_v18 = vld [vmem:[%s14081_s1 + $0xa7c] ss:$16 sps:$4 sm:$0xff]   ;;  %v10805_v1 = vld [vmem:[%s14081_s1 + $0xa70] ss:$16 sps:$4 sm:$0xff]  }
 0x1aa   : > { %4081 = vmatprep.subr.bf16.mxu0 %v10745_v2  ;;  %4134 = vmatprep.subr.bf16.mxu1 %v10748_v3  ;;  %v10808_v2 = vld [vmem:[%s14081_s1 + $0xa78] ss:$16 sps:$4 sm:$0xff]   ;;  %v10813_v3 = vld [vmem:[%s14081_s1 + $0xa94] ss:$16 sps:$4 sm:$0xff]  }
 0x1ac   : > { %8960 = vmatmul.mubr.msk.bf16.gmra.mrb[4].mxu0 %vm505_vm2, %v3671_v6  ;;  %8963 = vmatmul.mubr.msk.bf16.gmra.mrb[4].mxu1 %vm505_vm2, %v3671_v6  ;;  %v10814_v6 = vld [vmem:[%s14081_s1 + $0xa98] ss:$16 sps:$4 sm:$0xff]  }
 0x1ad   : > { %4082 = vmatpush1.bf16.msra.mxu0 %v10743_v4  ;;  %4135 = vmatpush1.bf16.msra.mxu1 %v10746_v5  ;;  %v10816_v4 = vld [vmem:[%s14081_s1 + $0xa9c] ss:$16 sps:$4 sm:$0xff]   ;;  %v10811_v5 = vld [vmem:[%s14081_s1 + $0xa90] ss:$16 sps:$4 sm:$0xff]  }
 0x1ae   : > { %4083 = vmatprep.subr.bf16.mxu0 %v10751_v7  ;;  %4136 = vmatprep.subr.bf16.mxu1 %v10754_v15  ;;  %v4225_v7 = vpop.permute.xlu1 %4224  ;;  %v10819_v15 = vld [vmem:[%s14081_s1 + $0xab4] ss:$16 sps:$4 sm:$0xff]  }
 0x1af   : > { %4109 = vmatprep.mubr.bf16.mxu0 %v11149_v9  ;;  %4162 = vmatprep.mubr.bf16.mxu1 %v11149_v9 }
 0x1b1   : > { %4084 = vmatpush1.bf16.msra.mxu0 %v10749_v11  ;;  %4137 = vmatpush1.bf16.msra.mxu1 %v10752_v12  ;;  %v10822_v11 = vld [vmem:[%s14081_s1 + $0xabc] ss:$16 sps:$4 sm:$0xff]   ;;  %v10817_v12 = vld [vmem:[%s14081_s1 + $0xab0] ss:$16 sps:$4 sm:$0xff]  }
 0x1b2   : > { %4085 = vmatprep.subr.bf16.mxu0 %v10757_v13  ;;  %4138 = vmatprep.subr.bf16.mxu1 %v10760_v14  ;;  %v10820_v13 = vld [vmem:[%s14081_s1 + $0xab8] ss:$16 sps:$4 sm:$0xff]   ;;  %v10825_v14 = vld [vmem:[%s14081_s1 + $0xad4] ss:$16 sps:$4 sm:$0xff]  }
 0x1b5   : > { %4086 = vmatpush1.bf16.msra.mxu0 %v10755_v19  ;;  %4139 = vmatpush1.bf16.msra.mxu1 %v10758_v20  ;;  %v9089_v19 = vld [vmem:[%s14081_s1 + $0xaf8] sm:$0x33]  ;;  %v10823_v20 = vld [vmem:[%s14081_s1 + $0xad0] ss:$16 sps:$4 sm:$0xff]  }
 0x1b6   : > { %9010 = vmatprep.subr.msk.bf16.mxu0 %vm512_vm0, %v9007_v21  ;;  %9013 = vmatprep.subr.msk.bf16.mxu1 %vm512_vm0, %v9009_v22  ;;  %v10826_v21 = vld [vmem:[%s14081_s1 + $0xad8] ss:$16 sps:$4 sm:$0xff]   ;;  %v9111_v22 = vcombine.high %v9088_v17, %v9088_v17  ;;  %v9113_v23 = vcombine.high %v9089_v19, %v9089_v19 }
 0x1b7   : > { %v10894_v17 = vld [vmem:[%s14081_s1 + $0xc38] ss:$16 sps:$4 sm:$0xff]  }
 0x1b9   : > { %4088 = vmatpush1.bf16.msra.mxu0 %v4066_v25  ;;  %4141 = vmatpush1.bf16.msra.mxu1 %v4072_v26  ;;  %v9112_v25 = vcombine.low %v9089_v19, %v9089_v19  ;;  %v4624_v26 = vsel %vm512_vm0, %v9110_v24, 0 }
 0x1ba   : > { %4354 = vmatprep.subr.bf16.mxu0 %v10767_v27  ;;  %4407 = vmatprep.subr.bf16.mxu1 %v10770_v31  ;;  %v10835_v31 = vld [vmem:[%s14081_s1 + $0xb04] ss:$16 sps:$4 sm:$0xff]  }
 0x1bb   : > { %v4630_v27 = vsel %vm512_vm0, %v9112_v25, 0  ;;  %v10903_v25 = vld [vmem:[%s14081_s1 + $0xc64] ss:$16 sps:$4 sm:$0xff]  }
 0x1bc   : > { %9011 = vmatmul.mubr.msk.bf16.vlgmr.msra.gmra.mrb[0].mxu0 %vm505_vm2, %v3946_v32  ;;  %9014 = vmatmul.mubr.msk.bf16.vlgmr.msra.gmra.mrb[0].mxu1 %vm505_vm2, %v3946_v32  ;;  %v10838_v32 = vld [vmem:[%s14081_s1 + $0xb0c] ss:$16 sps:$4 sm:$0xff]  }
 0x1bd   : > { %4355 = vmatpush1.bf16.msra.mxu0 %v10765_v33  ;;  %4408 = vmatpush1.bf16.msra.mxu1 %v10768_v34  ;;  %v10833_v33 = vld [vmem:[%s14081_s1 + $0xb00] ss:$16 sps:$4 sm:$0xff]   ;;  %v10836_v34 = vld [vmem:[%s14081_s1 + $0xb08] ss:$16 sps:$4 sm:$0xff]  }
 0x1be   : > { %4356 = vmatprep.subr.bf16.mxu0 %v10773_v35  ;;  %4409 = vmatprep.subr.bf16.mxu1 %v10776_v36  ;;  %v10841_v35 = vld [vmem:[%s14081_s1 + $0xb24] ss:$16 sps:$4 sm:$0xff]   ;;  %v10844_v36 = vld [vmem:[%s14081_s1 + $0xb2c] ss:$16 sps:$4 sm:$0xff]  }
 0x1bf   : > { %4119 = vmatprep.mubr.bf16.mxu0 %v11149_v9  ;;  %4172 = vmatprep.mubr.bf16.mxu1 %v11149_v9 }
 0x1c1   : > { %4357 = vmatpush1.bf16.msra.mxu0 %v10771_v10  ;;  %4410 = vmatpush1.bf16.msra.mxu1 %v10774_v37  ;;  %v10839_v10 = vld [vmem:[%s14081_s1 + $0xb20] ss:$16 sps:$4 sm:$0xff]   ;;  %v10842_v37 = vld [vmem:[%s14081_s1 + $0xb28] ss:$16 sps:$4 sm:$0xff]  }
 0x1c2   : > { %4358 = vmatprep.subr.bf16.mxu0 %v10779_v38  ;;  %4411 = vmatprep.subr.bf16.mxu1 %v10782_v40  ;;  %v10847_v38 = vld [vmem:[%s14081_s1 + $0xb44] ss:$16 sps:$4 sm:$0xff]   ;;  %v10845_v40 = vld [vmem:[%s14081_s1 + $0xb40] ss:$16 sps:$4 sm:$0xff]  }
 0x1c4   : > { %9012 = vmatmul.mubr.msk.bf16.gmra.mrb[4].mxu0 %vm505_vm2, %v3948_v45  ;;  %9015 = vmatmul.mubr.msk.bf16.gmra.mrb[4].mxu1 %vm505_vm2, %v3948_v45  ;;  %v10856_v45 = vld [vmem:[%s14081_s1 + $0xb6c] ss:$16 sps:$4 sm:$0xff]  }
 0x1c5   : > { %4359 = vmatpush1.bf16.msra.mxu0 %v10777_v41  ;;  %4412 = vmatpush1.bf16.msra.mxu1 %v10780_v43  ;;  %v10848_v41 = vld [vmem:[%s14081_s1 + $0xb48] ss:$16 sps:$4 sm:$0xff]   ;;  %v10853_v43 = vld [vmem:[%s14081_s1 + $0xb64] ss:$16 sps:$4 sm:$0xff]  }
 0x1c6   : > { %4360 = vmatprep.subr.bf16.mxu0 %v10785_v42  ;;  %4413 = vmatprep.subr.bf16.mxu1 %v10788_v46  ;;  %v10851_v42 = vld [vmem:[%s14081_s1 + $0xb60] ss:$16 sps:$4 sm:$0xff]   ;;  %v10854_v46 = vld [vmem:[%s14081_s1 + $0xb68] ss:$16 sps:$4 sm:$0xff]  }
 0x1c7   : > { %4386 = vmatprep.mubr.bf16.mxu0 %v11149_v9  ;;  %4439 = vmatprep.mubr.bf16.mxu1 %v11149_v9 }
 0x1c9   : > { %4361 = vmatpush1.bf16.msra.mxu0 %v10783_v47  ;;  %4414 = vmatpush1.bf16.msra.mxu1 %v10786_v48  ;;  %v10859_v47 = vld [vmem:[%s14081_s1 + $0xb84] ss:$16 sps:$4 sm:$0xff]  }
 0x1ca   : > { %4362 = vmatprep.subr.bf16.mxu0 %v10791_v49  ;;  %4415 = vmatprep.subr.bf16.mxu1 %v10794_v50  ;;  %v9140_v48 = vld [vmem:[%s14081_s1 + $0xba0] sm:$0x33]  ;;  %v9141_v49 = vld [vmem:[%s14081_s1 + $0xba8] sm:$0x33] }
 0x1cb   : > { %v10857_v50 = vld [vmem:[%s14081_s1 + $0xb80] ss:$16 sps:$4 sm:$0xff]   ;;  %v9163_v52 = vcombine.high %v9140_v48, %v9140_v48 }
 0x1cd   : > { %4363 = vmatpush1.bf16.msra.mxu0 %v10789_v53  ;;  %4416 = vmatpush1.bf16.msra.mxu1 %v10792_v54  ;;  %v9165_v53 = vcombine.high %v9141_v49, %v9141_v49  ;;  %v9162_v54 = vcombine.low %v9140_v48, %v9140_v48  ;;  %v9245_v48 = vld [vmem:[%s14081_s1 + $0xd08] sm:$0x33] }
 0x1ce   : > { %9062 = vmatprep.subr.msk.bf16.mxu0 %vm512_vm0, %v9059_v55  ;;  %9065 = vmatprep.subr.msk.bf16.mxu1 %vm512_vm0, %v9061_v56  ;;  %v9164_v55 = vcombine.low %v9141_v49, %v9141_v49  ;;  %v10925_v49 = vld [vmem:[%s14081_s1 + $0xce0] ss:$16 sps:$4 sm:$0xff]  }
 0x1cf   : > { %v4901_v56 = vsel %vm512_vm0, %v9162_v54, 0  ;;  %v9268_v54 = vcombine.low %v9245_v48, %v9245_v48 }
 0x1d0   : > { %v4907_v57 = vsel %vm512_vm0, %v9164_v55, 0 }
 0x1d1   : > { %4365 = vmatpush1.bf16.msra.mxu0 %v4343_v29  ;;  %4418 = vmatpush1.bf16.msra.mxu1 %v4349_v30  ;;  %v10872_v29 = vld [vmem:[%s14081_s1 + $0xbbc] ss:$16 sps:$4 sm:$0xff]   ;;  %v4781_v30 = vpop.permute.xlu0 %4780 }
 0x1d2   : > { %4635 = vmatprep.subr.bf16.mxu0 %v10801_v59  ;;  %4688 = vmatprep.subr.bf16.mxu1 %v10804_v60  ;;  %v10867_v59 = vld [vmem:[%s14081_s1 + $0xbb0] ss:$16 sps:$4 sm:$0xff]   ;;  %v10870_v60 = vld [vmem:[%s14081_s1 + $0xbb8] ss:$16 sps:$4 sm:$0xff]  }
 0x1d4   : > { %9063 = vmatmul.mubr.msk.bf16.vlgmr.msra.gmra.mrb[0].mxu0 %vm505_vm2, %v4223_v61  ;;  %9066 = vmatmul.mubr.msk.bf16.vlgmr.msra.gmra.mrb[0].mxu1 %vm505_vm2, %v4223_v61  ;;  %v10875_v61 = vld [vmem:[%s14081_s1 + $0xbd4] ss:$16 sps:$4 sm:$0xff]  }
 0x1d5   : > { %4636 = vmatpush1.bf16.msra.mxu0 %v10799_v62  ;;  %4689 = vmatpush1.bf16.msra.mxu1 %v10802_v63  ;;  %v10878_v62 = vld [vmem:[%s14081_s1 + $0xbdc] ss:$16 sps:$4 sm:$0xff]   ;;  %v10873_v63 = vld [vmem:[%s14081_s1 + $0xbd0] ss:$16 sps:$4 sm:$0xff]  }
 0x1d6   : > { %4637 = vmatprep.subr.bf16.mxu0 %v10807_v0  ;;  %4690 = vmatprep.subr.bf16.mxu1 %v10810_v18  ;;  %v10876_v0 = vld [vmem:[%s14081_s1 + $0xbd8] ss:$16 sps:$4 sm:$0xff]   ;;  %v10881_v18 = vld [vmem:[%s14081_s1 + $0xbf4] ss:$16 sps:$4 sm:$0xff]  }
 0x1d7   : > { %4396 = vmatprep.mubr.bf16.mxu0 %v11149_v9  ;;  %4449 = vmatprep.mubr.bf16.mxu1 %v11149_v9 }
 0x1d9   : > { %4638 = vmatpush1.bf16.msra.mxu0 %v10805_v1  ;;  %4691 = vmatpush1.bf16.msra.mxu1 %v10808_v2  ;;  %v10884_v1 = vld [vmem:[%s14081_s1 + $0xbfc] ss:$16 sps:$4 sm:$0xff]   ;;  %v10879_v2 = vld [vmem:[%s14081_s1 + $0xbf0] ss:$16 sps:$4 sm:$0xff]  }
 0x1da   : > { %4639 = vmatprep.subr.bf16.mxu0 %v10813_v3  ;;  %4692 = vmatprep.subr.bf16.mxu1 %v10816_v4  ;;  %v10882_v3 = vld [vmem:[%s14081_s1 + $0xbf8] ss:$16 sps:$4 sm:$0xff]   ;;  %v4783_v4 = vpop.permute.xlu1 %4782 }
 0x1dc   : > { %9064 = vmatmul.mubr.msk.bf16.gmra.mrb[4].mxu0 %vm505_vm2, %v4225_v7  ;;  %9067 = vmatmul.mubr.msk.bf16.gmra.mrb[4].mxu1 %vm505_vm2, %v4225_v7  ;;  %v10885_v7 = vld [vmem:[%s14081_s1 + $0xc10] ss:$16 sps:$4 sm:$0xff]  }
 0x1dd   : > { %4640 = vmatpush1.bf16.msra.mxu0 %v10811_v5  ;;  %4693 = vmatpush1.bf16.msra.mxu1 %v10814_v6  ;;  %v10887_v5 = vld [vmem:[%s14081_s1 + $0xc14] ss:$16 sps:$4 sm:$0xff]   ;;  %v10890_v6 = vld [vmem:[%s14081_s1 + $0xc1c] ss:$16 sps:$4 sm:$0xff]  }
 0x1de   : > { %4641 = vmatprep.subr.bf16.mxu0 %v10819_v15  ;;  %4694 = vmatprep.subr.bf16.mxu1 %v10822_v11  ;;  %v10888_v15 = vld [vmem:[%s14081_s1 + $0xc18] ss:$16 sps:$4 sm:$0xff]   ;;  %v10893_v11 = vld [vmem:[%s14081_s1 + $0xc34] ss:$16 sps:$4 sm:$0xff]  }
 0x1df   : > { %4667 = vmatprep.mubr.bf16.mxu0 %v11149_v9  ;;  %4720 = vmatprep.mubr.bf16.mxu1 %v11149_v9 }
 0x1e1   : > { %4642 = vmatpush1.bf16.msra.mxu0 %v10817_v12  ;;  %4695 = vmatpush1.bf16.msra.mxu1 %v10820_v13  ;;  %v10896_v12 = vld [vmem:[%s14081_s1 + $0xc3c] ss:$16 sps:$4 sm:$0xff]   ;;  %v9192_v13 = vld [vmem:[%s14081_s1 + $0xc50] sm:$0x33] }
 0x1e2   : > { %4643 = vmatprep.subr.bf16.mxu0 %v10825_v14  ;;  %4696 = vmatprep.subr.bf16.mxu1 %v10828_v16  ;;  %v9193_v14 = vld [vmem:[%s14081_s1 + $0xc58] sm:$0x33]  ;;  %v10891_v16 = vld [vmem:[%s14081_s1 + $0xc30] ss:$16 sps:$4 sm:$0xff]   ;;  %v9215_v19 = vcombine.high %v9192_v13, %v9192_v13 }
 0x1e5   : > { %4644 = vmatpush1.bf16.msra.mxu0 %v10823_v20  ;;  %4697 = vmatpush1.bf16.msra.mxu1 %v10826_v21  ;;  %v9217_v20 = vcombine.high %v9193_v14, %v9193_v14  ;;  %v9214_v21 = vcombine.low %v9192_v13, %v9192_v13  ;;  %v9297_v13 = vld [vmem:[%s14081_s1 + $0xdb8] sm:$0x33] }
 0x1e6   : > { %9114 = vmatprep.subr.msk.bf16.mxu0 %vm512_vm0, %v9111_v22  ;;  %9117 = vmatprep.subr.msk.bf16.mxu1 %vm512_vm0, %v9113_v23  ;;  %v9216_v22 = vcombine.low %v9193_v14, %v9193_v14  ;;  %v10959_v14 = vld [vmem:[%s14081_s1 + $0xd90] ss:$16 sps:$4 sm:$0xff]  }
 0x1e7   : > { %v5178_v23 = vsel %vm512_vm0, %v9214_v21, 0  ;;  %v9320_v21 = vcombine.low %v9297_v13, %v9297_v13 }
 0x1e8   : > { %v5184_v24 = vsel %vm512_vm0, %v9216_v22, 0 }
 0x1e9   : > { %4646 = vmatpush1.bf16.msra.mxu0 %v4624_v26  ;;  %4699 = vmatpush1.bf16.msra.mxu1 %v4630_v27  ;;  %v10906_v26 = vld [vmem:[%s14081_s1 + $0xc6c] ss:$16 sps:$4 sm:$0xff]   ;;  %v5058_v27 = vpop.permute.xlu0 %5057 }
 0x1ea   : > { %4912 = vmatprep.subr.bf16.mxu0 %v10835_v31  ;;  %4965 = vmatprep.subr.bf16.mxu1 %v10838_v32  ;;  %v10901_v31 = vld [vmem:[%s14081_s1 + $0xc60] ss:$16 sps:$4 sm:$0xff]   ;;  %v10904_v32 = vld [vmem:[%s14081_s1 + $0xc68] ss:$16 sps:$4 sm:$0xff]  }
 0x1ec   : > { %9115 = vmatmul.mubr.msk.bf16.vlgmr.msra.gmra.mrb[0].mxu0 %vm505_vm2, %v11872_v58  ;;  %9118 = vmatmul.mubr.msk.bf16.vlgmr.msra.gmra.mrb[0].mxu1 %vm505_vm2, %v11872_v58  ;;  %v10850_v58 = vld [vmem:[%s14081_s1 + $0xb4c] ss:$16 sps:$4 sm:$0xff]  }
 0x1ed   : > { %4913 = vmatpush1.bf16.msra.mxu0 %v10833_v33  ;;  %4966 = vmatpush1.bf16.msra.mxu1 %v10836_v34  ;;  %v10909_v33 = vld [vmem:[%s14081_s1 + $0xc84] ss:$16 sps:$4 sm:$0xff]   ;;  %v10912_v34 = vld [vmem:[%s14081_s1 + $0xc8c] ss:$16 sps:$4 sm:$0xff]  }
 0x1ee   : > { %4914 = vmatprep.subr.bf16.mxu0 %v10841_v35  ;;  %4967 = vmatprep.subr.bf16.mxu1 %v10844_v36  ;;  %v10907_v35 = vld [vmem:[%s14081_s1 + $0xc80] ss:$16 sps:$4 sm:$0xff]   ;;  %v10910_v36 = vld [vmem:[%s14081_s1 + $0xc88] ss:$16 sps:$4 sm:$0xff]  }
 0x1ef   : > { %4677 = vmatprep.mubr.bf16.mxu0 %v11149_v9  ;;  %4730 = vmatprep.mubr.bf16.mxu1 %v11149_v9 }
 0x1f1   : > { %4915 = vmatpush1.bf16.msra.mxu0 %v10839_v10  ;;  %4968 = vmatpush1.bf16.msra.mxu1 %v10842_v37  ;;  %v10915_v10 = vld [vmem:[%s14081_s1 + $0xca4] ss:$16 sps:$4 sm:$0xff]   ;;  %v10918_v37 = vld [vmem:[%s14081_s1 + $0xcac] ss:$16 sps:$4 sm:$0xff]  }
 0x1f2   : > { %4916 = vmatprep.subr.bf16.mxu0 %v10847_v38  ;;  %4969 = vmatprep.subr.bf16.mxu1 %v10850_v58  ;;  %v10913_v38 = vld [vmem:[%s14081_s1 + $0xca0] ss:$16 sps:$4 sm:$0xff]   ;;  %v10916_v58 = vld [vmem:[%s14081_s1 + $0xca8] ss:$16 sps:$4 sm:$0xff]  }
 0x1f4   : > { %9116 = vmatmul.mubr.msk.bf16.gmra.mrb[4].mxu0 %vm505_vm2, %v11338_v44  ;;  %9119 = vmatmul.mubr.msk.bf16.gmra.mrb[4].mxu1 %vm505_vm2, %v11338_v44  ;;  %v10862_v44 = vld [vmem:[%s14081_s1 + $0xb8c] ss:$16 sps:$4 sm:$0xff]  }
 0x1f5   : > { %4917 = vmatpush1.bf16.msra.mxu0 %v10845_v40  ;;  %4970 = vmatpush1.bf16.msra.mxu1 %v10848_v41  ;;  %v5060_v40 = vpop.permute.xlu1 %5059  ;;  %v10921_v41 = vld [vmem:[%s14081_s1 + $0xcc4] ss:$16 sps:$4 sm:$0xff]  }
 0x1f6   : > { %4918 = vmatprep.subr.bf16.mxu0 %v10853_v43  ;;  %4971 = vmatprep.subr.bf16.mxu1 %v10856_v45  ;;  %v10924_v43 = vld [vmem:[%s14081_s1 + $0xccc] ss:$16 sps:$4 sm:$0xff]   ;;  %v10919_v45 = vld [vmem:[%s14081_s1 + $0xcc0] ss:$16 sps:$4 sm:$0xff]  }
 0x1f7   : > { %4944 = vmatprep.mubr.bf16.mxu0 %v11149_v9  ;;  %4997 = vmatprep.mubr.bf16.mxu1 %v11149_v9 }
 0x1f9   : > { %4919 = vmatpush1.bf16.msra.mxu0 %v10851_v42  ;;  %4972 = vmatpush1.bf16.msra.mxu1 %v10854_v46  ;;  %v10922_v42 = vld [vmem:[%s14081_s1 + $0xcc8] ss:$16 sps:$4 sm:$0xff]   ;;  %v10927_v46 = vld [vmem:[%s14081_s1 + $0xce4] ss:$16 sps:$4 sm:$0xff]  }
 0x1fa   : > { %4920 = vmatprep.subr.bf16.mxu0 %v10859_v47  ;;  %4973 = vmatprep.subr.bf16.mxu1 %v10862_v44  ;;  %v10930_v47 = vld [vmem:[%s14081_s1 + $0xcec] ss:$16 sps:$4 sm:$0xff]   ;;  %v9244_v44 = vld [vmem:[%s14081_s1 + $0xd00] sm:$0x33] }
 0x1fd   : > { %4921 = vmatpush1.bf16.msra.mxu0 %v10857_v50  ;;  %4974 = vmatpush1.bf16.msra.mxu1 %v10860_v51  ;;  %v10928_v50 = vld [vmem:[%s14081_s1 + $0xce8] ss:$16 sps:$4 sm:$0xff]   ;;  %v9267_v51 = vcombine.high %v9244_v44, %v9244_v44 }
 0x1fe   : > { %9166 = vmatprep.subr.msk.bf16.mxu0 %vm512_vm0, %v9163_v52  ;;  %9169 = vmatprep.subr.msk.bf16.mxu1 %vm512_vm0, %v9165_v53  ;;  %v9269_v52 = vcombine.high %v9245_v48, %v9245_v48  ;;  %v9266_v53 = vcombine.low %v9244_v44, %v9244_v44  ;;  %v9349_v44 = vld [vmem:[%s14081_s1 + $0xe68] sm:$0x33]  ;;  %v10993_v48 = vld [vmem:[%s14081_s1 + $0xe40] ss:$16 sps:$4 sm:$0xff]  }
 0x200   : > { %v5455_v55 = vsel %vm512_vm0, %v9266_v53, 0  ;;  %v9372_v53 = vcombine.low %v9349_v44, %v9349_v44 }
 0x201   : > { %4923 = vmatpush1.bf16.msra.mxu0 %v4901_v56  ;;  %4976 = vmatpush1.bf16.msra.mxu1 %v4907_v57  ;;  %v5461_v56 = vsel %vm512_vm0, %v9268_v54, 0  ;;  %v10937_v57 = vld [vmem:[%s14081_s1 + $0xd14] ss:$16 sps:$4 sm:$0xff]  }
 0x202   : > { %5189 = vmatprep.subr.bf16.mxu0 %v10869_v8  ;;  %5242 = vmatprep.subr.bf16.mxu1 %v10872_v29  ;;  %v10940_v8 = vld [vmem:[%s14081_s1 + $0xd1c] ss:$16 sps:$4 sm:$0xff]   ;;  %v5335_v29 = vpop.permute.xlu0 %5334 }
 0x204   : > { %9167 = vmatmul.mubr.msk.bf16.vlgmr.msra.gmra.mrb[0].mxu0 %vm505_vm2, %v4781_v30  ;;  %9170 = vmatmul.mubr.msk.bf16.vlgmr.msra.gmra.mrb[0].mxu1 %vm505_vm2, %v4781_v30  ;;  %v10935_v30 = vld [vmem:[%s14081_s1 + $0xd10] ss:$16 sps:$4 sm:$0xff]  }
 0x205   : > { %5190 = vmatpush1.bf16.msra.mxu0 %v10867_v59  ;;  %5243 = vmatpush1.bf16.msra.mxu1 %v10870_v60  ;;  %v10938_v59 = vld [vmem:[%s14081_s1 + $0xd18] ss:$16 sps:$4 sm:$0xff]   ;;  %v10943_v60 = vld [vmem:[%s14081_s1 + $0xd34] ss:$16 sps:$4 sm:$0xff]  }
 0x206   : > { %5191 = vmatprep.subr.bf16.mxu0 %v10875_v61  ;;  %5244 = vmatprep.subr.bf16.mxu1 %v10878_v62  ;;  %v10946_v61 = vld [vmem:[%s14081_s1 + $0xd3c] ss:$16 sps:$4 sm:$0xff]   ;;  %v10941_v62 = vld [vmem:[%s14081_s1 + $0xd30] ss:$16 sps:$4 sm:$0xff]  }
 0x207   : > { %4954 = vmatprep.mubr.bf16.mxu0 %v11149_v9  ;;  %5007 = vmatprep.mubr.bf16.mxu1 %v11149_v9 }
 0x209   : > { %5192 = vmatpush1.bf16.msra.mxu0 %v10873_v63  ;;  %5245 = vmatpush1.bf16.msra.mxu1 %v10876_v0  ;;  %v10944_v63 = vld [vmem:[%s14081_s1 + $0xd38] ss:$16 sps:$4 sm:$0xff]   ;;  %v10949_v0 = vld [vmem:[%s14081_s1 + $0xd54] ss:$16 sps:$4 sm:$0xff]  }
 0x20a   : > { %5193 = vmatprep.subr.bf16.mxu0 %v10881_v18  ;;  %5246 = vmatprep.subr.bf16.mxu1 %v10884_v1  ;;  %v10952_v18 = vld [vmem:[%s14081_s1 + $0xd5c] ss:$16 sps:$4 sm:$0xff]   ;;  %v10947_v1 = vld [vmem:[%s14081_s1 + $0xd50] ss:$16 sps:$4 sm:$0xff]  }
 0x20c   : > { %9168 = vmatmul.mubr.msk.bf16.gmra.mrb[4].mxu0 %vm505_vm2, %v4783_v4  ;;  %9171 = vmatmul.mubr.msk.bf16.gmra.mrb[4].mxu1 %vm505_vm2, %v4783_v4  ;;  %v10955_v4 = vld [vmem:[%s14081_s1 + $0xd74] ss:$16 sps:$4 sm:$0xff]  }
 0x20d   : > { %5194 = vmatpush1.bf16.msra.mxu0 %v10879_v2  ;;  %5247 = vmatpush1.bf16.msra.mxu1 %v10882_v3  ;;  %v10950_v2 = vld [vmem:[%s14081_s1 + $0xd58] ss:$16 sps:$4 sm:$0xff]   ;;  %v5337_v3 = vpop.permute.xlu1 %5336 }
 0x20e   : > { %5195 = vmatprep.subr.bf16.mxu0 %v10887_v5  ;;  %5248 = vmatprep.subr.bf16.mxu1 %v10890_v6  ;;  %v10958_v5 = vld [vmem:[%s14081_s1 + $0xd7c] ss:$16 sps:$4 sm:$0xff]   ;;  %v10953_v6 = vld [vmem:[%s14081_s1 + $0xd70] ss:$16 sps:$4 sm:$0xff]  }
 0x20f   : > { %5221 = vmatprep.mubr.bf16.mxu0 %v11149_v9  ;;  %5274 = vmatprep.mubr.bf16.mxu1 %v11149_v9 }
 0x211   : > { %5196 = vmatpush1.bf16.msra.mxu0 %v10885_v7  ;;  %5249 = vmatpush1.bf16.msra.mxu1 %v10888_v15  ;;  %v10956_v7 = vld [vmem:[%s14081_s1 + $0xd78] ss:$16 sps:$4 sm:$0xff]   ;;  %v10961_v15 = vld [vmem:[%s14081_s1 + $0xd94] ss:$16 sps:$4 sm:$0xff]  }
 0x212   : > { %5197 = vmatprep.subr.bf16.mxu0 %v10893_v11  ;;  %5250 = vmatprep.subr.bf16.mxu1 %v10896_v12  ;;  %v10964_v11 = vld [vmem:[%s14081_s1 + $0xd9c] ss:$16 sps:$4 sm:$0xff]   ;;  %v9296_v12 = vld [vmem:[%s14081_s1 + $0xdb0] sm:$0x33] }
 0x215   : > { %5198 = vmatpush1.bf16.msra.mxu0 %v10891_v16  ;;  %5251 = vmatpush1.bf16.msra.mxu1 %v10894_v17  ;;  %v10962_v16 = vld [vmem:[%s14081_s1 + $0xd98] ss:$16 sps:$4 sm:$0xff]   ;;  %v9319_v17 = vcombine.high %v9296_v12, %v9296_v12 }
 0x216   : > { %9218 = vmatprep.subr.msk.bf16.mxu0 %vm512_vm0, %v9215_v19  ;;  %9221 = vmatprep.subr.msk.bf16.mxu1 %vm512_vm0, %v9217_v20  ;;  %v9321_v19 = vcombine.high %v9297_v13, %v9297_v13  ;;  %v9318_v20 = vcombine.low %v9296_v12, %v9296_v12 }
 0x218   : > { %v5732_v22 = vsel %vm512_vm0, %v9318_v20, 0  ;;  %v11042_v20 = vld [vmem:[%s14081_s1 + $0xf2c] ss:$16 sps:$4 sm:$0xff]  }
 0x219   : > { %5200 = vmatpush1.bf16.msra.mxu0 %v5178_v23  ;;  %5253 = vmatpush1.bf16.msra.mxu1 %v5184_v24  ;;  %v5738_v23 = vsel %vm512_vm0, %v9320_v21, 0  ;;  %v10971_v24 = vld [vmem:[%s14081_s1 + $0xdc4] ss:$16 sps:$4 sm:$0xff]  }
 0x21a   : > { %5466 = vmatprep.subr.bf16.mxu0 %v10903_v25  ;;  %5519 = vmatprep.subr.bf16.mxu1 %v10906_v26  ;;  %v10974_v25 = vld [vmem:[%s14081_s1 + $0xdcc] ss:$16 sps:$4 sm:$0xff]   ;;  %v5612_v26 = vpop.permute.xlu0 %5611 }
 0x21c   : > { %9219 = vmatmul.mubr.msk.bf16.vlgmr.msra.gmra.mrb[0].mxu0 %vm505_vm2, %v5058_v27  ;;  %9222 = vmatmul.mubr.msk.bf16.vlgmr.msra.gmra.mrb[0].mxu1 %vm505_vm2, %v5058_v27  ;;  %v10969_v27 = vld [vmem:[%s14081_s1 + $0xdc0] ss:$16 sps:$4 sm:$0xff]  }
 0x21d   : > { %5467 = vmatpush1.bf16.msra.mxu0 %v10901_v31  ;;  %5520 = vmatpush1.bf16.msra.mxu1 %v10904_v32  ;;  %v10972_v31 = vld [vmem:[%s14081_s1 + $0xdc8] ss:$16 sps:$4 sm:$0xff]   ;;  %v10977_v32 = vld [vmem:[%s14081_s1 + $0xde4] ss:$16 sps:$4 sm:$0xff]  }
 0x21e   : > { %5468 = vmatprep.subr.bf16.mxu0 %v10909_v33  ;;  %5521 = vmatprep.subr.bf16.mxu1 %v10912_v34  ;;  %v10980_v33 = vld [vmem:[%s14081_s1 + $0xdec] ss:$16 sps:$4 sm:$0xff]   ;;  %v10975_v34 = vld [vmem:[%s14081_s1 + $0xde0] ss:$16 sps:$4 sm:$0xff]   ;;  %v6166_v21 = vpop.permute.xlu0 %6165 }
 0x21f   : > { %5231 = vmatprep.mubr.bf16.mxu0 %v11149_v9  ;;  %5284 = vmatprep.mubr.bf16.mxu1 %v11149_v9 }
 0x221   : > { %5469 = vmatpush1.bf16.msra.mxu0 %v10907_v35  ;;  %5522 = vmatpush1.bf16.msra.mxu1 %v10910_v36  ;;  %v10978_v35 = vld [vmem:[%s14081_s1 + $0xde8] ss:$16 sps:$4 sm:$0xff]   ;;  %v10983_v36 = vld [vmem:[%s14081_s1 + $0xe04] ss:$16 sps:$4 sm:$0xff]  }
 0x222   : > { %5470 = vmatprep.subr.bf16.mxu0 %v10915_v10  ;;  %5523 = vmatprep.subr.bf16.mxu1 %v10918_v37  ;;  %v10986_v10 = vld [vmem:[%s14081_s1 + $0xe0c] ss:$16 sps:$4 sm:$0xff]   ;;  %v10981_v37 = vld [vmem:[%s14081_s1 + $0xe00] ss:$16 sps:$4 sm:$0xff]  }
 0x224   : > { %9220 = vmatmul.mubr.msk.bf16.gmra.mrb[4].mxu0 %vm505_vm2, %v5060_v40  ;;  %9223 = vmatmul.mubr.msk.bf16.gmra.mrb[4].mxu1 %vm505_vm2, %v5060_v40  ;;  %v10989_v40 = vld [vmem:[%s14081_s1 + $0xe24] ss:$16 sps:$4 sm:$0xff]  }
 0x225   : > { %5471 = vmatpush1.bf16.msra.mxu0 %v10913_v38  ;;  %5524 = vmatpush1.bf16.msra.mxu1 %v10916_v58  ;;  %v10984_v38 = vld [vmem:[%s14081_s1 + $0xe08] ss:$16 sps:$4 sm:$0xff]   ;;  %v5614_v58 = vpop.permute.xlu1 %5613 }
 0x226   : > { %5472 = vmatprep.subr.bf16.mxu0 %v10921_v41  ;;  %5525 = vmatprep.subr.bf16.mxu1 %v10924_v43  ;;  %v10992_v41 = vld [vmem:[%s14081_s1 + $0xe2c] ss:$16 sps:$4 sm:$0xff]   ;;  %v10987_v43 = vld [vmem:[%s14081_s1 + $0xe20] ss:$16 sps:$4 sm:$0xff]  }
 0x227   : > { %5498 = vmatprep.mubr.bf16.mxu0 %v11149_v9  ;;  %5551 = vmatprep.mubr.bf16.mxu1 %v11149_v9 }
 0x229   : > { %5473 = vmatpush1.bf16.msra.mxu0 %v10919_v45  ;;  %5526 = vmatpush1.bf16.msra.mxu1 %v10922_v42  ;;  %v10990_v45 = vld [vmem:[%s14081_s1 + $0xe28] ss:$16 sps:$4 sm:$0xff]   ;;  %v10995_v42 = vld [vmem:[%s14081_s1 + $0xe44] ss:$16 sps:$4 sm:$0xff]  }
 0x22a   : > { %5474 = vmatprep.subr.bf16.mxu0 %v10927_v46  ;;  %5527 = vmatprep.subr.bf16.mxu1 %v10930_v47  ;;  %v10998_v46 = vld [vmem:[%s14081_s1 + $0xe4c] ss:$16 sps:$4 sm:$0xff]   ;;  %v9348_v47 = vld [vmem:[%s14081_s1 + $0xe60] sm:$0x33] }
 0x22d   : > { %5475 = vmatpush1.bf16.msra.mxu0 %v10925_v49  ;;  %5528 = vmatpush1.bf16.msra.mxu1 %v10928_v50  ;;  %v10996_v49 = vld [vmem:[%s14081_s1 + $0xe48] ss:$16 sps:$4 sm:$0xff]   ;;  %v9371_v50 = vcombine.high %v9348_v47, %v9348_v47 }
 0x22e   : > { %9270 = vmatprep.subr.msk.bf16.mxu0 %vm512_vm0, %v9267_v51  ;;  %9273 = vmatprep.subr.msk.bf16.mxu1 %vm512_vm0, %v9269_v52  ;;  %v9373_v51 = vcombine.high %v9349_v44, %v9349_v44  ;;  %v9370_v52 = vcombine.low %v9348_v47, %v9348_v47 }
 0x230   : > { %v6009_v54 = vsel %vm512_vm0, %v9370_v52, 0  ;;  %v11076_v52 = vld [vmem:[%s14081_s1 + $0xfdc] ss:$16 sps:$4 sm:$0xff]  }
 0x231   : > { %5477 = vmatpush1.bf16.msra.mxu0 %v5455_v55  ;;  %5530 = vmatpush1.bf16.msra.mxu1 %v5461_v56  ;;  %v6015_v55 = vsel %vm512_vm0, %v9372_v53, 0  ;;  %v11005_v56 = vld [vmem:[%s14081_s1 + $0xe74] ss:$16 sps:$4 sm:$0xff]   ;;  %v6443_v53 = vpop.permute.xlu0 %6442 }
 0x232   : > { %5743 = vmatprep.subr.bf16.mxu0 %v10937_v57  ;;  %5796 = vmatprep.subr.bf16.mxu1 %v10940_v8  ;;  %v11008_v57 = vld [vmem:[%s14081_s1 + $0xe7c] ss:$16 sps:$4 sm:$0xff]   ;;  %v11003_v8 = vld [vmem:[%s14081_s1 + $0xe70] ss:$16 sps:$4 sm:$0xff]  }
 0x234   : > { %9271 = vmatmul.mubr.msk.bf16.vlgmr.msra.gmra.mrb[0].mxu0 %vm505_vm2, %v5335_v29  ;;  %9274 = vmatmul.mubr.msk.bf16.vlgmr.msra.gmra.mrb[0].mxu1 %vm505_vm2, %v5335_v29  ;;  %v11006_v29 = vld [vmem:[%s14081_s1 + $0xe78] ss:$16 sps:$4 sm:$0xff]  }
 0x235   : > { %5744 = vmatpush1.bf16.msra.mxu0 %v10935_v30  ;;  %5797 = vmatpush1.bf16.msra.mxu1 %v10938_v59  ;;  %v11011_v30 = vld [vmem:[%s14081_s1 + $0xe94] ss:$16 sps:$4 sm:$0xff]   ;;  %v11014_v59 = vld [vmem:[%s14081_s1 + $0xe9c] ss:$16 sps:$4 sm:$0xff]  }
 0x236   : > { %5745 = vmatprep.subr.bf16.mxu0 %v10943_v60  ;;  %5798 = vmatprep.subr.bf16.mxu1 %v10946_v61  ;;  %v11009_v60 = vld [vmem:[%s14081_s1 + $0xe90] ss:$16 sps:$4 sm:$0xff]   ;;  %v11012_v61 = vld [vmem:[%s14081_s1 + $0xe98] ss:$16 sps:$4 sm:$0xff]  }
 0x237   : > { %5508 = vmatprep.mubr.bf16.mxu0 %v11149_v9  ;;  %5561 = vmatprep.mubr.bf16.mxu1 %v11149_v9 }
 0x239   : > { %5746 = vmatpush1.bf16.msra.mxu0 %v10941_v62  ;;  %5799 = vmatpush1.bf16.msra.mxu1 %v10944_v63  ;;  %v11017_v62 = vld [vmem:[%s14081_s1 + $0xeb4] ss:$16 sps:$4 sm:$0xff]   ;;  %v11015_v63 = vld [vmem:[%s14081_s1 + $0xeb0] ss:$16 sps:$4 sm:$0xff]  }
 0x23a   : > { %5747 = vmatprep.subr.bf16.mxu0 %v10949_v0  ;;  %5800 = vmatprep.subr.bf16.mxu1 %v10952_v18  ;;  %v11018_v0 = vld [vmem:[%s14081_s1 + $0xeb8] ss:$16 sps:$4 sm:$0xff]   ;;  %v11023_v18 = vld [vmem:[%s14081_s1 + $0xed4] ss:$16 sps:$4 sm:$0xff]  }
 0x23c   : > { %9272 = vmatmul.mubr.msk.bf16.gmra.mrb[4].mxu0 %vm505_vm2, %v5337_v3  ;;  %9275 = vmatmul.mubr.msk.bf16.gmra.mrb[4].mxu1 %vm505_vm2, %v5337_v3  ;;  %v11024_v3 = vld [vmem:[%s14081_s1 + $0xed8] ss:$16 sps:$4 sm:$0xff]  }
 0x23d   : > { %5748 = vmatpush1.bf16.msra.mxu0 %v10947_v1  ;;  %5801 = vmatpush1.bf16.msra.mxu1 %v10950_v2  ;;  %v11026_v1 = vld [vmem:[%s14081_s1 + $0xedc] ss:$16 sps:$4 sm:$0xff]   ;;  %v11021_v2 = vld [vmem:[%s14081_s1 + $0xed0] ss:$16 sps:$4 sm:$0xff]  }
 0x23e   : > { %5749 = vmatprep.subr.bf16.mxu0 %v10955_v4  ;;  %5802 = vmatprep.subr.bf16.mxu1 %v10958_v5  ;;  %v11029_v4 = vld [vmem:[%s14081_s1 + $0xef4] ss:$16 sps:$4 sm:$0xff]  }
 0x23f   : > { %5775 = vmatprep.mubr.bf16.mxu0 %v11149_v9  ;;  %5828 = vmatprep.mubr.bf16.mxu1 %v11149_v9  ;;  %v9400_v5 = vld [vmem:[%s14081_s1 + $0xf10] sm:$0x33] }
 0x240   : > { %v9422_v13 = vcombine.low %v9400_v5, %v9400_v5 }
 0x241   : > { %5750 = vmatpush1.bf16.msra.mxu0 %v10953_v6  ;;  %5803 = vmatpush1.bf16.msra.mxu1 %v10956_v7  ;;  %v9401_v6 = vld [vmem:[%s14081_s1 + $0xf18] sm:$0x33]  ;;  %v11027_v7 = vld [vmem:[%s14081_s1 + $0xef0] ss:$16 sps:$4 sm:$0xff]  }
 0x242   : > { %5751 = vmatprep.subr.bf16.mxu0 %v10961_v15  ;;  %5804 = vmatprep.subr.bf16.mxu1 %v10964_v11  ;;  %v11030_v15 = vld [vmem:[%s14081_s1 + $0xef8] ss:$16 sps:$4 sm:$0xff]   ;;  %v9423_v11 = vcombine.high %v9400_v5, %v9400_v5  ;;  %v9425_v12 = vcombine.high %v9401_v6, %v9401_v6 }
 0x243   : > { %v11098_v5 = vld [vmem:[%s14081_s1 + $0x1058] ss:$16 sps:$4 sm:$0xff]  }
 0x245   : > { %5752 = vmatpush1.bf16.msra.mxu0 %v10959_v14  ;;  %5805 = vmatpush1.bf16.msra.mxu1 %v10962_v16  ;;  %v9424_v14 = vcombine.low %v9401_v6, %v9401_v6  ;;  %v6286_v16 = vsel %vm512_vm0, %v9422_v13, 0 }
 0x246   : > { %9322 = vmatprep.subr.msk.bf16.mxu0 %vm512_vm0, %v9319_v17  ;;  %9325 = vmatprep.subr.msk.bf16.mxu1 %vm512_vm0, %v9321_v19  ;;  %v11039_v19 = vld [vmem:[%s14081_s1 + $0xf24] ss:$16 sps:$4 sm:$0xff]  }
 0x247   : > { %v6292_v17 = vsel %vm512_vm0, %v9424_v14, 0  ;;  %v11107_v14 = vld [vmem:[%s14081_s1 + $0x1084] ss:$16 sps:$4 sm:$0xff]  }
 0x249   : > { %5754 = vmatpush1.bf16.msra.mxu0 %v5732_v22  ;;  %5807 = vmatpush1.bf16.msra.mxu1 %v5738_v23  ;;  %v11037_v22 = vld [vmem:[%s14081_s1 + $0xf20] ss:$16 sps:$4 sm:$0xff]   ;;  %v11040_v23 = vld [vmem:[%s14081_s1 + $0xf28] ss:$16 sps:$4 sm:$0xff]  }
 0x24a   : > { %6020 = vmatprep.subr.bf16.mxu0 %v10971_v24  ;;  %6073 = vmatprep.subr.bf16.mxu1 %v10974_v25  ;;  %v11045_v24 = vld [vmem:[%s14081_s1 + $0xf44] ss:$16 sps:$4 sm:$0xff]   ;;  %v11048_v25 = vld [vmem:[%s14081_s1 + $0xf4c] ss:$16 sps:$4 sm:$0xff]  }
 0x24c   : > { %9323 = vmatmul.mubr.msk.bf16.vlgmr.msra.gmra.mrb[0].mxu0 %vm505_vm2, %v5612_v26  ;;  %9326 = vmatmul.mubr.msk.bf16.vlgmr.msra.gmra.mrb[0].mxu1 %vm505_vm2, %v5612_v26  ;;  %v11043_v26 = vld [vmem:[%s14081_s1 + $0xf40] ss:$16 sps:$4 sm:$0xff]  }
 0x24d   : > { %6021 = vmatpush1.bf16.msra.mxu0 %v10969_v27  ;;  %6074 = vmatpush1.bf16.msra.mxu1 %v10972_v31  ;;  %v11046_v27 = vld [vmem:[%s14081_s1 + $0xf48] ss:$16 sps:$4 sm:$0xff]   ;;  %v11051_v31 = vld [vmem:[%s14081_s1 + $0xf64] ss:$16 sps:$4 sm:$0xff]  }
 0x24e   : > { %6022 = vmatprep.subr.bf16.mxu0 %v10977_v32  ;;  %6075 = vmatprep.subr.bf16.mxu1 %v10980_v33  ;;  %v11054_v32 = vld [vmem:[%s14081_s1 + $0xf6c] ss:$16 sps:$4 sm:$0xff]   ;;  %v11049_v33 = vld [vmem:[%s14081_s1 + $0xf60] ss:$16 sps:$4 sm:$0xff]  }
 0x24f   : > { %5785 = vmatprep.mubr.bf16.mxu0 %v11149_v9  ;;  %5838 = vmatprep.mubr.bf16.mxu1 %v11149_v9 }
 0x251   : > { %6023 = vmatpush1.bf16.msra.mxu0 %v10975_v34  ;;  %6076 = vmatpush1.bf16.msra.mxu1 %v10978_v35  ;;  %v11052_v34 = vld [vmem:[%s14081_s1 + $0xf68] ss:$16 sps:$4 sm:$0xff]   ;;  %v6168_v35 = vpop.permute.xlu1 %6167 }
 0x252   : > { %6024 = vmatprep.subr.bf16.mxu0 %v10983_v36  ;;  %6077 = vmatprep.subr.bf16.mxu1 %v10986_v10  ;;  %v11057_v36 = vld [vmem:[%s14081_s1 + $0xf84] ss:$16 sps:$4 sm:$0xff]   ;;  %v11060_v10 = vld [vmem:[%s14081_s1 + $0xf8c] ss:$16 sps:$4 sm:$0xff]  }
 0x254   : > { %9324 = vmatmul.mubr.msk.bf16.gmra.mrb[4].mxu0 %vm505_vm2, %v5614_v58  ;;  %9327 = vmatmul.mubr.msk.bf16.gmra.mrb[4].mxu1 %vm505_vm2, %v5614_v58  ;;  %v11063_v58 = vld [vmem:[%s14081_s1 + $0xfa4] ss:$16 sps:$4 sm:$0xff]  }
 0x255   : > { %6025 = vmatpush1.bf16.msra.mxu0 %v10981_v37  ;;  %6078 = vmatpush1.bf16.msra.mxu1 %v10984_v38  ;;  %v11055_v37 = vld [vmem:[%s14081_s1 + $0xf80] ss:$16 sps:$4 sm:$0xff]   ;;  %v11058_v38 = vld [vmem:[%s14081_s1 + $0xf88] ss:$16 sps:$4 sm:$0xff]  }
 0x256   : > { %6026 = vmatprep.subr.bf16.mxu0 %v10989_v40  ;;  %6079 = vmatprep.subr.bf16.mxu1 %v10992_v41  ;;  %v11066_v40 = vld [vmem:[%s14081_s1 + $0xfac] ss:$16 sps:$4 sm:$0xff]   ;;  %v9452_v41 = vld [vmem:[%s14081_s1 + $0xfc0] sm:$0x33] }
 0x257   : > { %6052 = vmatprep.mubr.bf16.mxu0 %v11149_v9  ;;  %6105 = vmatprep.mubr.bf16.mxu1 %v11149_v9  ;;  %v9474_v44 = vcombine.low %v9452_v41, %v9452_v41 }
 0x259   : > { %6027 = vmatpush1.bf16.msra.mxu0 %v10987_v43  ;;  %6080 = vmatpush1.bf16.msra.mxu1 %v10990_v45  ;;  %v9453_v43 = vld [vmem:[%s14081_s1 + $0xfc8] sm:$0x33]  ;;  %v11061_v45 = vld [vmem:[%s14081_s1 + $0xfa0] ss:$16 sps:$4 sm:$0xff]  }
 0x25a   : > { %6028 = vmatprep.subr.bf16.mxu0 %v10995_v42  ;;  %6081 = vmatprep.subr.bf16.mxu1 %v10998_v46  ;;  %v11064_v42 = vld [vmem:[%s14081_s1 + $0xfa8] ss:$16 sps:$4 sm:$0xff]   ;;  %v9475_v46 = vcombine.high %v9452_v41, %v9452_v41  ;;  %v9477_v47 = vcombine.high %v9453_v43, %v9453_v43 }
 0x25b   : > { %v11132_v41 = vld [vmem:[%s14081_s1 + $0x1108] ss:$16 sps:$4 sm:$0xff]  }
 0x25d   : > { %6029 = vmatpush1.bf16.msra.mxu0 %v10993_v48  ;;  %6082 = vmatpush1.bf16.msra.mxu1 %v10996_v49  ;;  %v9476_v48 = vcombine.low %v9453_v43, %v9453_v43  ;;  %v6563_v49 = vsel %vm512_vm0, %v9474_v44, 0 }
 0x25e   : > { %9374 = vmatprep.subr.msk.bf16.mxu0 %vm512_vm0, %v9371_v50  ;;  %9377 = vmatprep.subr.msk.bf16.mxu1 %vm512_vm0, %v9373_v51  ;;  %v11073_v51 = vld [vmem:[%s14081_s1 + $0xfd4] ss:$16 sps:$4 sm:$0xff]  }
 0x25f   : > { %v6569_v50 = vsel %vm512_vm0, %v9476_v48, 0 }
 0x261   : > { %6031 = vmatpush1.bf16.msra.mxu0 %v6009_v54  ;;  %6084 = vmatpush1.bf16.msra.mxu1 %v6015_v55  ;;  %v11071_v54 = vld [vmem:[%s14081_s1 + $0xfd0] ss:$16 sps:$4 sm:$0xff]   ;;  %v11074_v55 = vld [vmem:[%s14081_s1 + $0xfd8] ss:$16 sps:$4 sm:$0xff]  }
 0x262   : > { %6297 = vmatprep.subr.bf16.mxu0 %v11005_v56  ;;  %6350 = vmatprep.subr.bf16.mxu1 %v11008_v57  ;;  %v11079_v56 = vld [vmem:[%s14081_s1 + $0xff4] ss:$16 sps:$4 sm:$0xff]   ;;  %v11082_v57 = vld [vmem:[%s14081_s1 + $0xffc] ss:$16 sps:$4 sm:$0xff]  }
 0x264   : > { %9375 = vmatmul.mubr.msk.bf16.vlgmr.msra.gmra.mrb[0].mxu0 %vm505_vm2, %v12281_v39  ;;  %9378 = vmatmul.mubr.msk.bf16.vlgmr.msra.gmra.mrb[0].mxu1 %vm505_vm2, %v12281_v39  ;;  %v11020_v39 = vld [vmem:[%s14081_s1 + $0xebc] ss:$16 sps:$4 sm:$0xff]  }
 0x265   : > { %6298 = vmatpush1.bf16.msra.mxu0 %v11003_v8  ;;  %6351 = vmatpush1.bf16.msra.mxu1 %v11006_v29  ;;  %v11077_v8 = vld [vmem:[%s14081_s1 + $0xff0] ss:$16 sps:$4 sm:$0xff]   ;;  %v11080_v29 = vld [vmem:[%s14081_s1 + $0xff8] ss:$16 sps:$4 sm:$0xff]  }
 0x266   : > { %6299 = vmatprep.subr.bf16.mxu0 %v11011_v30  ;;  %6352 = vmatprep.subr.bf16.mxu1 %v11014_v59  ;;  %v11085_v30 = vld [vmem:[%s14081_s1 + $0x1014] ss:$16 sps:$4 sm:$0xff]   ;;  %v11088_v59 = vld [vmem:[%s14081_s1 + $0x101c] ss:$16 sps:$4 sm:$0xff]  }
 0x267   : > { %6062 = vmatprep.mubr.bf16.mxu0 %v11149_v9  ;;  %6115 = vmatprep.mubr.bf16.mxu1 %v11149_v9 }
 0x269   : > { %6300 = vmatpush1.bf16.msra.mxu0 %v11009_v60  ;;  %6353 = vmatpush1.bf16.msra.mxu1 %v11012_v61  ;;  %v11083_v60 = vld [vmem:[%s14081_s1 + $0x1010] ss:$16 sps:$4 sm:$0xff]   ;;  %v11086_v61 = vld [vmem:[%s14081_s1 + $0x1018] ss:$16 sps:$4 sm:$0xff]  }
 0x26a   : > { %6301 = vmatprep.subr.bf16.mxu0 %v11017_v62  ;;  %6354 = vmatprep.subr.bf16.mxu1 %v11020_v39  ;;  %v6445_v62 = vpop.permute.xlu1 %6444  ;;  %v11091_v39 = vld [vmem:[%s14081_s1 + $0x1034] ss:$16 sps:$4 sm:$0xff]  }
 0x26c   : > { %9376 = vmatmul.mubr.msk.bf16.gmra.mrb[4].mxu0 %vm505_vm2, %v12272_v28  ;;  %9379 = vmatmul.mubr.msk.bf16.gmra.mrb[4].mxu1 %vm505_vm2, %v12272_v28  ;;  %v11032_v28 = vld [vmem:[%s14081_s1 + $0xefc] ss:$16 sps:$4 sm:$0xff]  }
 0x26d   : > { %6302 = vmatpush1.bf16.msra.mxu0 %v11015_v63  ;;  %6355 = vmatpush1.bf16.msra.mxu1 %v11018_v0  ;;  %v11094_v63 = vld [vmem:[%s14081_s1 + $0x103c] ss:$16 sps:$4 sm:$0xff]   ;;  %v11089_v0 = vld [vmem:[%s14081_s1 + $0x1030] ss:$16 sps:$4 sm:$0xff]  }
 0x26e   : > { %6303 = vmatprep.subr.bf16.mxu0 %v11023_v18  ;;  %6356 = vmatprep.subr.bf16.mxu1 %v11026_v1  ;;  %v11092_v18 = vld [vmem:[%s14081_s1 + $0x1038] ss:$16 sps:$4 sm:$0xff]   ;;  %v11097_v1 = vld [vmem:[%s14081_s1 + $0x1054] ss:$16 sps:$4 sm:$0xff]  }
 0x26f   : > { %6329 = vmatprep.mubr.bf16.mxu0 %v11149_v9  ;;  %6382 = vmatprep.mubr.bf16.mxu1 %v11149_v9 }
 0x271   : > { %6304 = vmatpush1.bf16.msra.mxu0 %v11021_v2  ;;  %6357 = vmatpush1.bf16.msra.mxu1 %v11024_v3  ;;  %v11100_v2 = vld [vmem:[%s14081_s1 + $0x105c] ss:$16 sps:$4 sm:$0xff]   ;;  %v9504_v3 = vld [vmem:[%s14081_s1 + $0x1070] sm:$0x33] }
 0x272   : > { %6305 = vmatprep.subr.bf16.mxu0 %v11029_v4  ;;  %6358 = vmatprep.subr.bf16.mxu1 %v11032_v28  ;;  %v9505_v4 = vld [vmem:[%s14081_s1 + $0x1078] sm:$0x33]  ;;  %v11095_v28 = vld [vmem:[%s14081_s1 + $0x1050] ss:$16 sps:$4 sm:$0xff]   ;;  %v9527_v6 = vcombine.high %v9504_v3, %v9504_v3 }
 0x275   : > { %6306 = vmatpush1.bf16.msra.mxu0 %v11027_v7  ;;  %6359 = vmatpush1.bf16.msra.mxu1 %v11030_v15  ;;  %v9529_v7 = vcombine.high %v9505_v4, %v9505_v4  ;;  %v9526_v15 = vcombine.low %v9504_v3, %v9504_v3 }
 0x276   : > { %9426 = vmatprep.subr.msk.bf16.mxu0 %vm512_vm0, %v9423_v11  ;;  %9429 = vmatprep.subr.msk.bf16.mxu1 %vm512_vm0, %v9425_v12  ;;  %v9528_v11 = vcombine.low %v9505_v4, %v9505_v4 }
 0x277   : > { %v6840_v12 = vsel %vm512_vm0, %v9526_v15, 0 }
 0x278   : > { %v6846_v13 = vsel %vm512_vm0, %v9528_v11, 0 }
 0x279   : > { %6308 = vmatpush1.bf16.msra.mxu0 %v6286_v16  ;;  %6361 = vmatpush1.bf16.msra.mxu1 %v6292_v17  ;;  %v11110_v16 = vld [vmem:[%s14081_s1 + $0x108c] ss:$16 sps:$4 sm:$0xff]   ;;  %v6720_v17 = vpop.permute.xlu0 %6719 }
 0x27a   : > { %6574 = vmatprep.subr.bf16.mxu0 %v11039_v19  ;;  %6627 = vmatprep.subr.bf16.mxu1 %v11042_v20  ;;  %v11105_v19 = vld [vmem:[%s14081_s1 + $0x1080] ss:$16 sps:$4 sm:$0xff]   ;;  %v11108_v20 = vld [vmem:[%s14081_s1 + $0x1088] ss:$16 sps:$4 sm:$0xff]  }
 0x27c   : > { %9427 = vmatmul.mubr.msk.bf16.vlgmr.msra.gmra.mrb[0].mxu0 %vm505_vm2, %v6166_v21  ;;  %9430 = vmatmul.mubr.msk.bf16.vlgmr.msra.gmra.mrb[0].mxu1 %vm505_vm2, %v6166_v21  ;;  %v11113_v21 = vld [vmem:[%s14081_s1 + $0x10a4] ss:$16 sps:$4 sm:$0xff]  }
 0x27d   : > { %6575 = vmatpush1.bf16.msra.mxu0 %v11037_v22  ;;  %6628 = vmatpush1.bf16.msra.mxu1 %v11040_v23  ;;  %v11116_v22 = vld [vmem:[%s14081_s1 + $0x10ac] ss:$16 sps:$4 sm:$0xff]   ;;  %v11111_v23 = vld [vmem:[%s14081_s1 + $0x10a0] ss:$16 sps:$4 sm:$0xff]   ;;  %v6997_v48 = vpop.permute.xlu0 %6996 }
 0x27e   : > { %6576 = vmatprep.subr.bf16.mxu0 %v11045_v24  ;;  %6629 = vmatprep.subr.bf16.mxu1 %v11048_v25  ;;  %v11114_v24 = vld [vmem:[%s14081_s1 + $0x10a8] ss:$16 sps:$4 sm:$0xff]   ;;  %v11119_v25 = vld [vmem:[%s14081_s1 + $0x10c4] ss:$16 sps:$4 sm:$0xff]  }
 0x27f   : > { %6339 = vmatprep.mubr.bf16.mxu0 %v11149_v9  ;;  %6392 = vmatprep.mubr.bf16.mxu1 %v11149_v9 }
 0x281   : > { %6577 = vmatpush1.bf16.msra.mxu0 %v11043_v26  ;;  %6630 = vmatpush1.bf16.msra.mxu1 %v11046_v27  ;;  %v11122_v26 = vld [vmem:[%s14081_s1 + $0x10cc] ss:$16 sps:$4 sm:$0xff]   ;;  %v11117_v27 = vld [vmem:[%s14081_s1 + $0x10c0] ss:$16 sps:$4 sm:$0xff]  }
 0x282   : > { %6578 = vmatprep.subr.bf16.mxu0 %v11051_v31  ;;  %6631 = vmatprep.subr.bf16.mxu1 %v11054_v32  ;;  %v11120_v31 = vld [vmem:[%s14081_s1 + $0x10c8] ss:$16 sps:$4 sm:$0xff]   ;;  %v6722_v32 = vpop.permute.xlu1 %6721 }
 0x284   : > { %9428 = vmatmul.mubr.msk.bf16.gmra.mrb[4].mxu0 %vm505_vm2, %v6168_v35  ;;  %9431 = vmatmul.mubr.msk.bf16.gmra.mrb[4].mxu1 %vm505_vm2, %v6168_v35  ;;  %v11123_v35 = vld [vmem:[%s14081_s1 + $0x10e0] ss:$16 sps:$4 sm:$0xff]  }
 0x285   : > { %6579 = vmatpush1.bf16.msra.mxu0 %v11049_v33  ;;  %6632 = vmatpush1.bf16.msra.mxu1 %v11052_v34  ;;  %v11125_v33 = vld [vmem:[%s14081_s1 + $0x10e4] ss:$16 sps:$4 sm:$0xff]   ;;  %v11128_v34 = vld [vmem:[%s14081_s1 + $0x10ec] ss:$16 sps:$4 sm:$0xff]  }
 0x286   : > { %6580 = vmatprep.subr.bf16.mxu0 %v11057_v36  ;;  %6633 = vmatprep.subr.bf16.mxu1 %v11060_v10  ;;  %v11126_v36 = vld [vmem:[%s14081_s1 + $0x10e8] ss:$16 sps:$4 sm:$0xff]   ;;  %v11131_v10 = vld [vmem:[%s14081_s1 + $0x1104] ss:$16 sps:$4 sm:$0xff]  }
 0x287   : > { %6606 = vmatprep.mubr.bf16.mxu0 %v11149_v9  ;;  %6659 = vmatprep.mubr.bf16.mxu1 %v11149_v9 }
 0x289   : > { %6581 = vmatpush1.bf16.msra.mxu0 %v11055_v37  ;;  %6634 = vmatpush1.bf16.msra.mxu1 %v11058_v38  ;;  %v11134_v37 = vld [vmem:[%s14081_s1 + $0x110c] ss:$16 sps:$4 sm:$0xff]   ;;  %v9556_v38 = vld [vmem:[%s14081_s1 + $0x1120] sm:$0x33] }
 0x28a   : > { %6582 = vmatprep.subr.bf16.mxu0 %v11063_v58  ;;  %6635 = vmatprep.subr.bf16.mxu1 %v11066_v40  ;;  %v9557_v58 = vld [vmem:[%s14081_s1 + $0x1128] sm:$0x33]  ;;  %v11129_v40 = vld [vmem:[%s14081_s1 + $0x1100] ss:$16 sps:$4 sm:$0xff]   ;;  %v9579_v43 = vcombine.high %v9556_v38, %v9556_v38 }
 0x28d   : > { %6583 = vmatpush1.bf16.msra.mxu0 %v11061_v45  ;;  %6636 = vmatpush1.bf16.msra.mxu1 %v11064_v42  ;;  %v9581_v45 = vcombine.high %v9557_v58, %v9557_v58  ;;  %v9578_v42 = vcombine.low %v9556_v38, %v9556_v38 }
 0x28e   : > { %9478 = vmatprep.subr.msk.bf16.mxu0 %vm512_vm0, %v9475_v46  ;;  %9481 = vmatprep.subr.msk.bf16.mxu1 %vm512_vm0, %v9477_v47  ;;  %v9580_v46 = vcombine.low %v9557_v58, %v9557_v58 }
 0x28f   : > { %v7117_v47 = vsel %vm512_vm0, %v9578_v42, 0 }
 0x290   : > { %v7123_v44 = vsel %vm512_vm0, %v9580_v46, 0 }
 0x291   : > { %6585 = vmatpush1.bf16.msra.mxu0 %v6563_v49  ;;  %6638 = vmatpush1.bf16.msra.mxu1 %v6569_v50  ;;  %v6999_v49 = vpop.permute.xlu1 %6998  ;;  %v11154_v50 = vmov 0.0  }
 0x292   : > { %6851 = vmatprep.subr.bf16.mxu0 %v11073_v51  ;;  %6904 = vmatprep.subr.bf16.mxu1 %v11076_v52  ;;  %v7252_v51 = vlaneseq }
 0x294   : > { %9479 = vmatmul.mubr.msk.bf16.vlgmr.msra.gmra.mrb[0].mxu0 %vm505_vm2, %v6443_v53  ;;  %9482 = vmatmul.mubr.msk.bf16.vlgmr.msra.gmra.mrb[0].mxu1 %vm505_vm2, %v6443_v53  ;;  %v7253_v52 = vshrl.u32 %v7252_v51, 7 }
 0x295   : > { %6852 = vmatpush1.bf16.msra.mxu0 %v11071_v54  ;;  %6905 = vmatpush1.bf16.msra.mxu1 %v11074_v55  ;;  %v7250_v55 = vld [vmem:[%s14086_s6] sm:$0xf] }
 0x296   : > { %6853 = vmatprep.subr.bf16.mxu0 %v11079_v56  ;;  %6906 = vmatprep.subr.bf16.mxu1 %v11082_v57  ;;  %v13317_v53 = vsub.s32 0, %v7253_v52  ;;  %v7262_v54 = vsub.s32 2, %v7253_v52  ;;  %v7266_v56 = vsub.s32 3, %v7253_v52 }
 0x297   : > { %6616 = vmatprep.mubr.bf16.mxu0 %v11149_v9  ;;  %6669 = vmatprep.mubr.bf16.mxu1 %v11149_v9 }
 0x298   : > { %v7255_v57 = vrot.slane %v7250_v55, %v13317_v53 }
 0x299   : > { %6854 = vmatpush1.bf16.msra.mxu0 %v11077_v8  ;;  %6907 = vmatpush1.bf16.msra.mxu1 %v11080_v29  ;;  %v7263_v8 = vrot.slane %v7250_v55, %v7262_v54 }
 0x29a   : > { %6855 = vmatprep.subr.bf16.mxu0 %v11085_v30  ;;  %6908 = vmatprep.subr.bf16.mxu1 %v11088_v59  ;;  %v7267_v30 = vrot.slane %v7250_v55, %v7266_v56 }
 0x29c   : > { %9480 = vmatmul.mubr.msk.bf16.gmra.mrb[4].mxu0 %vm505_vm2, %v6445_v62  ;;  %9483 = vmatmul.mubr.msk.bf16.gmra.mrb[4].mxu1 %vm505_vm2, %v6445_v62 }
 0x29d   : > { %6856 = vmatpush1.bf16.msra.mxu0 %v11083_v60  ;;  %6909 = vmatpush1.bf16.msra.mxu1 %v11086_v61 }
 0x29e   : > { %6857 = vmatprep.subr.bf16.mxu0 %v11091_v39  ;;  %6910 = vmatprep.subr.bf16.mxu1 %v11094_v63 }
 0x29f   : > { %6883 = vmatprep.mubr.bf16.mxu0 %v11149_v9  ;;  %6936 = vmatprep.mubr.bf16.mxu1 %v11149_v9 }
 0x2a1   : > { %6858 = vmatpush1.bf16.msra.mxu0 %v11089_v0  ;;  %6911 = vmatpush1.bf16.msra.mxu1 %v11092_v18 }
 0x2a2   : > { %6859 = vmatprep.subr.bf16.mxu0 %v11097_v1  ;;  %6912 = vmatprep.subr.bf16.mxu1 %v11100_v2 }
 0x2a5   : > { %6860 = vmatpush1.bf16.msra.mxu0 %v11095_v28  ;;  %6913 = vmatpush1.bf16.msra.mxu1 %v11098_v5 }
 0x2a6   : > { %9530 = vmatprep.subr.msk.bf16.mxu0 %vm512_vm0, %v9527_v6  ;;  %9533 = vmatprep.subr.msk.bf16.mxu1 %vm512_vm0, %v9529_v7 }
 0x2a9   : > { %6862 = vmatpush1.bf16.msra.mxu0 %v6840_v12  ;;  %6915 = vmatpush1.bf16.msra.mxu1 %v6846_v13 }
 0x2aa   : > { %7128 = vmatprep.subr.bf16.mxu0 %v11107_v14  ;;  %7181 = vmatprep.subr.bf16.mxu1 %v11110_v16 }
 0x2ac   : > { %9531 = vmatmul.mubr.msk.bf16.vlgmr.msra.gmra.mrb[0].mxu0 %vm505_vm2, %v6720_v17  ;;  %9534 = vmatmul.mubr.msk.bf16.vlgmr.msra.gmra.mrb[0].mxu1 %vm505_vm2, %v6720_v17 }
 0x2ad   : > { %7129 = vmatpush1.bf16.msra.mxu0 %v11105_v19  ;;  %7182 = vmatpush1.bf16.msra.mxu1 %v11108_v20 }
 0x2ae   : > { %7130 = vmatprep.subr.bf16.mxu0 %v11113_v21  ;;  %7183 = vmatprep.subr.bf16.mxu1 %v11116_v22 }
 0x2af   : > { %6893 = vmatprep.mubr.bf16.mxu0 %v11149_v9  ;;  %6946 = vmatprep.mubr.bf16.mxu1 %v11149_v9 }
 0x2b1   : > { %7131 = vmatpush1.bf16.msra.mxu0 %v11111_v23  ;;  %7184 = vmatpush1.bf16.msra.mxu1 %v11114_v24 }
 0x2b2   : > { %7132 = vmatprep.subr.bf16.mxu0 %v11119_v25  ;;  %7185 = vmatprep.subr.bf16.mxu1 %v11122_v26 }
 0x2b4   : > { %9532 = vmatmul.mubr.msk.bf16.gmra.mrb[4].mxu0 %vm505_vm2, %v6722_v32  ;;  %9535 = vmatmul.mubr.msk.bf16.gmra.mrb[4].mxu1 %vm505_vm2, %v6722_v32 }
 0x2b5   : > { %7133 = vmatpush1.bf16.msra.mxu0 %v11117_v27  ;;  %7186 = vmatpush1.bf16.msra.mxu1 %v11120_v31 }
 0x2b6   : > { %7134 = vmatprep.subr.bf16.mxu0 %v11125_v33  ;;  %7187 = vmatprep.subr.bf16.mxu1 %v11128_v34 }
 0x2b7   : > { %7160 = vmatprep.mubr.bf16.mxu0 %v11149_v9  ;;  %7213 = vmatprep.mubr.bf16.mxu1 %v11149_v9 }
 0x2b9   : > { %7135 = vmatpush1.bf16.msra.mxu0 %v11123_v35  ;;  %7188 = vmatpush1.bf16.msra.mxu1 %v11126_v36 }
 0x2ba   : > { %7136 = vmatprep.subr.bf16.mxu0 %v11131_v10  ;;  %7189 = vmatprep.subr.bf16.mxu1 %v11134_v37 }
 0x2bd   : > { %7137 = vmatpush1.bf16.msra.mxu0 %v11129_v40  ;;  %7190 = vmatpush1.bf16.msra.mxu1 %v11132_v41 }
 0x2be   : > { %9582 = vmatprep.subr.msk.bf16.mxu0 %vm512_vm0, %v9579_v43  ;;  %9585 = vmatprep.subr.msk.bf16.mxu1 %vm512_vm0, %v9581_v45 }
 0x2c1   : > { %7139 = vmatpush1.bf16.msra.mxu0 %v7117_v47  ;;  %7192 = vmatpush1.bf16.msra.mxu1 %v7123_v44 }
 0x2c4   : > { %9583 = vmatmul.mubr.msk.bf16.vlgmr.msra.gmra.mrb[0].mxu0 %vm505_vm2, %v6997_v48  ;;  %9586 = vmatmul.mubr.msk.bf16.vlgmr.msra.gmra.mrb[0].mxu1 %vm505_vm2, %v6997_v48 }
 0x2c5   : > { %7170 = vmatprep.mubr.bf16.mxu0 %v11149_v9  ;;  %7223 = vmatprep.mubr.bf16.mxu1 %v11149_v9  ;;  %v13322_v9 = vsub.s32 1, %v7253_v52 }
 0x2c7   : > { %v7259_v29 = vrot.slane %v7250_v55, %v13322_v9 }
 0x2cc   : > { %9584 = vmatmul.mubr.msk.bf16.gmra.mrb[4].mxu0 %vm505_vm2, %v6999_v49  ;;  %9587 = vmatmul.mubr.msk.bf16.gmra.mrb[4].mxu1 %vm505_vm2, %v6999_v49 }
 0x2cd   : > { %7390 = vmatprep.mubr.f32.mxu0 %v11154_v50  ;;  %7467 = vmatprep.mubr.f32.mxu1 %v11154_v50 }
 0x397   : > { %v7162_v59 = vpop.f32.mrb[0].mxu0  ;;  %v7215_v60 = vpop.f32.mrb[0].mxu1 }
 0x398   : > { %v7272_v61 = vadd.f32 %v7255_v57, %v7162_v59  ;;  %v7274_v62 = vadd.f32 %v7263_v8, %v7215_v60  ;;  %v7164_v39 = vpop.f32.mrb[1].mxu0  ;;  %v7217_v63 = vpop.f32.mrb[1].mxu1  ;;  %v7926_v59 = vld [vmem:[%s14085_s5 + $0x18] sm:$0xff]  ;;  %v7305_v60 = vld [vmem:[%s14082_s2 + $0x8] sm:$0x3f] }
 0x399   : > { %v7273_v0 = vadd.f32 %v7259_v29, %v7164_v39  ;;  %v7275_v18 = vadd.f32 %v7267_v30, %v7217_v63  ;;  %v7166_v1 = vpop.f32.mrb[2].mxu0  ;;  %v7219_v2 = vpop.f32.mrb[2].mxu1 }
 0x39a   : > { %v7276_v3 = vadd.f32 %v7255_v57, %v7166_v1  ;;  %v7278_v4 = vadd.f32 %v7263_v8, %v7219_v2  ;;  %v7168_v28 = vpop.f32.mrb[3].mxu0  ;;  %v7221_v5 = vpop.f32.mrb[3].mxu1  ;;  %v7288_v15 = vmax.f32 %v7272_v61, 0.0  ;;  %v7290_v11 = vmax.f32 %v7274_v62, 0.0  ;;  %v7650_v61 = vld [vmem:[%s14084_s4] sm:$0xff]  ;;  %v7652_v62 = vld [vmem:[%s14084_s4 + $0x10] sm:$0xff] }
 0x39b   : > { %v7277_v6 = vadd.f32 %v7259_v29, %v7168_v28  ;;  %v7279_v7 = vadd.f32 %v7267_v30, %v7221_v5  ;;  %v7289_v14 = vmax.f32 %v7273_v0, 0.0  ;;  %v7291_v16 = vmax.f32 %v7275_v18, 0.0  ;;  %v7923_v0 = vld [vmem:[%s14085_s5] sm:$0xff]  ;;  %v7925_v18 = vld [vmem:[%s14085_s5 + $0x10] sm:$0xff]  ;;  %v7655_v1 = vld [vmem:[%s14084_s4 + $0x28] sm:$0xff] }
 0x39c   : > { %v7292_v12 = vmax.f32 %v7276_v3, 0.0  ;;  %v7294_v13 = vmax.f32 %v7278_v4, 0.0  ;;  %v7657_v2 = vld [vmem:[%s14084_s4 + $0x38] sm:$0xff]  ;;  %v7928_v3 = vld [vmem:[%s14085_s5 + $0x28] sm:$0xff]  ;;  %v7480_v28 = vld [vmem:[%s14083_s3] sm:$0xff]  ;;  %v9658_v5 = vpack.c.bf16 %v7652_v62, %v7650_v61 }
 0x39d   : > { %v7293_v17 = vmax.f32 %v7277_v6, 0.0  ;;  %v7295_v19 = vmax.f32 %v7279_v7, 0.0  ;;  %v7930_v4 = vld [vmem:[%s14085_s5 + $0x38] sm:$0xff]  ;;  %v9770_v6 = vpack.c.bf16 %v7925_v18, %v7923_v0  ;;  %v7654_v7 = vld [vmem:[%s14084_s4 + $0x20] sm:$0xff]  ;;  %v7672_v62 = vld [vmem:[%s14084_s4 + $0xb0] sm:$0xff] }
 0x39e   : > { %v9618_v20 = vpack.c.bf16 %v7292_v12, %v7288_v15  ;;  %v9628_v21 = vpack.c.bf16 %v7294_v13, %v7290_v11  ;;  %v7656_v15 = vld [vmem:[%s14084_s4 + $0x30] sm:$0xff]  ;;  %v9660_v11 = vpack.c.bf16 %v7657_v2, %v7655_v1  ;;  %v9772_v12 = vpack.c.bf16 %v7930_v4, %v7928_v3  ;;  %v7927_v13 = vld [vmem:[%s14085_s5 + $0x20] sm:$0xff]  ;;  %v7675_v1 = vld [vmem:[%s14084_s4 + $0xc8] sm:$0xff] }
 0x39f   : > { %v9616_v22 = vpack.c.bf16 %v7293_v17, %v7289_v14  ;;  %v9626_v23 = vpack.c.bf16 %v7295_v19, %v7291_v16  ;;  %v7172_v24 = vpop.f32.mrb[4].mxu0  ;;  %v7225_v25 = vpop.f32.mrb[4].mxu1  ;;  %v7929_v14 = vld [vmem:[%s14085_s5 + $0x30] sm:$0xff]  ;;  %v7659_v16 = vld [vmem:[%s14084_s4 + $0x48] sm:$0xff]  ;;  %v7661_v17 = vld [vmem:[%s14084_s4 + $0x58] sm:$0xff] }
 0x3a0   : > { %v7280_v26 = vadd.f32 %v7255_v57, %v7172_v24  ;;  %v7282_v27 = vadd.f32 %v7263_v8, %v7225_v25  ;;  %v7174_v31 = vpop.f32.mrb[5].mxu0  ;;  %v7227_v32 = vpop.f32.mrb[5].mxu1  ;;  %v7932_v19 = vld [vmem:[%s14085_s5 + $0x48] sm:$0xff]  ;;  %v7658_v24 = vld [vmem:[%s14084_s4 + $0x40] sm:$0xff]  ;;  %v7660_v25 = vld [vmem:[%s14084_s4 + $0x50] sm:$0xff] }
 0x3a1   : > { %v7281_v33 = vadd.f32 %v7259_v29, %v7174_v31  ;;  %v7283_v34 = vadd.f32 %v7267_v30, %v7227_v32  ;;  %v7176_v35 = vpop.f32.mrb[6].mxu0  ;;  %v7229_v36 = vpop.f32.mrb[6].mxu1  ;;  %9617 = vmatprep.subr.bf16.mxu0 %v9616_v22  ;;  %9627 = vmatprep.subr.bf16.mxu1 %v9626_v23  ;;  %v7933_v31 = vld [vmem:[%s14085_s5 + $0x50] sm:$0xff]  ;;  %v7663_v32 = vld [vmem:[%s14084_s4 + $0x68] sm:$0xff]  ;;  %v7670_v61 = vld [vmem:[%s14084_s4 + $0xa0] sm:$0xff] }
 0x3a2   : > { %v7284_v10 = vadd.f32 %v7255_v57, %v7176_v35  ;;  %v7286_v37 = vadd.f32 %v7263_v8, %v7229_v36  ;;  %v7178_v38 = vpop.f32.mrb[7].mxu0  ;;  %v7231_v58 = vpop.f32.mrb[7].mxu1  ;;  %9619 = vmatpush1.bf16.msra.mxu0 %v9618_v20  ;;  %9629 = vmatpush1.bf16.msra.mxu1 %v9628_v21  ;;  %v7296_v43 = vmax.f32 %v7280_v26, 0.0  ;;  %v7298_v45 = vmax.f32 %v7282_v27, 0.0  ;;  %v7304_v57 = vld [vmem:[%s14082_s2] sm:$0xff]  ;;  %v7651_v8 = vld [vmem:[%s14084_s4 + $0x8] sm:$0xff] }
 0x3a3   : > { %v7285_v40 = vadd.f32 %v7259_v29, %v7178_v38  ;;  %v7287_v41 = vadd.f32 %v7267_v30, %v7231_v58  ;;  %v7297_v47 = vmax.f32 %v7281_v33, 0.0  ;;  %v7299_v44 = vmax.f32 %v7283_v34, 0.0  ;;  %v7653_v29 = vld [vmem:[%s14084_s4 + $0x18] sm:$0xff]  ;;  %v7924_v30 = vld [vmem:[%s14085_s5 + $0x8] sm:$0xff]  ;;  %v7664_v38 = vld [vmem:[%s14084_s4 + $0x70] sm:$0xff] }
 0x3a4   : > { %v7300_v42 = vmax.f32 %v7284_v10, 0.0  ;;  %v7302_v46 = vmax.f32 %v7286_v37, 0.0  ;;  %v9656_v39 = vpack.c.bf16 %v7653_v29, %v7651_v8  ;;  %v9768_v63 = vpack.c.bf16 %v7926_v59, %v7924_v30  ;;  %v7665_v33 = vld [vmem:[%s14084_s4 + $0x78] sm:$0xff]  ;;  %v7936_v34 = vld [vmem:[%s14085_s5 + $0x68] sm:$0xff]  ;;  %v7662_v37 = vld [vmem:[%s14084_s4 + $0x60] sm:$0xff] }
 0x3a5   : > { %v7301_v48 = vmax.f32 %v7285_v40, 0.0  ;;  %v7303_v49 = vmax.f32 %v7287_v41, 0.0  ;;  %v9664_v26 = vpack.c.bf16 %v7661_v17, %v7659_v16  ;;  %v7938_v35 = vld [vmem:[%s14085_s5 + $0x78] sm:$0xff]  ;;  %v9666_v36 = vpack.c.bf16 %v7660_v25, %v7658_v24  ;;  %v7935_v41 = vld [vmem:[%s14085_s5 + $0x60] sm:$0xff]  ;;  %v7944_v29 = vld [vmem:[%s14085_s5 + $0xa8] sm:$0xff] }
 0x3a6   : > { %v9623_v51 = vpack.c.bf16 %v7300_v42, %v7296_v43  ;;  %v9633_v52 = vpack.c.bf16 %v7302_v46, %v7298_v45  ;;  %v9668_v58 = vpack.c.bf16 %v7665_v33, %v7663_v32  ;;  %v9780_v40 = vpack.c.bf16 %v7938_v35, %v7936_v34  ;;  %v7937_v43 = vld [vmem:[%s14085_s5 + $0x70] sm:$0xff]  ;;  %v7667_v45 = vld [vmem:[%s14084_s4 + $0x88] sm:$0xff]  ;;  %v7669_v42 = vld [vmem:[%s14084_s4 + $0x98] sm:$0xff] }
 0x3a7   : > { %v9620_v55 = vpack.c.bf16 %v7301_v48, %v7297_v47  ;;  %v9630_v56 = vpack.c.bf16 %v7303_v49, %v7299_v44  ;;  %v7940_v46 = vld [vmem:[%s14085_s5 + $0x88] sm:$0xff]  ;;  %v7942_v47 = vld [vmem:[%s14085_s5 + $0x98] sm:$0xff]  ;;  %v9670_v44 = vpack.c.bf16 %v7664_v38, %v7662_v37  ;;  %v9782_v48 = vpack.c.bf16 %v7937_v43, %v7935_v41  ;;  %v7666_v49 = vld [vmem:[%s14084_s4 + $0x80] sm:$0xff] }
 0x3a8   : > { %v9784_v54 = vpack.c.bf16 %v7942_v47, %v7940_v46  ;;  %v7673_v8 = vld [vmem:[%s14084_s4 + $0xb8] sm:$0xff]  ;;  %v7943_v0 = vld [vmem:[%s14085_s5 + $0xa0] sm:$0xff]  ;;  %v7945_v18 = vld [vmem:[%s14085_s5 + $0xb0] sm:$0xff] }
 0x3a9   : > { %9622 = vmatprep.subr.msk.bf16.mxu0 %vm13327_vm8, %v9620_v55  ;;  %9632 = vmatprep.subr.msk.bf16.mxu1 %vm13327_vm8, %v9630_v56  ;;  %v7946_v30 = vld [vmem:[%s14085_s5 + $0xb8] sm:$0xff]  ;;  %v7948_v3 = vld [vmem:[%s14085_s5 + $0xc8] sm:$0xff] }
 0x3aa   : > { %9625 = vmatpush1.bf16.msk.msra.mxu0 %vm13327_vm8, %v9623_v51  ;;  %9635 = vmatpush1.bf16.msk.msra.mxu1 %vm13327_vm8, %v9633_v52  ;;  %v7677_v2 = vld [vmem:[%s14084_s4 + $0xd8] sm:$0xff]  ;;  %v7952_v17 = vld [vmem:[%s14085_s5 + $0xe8] sm:$0xff] }
 0x3ab   : > { %9637 = vmatprep.subr.bf16.mxu0 %v9616_v22  ;;  %9647 = vmatprep.subr.bf16.mxu1 %v9626_v23  ;;  %v9662_v22 = vpack.c.bf16 %v7656_v15, %v7654_v7  ;;  %v9774_v23 = vpack.c.bf16 %v7929_v14, %v7927_v13  ;;  %v7950_v4 = vld [vmem:[%s14085_s5 + $0xd8] sm:$0xff]  ;;  %v7676_v7 = vld [vmem:[%s14084_s4 + $0xd0] sm:$0xff]  ;;  %v9680_v15 = vpack.c.bf16 %v7677_v2, %v7675_v1  ;;  %v7679_v14 = vld [vmem:[%s14084_s4 + $0xe8] sm:$0xff] }
 0x3ac   : > { %v7949_v13 = vld [vmem:[%s14085_s5 + $0xd0] sm:$0xff]  ;;  %v7681_v16 = vld [vmem:[%s14084_s4 + $0xf8] sm:$0xff]  ;;  %v7956_v32 = vld [vmem:[%s14085_s5 + $0x108] sm:$0xff] }
 0x3ad   : > { %9590 = vmatmul.mubr.msk.f32.vlgmr.msra.gmra.mrb[8].mxu0 %vm7306_vm9, %v7304_v57  ;;  %9594 = vmatmul.mubr.msk.f32.vlgmr.msra.gmra.mrb[8].mxu1 %vm7306_vm9, %v7304_v57  ;;  %v7671_v57 = vld [vmem:[%s14084_s4 + $0xa8] sm:$0xff]  ;;  %v9684_v24 = vpack.c.bf16 %v7681_v16, %v7679_v14  ;;  %v7958_v33 = vld [vmem:[%s14085_s5 + $0x118] sm:$0xff] }
 0x3ae   : > { %9639 = vmatpush1.bf16.msra.mxu0 %v9618_v20  ;;  %9649 = vmatpush1.bf16.msra.mxu1 %v9628_v21  ;;  %v7934_v20 = vld [vmem:[%s14085_s5 + $0x58] sm:$0xff]  ;;  %v7481_v21 = vld [vmem:[%s14083_s3 + $0x8] sm:$0x3f]  ;;  %v9800_v38 = vpack.c.bf16 %v7958_v33, %v7956_v32 }
 0x3af   : > { %9642 = vmatprep.subr.msk.bf16.mxu0 %vm13327_vm8, %v9620_v55  ;;  %9652 = vmatprep.subr.msk.bf16.mxu1 %vm13327_vm8, %v9630_v56  ;;  %v9776_v27 = vpack.c.bf16 %v7934_v20, %v7932_v19  ;;  %v7939_v55 = vld [vmem:[%s14085_s5 + $0x80] sm:$0xff]  ;;  %v7941_v56 = vld [vmem:[%s14085_s5 + $0x90] sm:$0xff]  ;;  %v7954_v19 = vld [vmem:[%s14085_s5 + $0xf8] sm:$0xff] }
 0x3b0   : > { %7396 = vmatprep.mubr.f32.mxu0 %v11154_v50  ;;  %7473 = vmatprep.mubr.f32.mxu1 %v11154_v50  ;;  %v9796_v25 = vpack.c.bf16 %v7954_v19, %v7952_v17  ;;  %v7687_v41 = vld [vmem:[%s14084_s4 + $0x128] sm:$0xff]  ;;  %v7689_v43 = vld [vmem:[%s14084_s4 + $0x138] sm:$0xff] }
 0x3b1   : > { %9591 = vmatmul.mubr.msk.f32.gmra.mrb[10].mxu0 %vm7306_vm9, %v7305_v60  ;;  %9595 = vmatmul.mubr.msk.f32.gmra.mrb[10].mxu1 %vm7306_vm9, %v7305_v60  ;;  %v9786_v60 = vpack.c.bf16 %v7941_v56, %v7939_v55  ;;  %v7691_v55 = vld [vmem:[%s14084_s4 + $0x148] sm:$0xff]  ;;  %v7693_v56 = vld [vmem:[%s14084_s4 + $0x158] sm:$0xff] }
 0x3b2   : > { %9645 = vmatpush1.bf16.msk.msra.mxu0 %vm13327_vm8, %v9623_v51  ;;  %9655 = vmatpush1.bf16.msk.msra.mxu1 %vm13327_vm8, %v9633_v52  ;;  %v7668_v51 = vld [vmem:[%s14084_s4 + $0x90] sm:$0xff]  ;;  %v9672_v52 = vpack.c.bf16 %v7669_v42, %v7667_v45  ;;  %v7960_v45 = vld [vmem:[%s14085_s5 + $0x128] sm:$0xff]  ;;  %v7962_v42 = vld [vmem:[%s14085_s5 + $0x138] sm:$0xff] }
 0x3b3   : > { %7552 = vmatprep.mubr.f32.mxu0 %v11154_v50  ;;  %7629 = vmatprep.mubr.f32.mxu1 %v11154_v50  ;;  %v9674_v59 = vpack.c.bf16 %v7668_v51, %v7666_v49  ;;  %v9692_v49 = vpack.c.bf16 %v7689_v43, %v7687_v41  ;;  %v9804_v51 = vpack.c.bf16 %v7962_v42, %v7960_v45  ;;  %v7968_v1 = vld [vmem:[%s14085_s5 + $0x168] sm:$0xff]  ;;  %v7970_v2 = vld [vmem:[%s14085_s5 + $0x178] sm:$0xff] }
 0x3b4   : > { %9657 = vmatprep.subr.bf16.mxu0 %v9656_v39  ;;  %9769 = vmatprep.subr.bf16.mxu1 %v9768_v63  ;;  %v9676_v39 = vpack.c.bf16 %v7673_v8, %v7671_v57  ;;  %v9788_v63 = vpack.c.bf16 %v7946_v30, %v7944_v29  ;;  %v7964_v57 = vld [vmem:[%s14085_s5 + $0x148] sm:$0xff]  ;;  %v7966_v8 = vld [vmem:[%s14085_s5 + $0x158] sm:$0xff] }
 0x3b5   : > { %9598 = vmatmul.mubr.msk.f32.vlgmr.msra.gmra.mrb[12].mxu0 %vm7306_vm9, %v7480_v28  ;;  %9602 = vmatmul.mubr.msk.f32.vlgmr.msra.gmra.mrb[12].mxu1 %vm7306_vm9, %v7480_v28  ;;  %v9678_v28 = vpack.c.bf16 %v7672_v62, %v7670_v61  ;;  %v9696_v61 = vpack.c.bf16 %v7693_v56, %v7691_v55  ;;  %v9808_v62 = vpack.c.bf16 %v7966_v8, %v7964_v57  ;;  %v7972_v14 = vld [vmem:[%s14085_s5 + $0x188] sm:$0xff]  ;;  %v7974_v16 = vld [vmem:[%s14085_s5 + $0x198] sm:$0xff] }
 0x3b6   : > { %7558 = vmatprep.mubr.f32.mxu0 %v11154_v50  ;;  %7635 = vmatprep.mubr.f32.mxu1 %v11154_v50  ;;  %v7931_v50 = vld [vmem:[%s14085_s5 + $0x40] sm:$0xff]  ;;  %v7707_v41 = vld [vmem:[%s14084_s4 + $0x1c8] sm:$0xff]  ;;  %v7709_v43 = vld [vmem:[%s14084_s4 + $0x1d8] sm:$0xff] }
 0x3b7   : > { %9659 = vmatpush1.bf16.msra.mxu0 %v9658_v5  ;;  %9771 = vmatpush1.bf16.msra.mxu1 %v9770_v6  ;;  %v9778_v10 = vpack.c.bf16 %v7933_v31, %v7931_v50  ;;  %v9790_v5 = vpack.c.bf16 %v7945_v18, %v7943_v0  ;;  %v7674_v6 = vld [vmem:[%s14084_s4 + $0xc0] sm:$0xff]  ;;  %v7683_v50 = vld [vmem:[%s14084_s4 + $0x108] sm:$0xff]  ;;  %v7685_v31 = vld [vmem:[%s14084_s4 + $0x118] sm:$0xff]  ;;  %v9712_v42 = vpack.c.bf16 %v7709_v43, %v7707_v41 }
 0x3b8   : > { %9661 = vmatprep.subr.bf16.mxu0 %v9660_v11  ;;  %9773 = vmatprep.subr.bf16.mxu1 %v9772_v12  ;;  %v9792_v11 = vpack.c.bf16 %v7950_v4, %v7948_v3  ;;  %v7947_v12 = vld [vmem:[%s14085_s5 + $0xc0] sm:$0xff]  ;;  %v9682_v20 = vpack.c.bf16 %v7676_v7, %v7674_v6  ;;  %v9688_v37 = vpack.c.bf16 %v7685_v31, %v7683_v50  ;;  %v7695_v0 = vld [vmem:[%s14084_s4 + $0x168] sm:$0xff]  ;;  %v7697_v18 = vld [vmem:[%s14084_s4 + $0x178] sm:$0xff] }
 0x3b9   : > { %9599 = vmatmul.mubr.msk.f32.gmra.mrb[14].mxu0 %vm7306_vm9, %v7481_v21  ;;  %9603 = vmatmul.mubr.msk.f32.gmra.mrb[14].mxu1 %vm7306_vm9, %v7481_v21  ;;  %v9794_v21 = vpack.c.bf16 %v7949_v13, %v7947_v12  ;;  %v9700_v6 = vpack.c.bf16 %v7697_v18, %v7695_v0  ;;  %v9812_v7 = vpack.c.bf16 %v7970_v2, %v7968_v1  ;;  %v7699_v12 = vld [vmem:[%s14084_s4 + $0x188] sm:$0xff]  ;;  %v7701_v13 = vld [vmem:[%s14084_s4 + $0x198] sm:$0xff] }
 0x3ba   : > { %v7976_v50 = vld [vmem:[%s14085_s5 + $0x1a8] sm:$0xff]  ;;  %v7978_v31 = vld [vmem:[%s14085_s5 + $0x1b8] sm:$0xff] }
 0x3bb   : > { %9663 = vmatpush1.bf16.msra.mxu0 %v9662_v22  ;;  %9775 = vmatpush1.bf16.msra.mxu1 %v9774_v23  ;;  %v7678_v22 = vld [vmem:[%s14084_s4 + $0xe0] sm:$0xff]  ;;  %v7680_v23 = vld [vmem:[%s14084_s4 + $0xf0] sm:$0xff]  ;;  %v7980_v45 = vld [vmem:[%s14085_s5 + $0x1c8] sm:$0xff] }
 0x3bc   : > { %9665 = vmatprep.subr.bf16.mxu0 %v9664_v26  ;;  %9777 = vmatprep.subr.bf16.mxu1 %v9776_v27  ;;  %v7951_v26 = vld [vmem:[%s14085_s5 + $0xe0] sm:$0xff]  ;;  %v7953_v27 = vld [vmem:[%s14085_s5 + $0xf0] sm:$0xff]  ;;  %v9686_v34 = vpack.c.bf16 %v7680_v23, %v7678_v22  ;;  %v9704_v22 = vpack.c.bf16 %v7701_v13, %v7699_v12  ;;  %v9816_v23 = vpack.c.bf16 %v7974_v16, %v7972_v14  ;;  %v7711_v55 = vld [vmem:[%s14084_s4 + $0x1e8] sm:$0xff] }
 0x3bd   : > { %v9798_v35 = vpack.c.bf16 %v7953_v27, %v7951_v26  ;;  %v7703_v26 = vld [vmem:[%s14084_s4 + $0x1a8] sm:$0xff]  ;;  %v7705_v27 = vld [vmem:[%s14084_s4 + $0x1b8] sm:$0xff]  ;;  %v7714_v14 = vld [vmem:[%s14084_s4 + $0x200] sm:$0xff] }
 0x3be   : > { %v7713_v56 = vld [vmem:[%s14084_s4 + $0x1f8] sm:$0xff]  ;;  %v7984_v57 = vld [vmem:[%s14085_s5 + $0x1e8] sm:$0xff]  ;;  %v7716_v16 = vld [vmem:[%s14084_s4 + $0x210] sm:$0xff] }
 0x3bf   : > { %9667 = vmatpush1.bf16.msra.mxu0 %v9666_v36  ;;  %9779 = vmatpush1.bf16.msra.mxu1 %v9778_v10  ;;  %v7682_v36 = vld [vmem:[%s14084_s4 + $0x100] sm:$0xff]  ;;  %v7684_v10 = vld [vmem:[%s14084_s4 + $0x110] sm:$0xff]  ;;  %v9716_v8 = vpack.c.bf16 %v7713_v56, %v7711_v55  ;;  %v7715_v0 = vld [vmem:[%s14084_s4 + $0x208] sm:$0xff] }
 0x3c0   : > { %9669 = vmatprep.subr.bf16.mxu0 %v9668_v58  ;;  %9781 = vmatprep.subr.bf16.mxu1 %v9780_v40  ;;  %v7955_v58 = vld [vmem:[%s14085_s5 + $0x100] sm:$0xff]  ;;  %v7957_v40 = vld [vmem:[%s14085_s5 + $0x110] sm:$0xff]  ;;  %v9690_v46 = vpack.c.bf16 %v7684_v10, %v7682_v36  ;;  %v9820_v36 = vpack.c.bf16 %v7978_v31, %v7976_v50  ;;  %v7717_v18 = vld [vmem:[%s14084_s4 + $0x218] sm:$0xff] }
 0x3c1   : > { %v9802_v47 = vpack.c.bf16 %v7957_v40, %v7955_v58  ;;  %v7704_v10 = vld [vmem:[%s14084_s4 + $0x1b0] sm:$0xff]  ;;  %v7988_v1 = vld [vmem:[%s14085_s5 + $0x208] sm:$0xff]  ;;  %v9720_v2 = vpack.c.bf16 %v7717_v18, %v7715_v0  ;;  %v7722_v56 = vld [vmem:[%s14084_s4 + $0x240] sm:$0xff] }
 0x3c2   : > { %v7723_v41 = vld [vmem:[%s14084_s4 + $0x248] sm:$0xff] }
 0x3c3   : > { %9671 = vmatpush1.bf16.msra.mxu0 %v9670_v44  ;;  %9783 = vmatpush1.bf16.msra.mxu1 %v9782_v48  ;;  %v7686_v44 = vld [vmem:[%s14084_s4 + $0x120] sm:$0xff]  ;;  %v7688_v48 = vld [vmem:[%s14084_s4 + $0x130] sm:$0xff] }
 0x3c4   : > { %9673 = vmatprep.subr.bf16.mxu0 %v9672_v52  ;;  %9785 = vmatprep.subr.bf16.mxu1 %v9784_v54  ;;  %v7959_v52 = vld [vmem:[%s14085_s5 + $0x120] sm:$0xff]  ;;  %v7961_v54 = vld [vmem:[%s14085_s5 + $0x130] sm:$0xff]  ;;  %v9694_v29 = vpack.c.bf16 %v7688_v48, %v7686_v44 }
 0x3c5   : > { %v9806_v30 = vpack.c.bf16 %v7961_v54, %v7959_v52  ;;  %v7708_v44 = vld [vmem:[%s14084_s4 + $0x1d0] sm:$0xff] }
 0x3c6   : > { %v7981_v52 = vld [vmem:[%s14085_s5 + $0x1d0] sm:$0xff] }
 0x3c7   : > { %9675 = vmatpush1.bf16.msra.mxu0 %v9674_v59  ;;  %9787 = vmatpush1.bf16.msra.mxu1 %v9786_v60  ;;  %v7690_v59 = vld [vmem:[%s14084_s4 + $0x140] sm:$0xff]  ;;  %v7692_v60 = vld [vmem:[%s14084_s4 + $0x150] sm:$0xff] }
 0x3c8   : > { %9677 = vmatprep.subr.bf16.mxu0 %v9676_v39  ;;  %9789 = vmatprep.subr.bf16.mxu1 %v9788_v63  ;;  %v7963_v39 = vld [vmem:[%s14085_s5 + $0x140] sm:$0xff]  ;;  %v7965_v63 = vld [vmem:[%s14085_s5 + $0x150] sm:$0xff]  ;;  %v9698_v3 = vpack.c.bf16 %v7692_v60, %v7690_v59 }
 0x3c9   : > { %v9810_v4 = vpack.c.bf16 %v7965_v63, %v7963_v39  ;;  %v7712_v59 = vld [vmem:[%s14084_s4 + $0x1f0] sm:$0xff] }
 0x3ca   : > { %v7985_v39 = vld [vmem:[%s14085_s5 + $0x1f0] sm:$0xff] }
 0x3cb   : > { %9679 = vmatpush1.bf16.msra.mxu0 %v9678_v28  ;;  %9791 = vmatpush1.bf16.msra.mxu1 %v9790_v5  ;;  %v7694_v28 = vld [vmem:[%s14084_s4 + $0x160] sm:$0xff]  ;;  %v7696_v5 = vld [vmem:[%s14084_s4 + $0x170] sm:$0xff] }
 0x3cc   : > { %9681 = vmatprep.subr.bf16.mxu0 %v9680_v15  ;;  %9793 = vmatprep.subr.bf16.mxu1 %v9792_v11  ;;  %v7967_v15 = vld [vmem:[%s14085_s5 + $0x160] sm:$0xff]  ;;  %v7969_v11 = vld [vmem:[%s14085_s5 + $0x170] sm:$0xff]  ;;  %v9702_v17 = vpack.c.bf16 %v7696_v5, %v7694_v28 }
 0x3cd   : > { %v9814_v19 = vpack.c.bf16 %v7969_v11, %v7967_v15 }
 0x3cf   : > { %9683 = vmatpush1.bf16.msra.mxu0 %v9682_v20  ;;  %9795 = vmatpush1.bf16.msra.mxu1 %v9794_v21  ;;  %v7698_v20 = vld [vmem:[%s14084_s4 + $0x180] sm:$0xff]  ;;  %v7700_v21 = vld [vmem:[%s14084_s4 + $0x190] sm:$0xff] }
 0x3d0   : > { %9685 = vmatprep.subr.bf16.mxu0 %v9684_v24  ;;  %9797 = vmatprep.subr.bf16.mxu1 %v9796_v25  ;;  %v7971_v24 = vld [vmem:[%s14085_s5 + $0x180] sm:$0xff]  ;;  %v7973_v25 = vld [vmem:[%s14085_s5 + $0x190] sm:$0xff]  ;;  %v9706_v32 = vpack.c.bf16 %v7700_v21, %v7698_v20  ;;  %v7719_v20 = vld [vmem:[%s14084_s4 + $0x228] sm:$0xff] }
 0x3d1   : > { %v9818_v33 = vpack.c.bf16 %v7973_v25, %v7971_v24  ;;  %v7994_v24 = vld [vmem:[%s14085_s5 + $0x238] sm:$0xff] }
 0x3d3   : > { %9687 = vmatpush1.bf16.msra.mxu0 %v9686_v34  ;;  %9799 = vmatpush1.bf16.msra.mxu1 %v9798_v35  ;;  %v7702_v34 = vld [vmem:[%s14084_s4 + $0x1a0] sm:$0xff]  ;;  %v9708_v35 = vpack.c.bf16 %v7705_v27, %v7703_v26 }
 0x3d4   : > { %9689 = vmatprep.subr.bf16.mxu0 %v9688_v37  ;;  %9801 = vmatprep.subr.bf16.mxu1 %v9800_v38  ;;  %v7975_v37 = vld [vmem:[%s14085_s5 + $0x1a0] sm:$0xff]  ;;  %v7977_v38 = vld [vmem:[%s14085_s5 + $0x1b0] sm:$0xff]  ;;  %v9710_v58 = vpack.c.bf16 %v7704_v10, %v7702_v34 }
 0x3d5   : > { %v9822_v40 = vpack.c.bf16 %v7977_v38, %v7975_v37 }
 0x3d7   : > { %9691 = vmatpush1.bf16.msra.mxu0 %v9690_v46  ;;  %9803 = vmatpush1.bf16.msra.mxu1 %v9802_v47  ;;  %v7982_v46 = vld [vmem:[%s14085_s5 + $0x1d8] sm:$0xff]  ;;  %v7706_v47 = vld [vmem:[%s14084_s4 + $0x1c0] sm:$0xff] }
 0x3d8   : > { %9693 = vmatprep.subr.bf16.mxu0 %v9692_v49  ;;  %9805 = vmatprep.subr.bf16.mxu1 %v9804_v51  ;;  %v9824_v48 = vpack.c.bf16 %v7982_v46, %v7980_v45  ;;  %v9714_v49 = vpack.c.bf16 %v7708_v44, %v7706_v47  ;;  %v7979_v51 = vld [vmem:[%s14085_s5 + $0x1c0] sm:$0xff]  ;;  %v7725_v45 = vld [vmem:[%s14084_s4 + $0x258] sm:$0xff] }
 0x3d9   : > { %v9826_v54 = vpack.c.bf16 %v7981_v52, %v7979_v51  ;;  %v7998_v46 = vld [vmem:[%s14085_s5 + $0x258] sm:$0xff] }
 0x3db   : > { %9695 = vmatpush1.bf16.msra.mxu0 %v9694_v29  ;;  %9807 = vmatpush1.bf16.msra.mxu1 %v9806_v30  ;;  %v7986_v29 = vld [vmem:[%s14085_s5 + $0x1f8] sm:$0xff]  ;;  %v7710_v30 = vld [vmem:[%s14084_s4 + $0x1e0] sm:$0xff] }
 0x3dc   : > { %9697 = vmatprep.subr.bf16.mxu0 %v9696_v61  ;;  %9809 = vmatprep.subr.bf16.mxu1 %v9808_v62  ;;  %v9828_v60 = vpack.c.bf16 %v7986_v29, %v7984_v57  ;;  %v9718_v61 = vpack.c.bf16 %v7712_v59, %v7710_v30  ;;  %v7983_v62 = vld [vmem:[%s14085_s5 + $0x1e0] sm:$0xff]  ;;  %v7724_v57 = vld [vmem:[%s14084_s4 + $0x250] sm:$0xff]  ;;  %v9728_v29 = vpack.c.bf16 %v7725_v45, %v7723_v41 }
 0x3dd   : > { %v9830_v63 = vpack.c.bf16 %v7985_v39, %v7983_v62  ;;  %v7995_v59 = vld [vmem:[%s14085_s5 + $0x240] sm:$0xff]  ;;  %v7729_v62 = vld [vmem:[%s14084_s4 + $0x278] sm:$0xff]  ;;  %v8000_v39 = vld [vmem:[%s14085_s5 + $0x268] sm:$0xff]  ;;  %v9730_v0 = vpack.c.bf16 %v7724_v57, %v7722_v56 }
 0x3de   : > { %v7740_v45 = vld [vmem:[%s14084_s4 + $0x2d0] sm:$0xff]  ;;  %v7742_v57 = vld [vmem:[%s14084_s4 + $0x2e0] sm:$0xff] }
 0x3df   : > { %9699 = vmatpush1.bf16.msra.mxu0 %v9698_v3  ;;  %9811 = vmatpush1.bf16.msra.mxu1 %v9810_v4  ;;  %v7990_v3 = vld [vmem:[%s14085_s5 + $0x218] sm:$0xff] }
 0x3e0   : > { %9701 = vmatprep.subr.bf16.mxu0 %v9700_v6  ;;  %9813 = vmatprep.subr.bf16.mxu1 %v9812_v7  ;;  %v9832_v4 = vpack.c.bf16 %v7990_v3, %v7988_v1  ;;  %v7726_v1 = vld [vmem:[%s14084_s4 + $0x260] sm:$0xff] }
 0x3e3   : > { %9703 = vmatpush1.bf16.msra.mxu0 %v9702_v17  ;;  %9815 = vmatpush1.bf16.msra.mxu1 %v9814_v19  ;;  %v7987_v17 = vld [vmem:[%s14085_s5 + $0x200] sm:$0xff]  ;;  %v7989_v19 = vld [vmem:[%s14085_s5 + $0x210] sm:$0xff] }
 0x3e4   : > { %9705 = vmatprep.subr.bf16.mxu0 %v9704_v22  ;;  %9817 = vmatprep.subr.bf16.mxu1 %v9816_v23  ;;  %v7721_v22 = vld [vmem:[%s14084_s4 + $0x238] sm:$0xff]  ;;  %v7992_v23 = vld [vmem:[%s14085_s5 + $0x228] sm:$0xff]  ;;  %v9834_v34 = vpack.c.bf16 %v7989_v19, %v7987_v17 }
 0x3e5   : > { %v9724_v37 = vpack.c.bf16 %v7721_v22, %v7719_v20  ;;  %v9836_v38 = vpack.c.bf16 %v7994_v24, %v7992_v23  ;;  %v8003_v20 = vld [vmem:[%s14085_s5 + $0x280] sm:$0xff]  ;;  %v7735_v22 = vld [vmem:[%s14084_s4 + $0x2a8] sm:$0xff]  ;;  %v7737_v23 = vld [vmem:[%s14084_s4 + $0x2b8] sm:$0xff] }
 0x3e6   : > { %v8008_v24 = vld [vmem:[%s14085_s5 + $0x2a8] sm:$0xff] }
 0x3e7   : > { %9707 = vmatpush1.bf16.msra.mxu0 %v9706_v32  ;;  %9819 = vmatpush1.bf16.msra.mxu1 %v9818_v33  ;;  %v9722_v33 = vpack.c.bf16 %v7716_v16, %v7714_v14  ;;  %v7730_v14 = vld [vmem:[%s14084_s4 + $0x280] sm:$0xff]  ;;  %v7732_v16 = vld [vmem:[%s14084_s4 + $0x290] sm:$0xff] }
 0x3e8   : > { %9709 = vmatprep.subr.bf16.mxu0 %v9708_v35  ;;  %9821 = vmatprep.subr.bf16.mxu1 %v9820_v36  ;;  %v7718_v35 = vld [vmem:[%s14084_s4 + $0x220] sm:$0xff]  ;;  %v7720_v36 = vld [vmem:[%s14084_s4 + $0x230] sm:$0xff] }
 0x3eb   : > { %9711 = vmatpush1.bf16.msra.mxu0 %v9710_v58  ;;  %9823 = vmatpush1.bf16.msra.mxu1 %v9822_v40  ;;  %v7991_v58 = vld [vmem:[%s14085_s5 + $0x220] sm:$0xff]  ;;  %v7993_v40 = vld [vmem:[%s14085_s5 + $0x230] sm:$0xff] }
 0x3ec   : > { %9713 = vmatprep.subr.bf16.mxu0 %v9712_v42  ;;  %9825 = vmatprep.subr.bf16.mxu1 %v9824_v48  ;;  %v7996_v42 = vld [vmem:[%s14085_s5 + $0x248] sm:$0xff]  ;;  %v9838_v55 = vpack.c.bf16 %v7993_v40, %v7991_v58  ;;  %v8014_v58 = vld [vmem:[%s14085_s5 + $0x2d8] sm:$0xff] }
 0x3ed   : > { %v9840_v30 = vpack.c.bf16 %v7998_v46, %v7996_v42 }
 0x3ef   : > { %9715 = vmatpush1.bf16.msra.mxu0 %v9714_v49  ;;  %9827 = vmatpush1.bf16.msra.mxu1 %v9826_v54  ;;  %v9726_v49 = vpack.c.bf16 %v7720_v36, %v7718_v35  ;;  %v8007_v35 = vld [vmem:[%s14085_s5 + $0x2a0] sm:$0xff]  ;;  %v8009_v36 = vld [vmem:[%s14085_s5 + $0x2b0] sm:$0xff] }
 0x3f0   : > { %9717 = vmatprep.subr.bf16.mxu0 %v9716_v8  ;;  %9829 = vmatprep.subr.bf16.mxu1 %v9828_v60  ;;  %v7997_v60 = vld [vmem:[%s14085_s5 + $0x250] sm:$0xff]  ;;  %v9854_v41 = vpack.c.bf16 %v8009_v36, %v8007_v35  ;;  %v8027_v36 = vld [vmem:[%s14085_s5 + $0x340] sm:$0xff] }
 0x3f1   : > { %v9842_v18 = vpack.c.bf16 %v7997_v60, %v7995_v59  ;;  %v8015_v60 = vld [vmem:[%s14085_s5 + $0x2e0] sm:$0xff] }
 0x3f3   : > { %9719 = vmatpush1.bf16.msra.mxu0 %v9718_v61  ;;  %9831 = vmatpush1.bf16.msra.mxu1 %v9830_v63  ;;  %v7727_v61 = vld [vmem:[%s14084_s4 + $0x268] sm:$0xff]  ;;  %v8002_v63 = vld [vmem:[%s14085_s5 + $0x278] sm:$0xff] }
 0x3f4   : > { %9721 = vmatprep.subr.bf16.mxu0 %v9720_v2  ;;  %9833 = vmatprep.subr.bf16.mxu1 %v9832_v4  ;;  %v7728_v2 = vld [vmem:[%s14084_s4 + $0x270] sm:$0xff]  ;;  %v9732_v3 = vpack.c.bf16 %v7729_v62, %v7727_v61  ;;  %v9844_v4 = vpack.c.bf16 %v8002_v63, %v8000_v39  ;;  %v7747_v62 = vld [vmem:[%s14084_s4 + $0x308] sm:$0xff]  ;;  %v7749_v39 = vld [vmem:[%s14084_s4 + $0x318] sm:$0xff] }
 0x3f5   : > { %v8017_v61 = vld [vmem:[%s14085_s5 + $0x2f0] sm:$0xff]  ;;  %v8020_v63 = vld [vmem:[%s14085_s5 + $0x308] sm:$0xff] }
 0x480   : > { %v7392_v28 = vpop.f32.mrb[8].mxu0  ;;  %v7469_v5 = vpop.f32.mrb[8].mxu1 }
 0x481   : > { %v7394_v6 = vpop.f32.mrb[9].mxu0  ;;  %v7471_v7 = vpop.f32.mrb[9].mxu1 }
 0x484   : > { %v7398_v15 = vpop.f32.mrb[10].mxu0  ;;  %v7475_v11 = vpop.f32.mrb[10].mxu1 }
 0x485   : > { %v7400_v12 = vpop.f32.mrb[11].mxu0  ;;  %v7477_v13 = vpop.f32.mrb[11].mxu1 }
 0x488   : > { %v7554_v21 = vpop.f32.mrb[12].mxu0  ;;  %v7631_v25 = vpop.f32.mrb[12].mxu1 }
 0x489   : > { %v7642_v26 = vmax.f32 %v7392_v28, %v7554_v21  ;;  %v7556_v27 = vpop.f32.mrb[13].mxu0  ;;  %v13793_v50 = vmax.f32 %v7469_v5, %v7631_v25  ;;  %v7633_v31 = vpop.f32.mrb[13].mxu1  ;;  %v7999_v28 = vld [vmem:[%s14085_s5 + $0x260] sm:$0xff]  ;;  %v8001_v5 = vld [vmem:[%s14085_s5 + $0x270] sm:$0xff]  ;;  %v8010_v25 = vld [vmem:[%s14085_s5 + $0x2b8] sm:$0xff] }
 0x48a   : > { %v7643_v32 = vmax.f32 %v7394_v6, %v7556_v27  ;;  %v7645_v10 = vmax.f32 %v7471_v7, %v7633_v31  ;;  %v7731_v6 = vld [vmem:[%s14084_s4 + $0x288] sm:$0xff]  ;;  %v7733_v7 = vld [vmem:[%s14084_s4 + $0x298] sm:$0xff]  ;;  %v8005_v21 = vld [vmem:[%s14085_s5 + $0x290] sm:$0xff] }
 0x48b   : > { %v9736_v17 = vpack.c.bf16 %v7733_v7, %v7731_v6  ;;  %v9850_v27 = vpack.c.bf16 %v8005_v21, %v8003_v20  ;;  %v7734_v31 = vld [vmem:[%s14084_s4 + $0x2a0] sm:$0xff]  ;;  %v8021_v6 = vld [vmem:[%s14085_s5 + $0x310] sm:$0xff]  ;;  %v7751_v7 = vld [vmem:[%s14084_s4 + $0x328] sm:$0xff] }
 0x48c   : > { %v7560_v43 = vpop.f32.mrb[14].mxu0  ;;  %7833 = vmatprep.mubr.f32.mxu0 %v7643_v32  ;;  %8099 = vmatprep.mubr.f32.mxu1 %v7643_v32  ;;  %v7637_v47 = vpop.f32.mrb[14].mxu1  ;;  %v7736_v32 = vld [vmem:[%s14084_s4 + $0x2b0] sm:$0xff]  ;;  %v8023_v21 = vld [vmem:[%s14085_s5 + $0x320] sm:$0xff] }
 0x48d   : > { %v7646_v44 = vmax.f32 %v7398_v15, %v7560_v43  ;;  %v7562_v48 = vpop.f32.mrb[15].mxu0  ;;  %7834 = vmatmul.mubr.f32.vlgmr.msra.gmra.mrb[16].mxu0 %v7642_v26  ;;  %8100 = vmatmul.mubr.f32.vlgmr.msra.gmra.mrb[16].mxu1 %v7642_v26  ;;  %v13819_v51 = vmax.f32 %v7475_v11, %v7637_v47  ;;  %v7639_v52 = vpop.f32.mrb[15].mxu1  ;;  %v8004_v15 = vld [vmem:[%s14085_s5 + $0x288] sm:$0xff]  ;;  %v8006_v11 = vld [vmem:[%s14085_s5 + $0x298] sm:$0xff]  ;;  %v9738_v26 = vpack.c.bf16 %v7732_v16, %v7730_v14  ;;  %v7738_v43 = vld [vmem:[%s14084_s4 + $0x2c0] sm:$0xff] }
 0x48e   : > { %v7647_v54 = vmax.f32 %v7400_v12, %v7562_v48  ;;  %9723 = vmatpush1.bf16.msra.mxu0 %v9722_v33  ;;  %9835 = vmatpush1.bf16.msra.mxu1 %v9834_v34  ;;  %v13827_v8 = vmax.f32 %v7477_v13, %v7639_v52  ;;  %v9734_v12 = vpack.c.bf16 %v7728_v2, %v7726_v1  ;;  %v8011_v47 = vld [vmem:[%s14085_s5 + $0x2c0] sm:$0xff]  ;;  %v7743_v48 = vld [vmem:[%s14084_s4 + $0x2e8] sm:$0xff] }
 0x48f   : > { %9725 = vmatprep.subr.bf16.mxu0 %v9724_v37  ;;  %9837 = vmatprep.subr.bf16.mxu1 %v9836_v38  ;;  %v9846_v13 = vpack.c.bf16 %v8001_v5, %v7999_v28  ;;  %v9848_v19 = vpack.c.bf16 %v8006_v11, %v8004_v15  ;;  %v9740_v33 = vpack.c.bf16 %v7737_v23, %v7735_v22  ;;  %v7741_v37 = vld [vmem:[%s14084_s4 + $0x2d8] sm:$0xff]  ;;  %v8012_v38 = vld [vmem:[%s14085_s5 + $0x2c8] sm:$0xff]  ;;  %v7746_v2 = vld [vmem:[%s14084_s4 + $0x300] sm:$0xff] }
 0x490   : > { %7839 = vmatprep.mubr.f32.mxu0 %v7647_v54  ;;  %8105 = vmatprep.mubr.f32.mxu1 %v7647_v54  ;;  %v9852_v34 = vpack.c.bf16 %v8010_v25, %v8008_v24  ;;  %v9742_v40 = vpack.c.bf16 %v7736_v32, %v7734_v31  ;;  %v9856_v46 = vpack.c.bf16 %v8014_v58, %v8012_v38  ;;  %v8016_v52 = vld [vmem:[%s14085_s5 + $0x2e8] sm:$0xff]  ;;  %v8018_v54 = vld [vmem:[%s14085_s5 + $0x2f8] sm:$0xff]  ;;  %v8019_v5 = vld [vmem:[%s14085_s5 + $0x300] sm:$0xff] }
 0x491   : > { %7840 = vmatmul.mubr.f32.gmra.mrb[18].mxu0 %v7646_v44  ;;  %8106 = vmatmul.mubr.f32.gmra.mrb[18].mxu1 %v7646_v44  ;;  %v8013_v44 = vld [vmem:[%s14085_s5 + $0x2d0] sm:$0xff]  ;;  %v9860_v59 = vpack.c.bf16 %v8018_v54, %v8016_v52  ;;  %v9862_v1 = vpack.c.bf16 %v8017_v61, %v8015_v60  ;;  %v7753_v15 = vld [vmem:[%s14084_s4 + $0x338] sm:$0xff]  ;;  %v8024_v11 = vld [vmem:[%s14085_s5 + $0x328] sm:$0xff]  ;;  %v9866_v14 = vpack.c.bf16 %v8021_v6, %v8019_v5 }
 0x492   : > { %9727 = vmatpush1.bf16.msra.mxu0 %v9726_v49  ;;  %9839 = vmatpush1.bf16.msra.mxu1 %v9838_v55  ;;  %v7745_v49 = vld [vmem:[%s14084_s4 + $0x2f8] sm:$0xff]  ;;  %v9746_v55 = vpack.c.bf16 %v7740_v45, %v7738_v43  ;;  %v9858_v56 = vpack.c.bf16 %v8013_v44, %v8011_v47  ;;  %v7750_v16 = vld [vmem:[%s14084_s4 + $0x320] sm:$0xff]  ;;  %v8025_v22 = vld [vmem:[%s14085_s5 + $0x330] sm:$0xff] }
 0x493   : > { %9729 = vmatprep.subr.bf16.mxu0 %v9728_v29  ;;  %9841 = vmatprep.subr.bf16.mxu1 %v9840_v30  ;;  %v7744_v29 = vld [vmem:[%s14084_s4 + $0x2f0] sm:$0xff]  ;;  %v9748_v30 = vpack.c.bf16 %v7745_v49, %v7743_v48  ;;  %v7755_v23 = vld [vmem:[%s14084_s4 + $0x348] sm:$0xff]  ;;  %v7757_v24 = vld [vmem:[%s14084_s4 + $0x358] sm:$0xff]  ;;  %v9870_v31 = vpack.c.bf16 %v8025_v22, %v8023_v21 }
 0x494   : > { %9604 = vmatprep.mubr.msk.f32.mxu0 %vm7762_vm10, %v7645_v10  ;;  %9606 = vmatprep.mubr.msk.f32.mxu1 %vm7762_vm10, %v7645_v10  ;;  %v7739_v10 = vld [vmem:[%s14084_s4 + $0x2c8] sm:$0xff]  ;;  %v7754_v32 = vld [vmem:[%s14084_s4 + $0x340] sm:$0xff]  ;;  %v7761_v38 = vld [vmem:[%s14084_s4 + $0x378] sm:$0xff] }
 0x495   : > { %v9744_v42 = vpack.c.bf16 %v7741_v37, %v7739_v10  ;;  %v8028_v25 = vld [vmem:[%s14085_s5 + $0x348] sm:$0xff]  ;;  %v8029_v10 = vld [vmem:[%s14085_s5 + $0x350] sm:$0xff]  ;;  %v7758_v45 = vld [vmem:[%s14084_s4 + $0x360] sm:$0xff] }
 0x496   : > { %9731 = vmatpush1.bf16.msra.mxu0 %v9730_v0  ;;  %9843 = vmatpush1.bf16.msra.mxu1 %v9842_v18  ;;  %v8022_v0 = vld [vmem:[%s14085_s5 + $0x318] sm:$0xff]  ;;  %v9750_v18 = vpack.c.bf16 %v7744_v29, %v7742_v57  ;;  %v7759_v37 = vld [vmem:[%s14084_s4 + $0x368] sm:$0xff]  ;;  %v9874_v43 = vpack.c.bf16 %v8029_v10, %v8027_v36  ;;  %v7760_v47 = vld [vmem:[%s14084_s4 + $0x370] sm:$0xff] }
 0x497   : > { %9733 = vmatprep.subr.bf16.mxu0 %v9732_v3  ;;  %9845 = vmatprep.subr.bf16.mxu1 %v9844_v4  ;;  %v7748_v3 = vld [vmem:[%s14084_s4 + $0x310] sm:$0xff]  ;;  %v9752_v4 = vpack.c.bf16 %v7749_v39, %v7747_v62  ;;  %v9864_v28 = vpack.c.bf16 %v8022_v0, %v8020_v63  ;;  %v8032_v58 = vld [vmem:[%s14085_s5 + $0x368] sm:$0xff]  ;;  %v8031_v44 = vld [vmem:[%s14085_s5 + $0x360] sm:$0xff]  ;;  %v9766_v49 = vpack.c.bf16 %v7760_v47, %v7758_v45 }
 0x498   : > { %v8033_v48 = vld [vmem:[%s14085_s5 + $0x370] sm:$0xff]  ;;  %v8193_v54 = vld [vmem:[%s14087_s7] sm:$0x3] }
 0x499   : > { %v9878_v52 = vpack.c.bf16 %v8033_v48, %v8031_v44  ;;  %v8202_v29 = vrot.slane %v8193_v54, %v13322_v9 }
 0x49a   : > { %9735 = vmatpush1.bf16.msra.mxu0 %v9734_v12  ;;  %9847 = vmatpush1.bf16.msra.mxu1 %v9846_v13  ;;  %v8026_v12 = vld [vmem:[%s14085_s5 + $0x338] sm:$0xff]  ;;  %v9754_v13 = vpack.c.bf16 %v7748_v3, %v7746_v2 }
 0x49b   : > { %9737 = vmatprep.subr.bf16.mxu0 %v9736_v17  ;;  %9849 = vmatprep.subr.bf16.mxu1 %v9848_v19  ;;  %v7752_v17 = vld [vmem:[%s14084_s4 + $0x330] sm:$0xff]  ;;  %v9756_v19 = vpack.c.bf16 %v7753_v15, %v7751_v7  ;;  %v9868_v20 = vpack.c.bf16 %v8026_v12, %v8024_v11 }
 0x49e   : > { %9739 = vmatpush1.bf16.msra.mxu0 %v9738_v26  ;;  %9851 = vmatpush1.bf16.msra.mxu1 %v9850_v27  ;;  %v8030_v26 = vld [vmem:[%s14085_s5 + $0x358] sm:$0xff]  ;;  %v9758_v27 = vpack.c.bf16 %v7752_v17, %v7750_v16 }
 0x49f   : > { %9741 = vmatprep.subr.bf16.mxu0 %v9740_v33  ;;  %9853 = vmatprep.subr.bf16.mxu1 %v9852_v34  ;;  %v7756_v33 = vld [vmem:[%s14084_s4 + $0x350] sm:$0xff]  ;;  %v9760_v34 = vpack.c.bf16 %v7757_v24, %v7755_v23  ;;  %v9872_v35 = vpack.c.bf16 %v8030_v26, %v8028_v25 }
 0x4a2   : > { %9743 = vmatpush1.bf16.msra.mxu0 %v9742_v40  ;;  %9855 = vmatpush1.bf16.msra.mxu1 %v9854_v41  ;;  %v8034_v40 = vld [vmem:[%s14085_s5 + $0x378] sm:$0xff]  ;;  %v9762_v41 = vpack.c.bf16 %v7756_v33, %v7754_v32 }
 0x4a3   : > { %9745 = vmatprep.subr.bf16.mxu0 %v9744_v42  ;;  %9857 = vmatprep.subr.bf16.mxu1 %v9856_v46  ;;  %v9764_v42 = vpack.c.bf16 %v7761_v38, %v7759_v37  ;;  %v9876_v46 = vpack.c.bf16 %v8034_v40, %v8032_v58 }
 0x4a6   : > { %9747 = vmatpush1.bf16.msra.mxu0 %v9746_v55  ;;  %9859 = vmatpush1.bf16.msra.mxu1 %v9858_v56  ;;  %v8209_v55 = vld [vmem:[%s14088_s8] sm:$0x3] }
 0x4a7   : > { %9749 = vmatprep.subr.bf16.mxu0 %v9748_v30  ;;  %9861 = vmatprep.subr.bf16.mxu1 %v9860_v59  ;;  %v8218_v61 = vrot.slane %v8209_v55, %v13322_v9 }
 0x4aa   : > { %9751 = vmatpush1.bf16.msra.mxu0 %v9750_v18  ;;  %9863 = vmatpush1.bf16.msra.mxu1 %v9862_v1 }
 0x4ab   : > { %9753 = vmatprep.subr.bf16.mxu0 %v9752_v4  ;;  %9865 = vmatprep.subr.bf16.mxu1 %v9864_v28 }
 0x4ae   : > { %9755 = vmatpush1.bf16.msra.mxu0 %v9754_v13  ;;  %9867 = vmatpush1.bf16.msra.mxu1 %v9866_v14 }
 0x4af   : > { %9757 = vmatprep.subr.bf16.mxu0 %v9756_v19  ;;  %9869 = vmatprep.subr.bf16.mxu1 %v9868_v20 }
 0x4b2   : > { %9759 = vmatpush1.bf16.msra.mxu0 %v9758_v27  ;;  %9871 = vmatpush1.bf16.msra.mxu1 %v9870_v31 }
 0x4b3   : > { %9761 = vmatprep.subr.bf16.mxu0 %v9760_v34  ;;  %9873 = vmatprep.subr.bf16.mxu1 %v9872_v35 }
 0x4b6   : > { %9763 = vmatpush1.bf16.msra.mxu0 %v9762_v41  ;;  %9875 = vmatpush1.bf16.msra.mxu1 %v9874_v43 }
 0x4b7   : > { %9765 = vmatprep.subr.bf16.mxu0 %v9764_v42  ;;  %9877 = vmatprep.subr.bf16.mxu1 %v9876_v46 }
 0x4ba   : > { %9767 = vmatpush1.bf16.msra.mxu0 %v9766_v49  ;;  %9879 = vmatpush1.bf16.msra.mxu1 %v9878_v52 }
 0x4bd   : > { %7911 = vmatmul.mubr.f32.vlgmr.msra.gmra.mrb[16].mxu0 %v13793_v50  ;;  %8177 = vmatmul.mubr.f32.vlgmr.msra.gmra.mrb[16].mxu1 %v13793_v50  ;;  %v8198_v50 = vrot.slane %v8193_v54, %v13317_v53 }
 0x4be   : > { %9605 = vmatprep.mubr.msk.f32.mxu0 %vm7762_vm10, %v13827_v8  ;;  %9607 = vmatprep.mubr.msk.f32.mxu1 %vm7762_vm10, %v13827_v8  ;;  %v8214_v8 = vrot.slane %v8209_v55, %v13317_v53 }
 0x4c1   : > { %7917 = vmatmul.mubr.f32.gmra.mrb[18].mxu0 %v13819_v51  ;;  %8183 = vmatmul.mubr.f32.gmra.mrb[18].mxu1 %v13819_v51 }
 0x590   : > { %v7912_v56 = vpop.f32.mrb[16].mxu0  ;;  %v8178_v57 = vpop.f32.mrb[16].mxu1 }
 0x591   : > { %v8189_v30 = vmax.f32 %v7912_v56, %v8178_v57  ;;  %v7914_v59 = vpop.f32.mrb[17].mxu0  ;;  %v8180_v51 = vpop.f32.mrb[17].mxu1 }
 0x592   : > { %v8190_v60 = vmax.f32 %v7914_v59, %v8180_v51 }
 0x593   : > { %v8205_v62 = vmul.f32 %v8198_v50, %v8189_v30 }
 0x594   : > { %v8206_v39 = vmul.f32 %v8202_v29, %v8190_v60  ;;  %v7918_v63 = vpop.f32.mrb[18].mxu0  ;;  %v8184_v0 = vpop.f32.mrb[18].mxu1 }
 0x595   : > { %v8221_v18 = vadd.f32 %v8214_v8, %v8205_v62  ;;  %v8191_v1 = vmax.f32 %v7918_v63, %v8184_v0  ;;  %v7920_v2 = vpop.f32.mrb[19].mxu0  ;;  %v8186_v3 = vpop.f32.mrb[19].mxu1 }
 0x596   : > { %v8222_v4 = vadd.f32 %v8218_v61, %v8206_v39  ;;  %v8192_v28 = vmax.f32 %v7920_v2, %v8186_v3 }
 0x597   : > { %v8207_v53 = vmul.f32 %v8198_v50, %v8191_v1 }
 0x598   : > { %v9614_v9 = vpack.c.bf16 %v8222_v4, %v8221_v18  ;;  %v8208_v5 = vmul.f32 %v8202_v29, %v8192_v28 }
 0x599   : > { %v8223_v6 = vadd.f32 %v8214_v8, %v8207_v53 }
 0x59a   : > { %8239 = vst.msk [vmem:[%s332_s16] sm:$0xff] %vm8238_vm12, %v9614_v9  ;;  %v8224_v7 = vadd.f32 %v8218_v61, %v8208_v5 }
 0x59c   : > { %v9615_v15 = vpack.c.bf16 %v8224_v7, %v8223_v6 }
 0x59e   : > { %8243 = vst.msk [vmem:[%s332_s16 + $0x8] sm:$0x77] %vm8242_vm15, %v9615_v15 }
 0x59f PF: > { %s19_s30 = sadd.s32 1, %s11147_s30  }
 0x5a0   : > { %p16_p4 = scmp.ge.s32.totalorder %s19_s30, 14  }
 0x5a2   :  { %18 = sbr.rel (!%p16_p4) target bundleno = 1 (0x1), region = 110 }

</bundles_post_ra>
